<compile_context>
chip_gen: v5e
topology: v5e:2x2
jax: 0.10.0
libtpu: 0.0.40
codegen_flags: <defaults>
</compile_context>

<pallas_src>
import jax
import jax.numpy as jnp
from jax.experimental import pallas as pl
from jax.experimental.pallas import tpu as pltpu

INPUT_SIZE = 5
HIDDEN_SIZE = 100
MLP_HIDDEN = 100
OUTPUT_SIZE = 1
NUM_LAYERS = 2  # kernel hard-codes the 2 stacked LSTM layers of the module

HP = 128  # padded hidden size (lane-aligned)
FP = 128  # padded input feature size
MP = 128  # padded MLP hidden size


def lstm_mlp_kernel(x_ref,
                    wih0_ref, whh0_ref, b0_ref,
                    wih1_ref, whh1_ref, b1_ref,
                    w1_ref, bm1_ref, w2_ref, bm2_ref, w3_ref, bm3_ref,
                    w4_ref, bm4_ref,
                    out_ref):
    f32 = jnp.float32
    B = out_ref.shape[0]
    TB, _ = x_ref.shape
    T = TB // B
    HPk = whh0_ref.shape[0]          # 128
    G4 = whh0_ref.shape[1]           # 4 * 128

    # One batched MXU pass for the layer-0 input projection of ALL timesteps,
    # with the combined layer-0 bias folded in once.
    xw0 = jnp.dot(x_ref[...], wih0_ref[...], preferred_element_type=f32) + b0_ref[...]

    whh0 = whh0_ref[...]
    wih1 = wih1_ref[...]
    whh1 = whh1_ref[...]
    # Hoisted bias broadcast (JAX does not CSE broadcast_in_dim inside the unrolled loop).
    b1b = jnp.broadcast_to(b1_ref[...], (B, G4))

    def cell(gates, c):
        # PyTorch gate order i, f, g, o; each gate occupies one 128-lane block.
        i = jax.nn.sigmoid(gates[:, 0 * HPk:1 * HPk])
        f = jax.nn.sigmoid(gates[:, 1 * HPk:2 * HPk])
        g = jnp.tanh(gates[:, 2 * HPk:3 * HPk])
        o = jax.nn.sigmoid(gates[:, 3 * HPk:4 * HPk])
        c_new = f * c + i * g
        return o * jnp.tanh(c_new), c_new

    h1 = jnp.zeros((B, HPk), f32)
    c1 = jnp.zeros((B, HPk), f32)
    h2 = jnp.zeros((B, HPk), f32)
    c2 = jnp.zeros((B, HPk), f32)

    # T is small and static: fully unrolled recurrence (same codegen as
    # lax.fori_loop(..., unroll=True)); h/c state stays in vregs.
    for t in range(T):
        g0 = xw0[t * B:(t + 1) * B] + jnp.dot(h1, whh0, preferred_element_type=f32)
        h1, c1 = cell(g0, c1)
        g1 = (jnp.dot(h1, wih1, preferred_element_type=f32)
              + jnp.dot(h2, whh1, preferred_element_type=f32) + b1b)
        h2, c2 = cell(g1, c2)

    # 4-layer MLP on the last-timestep hidden state (matches lstm_out[:, -1, :]).
    z = jnp.maximum(jnp.dot(h2, w1_ref[...], preferred_element_type=f32) + bm1_ref[...], 0.0)
    z = jnp.maximum(jnp.dot(z, w2_ref[...], preferred_element_type=f32) + bm2_ref[...], 0.0)
    z = jnp.maximum(jnp.dot(z, w3_ref[...], preferred_element_type=f32) + bm3_ref[...], 0.0)
    # Final (128 -> 1) layer as VPU multiply + cross-lane reduce instead of an N=1 MXU pass.
    out = jnp.sum(z * w4_ref[...], axis=-1, keepdims=True) + bm4_ref[...]
    out_ref[...] = out.astype(out_ref.dtype)


def init_params(key):
    """Deterministic parameter init matching the PyTorch module's shapes."""
    H, F, M, O = HIDDEN_SIZE, INPUT_SIZE, MLP_HIDDEN, OUTPUT_SIZE
    keys = jax.random.split(key, 16)
    uH = 1.0 / jnp.sqrt(H)
    uM = 1.0 / jnp.sqrt(M)

    def unif(k, shape, scale):
        return jax.random.uniform(k, shape, jnp.float32, -scale, scale)

    return dict(
        wih0=unif(keys[0], (4 * H, F), uH), whh0=unif(keys[1], (4 * H, H), uH),
        bih0=unif(keys[2], (4 * H,), uH),  bhh0=unif(keys[3], (4 * H,), uH),
        wih1=unif(keys[4], (4 * H, H), uH), whh1=unif(keys[5], (4 * H, H), uH),
        bih1=unif(keys[6], (4 * H,), uH),  bhh1=unif(keys[7], (4 * H,), uH),
        w1=unif(keys[8], (M, H), uH), b1=unif(keys[9], (M,), uH),
        w2=unif(keys[10], (M, M), uM), b2=unif(keys[11], (M,), uM),
        w3=unif(keys[12], (M, M), uM), b3=unif(keys[13], (M,), uM),
        w4=unif(keys[14], (O, M), uM), b4=unif(keys[15], (O,), uM),
    )


@jax.jit
def lstm_mlp_forward(x, params):
    B, T, F = x.shape
    H, M, O = HIDDEN_SIZE, MLP_HIDDEN, OUTPUT_SIZE

    def pack_gate_weight(w, in_dim, in_pad):
        """(4H, in_dim) torch layout -> (in_pad, 4*HP); gate g at columns [g*HP:(g+1)*HP].
        Padded rows/cols are zero so padded lanes of h/c stay exactly zero."""
        w4 = jnp.transpose(w.reshape(4, H, in_dim), (0, 2, 1))          # (4, in, H)
        w4 = jnp.pad(w4, ((0, 0), (0, in_pad - in_dim), (0, HP - H)))   # (4, in_pad, HP)
        return jnp.transpose(w4, (1, 0, 2)).reshape(in_pad, 4 * HP).astype(jnp.float32)

    def pack_gate_bias(bih, bhh):
        b = (bih + bhh).reshape(4, H)
        b = jnp.pad(b, ((0, 0), (0, HP - H)))                           # zero-padded
        return b.reshape(1, 4 * HP).astype(jnp.float32)

    def pad_mat(w_t, rows, cols, rp, cp):
        return jnp.pad(w_t, ((0, rp - rows), (0, cp - cols))).astype(jnp.float32)

    # Time-major, feature-padded input, flattened to (T*B, FP) for the batched projection.
    x_tm = jnp.transpose(x, (1, 0, 2)).astype(jnp.float32)              # (T, B, F)
    x_tm = jnp.pad(x_tm, ((0, 0), (0, 0), (0, FP - F)))                 # (T, B, FP)
    x_tm = x_tm.reshape(T * B, FP)

    args = (
        x_tm,
        pack_gate_weight(params["wih0"], F, FP),
        pack_gate_weight(params["whh0"], H, HP),
        pack_gate_bias(params["bih0"], params["bhh0"]),
        pack_gate_weight(params["wih1"], H, HP),
        pack_gate_weight(params["whh1"], H, HP),
        pack_gate_bias(params["bih1"], params["bhh1"]),
        pad_mat(params["w1"].T, H, M, HP, MP),
        jnp.pad(params["b1"], (0, MP - M)).reshape(1, MP).astype(jnp.float32),
        pad_mat(params["w2"].T, M, M, MP, MP),
        jnp.pad(params["b2"], (0, MP - M)).reshape(1, MP).astype(jnp.float32),
        pad_mat(params["w3"].T, M, M, MP, MP),
        jnp.pad(params["b3"], (0, MP - M)).reshape(1, MP).astype(jnp.float32),
        jnp.pad(params["w4"], ((0, 0), (0, MP - M))).astype(jnp.float32),  # (1, MP) row
        params["b4"].reshape(1, O).astype(jnp.float32),
    )

    # Single invocation, no grid: everything (< ~1.5 MiB) is VMEM-resident; no per-step
    # pipeline overhead.  Fits easily on v5e/v6e (128 MiB) and v7x (64 MiB) single-TC VMEM.
    return pl.pallas_call(
        lstm_mlp_kernel,
        out_shape=jax.ShapeDtypeStruct((B, O), jnp.float32),
        in_specs=[pl.BlockSpec(memory_space=pltpu.MemorySpace.VMEM)] * len(args),
        out_specs=pl.BlockSpec(memory_space=pltpu.MemorySpace.VMEM),
    )(*args)


def reference_forward(x, params):
    """Pure-JAX reference replicating torch.nn.LSTM(num_layers=2, batch_first) + MLP."""
    H = HIDDEN_SIZE
    B = x.shape[0]

    def cell(x_in, h, c, wih, whh, bih, bhh):
        gates = x_in @ wih.T + h @ whh.T + bih + bhh
        i, f, g, o = jnp.split(gates, 4, axis=-1)
        c = jax.nn.sigmoid(f) * c + jax.nn.sigmoid(i) * jnp.tanh(g)
        h = jax.nn.sigmoid(o) * jnp.tanh(c)
        return h, c

    def step(carry, x_t):
        h1, c1, h2, c2 = carry
        h1, c1 = cell(x_t, h1, c1, params["wih0"], params["whh0"], params["bih0"], params["bhh0"])
        h2, c2 = cell(h1, h2, c2, params["wih1"], params["whh1"], params["bih1"], params["bhh1"])
        return (h1, c1, h2, c2), None

    init = tuple(jnp.zeros((B, H), jnp.float32) for _ in range(4))
    (h1, c1, h2, c2), _ = jax.lax.scan(step, init, jnp.transpose(x, (1, 0, 2)))
    z = jax.nn.relu(h2 @ params["w1"].T + params["b1"])
    z = jax.nn.relu(z @ params["w2"].T + params["b2"])
    z = jax.nn.relu(z @ params["w3"].T + params["b3"])
    return z @ params["w4"].T + params["b4"]


if __name__ == "__main__":
    key = jax.random.PRNGKey(0)
    pkey, xkey = jax.random.split(key)
    params = init_params(pkey)

    B, T = 8, 8
    x = jax.random.normal(xkey, (B, T, INPUT_SIZE), jnp.float32)

    out = jax.block_until_ready(lstm_mlp_forward(x, params))
    assert out.shape == (B, OUTPUT_SIZE), out.shape

    ref = reference_forward(x, params)
    if not jnp.allclose(out, ref, atol=1e-2, rtol=1e-2):
        raise AssertionError(f"mismatch: max abs err = {jnp.max(jnp.abs(out - ref))}")

    print("KERNEL_OK")
</pallas_src>

<mosaic_0001>
module attributes {stable_mosaic.version = 11 : i64} {
  func.func @lstm_mlp_kernel(%arg0: memref<64x128xf32, #tpu.memory_space<vmem>>, %arg1: memref<128x512xf32, #tpu.memory_space<vmem>>, %arg2: memref<128x512xf32, #tpu.memory_space<vmem>>, %arg3: memref<1x512xf32, #tpu.memory_space<vmem>>, %arg4: memref<128x512xf32, #tpu.memory_space<vmem>>, %arg5: memref<128x512xf32, #tpu.memory_space<vmem>>, %arg6: memref<1x512xf32, #tpu.memory_space<vmem>>, %arg7: memref<128x128xf32, #tpu.memory_space<vmem>>, %arg8: memref<1x128xf32, #tpu.memory_space<vmem>>, %arg9: memref<128x128xf32, #tpu.memory_space<vmem>>, %arg10: memref<1x128xf32, #tpu.memory_space<vmem>>, %arg11: memref<128x128xf32, #tpu.memory_space<vmem>>, %arg12: memref<1x128xf32, #tpu.memory_space<vmem>>, %arg13: memref<1x128xf32, #tpu.memory_space<vmem>>, %arg14: memref<1x1xf32, #tpu.memory_space<vmem>>, %arg15: memref<8x1xf32, #tpu.memory_space<vmem>>) attributes {dimension_semantics = [], scalar_prefetch = 0 : i64, scratch_operands = 0 : i64, tpu.core_type = #tpu.core_type<tc>} {
    %c0 = arith.constant 0 : index
    %c0_0 = arith.constant 0 : index
    %0 = vector.load %arg0[%c0, %c0_0] : memref<64x128xf32, #tpu.memory_space<vmem>>, vector<64x128xf32>
    %c0_1 = arith.constant 0 : index
    %c0_2 = arith.constant 0 : index
    %1 = vector.load %arg1[%c0_1, %c0_2] : memref<128x512xf32, #tpu.memory_space<vmem>>, vector<128x512xf32>
    %cst = arith.constant dense<0.000000e+00> : vector<64x512xf32>
    %2 = tpu.matmul %0, %1, %cst {dimension_numbers = #tpu.dot_dimension_numbers<[1], [0], [0], [1], [0, 0, 1, 1], [], []>} : vector<64x128xf32>, vector<128x512xf32>, vector<64x512xf32> -> vector<64x512xf32>
    %c0_3 = arith.constant 0 : index
    %c0_4 = arith.constant 0 : index
    %3 = vector.load %arg3[%c0_3, %c0_4] : memref<1x512xf32, #tpu.memory_space<vmem>>, vector<1x512xf32>
    %4 = vector.broadcast %3 : vector<1x512xf32> to vector<64x512xf32>
    %5 = arith.addf %2, %4 : vector<64x512xf32>
    %c0_5 = arith.constant 0 : index
    %c0_6 = arith.constant 0 : index
    %6 = vector.load %arg2[%c0_5, %c0_6] : memref<128x512xf32, #tpu.memory_space<vmem>>, vector<128x512xf32>
    %c0_7 = arith.constant 0 : index
    %c0_8 = arith.constant 0 : index
    %7 = vector.load %arg4[%c0_7, %c0_8] : memref<128x512xf32, #tpu.memory_space<vmem>>, vector<128x512xf32>
    %c0_9 = arith.constant 0 : index
    %c0_10 = arith.constant 0 : index
    %8 = vector.load %arg5[%c0_9, %c0_10] : memref<128x512xf32, #tpu.memory_space<vmem>>, vector<128x512xf32>
    %c0_11 = arith.constant 0 : index
    %c0_12 = arith.constant 0 : index
    %9 = vector.load %arg6[%c0_11, %c0_12] : memref<1x512xf32, #tpu.memory_space<vmem>>, vector<1x512xf32>
    %10 = vector.shape_cast %9 : vector<1x512xf32> to vector<1x512xf32>
    %11 = vector.broadcast %10 : vector<1x512xf32> to vector<8x512xf32>
    %cst_13 = arith.constant 0.000000e+00 : f32
    %12 = vector.broadcast %cst_13 : f32 to vector<8x128xf32>
    %cst_14 = arith.constant 0.000000e+00 : f32
    %13 = vector.broadcast %cst_14 : f32 to vector<8x128xf32>
    %cst_15 = arith.constant 0.000000e+00 : f32
    %14 = vector.broadcast %cst_15 : f32 to vector<8x128xf32>
    %cst_16 = arith.constant 0.000000e+00 : f32
    %15 = vector.broadcast %cst_16 : f32 to vector<8x128xf32>
    %16 = vector.extract_strided_slice %5 {offsets = [0, 0], sizes = [8, 512], strides = [1, 1]} : vector<64x512xf32> to vector<8x512xf32>
    %cst_17 = arith.constant dense<0.000000e+00> : vector<8x512xf32>
    %17 = tpu.matmul %12, %6, %cst_17 {dimension_numbers = #tpu.dot_dimension_numbers<[1], [0], [0], [1], [0, 0, 1, 1], [], []>} : vector<8x128xf32>, vector<128x512xf32>, vector<8x512xf32> -> vector<8x512xf32>
    %18 = arith.addf %16, %17 : vector<8x512xf32>
    %19 = vector.extract_strided_slice %18 {offsets = [0, 0], sizes = [8, 128], strides = [1, 1]} : vector<8x512xf32> to vector<8x128xf32>
    %20 = arith.negf %19 : vector<8x128xf32>
    %21 = math.exp %20 : vector<8x128xf32>
    %cst_18 = arith.constant 1.000000e+00 : f32
    %22 = vector.broadcast %cst_18 : f32 to vector<8x128xf32>
    %23 = arith.addf %22, %21 : vector<8x128xf32>
    %24 = arith.divf %22, %23 : vector<8x128xf32>
    %25 = vector.extract_strided_slice %18 {offsets = [0, 128], sizes = [8, 128], strides = [1, 1]} : vector<8x512xf32> to vector<8x128xf32>
    %26 = arith.negf %25 : vector<8x128xf32>
    %27 = math.exp %26 : vector<8x128xf32>
    %cst_19 = arith.constant 1.000000e+00 : f32
    %28 = vector.broadcast %cst_19 : f32 to vector<8x128xf32>
    %29 = arith.addf %28, %27 : vector<8x128xf32>
    %30 = arith.divf %28, %29 : vector<8x128xf32>
    %31 = vector.extract_strided_slice %18 {offsets = [0, 256], sizes = [8, 128], strides = [1, 1]} : vector<8x512xf32> to vector<8x128xf32>
    %32 = math.tanh %31 : vector<8x128xf32>
    %33 = vector.extract_strided_slice %18 {offsets = [0, 384], sizes = [8, 128], strides = [1, 1]} : vector<8x512xf32> to vector<8x128xf32>
    %34 = arith.negf %33 : vector<8x128xf32>
    %35 = math.exp %34 : vector<8x128xf32>
    %cst_20 = arith.constant 1.000000e+00 : f32
    %36 = vector.broadcast %cst_20 : f32 to vector<8x128xf32>
    %37 = arith.addf %36, %35 : vector<8x128xf32>
    %38 = arith.divf %36, %37 : vector<8x128xf32>
    %39 = arith.mulf %30, %13 : vector<8x128xf32>
    %40 = arith.mulf %24, %32 : vector<8x128xf32>
    %41 = arith.addf %39, %40 : vector<8x128xf32>
    %42 = math.tanh %41 : vector<8x128xf32>
    %43 = arith.mulf %38, %42 : vector<8x128xf32>
    %cst_21 = arith.constant dense<0.000000e+00> : vector<8x512xf32>
    %44 = tpu.matmul %43, %7, %cst_21 {dimension_numbers = #tpu.dot_dimension_numbers<[1], [0], [0], [1], [0, 0, 1, 1], [], []>} : vector<8x128xf32>, vector<128x512xf32>, vector<8x512xf32> -> vector<8x512xf32>
    %cst_22 = arith.constant dense<0.000000e+00> : vector<8x512xf32>
    %45 = tpu.matmul %14, %8, %cst_22 {dimension_numbers = #tpu.dot_dimension_numbers<[1], [0], [0], [1], [0, 0, 1, 1], [], []>} : vector<8x128xf32>, vector<128x512xf32>, vector<8x512xf32> -> vector<8x512xf32>
    %46 = arith.addf %44, %45 : vector<8x512xf32>
    %47 = arith.addf %46, %11 : vector<8x512xf32>
    %48 = vector.extract_strided_slice %47 {offsets = [0, 0], sizes = [8, 128], strides = [1, 1]} : vector<8x512xf32> to vector<8x128xf32>
    %49 = arith.negf %48 : vector<8x128xf32>
    %50 = math.exp %49 : vector<8x128xf32>
    %cst_23 = arith.constant 1.000000e+00 : f32
    %51 = vector.broadcast %cst_23 : f32 to vector<8x128xf32>
    %52 = arith.addf %51, %50 : vector<8x128xf32>
    %53 = arith.divf %51, %52 : vector<8x128xf32>
    %54 = vector.extract_strided_slice %47 {offsets = [0, 128], sizes = [8, 128], strides = [1, 1]} : vector<8x512xf32> to vector<8x128xf32>
    %55 = arith.negf %54 : vector<8x128xf32>
    %56 = math.exp %55 : vector<8x128xf32>
    %cst_24 = arith.constant 1.000000e+00 : f32
    %57 = vector.broadcast %cst_24 : f32 to vector<8x128xf32>
    %58 = arith.addf %57, %56 : vector<8x128xf32>
    %59 = arith.divf %57, %58 : vector<8x128xf32>
    %60 = vector.extract_strided_slice %47 {offsets = [0, 256], sizes = [8, 128], strides = [1, 1]} : vector<8x512xf32> to vector<8x128xf32>
    %61 = math.tanh %60 : vector<8x128xf32>
    %62 = vector.extract_strided_slice %47 {offsets = [0, 384], sizes = [8, 128], strides = [1, 1]} : vector<8x512xf32> to vector<8x128xf32>
    %63 = arith.negf %62 : vector<8x128xf32>
    %64 = math.exp %63 : vector<8x128xf32>
    %cst_25 = arith.constant 1.000000e+00 : f32
    %65 = vector.broadcast %cst_25 : f32 to vector<8x128xf32>
    %66 = arith.addf %65, %64 : vector<8x128xf32>
    %67 = arith.divf %65, %66 : vector<8x128xf32>
    %68 = arith.mulf %59, %15 : vector<8x128xf32>
    %69 = arith.mulf %53, %61 : vector<8x128xf32>
    %70 = arith.addf %68, %69 : vector<8x128xf32>
    %71 = math.tanh %70 : vector<8x128xf32>
    %72 = arith.mulf %67, %71 : vector<8x128xf32>
    %73 = vector.extract_strided_slice %5 {offsets = [8, 0], sizes = [8, 512], strides = [1, 1]} : vector<64x512xf32> to vector<8x512xf32>
    %cst_26 = arith.constant dense<0.000000e+00> : vector<8x512xf32>
    %74 = tpu.matmul %43, %6, %cst_26 {dimension_numbers = #tpu.dot_dimension_numbers<[1], [0], [0], [1], [0, 0, 1, 1], [], []>} : vector<8x128xf32>, vector<128x512xf32>, vector<8x512xf32> -> vector<8x512xf32>
    %75 = arith.addf %73, %74 : vector<8x512xf32>
    %76 = vector.extract_strided_slice %75 {offsets = [0, 0], sizes = [8, 128], strides = [1, 1]} : vector<8x512xf32> to vector<8x128xf32>
    %77 = arith.negf %76 : vector<8x128xf32>
    %78 = math.exp %77 : vector<8x128xf32>
    %cst_27 = arith.constant 1.000000e+00 : f32
    %79 = vector.broadcast %cst_27 : f32 to vector<8x128xf32>
    %80 = arith.addf %79, %78 : vector<8x128xf32>
    %81 = arith.divf %79, %80 : vector<8x128xf32>
    %82 = vector.extract_strided_slice %75 {offsets = [0, 128], sizes = [8, 128], strides = [1, 1]} : vector<8x512xf32> to vector<8x128xf32>
    %83 = arith.negf %82 : vector<8x128xf32>
    %84 = math.exp %83 : vector<8x128xf32>
    %cst_28 = arith.constant 1.000000e+00 : f32
    %85 = vector.broadcast %cst_28 : f32 to vector<8x128xf32>
    %86 = arith.addf %85, %84 : vector<8x128xf32>
    %87 = arith.divf %85, %86 : vector<8x128xf32>
    %88 = vector.extract_strided_slice %75 {offsets = [0, 256], sizes = [8, 128], strides = [1, 1]} : vector<8x512xf32> to vector<8x128xf32>
    %89 = math.tanh %88 : vector<8x128xf32>
    %90 = vector.extract_strided_slice %75 {offsets = [0, 384], sizes = [8, 128], strides = [1, 1]} : vector<8x512xf32> to vector<8x128xf32>
    %91 = arith.negf %90 : vector<8x128xf32>
    %92 = math.exp %91 : vector<8x128xf32>
    %cst_29 = arith.constant 1.000000e+00 : f32
    %93 = vector.broadcast %cst_29 : f32 to vector<8x128xf32>
    %94 = arith.addf %93, %92 : vector<8x128xf32>
    %95 = arith.divf %93, %94 : vector<8x128xf32>
    %96 = arith.mulf %87, %41 : vector<8x128xf32>
    %97 = arith.mulf %81, %89 : vector<8x128xf32>
    %98 = arith.addf %96, %97 : vector<8x128xf32>
    %99 = math.tanh %98 : vector<8x128xf32>
    %100 = arith.mulf %95, %99 : vector<8x128xf32>
    %cst_30 = arith.constant dense<0.000000e+00> : vector<8x512xf32>
    %101 = tpu.matmul %100, %7, %cst_30 {dimension_numbers = #tpu.dot_dimension_numbers<[1], [0], [0], [1], [0, 0, 1, 1], [], []>} : vector<8x128xf32>, vector<128x512xf32>, vector<8x512xf32> -> vector<8x512xf32>
    %cst_31 = arith.constant dense<0.000000e+00> : vector<8x512xf32>
    %102 = tpu.matmul %72, %8, %cst_31 {dimension_numbers = #tpu.dot_dimension_numbers<[1], [0], [0], [1], [0, 0, 1, 1], [], []>} : vector<8x128xf32>, vector<128x512xf32>, vector<8x512xf32> -> vector<8x512xf32>
    %103 = arith.addf %101, %102 : vector<8x512xf32>
    %104 = arith.addf %103, %11 : vector<8x512xf32>
    %105 = vector.extract_strided_slice %104 {offsets = [0, 0], sizes = [8, 128], strides = [1, 1]} : vector<8x512xf32> to vector<8x128xf32>
    %106 = arith.negf %105 : vector<8x128xf32>
    %107 = math.exp %106 : vector<8x128xf32>
    %cst_32 = arith.constant 1.000000e+00 : f32
    %108 = vector.broadcast %cst_32 : f32 to vector<8x128xf32>
    %109 = arith.addf %108, %107 : vector<8x128xf32>
    %110 = arith.divf %108, %109 : vector<8x128xf32>
    %111 = vector.extract_strided_slice %104 {offsets = [0, 128], sizes = [8, 128], strides = [1, 1]} : vector<8x512xf32> to vector<8x128xf32>
    %112 = arith.negf %111 : vector<8x128xf32>
    %113 = math.exp %112 : vector<8x128xf32>
    %cst_33 = arith.constant 1.000000e+00 : f32
    %114 = vector.broadcast %cst_33 : f32 to vector<8x128xf32>
    %115 = arith.addf %114, %113 : vector<8x128xf32>
    %116 = arith.divf %114, %115 : vector<8x128xf32>
    %117 = vector.extract_strided_slice %104 {offsets = [0, 256], sizes = [8, 128], strides = [1, 1]} : vector<8x512xf32> to vector<8x128xf32>
    %118 = math.tanh %117 : vector<8x128xf32>
    %119 = vector.extract_strided_slice %104 {offsets = [0, 384], sizes = [8, 128], strides = [1, 1]} : vector<8x512xf32> to vector<8x128xf32>
    %120 = arith.negf %119 : vector<8x128xf32>
    %121 = math.exp %120 : vector<8x128xf32>
    %cst_34 = arith.constant 1.000000e+00 : f32
    %122 = vector.broadcast %cst_34 : f32 to vector<8x128xf32>
    %123 = arith.addf %122, %121 : vector<8x128xf32>
    %124 = arith.divf %122, %123 : vector<8x128xf32>
    %125 = arith.mulf %116, %70 : vector<8x128xf32>
    %126 = arith.mulf %110, %118 : vector<8x128xf32>
    %127 = arith.addf %125, %126 : vector<8x128xf32>
    %128 = math.tanh %127 : vector<8x128xf32>
    %129 = arith.mulf %124, %128 : vector<8x128xf32>
    %130 = vector.extract_strided_slice %5 {offsets = [16, 0], sizes = [8, 512], strides = [1, 1]} : vector<64x512xf32> to vector<8x512xf32>
    %cst_35 = arith.constant dense<0.000000e+00> : vector<8x512xf32>
    %131 = tpu.matmul %100, %6, %cst_35 {dimension_numbers = #tpu.dot_dimension_numbers<[1], [0], [0], [1], [0, 0, 1, 1], [], []>} : vector<8x128xf32>, vector<128x512xf32>, vector<8x512xf32> -> vector<8x512xf32>
    %132 = arith.addf %130, %131 : vector<8x512xf32>
    %133 = vector.extract_strided_slice %132 {offsets = [0, 0], sizes = [8, 128], strides = [1, 1]} : vector<8x512xf32> to vector<8x128xf32>
    %134 = arith.negf %133 : vector<8x128xf32>
    %135 = math.exp %134 : vector<8x128xf32>
    %cst_36 = arith.constant 1.000000e+00 : f32
    %136 = vector.broadcast %cst_36 : f32 to vector<8x128xf32>
    %137 = arith.addf %136, %135 : vector<8x128xf32>
    %138 = arith.divf %136, %137 : vector<8x128xf32>
    %139 = vector.extract_strided_slice %132 {offsets = [0, 128], sizes = [8, 128], strides = [1, 1]} : vector<8x512xf32> to vector<8x128xf32>
    %140 = arith.negf %139 : vector<8x128xf32>
    %141 = math.exp %140 : vector<8x128xf32>
    %cst_37 = arith.constant 1.000000e+00 : f32
    %142 = vector.broadcast %cst_37 : f32 to vector<8x128xf32>
    %143 = arith.addf %142, %141 : vector<8x128xf32>
    %144 = arith.divf %142, %143 : vector<8x128xf32>
    %145 = vector.extract_strided_slice %132 {offsets = [0, 256], sizes = [8, 128], strides = [1, 1]} : vector<8x512xf32> to vector<8x128xf32>
    %146 = math.tanh %145 : vector<8x128xf32>
    %147 = vector.extract_strided_slice %132 {offsets = [0, 384], sizes = [8, 128], strides = [1, 1]} : vector<8x512xf32> to vector<8x128xf32>
    %148 = arith.negf %147 : vector<8x128xf32>
    %149 = math.exp %148 : vector<8x128xf32>
    %cst_38 = arith.constant 1.000000e+00 : f32
    %150 = vector.broadcast %cst_38 : f32 to vector<8x128xf32>
    %151 = arith.addf %150, %149 : vector<8x128xf32>
    %152 = arith.divf %150, %151 : vector<8x128xf32>
    %153 = arith.mulf %144, %98 : vector<8x128xf32>
    %154 = arith.mulf %138, %146 : vector<8x128xf32>
    %155 = arith.addf %153, %154 : vector<8x128xf32>
    %156 = math.tanh %155 : vector<8x128xf32>
    %157 = arith.mulf %152, %156 : vector<8x128xf32>
    %cst_39 = arith.constant dense<0.000000e+00> : vector<8x512xf32>
    %158 = tpu.matmul %157, %7, %cst_39 {dimension_numbers = #tpu.dot_dimension_numbers<[1], [0], [0], [1], [0, 0, 1, 1], [], []>} : vector<8x128xf32>, vector<128x512xf32>, vector<8x512xf32> -> vector<8x512xf32>
    %cst_40 = arith.constant dense<0.000000e+00> : vector<8x512xf32>
    %159 = tpu.matmul %129, %8, %cst_40 {dimension_numbers = #tpu.dot_dimension_numbers<[1], [0], [0], [1], [0, 0, 1, 1], [], []>} : vector<8x128xf32>, vector<128x512xf32>, vector<8x512xf32> -> vector<8x512xf32>
    %160 = arith.addf %158, %159 : vector<8x512xf32>
    %161 = arith.addf %160, %11 : vector<8x512xf32>
    %162 = vector.extract_strided_slice %161 {offsets = [0, 0], sizes = [8, 128], strides = [1, 1]} : vector<8x512xf32> to vector<8x128xf32>
    %163 = arith.negf %162 : vector<8x128xf32>
    %164 = math.exp %163 : vector<8x128xf32>
    %cst_41 = arith.constant 1.000000e+00 : f32
    %165 = vector.broadcast %cst_41 : f32 to vector<8x128xf32>
    %166 = arith.addf %165, %164 : vector<8x128xf32>
    %167 = arith.divf %165, %166 : vector<8x128xf32>
    %168 = vector.extract_strided_slice %161 {offsets = [0, 128], sizes = [8, 128], strides = [1, 1]} : vector<8x512xf32> to vector<8x128xf32>
    %169 = arith.negf %168 : vector<8x128xf32>
    %170 = math.exp %169 : vector<8x128xf32>
    %cst_42 = arith.constant 1.000000e+00 : f32
    %171 = vector.broadcast %cst_42 : f32 to vector<8x128xf32>
    %172 = arith.addf %171, %170 : vector<8x128xf32>
    %173 = arith.divf %171, %172 : vector<8x128xf32>
    %174 = vector.extract_strided_slice %161 {offsets = [0, 256], sizes = [8, 128], strides = [1, 1]} : vector<8x512xf32> to vector<8x128xf32>
    %175 = math.tanh %174 : vector<8x128xf32>
    %176 = vector.extract_strided_slice %161 {offsets = [0, 384], sizes = [8, 128], strides = [1, 1]} : vector<8x512xf32> to vector<8x128xf32>
    %177 = arith.negf %176 : vector<8x128xf32>
    %178 = math.exp %177 : vector<8x128xf32>
    %cst_43 = arith.constant 1.000000e+00 : f32
    %179 = vector.broadcast %cst_43 : f32 to vector<8x128xf32>
    %180 = arith.addf %179, %178 : vector<8x128xf32>
    %181 = arith.divf %179, %180 : vector<8x128xf32>
    %182 = arith.mulf %173, %127 : vector<8x128xf32>
    %183 = arith.mulf %167, %175 : vector<8x128xf32>
    %184 = arith.addf %182, %183 : vector<8x128xf32>
    %185 = math.tanh %184 : vector<8x128xf32>
    %186 = arith.mulf %181, %185 : vector<8x128xf32>
    %187 = vector.extract_strided_slice %5 {offsets = [24, 0], sizes = [8, 512], strides = [1, 1]} : vector<64x512xf32> to vector<8x512xf32>
    %cst_44 = arith.constant dense<0.000000e+00> : vector<8x512xf32>
    %188 = tpu.matmul %157, %6, %cst_44 {dimension_numbers = #tpu.dot_dimension_numbers<[1], [0], [0], [1], [0, 0, 1, 1], [], []>} : vector<8x128xf32>, vector<128x512xf32>, vector<8x512xf32> -> vector<8x512xf32>
    %189 = arith.addf %187, %188 : vector<8x512xf32>
    %190 = vector.extract_strided_slice %189 {offsets = [0, 0], sizes = [8, 128], strides = [1, 1]} : vector<8x512xf32> to vector<8x128xf32>
    %191 = arith.negf %190 : vector<8x128xf32>
    %192 = math.exp %191 : vector<8x128xf32>
    %cst_45 = arith.constant 1.000000e+00 : f32
    %193 = vector.broadcast %cst_45 : f32 to vector<8x128xf32>
    %194 = arith.addf %193, %192 : vector<8x128xf32>
    %195 = arith.divf %193, %194 : vector<8x128xf32>
    %196 = vector.extract_strided_slice %189 {offsets = [0, 128], sizes = [8, 128], strides = [1, 1]} : vector<8x512xf32> to vector<8x128xf32>
    %197 = arith.negf %196 : vector<8x128xf32>
    %198 = math.exp %197 : vector<8x128xf32>
    %cst_46 = arith.constant 1.000000e+00 : f32
    %199 = vector.broadcast %cst_46 : f32 to vector<8x128xf32>
    %200 = arith.addf %199, %198 : vector<8x128xf32>
    %201 = arith.divf %199, %200 : vector<8x128xf32>
    %202 = vector.extract_strided_slice %189 {offsets = [0, 256], sizes = [8, 128], strides = [1, 1]} : vector<8x512xf32> to vector<8x128xf32>
    %203 = math.tanh %202 : vector<8x128xf32>
    %204 = vector.extract_strided_slice %189 {offsets = [0, 384], sizes = [8, 128], strides = [1, 1]} : vector<8x512xf32> to vector<8x128xf32>
    %205 = arith.negf %204 : vector<8x128xf32>
    %206 = math.exp %205 : vector<8x128xf32>
    %cst_47 = arith.constant 1.000000e+00 : f32
    %207 = vector.broadcast %cst_47 : f32 to vector<8x128xf32>
    %208 = arith.addf %207, %206 : vector<8x128xf32>
    %209 = arith.divf %207, %208 : vector<8x128xf32>
    %210 = arith.mulf %201, %155 : vector<8x128xf32>
    %211 = arith.mulf %195, %203 : vector<8x128xf32>
    %212 = arith.addf %210, %211 : vector<8x128xf32>
    %213 = math.tanh %212 : vector<8x128xf32>
    %214 = arith.mulf %209, %213 : vector<8x128xf32>
    %cst_48 = arith.constant dense<0.000000e+00> : vector<8x512xf32>
    %215 = tpu.matmul %214, %7, %cst_48 {dimension_numbers = #tpu.dot_dimension_numbers<[1], [0], [0], [1], [0, 0, 1, 1], [], []>} : vector<8x128xf32>, vector<128x512xf32>, vector<8x512xf32> -> vector<8x512xf32>
    %cst_49 = arith.constant dense<0.000000e+00> : vector<8x512xf32>
    %216 = tpu.matmul %186, %8, %cst_49 {dimension_numbers = #tpu.dot_dimension_numbers<[1], [0], [0], [1], [0, 0, 1, 1], [], []>} : vector<8x128xf32>, vector<128x512xf32>, vector<8x512xf32> -> vector<8x512xf32>
    %217 = arith.addf %215, %216 : vector<8x512xf32>
    %218 = arith.addf %217, %11 : vector<8x512xf32>
    %219 = vector.extract_strided_slice %218 {offsets = [0, 0], sizes = [8, 128], strides = [1, 1]} : vector<8x512xf32> to vector<8x128xf32>
    %220 = arith.negf %219 : vector<8x128xf32>
    %221 = math.exp %220 : vector<8x128xf32>
    %cst_50 = arith.constant 1.000000e+00 : f32
    %222 = vector.broadcast %cst_50 : f32 to vector<8x128xf32>
    %223 = arith.addf %222, %221 : vector<8x128xf32>
    %224 = arith.divf %222, %223 : vector<8x128xf32>
    %225 = vector.extract_strided_slice %218 {offsets = [0, 128], sizes = [8, 128], strides = [1, 1]} : vector<8x512xf32> to vector<8x128xf32>
    %226 = arith.negf %225 : vector<8x128xf32>
    %227 = math.exp %226 : vector<8x128xf32>
    %cst_51 = arith.constant 1.000000e+00 : f32
    %228 = vector.broadcast %cst_51 : f32 to vector<8x128xf32>
    %229 = arith.addf %228, %227 : vector<8x128xf32>
    %230 = arith.divf %228, %229 : vector<8x128xf32>
    %231 = vector.extract_strided_slice %218 {offsets = [0, 256], sizes = [8, 128], strides = [1, 1]} : vector<8x512xf32> to vector<8x128xf32>
    %232 = math.tanh %231 : vector<8x128xf32>
    %233 = vector.extract_strided_slice %218 {offsets = [0, 384], sizes = [8, 128], strides = [1, 1]} : vector<8x512xf32> to vector<8x128xf32>
    %234 = arith.negf %233 : vector<8x128xf32>
    %235 = math.exp %234 : vector<8x128xf32>
    %cst_52 = arith.constant 1.000000e+00 : f32
    %236 = vector.broadcast %cst_52 : f32 to vector<8x128xf32>
    %237 = arith.addf %236, %235 : vector<8x128xf32>
    %238 = arith.divf %236, %237 : vector<8x128xf32>
    %239 = arith.mulf %230, %184 : vector<8x128xf32>
    %240 = arith.mulf %224, %232 : vector<8x128xf32>
    %241 = arith.addf %239, %240 : vector<8x128xf32>
    %242 = math.tanh %241 : vector<8x128xf32>
    %243 = arith.mulf %238, %242 : vector<8x128xf32>
    %244 = vector.extract_strided_slice %5 {offsets = [32, 0], sizes = [8, 512], strides = [1, 1]} : vector<64x512xf32> to vector<8x512xf32>
    %cst_53 = arith.constant dense<0.000000e+00> : vector<8x512xf32>
    %245 = tpu.matmul %214, %6, %cst_53 {dimension_numbers = #tpu.dot_dimension_numbers<[1], [0], [0], [1], [0, 0, 1, 1], [], []>} : vector<8x128xf32>, vector<128x512xf32>, vector<8x512xf32> -> vector<8x512xf32>
    %246 = arith.addf %244, %245 : vector<8x512xf32>
    %247 = vector.extract_strided_slice %246 {offsets = [0, 0], sizes = [8, 128], strides = [1, 1]} : vector<8x512xf32> to vector<8x128xf32>
    %248 = arith.negf %247 : vector<8x128xf32>
    %249 = math.exp %248 : vector<8x128xf32>
    %cst_54 = arith.constant 1.000000e+00 : f32
    %250 = vector.broadcast %cst_54 : f32 to vector<8x128xf32>
    %251 = arith.addf %250, %249 : vector<8x128xf32>
    %252 = arith.divf %250, %251 : vector<8x128xf32>
    %253 = vector.extract_strided_slice %246 {offsets = [0, 128], sizes = [8, 128], strides = [1, 1]} : vector<8x512xf32> to vector<8x128xf32>
    %254 = arith.negf %253 : vector<8x128xf32>
    %255 = math.exp %254 : vector<8x128xf32>
    %cst_55 = arith.constant 1.000000e+00 : f32
    %256 = vector.broadcast %cst_55 : f32 to vector<8x128xf32>
    %257 = arith.addf %256, %255 : vector<8x128xf32>
    %258 = arith.divf %256, %257 : vector<8x128xf32>
    %259 = vector.extract_strided_slice %246 {offsets = [0, 256], sizes = [8, 128], strides = [1, 1]} : vector<8x512xf32> to vector<8x128xf32>
    %260 = math.tanh %259 : vector<8x128xf32>
    %261 = vector.extract_strided_slice %246 {offsets = [0, 384], sizes = [8, 128], strides = [1, 1]} : vector<8x512xf32> to vector<8x128xf32>
    %262 = arith.negf %261 : vector<8x128xf32>
    %263 = math.exp %262 : vector<8x128xf32>
    %cst_56 = arith.constant 1.000000e+00 : f32
    %264 = vector.broadcast %cst_56 : f32 to vector<8x128xf32>
    %265 = arith.addf %264, %263 : vector<8x128xf32>
    %266 = arith.divf %264, %265 : vector<8x128xf32>
    %267 = arith.mulf %258, %212 : vector<8x128xf32>
    %268 = arith.mulf %252, %260 : vector<8x128xf32>
    %269 = arith.addf %267, %268 : vector<8x128xf32>
    %270 = math.tanh %269 : vector<8x128xf32>
    %271 = arith.mulf %266, %270 : vector<8x128xf32>
    %cst_57 = arith.constant dense<0.000000e+00> : vector<8x512xf32>
    %272 = tpu.matmul %271, %7, %cst_57 {dimension_numbers = #tpu.dot_dimension_numbers<[1], [0], [0], [1], [0, 0, 1, 1], [], []>} : vector<8x128xf32>, vector<128x512xf32>, vector<8x512xf32> -> vector<8x512xf32>
    %cst_58 = arith.constant dense<0.000000e+00> : vector<8x512xf32>
    %273 = tpu.matmul %243, %8, %cst_58 {dimension_numbers = #tpu.dot_dimension_numbers<[1], [0], [0], [1], [0, 0, 1, 1], [], []>} : vector<8x128xf32>, vector<128x512xf32>, vector<8x512xf32> -> vector<8x512xf32>
    %274 = arith.addf %272, %273 : vector<8x512xf32>
    %275 = arith.addf %274, %11 : vector<8x512xf32>
    %276 = vector.extract_strided_slice %275 {offsets = [0, 0], sizes = [8, 128], strides = [1, 1]} : vector<8x512xf32> to vector<8x128xf32>
    %277 = arith.negf %276 : vector<8x128xf32>
    %278 = math.exp %277 : vector<8x128xf32>
    %cst_59 = arith.constant 1.000000e+00 : f32
    %279 = vector.broadcast %cst_59 : f32 to vector<8x128xf32>
    %280 = arith.addf %279, %278 : vector<8x128xf32>
    %281 = arith.divf %279, %280 : vector<8x128xf32>
    %282 = vector.extract_strided_slice %275 {offsets = [0, 128], sizes = [8, 128], strides = [1, 1]} : vector<8x512xf32> to vector<8x128xf32>
    %283 = arith.negf %282 : vector<8x128xf32>
    %284 = math.exp %283 : vector<8x128xf32>
    %cst_60 = arith.constant 1.000000e+00 : f32
    %285 = vector.broadcast %cst_60 : f32 to vector<8x128xf32>
    %286 = arith.addf %285, %284 : vector<8x128xf32>
    %287 = arith.divf %285, %286 : vector<8x128xf32>
    %288 = vector.extract_strided_slice %275 {offsets = [0, 256], sizes = [8, 128], strides = [1, 1]} : vector<8x512xf32> to vector<8x128xf32>
    %289 = math.tanh %288 : vector<8x128xf32>
    %290 = vector.extract_strided_slice %275 {offsets = [0, 384], sizes = [8, 128], strides = [1, 1]} : vector<8x512xf32> to vector<8x128xf32>
    %291 = arith.negf %290 : vector<8x128xf32>
    %292 = math.exp %291 : vector<8x128xf32>
    %cst_61 = arith.constant 1.000000e+00 : f32
    %293 = vector.broadcast %cst_61 : f32 to vector<8x128xf32>
    %294 = arith.addf %293, %292 : vector<8x128xf32>
    %295 = arith.divf %293, %294 : vector<8x128xf32>
    %296 = arith.mulf %287, %241 : vector<8x128xf32>
    %297 = arith.mulf %281, %289 : vector<8x128xf32>
    %298 = arith.addf %296, %297 : vector<8x128xf32>
    %299 = math.tanh %298 : vector<8x128xf32>
    %300 = arith.mulf %295, %299 : vector<8x128xf32>
    %301 = vector.extract_strided_slice %5 {offsets = [40, 0], sizes = [8, 512], strides = [1, 1]} : vector<64x512xf32> to vector<8x512xf32>
    %cst_62 = arith.constant dense<0.000000e+00> : vector<8x512xf32>
    %302 = tpu.matmul %271, %6, %cst_62 {dimension_numbers = #tpu.dot_dimension_numbers<[1], [0], [0], [1], [0, 0, 1, 1], [], []>} : vector<8x128xf32>, vector<128x512xf32>, vector<8x512xf32> -> vector<8x512xf32>
    %303 = arith.addf %301, %302 : vector<8x512xf32>
    %304 = vector.extract_strided_slice %303 {offsets = [0, 0], sizes = [8, 128], strides = [1, 1]} : vector<8x512xf32> to vector<8x128xf32>
    %305 = arith.negf %304 : vector<8x128xf32>
    %306 = math.exp %305 : vector<8x128xf32>
    %cst_63 = arith.constant 1.000000e+00 : f32
    %307 = vector.broadcast %cst_63 : f32 to vector<8x128xf32>
    %308 = arith.addf %307, %306 : vector<8x128xf32>
    %309 = arith.divf %307, %308 : vector<8x128xf32>
    %310 = vector.extract_strided_slice %303 {offsets = [0, 128], sizes = [8, 128], strides = [1, 1]} : vector<8x512xf32> to vector<8x128xf32>
    %311 = arith.negf %310 : vector<8x128xf32>
    %312 = math.exp %311 : vector<8x128xf32>
    %cst_64 = arith.constant 1.000000e+00 : f32
    %313 = vector.broadcast %cst_64 : f32 to vector<8x128xf32>
    %314 = arith.addf %313, %312 : vector<8x128xf32>
    %315 = arith.divf %313, %314 : vector<8x128xf32>
    %316 = vector.extract_strided_slice %303 {offsets = [0, 256], sizes = [8, 128], strides = [1, 1]} : vector<8x512xf32> to vector<8x128xf32>
    %317 = math.tanh %316 : vector<8x128xf32>
    %318 = vector.extract_strided_slice %303 {offsets = [0, 384], sizes = [8, 128], strides = [1, 1]} : vector<8x512xf32> to vector<8x128xf32>
    %319 = arith.negf %318 : vector<8x128xf32>
    %320 = math.exp %319 : vector<8x128xf32>
    %cst_65 = arith.constant 1.000000e+00 : f32
    %321 = vector.broadcast %cst_65 : f32 to vector<8x128xf32>
    %322 = arith.addf %321, %320 : vector<8x128xf32>
    %323 = arith.divf %321, %322 : vector<8x128xf32>
    %324 = arith.mulf %315, %269 : vector<8x128xf32>
    %325 = arith.mulf %309, %317 : vector<8x128xf32>
    %326 = arith.addf %324, %325 : vector<8x128xf32>
    %327 = math.tanh %326 : vector<8x128xf32>
    %328 = arith.mulf %323, %327 : vector<8x128xf32>
    %cst_66 = arith.constant dense<0.000000e+00> : vector<8x512xf32>
    %329 = tpu.matmul %328, %7, %cst_66 {dimension_numbers = #tpu.dot_dimension_numbers<[1], [0], [0], [1], [0, 0, 1, 1], [], []>} : vector<8x128xf32>, vector<128x512xf32>, vector<8x512xf32> -> vector<8x512xf32>
    %cst_67 = arith.constant dense<0.000000e+00> : vector<8x512xf32>
    %330 = tpu.matmul %300, %8, %cst_67 {dimension_numbers = #tpu.dot_dimension_numbers<[1], [0], [0], [1], [0, 0, 1, 1], [], []>} : vector<8x128xf32>, vector<128x512xf32>, vector<8x512xf32> -> vector<8x512xf32>
    %331 = arith.addf %329, %330 : vector<8x512xf32>
    %332 = arith.addf %331, %11 : vector<8x512xf32>
    %333 = vector.extract_strided_slice %332 {offsets = [0, 0], sizes = [8, 128], strides = [1, 1]} : vector<8x512xf32> to vector<8x128xf32>
    %334 = arith.negf %333 : vector<8x128xf32>
    %335 = math.exp %334 : vector<8x128xf32>
    %cst_68 = arith.constant 1.000000e+00 : f32
    %336 = vector.broadcast %cst_68 : f32 to vector<8x128xf32>
    %337 = arith.addf %336, %335 : vector<8x128xf32>
    %338 = arith.divf %336, %337 : vector<8x128xf32>
    %339 = vector.extract_strided_slice %332 {offsets = [0, 128], sizes = [8, 128], strides = [1, 1]} : vector<8x512xf32> to vector<8x128xf32>
    %340 = arith.negf %339 : vector<8x128xf32>
    %341 = math.exp %340 : vector<8x128xf32>
    %cst_69 = arith.constant 1.000000e+00 : f32
    %342 = vector.broadcast %cst_69 : f32 to vector<8x128xf32>
    %343 = arith.addf %342, %341 : vector<8x128xf32>
    %344 = arith.divf %342, %343 : vector<8x128xf32>
    %345 = vector.extract_strided_slice %332 {offsets = [0, 256], sizes = [8, 128], strides = [1, 1]} : vector<8x512xf32> to vector<8x128xf32>
    %346 = math.tanh %345 : vector<8x128xf32>
    %347 = vector.extract_strided_slice %332 {offsets = [0, 384], sizes = [8, 128], strides = [1, 1]} : vector<8x512xf32> to vector<8x128xf32>
    %348 = arith.negf %347 : vector<8x128xf32>
    %349 = math.exp %348 : vector<8x128xf32>
    %cst_70 = arith.constant 1.000000e+00 : f32
    %350 = vector.broadcast %cst_70 : f32 to vector<8x128xf32>
    %351 = arith.addf %350, %349 : vector<8x128xf32>
    %352 = arith.divf %350, %351 : vector<8x128xf32>
    %353 = arith.mulf %344, %298 : vector<8x128xf32>
    %354 = arith.mulf %338, %346 : vector<8x128xf32>
    %355 = arith.addf %353, %354 : vector<8x128xf32>
    %356 = math.tanh %355 : vector<8x128xf32>
    %357 = arith.mulf %352, %356 : vector<8x128xf32>
    %358 = vector.extract_strided_slice %5 {offsets = [48, 0], sizes = [8, 512], strides = [1, 1]} : vector<64x512xf32> to vector<8x512xf32>
    %cst_71 = arith.constant dense<0.000000e+00> : vector<8x512xf32>
    %359 = tpu.matmul %328, %6, %cst_71 {dimension_numbers = #tpu.dot_dimension_numbers<[1], [0], [0], [1], [0, 0, 1, 1], [], []>} : vector<8x128xf32>, vector<128x512xf32>, vector<8x512xf32> -> vector<8x512xf32>
    %360 = arith.addf %358, %359 : vector<8x512xf32>
    %361 = vector.extract_strided_slice %360 {offsets = [0, 0], sizes = [8, 128], strides = [1, 1]} : vector<8x512xf32> to vector<8x128xf32>
    %362 = arith.negf %361 : vector<8x128xf32>
    %363 = math.exp %362 : vector<8x128xf32>
    %cst_72 = arith.constant 1.000000e+00 : f32
    %364 = vector.broadcast %cst_72 : f32 to vector<8x128xf32>
    %365 = arith.addf %364, %363 : vector<8x128xf32>
    %366 = arith.divf %364, %365 : vector<8x128xf32>
    %367 = vector.extract_strided_slice %360 {offsets = [0, 128], sizes = [8, 128], strides = [1, 1]} : vector<8x512xf32> to vector<8x128xf32>
    %368 = arith.negf %367 : vector<8x128xf32>
    %369 = math.exp %368 : vector<8x128xf32>
    %cst_73 = arith.constant 1.000000e+00 : f32
    %370 = vector.broadcast %cst_73 : f32 to vector<8x128xf32>
    %371 = arith.addf %370, %369 : vector<8x128xf32>
    %372 = arith.divf %370, %371 : vector<8x128xf32>
    %373 = vector.extract_strided_slice %360 {offsets = [0, 256], sizes = [8, 128], strides = [1, 1]} : vector<8x512xf32> to vector<8x128xf32>
    %374 = math.tanh %373 : vector<8x128xf32>
    %375 = vector.extract_strided_slice %360 {offsets = [0, 384], sizes = [8, 128], strides = [1, 1]} : vector<8x512xf32> to vector<8x128xf32>
    %376 = arith.negf %375 : vector<8x128xf32>
    %377 = math.exp %376 : vector<8x128xf32>
    %cst_74 = arith.constant 1.000000e+00 : f32
    %378 = vector.broadcast %cst_74 : f32 to vector<8x128xf32>
    %379 = arith.addf %378, %377 : vector<8x128xf32>
    %380 = arith.divf %378, %379 : vector<8x128xf32>
    %381 = arith.mulf %372, %326 : vector<8x128xf32>
    %382 = arith.mulf %366, %374 : vector<8x128xf32>
    %383 = arith.addf %381, %382 : vector<8x128xf32>
    %384 = math.tanh %383 : vector<8x128xf32>
    %385 = arith.mulf %380, %384 : vector<8x128xf32>
    %cst_75 = arith.constant dense<0.000000e+00> : vector<8x512xf32>
    %386 = tpu.matmul %385, %7, %cst_75 {dimension_numbers = #tpu.dot_dimension_numbers<[1], [0], [0], [1], [0, 0, 1, 1], [], []>} : vector<8x128xf32>, vector<128x512xf32>, vector<8x512xf32> -> vector<8x512xf32>
    %cst_76 = arith.constant dense<0.000000e+00> : vector<8x512xf32>
    %387 = tpu.matmul %357, %8, %cst_76 {dimension_numbers = #tpu.dot_dimension_numbers<[1], [0], [0], [1], [0, 0, 1, 1], [], []>} : vector<8x128xf32>, vector<128x512xf32>, vector<8x512xf32> -> vector<8x512xf32>
    %388 = arith.addf %386, %387 : vector<8x512xf32>
    %389 = arith.addf %388, %11 : vector<8x512xf32>
    %390 = vector.extract_strided_slice %389 {offsets = [0, 0], sizes = [8, 128], strides = [1, 1]} : vector<8x512xf32> to vector<8x128xf32>
    %391 = arith.negf %390 : vector<8x128xf32>
    %392 = math.exp %391 : vector<8x128xf32>
    %cst_77 = arith.constant 1.000000e+00 : f32
    %393 = vector.broadcast %cst_77 : f32 to vector<8x128xf32>
    %394 = arith.addf %393, %392 : vector<8x128xf32>
    %395 = arith.divf %393, %394 : vector<8x128xf32>
    %396 = vector.extract_strided_slice %389 {offsets = [0, 128], sizes = [8, 128], strides = [1, 1]} : vector<8x512xf32> to vector<8x128xf32>
    %397 = arith.negf %396 : vector<8x128xf32>
    %398 = math.exp %397 : vector<8x128xf32>
    %cst_78 = arith.constant 1.000000e+00 : f32
    %399 = vector.broadcast %cst_78 : f32 to vector<8x128xf32>
    %400 = arith.addf %399, %398 : vector<8x128xf32>
    %401 = arith.divf %399, %400 : vector<8x128xf32>
    %402 = vector.extract_strided_slice %389 {offsets = [0, 256], sizes = [8, 128], strides = [1, 1]} : vector<8x512xf32> to vector<8x128xf32>
    %403 = math.tanh %402 : vector<8x128xf32>
    %404 = vector.extract_strided_slice %389 {offsets = [0, 384], sizes = [8, 128], strides = [1, 1]} : vector<8x512xf32> to vector<8x128xf32>
    %405 = arith.negf %404 : vector<8x128xf32>
    %406 = math.exp %405 : vector<8x128xf32>
    %cst_79 = arith.constant 1.000000e+00 : f32
    %407 = vector.broadcast %cst_79 : f32 to vector<8x128xf32>
    %408 = arith.addf %407, %406 : vector<8x128xf32>
    %409 = arith.divf %407, %408 : vector<8x128xf32>
    %410 = arith.mulf %401, %355 : vector<8x128xf32>
    %411 = arith.mulf %395, %403 : vector<8x128xf32>
    %412 = arith.addf %410, %411 : vector<8x128xf32>
    %413 = math.tanh %412 : vector<8x128xf32>
    %414 = arith.mulf %409, %413 : vector<8x128xf32>
    %415 = vector.extract_strided_slice %5 {offsets = [56, 0], sizes = [8, 512], strides = [1, 1]} : vector<64x512xf32> to vector<8x512xf32>
    %cst_80 = arith.constant dense<0.000000e+00> : vector<8x512xf32>
    %416 = tpu.matmul %385, %6, %cst_80 {dimension_numbers = #tpu.dot_dimension_numbers<[1], [0], [0], [1], [0, 0, 1, 1], [], []>} : vector<8x128xf32>, vector<128x512xf32>, vector<8x512xf32> -> vector<8x512xf32>
    %417 = arith.addf %415, %416 : vector<8x512xf32>
    %418 = vector.extract_strided_slice %417 {offsets = [0, 0], sizes = [8, 128], strides = [1, 1]} : vector<8x512xf32> to vector<8x128xf32>
    %419 = arith.negf %418 : vector<8x128xf32>
    %420 = math.exp %419 : vector<8x128xf32>
    %cst_81 = arith.constant 1.000000e+00 : f32
    %421 = vector.broadcast %cst_81 : f32 to vector<8x128xf32>
    %422 = arith.addf %421, %420 : vector<8x128xf32>
    %423 = arith.divf %421, %422 : vector<8x128xf32>
    %424 = vector.extract_strided_slice %417 {offsets = [0, 128], sizes = [8, 128], strides = [1, 1]} : vector<8x512xf32> to vector<8x128xf32>
    %425 = arith.negf %424 : vector<8x128xf32>
    %426 = math.exp %425 : vector<8x128xf32>
    %cst_82 = arith.constant 1.000000e+00 : f32
    %427 = vector.broadcast %cst_82 : f32 to vector<8x128xf32>
    %428 = arith.addf %427, %426 : vector<8x128xf32>
    %429 = arith.divf %427, %428 : vector<8x128xf32>
    %430 = vector.extract_strided_slice %417 {offsets = [0, 256], sizes = [8, 128], strides = [1, 1]} : vector<8x512xf32> to vector<8x128xf32>
    %431 = math.tanh %430 : vector<8x128xf32>
    %432 = vector.extract_strided_slice %417 {offsets = [0, 384], sizes = [8, 128], strides = [1, 1]} : vector<8x512xf32> to vector<8x128xf32>
    %433 = arith.negf %432 : vector<8x128xf32>
    %434 = math.exp %433 : vector<8x128xf32>
    %cst_83 = arith.constant 1.000000e+00 : f32
    %435 = vector.broadcast %cst_83 : f32 to vector<8x128xf32>
    %436 = arith.addf %435, %434 : vector<8x128xf32>
    %437 = arith.divf %435, %436 : vector<8x128xf32>
    %438 = arith.mulf %429, %383 : vector<8x128xf32>
    %439 = arith.mulf %423, %431 : vector<8x128xf32>
    %440 = arith.addf %438, %439 : vector<8x128xf32>
    %441 = math.tanh %440 : vector<8x128xf32>
    %442 = arith.mulf %437, %441 : vector<8x128xf32>
    %cst_84 = arith.constant dense<0.000000e+00> : vector<8x512xf32>
    %443 = tpu.matmul %442, %7, %cst_84 {dimension_numbers = #tpu.dot_dimension_numbers<[1], [0], [0], [1], [0, 0, 1, 1], [], []>} : vector<8x128xf32>, vector<128x512xf32>, vector<8x512xf32> -> vector<8x512xf32>
    %cst_85 = arith.constant dense<0.000000e+00> : vector<8x512xf32>
    %444 = tpu.matmul %414, %8, %cst_85 {dimension_numbers = #tpu.dot_dimension_numbers<[1], [0], [0], [1], [0, 0, 1, 1], [], []>} : vector<8x128xf32>, vector<128x512xf32>, vector<8x512xf32> -> vector<8x512xf32>
    %445 = arith.addf %443, %444 : vector<8x512xf32>
    %446 = arith.addf %445, %11 : vector<8x512xf32>
    %447 = vector.extract_strided_slice %446 {offsets = [0, 0], sizes = [8, 128], strides = [1, 1]} : vector<8x512xf32> to vector<8x128xf32>
    %448 = arith.negf %447 : vector<8x128xf32>
    %449 = math.exp %448 : vector<8x128xf32>
    %cst_86 = arith.constant 1.000000e+00 : f32
    %450 = vector.broadcast %cst_86 : f32 to vector<8x128xf32>
    %451 = arith.addf %450, %449 : vector<8x128xf32>
    %452 = arith.divf %450, %451 : vector<8x128xf32>
    %453 = vector.extract_strided_slice %446 {offsets = [0, 128], sizes = [8, 128], strides = [1, 1]} : vector<8x512xf32> to vector<8x128xf32>
    %454 = arith.negf %453 : vector<8x128xf32>
    %455 = math.exp %454 : vector<8x128xf32>
    %cst_87 = arith.constant 1.000000e+00 : f32
    %456 = vector.broadcast %cst_87 : f32 to vector<8x128xf32>
    %457 = arith.addf %456, %455 : vector<8x128xf32>
    %458 = arith.divf %456, %457 : vector<8x128xf32>
    %459 = vector.extract_strided_slice %446 {offsets = [0, 256], sizes = [8, 128], strides = [1, 1]} : vector<8x512xf32> to vector<8x128xf32>
    %460 = math.tanh %459 : vector<8x128xf32>
    %461 = vector.extract_strided_slice %446 {offsets = [0, 384], sizes = [8, 128], strides = [1, 1]} : vector<8x512xf32> to vector<8x128xf32>
    %462 = arith.negf %461 : vector<8x128xf32>
    %463 = math.exp %462 : vector<8x128xf32>
    %cst_88 = arith.constant 1.000000e+00 : f32
    %464 = vector.broadcast %cst_88 : f32 to vector<8x128xf32>
    %465 = arith.addf %464, %463 : vector<8x128xf32>
    %466 = arith.divf %464, %465 : vector<8x128xf32>
    %467 = arith.mulf %458, %412 : vector<8x128xf32>
    %468 = arith.mulf %452, %460 : vector<8x128xf32>
    %469 = arith.addf %467, %468 : vector<8x128xf32>
    %470 = math.tanh %469 : vector<8x128xf32>
    %471 = arith.mulf %466, %470 : vector<8x128xf32>
    %c0_89 = arith.constant 0 : index
    %c0_90 = arith.constant 0 : index
    %472 = vector.load %arg7[%c0_89, %c0_90] : memref<128x128xf32, #tpu.memory_space<vmem>>, vector<128x128xf32>
    %cst_91 = arith.constant dense<0.000000e+00> : vector<8x128xf32>
    %473 = tpu.matmul %471, %472, %cst_91 {dimension_numbers = #tpu.dot_dimension_numbers<[1], [0], [0], [1], [0, 0, 1, 1], [], []>} : vector<8x128xf32>, vector<128x128xf32>, vector<8x128xf32> -> vector<8x128xf32>
    %c0_92 = arith.constant 0 : index
    %c0_93 = arith.constant 0 : index
    %474 = vector.load %arg8[%c0_92, %c0_93] : memref<1x128xf32, #tpu.memory_space<vmem>>, vector<1x128xf32>
    %475 = vector.broadcast %474 : vector<1x128xf32> to vector<8x128xf32>
    %476 = arith.addf %473, %475 : vector<8x128xf32>
    %cst_94 = arith.constant 0.000000e+00 : f32
    %477 = vector.broadcast %cst_94 : f32 to vector<8x128xf32>
    %478 = arith.maximumf %476, %477 : vector<8x128xf32>
    %c0_95 = arith.constant 0 : index
    %c0_96 = arith.constant 0 : index
    %479 = vector.load %arg9[%c0_95, %c0_96] : memref<128x128xf32, #tpu.memory_space<vmem>>, vector<128x128xf32>
    %cst_97 = arith.constant dense<0.000000e+00> : vector<8x128xf32>
    %480 = tpu.matmul %478, %479, %cst_97 {dimension_numbers = #tpu.dot_dimension_numbers<[1], [0], [0], [1], [0, 0, 1, 1], [], []>} : vector<8x128xf32>, vector<128x128xf32>, vector<8x128xf32> -> vector<8x128xf32>
    %c0_98 = arith.constant 0 : index
    %c0_99 = arith.constant 0 : index
    %481 = vector.load %arg10[%c0_98, %c0_99] : memref<1x128xf32, #tpu.memory_space<vmem>>, vector<1x128xf32>
    %482 = vector.broadcast %481 : vector<1x128xf32> to vector<8x128xf32>
    %483 = arith.addf %480, %482 : vector<8x128xf32>
    %cst_100 = arith.constant 0.000000e+00 : f32
    %484 = vector.broadcast %cst_100 : f32 to vector<8x128xf32>
    %485 = arith.maximumf %483, %484 : vector<8x128xf32>
    %c0_101 = arith.constant 0 : index
    %c0_102 = arith.constant 0 : index
    %486 = vector.load %arg11[%c0_101, %c0_102] : memref<128x128xf32, #tpu.memory_space<vmem>>, vector<128x128xf32>
    %cst_103 = arith.constant dense<0.000000e+00> : vector<8x128xf32>
    %487 = tpu.matmul %485, %486, %cst_103 {dimension_numbers = #tpu.dot_dimension_numbers<[1], [0], [0], [1], [0, 0, 1, 1], [], []>} : vector<8x128xf32>, vector<128x128xf32>, vector<8x128xf32> -> vector<8x128xf32>
    %c0_104 = arith.constant 0 : index
    %c0_105 = arith.constant 0 : index
    %488 = vector.load %arg12[%c0_104, %c0_105] : memref<1x128xf32, #tpu.memory_space<vmem>>, vector<1x128xf32>
    %489 = vector.broadcast %488 : vector<1x128xf32> to vector<8x128xf32>
    %490 = arith.addf %487, %489 : vector<8x128xf32>
    %cst_106 = arith.constant 0.000000e+00 : f32
    %491 = vector.broadcast %cst_106 : f32 to vector<8x128xf32>
    %492 = arith.maximumf %490, %491 : vector<8x128xf32>
    %c0_107 = arith.constant 0 : index
    %c0_108 = arith.constant 0 : index
    %493 = vector.load %arg13[%c0_107, %c0_108] : memref<1x128xf32, #tpu.memory_space<vmem>>, vector<1x128xf32>
    %494 = vector.broadcast %493 : vector<1x128xf32> to vector<8x128xf32>
    %495 = arith.mulf %492, %494 : vector<8x128xf32>
    %cst_109 = arith.constant dense<0.000000e+00> : vector<8xf32>
    %496 = vector.multi_reduction <add>, %495, %cst_109 [1] : vector<8x128xf32> to vector<8xf32>
    %497 = vector.shape_cast %496 : vector<8xf32> to vector<8x1xf32>
    %c0_110 = arith.constant 0 : index
    %c0_111 = arith.constant 0 : index
    %498 = vector.load %arg14[%c0_110, %c0_111] : memref<1x1xf32, #tpu.memory_space<vmem>>, vector<1x1xf32>
    %499 = vector.broadcast %498 : vector<1x1xf32> to vector<8x1xf32>
    %500 = arith.addf %497, %499 : vector<8x1xf32>
    %c0_112 = arith.constant 0 : index
    %c0_113 = arith.constant 0 : index
    %501 = vector.load %arg15[%c0_112, %c0_113] : memref<8x1xf32, #tpu.memory_space<vmem>>, vector<8x1xf32>
    tpu.vector_store %arg15[%c0_112, %c0_113], %500 {strides = array<i32>} : memref<8x1xf32, #tpu.memory_space<vmem>>, vector<8x1xf32>,
    return
  }
}

</mosaic_0001>

<bundles_post_ra>
// kernel: lstm_mlp_forward.1
= control target key start
LH: loop header
LB: loop body
LE: loop exit
PB: predicated region body
PF: predicated region fallthrough
CT: control target
= control target key end

     0   :  { %s10999_s1 = inlined_call_operand.vmem [shape: f32[128,512], index: 1, kind: input, shape index: {}]   ;;  %s11000_s0 = inlined_call_operand.vmem [shape: f32[64,128], index: 0, kind: input, shape index: {}]   ;;  %s11001_s2 = inlined_call_operand.vmem [shape: f32[128,512], index: 2, kind: input, shape index: {}]   ;;  %s11002_s5 = inlined_call_operand.vmem [shape: f32[128,512], index: 5, kind: input, shape index: {}]   ;;  %s11003_s4 = inlined_call_operand.vmem [shape: f32[128,512], index: 4, kind: input, shape index: {}]   ;;  %s11004_s3 = inlined_call_operand.vmem [shape: f32[1,512], index: 3, kind: input, shape index: {}]   ;;  %s11005_s6 = inlined_call_operand.vmem [shape: f32[1,512], index: 6, kind: input, shape index: {}]   ;;  %s11006_s8 = inlined_call_operand.vmem [shape: f32[1,128], index: 8, kind: input, shape index: {}]   ;;  %s11007_s7 = inlined_call_operand.vmem [shape: f32[128,128], index: 7, kind: input, shape index: {}]   ;;  %s11008_s9 = inlined_call_operand.vmem [shape: f32[128,128], index: 9, kind: input, shape index: {}]   ;;  %s11009_s10 = inlined_call_operand.vmem [shape: f32[1,128], index: 10, kind: input, shape index: {}]   ;;  %s11010_s11 = inlined_call_operand.vmem [shape: f32[128,128], index: 11, kind: input, shape index: {}]   ;;  %s11011_s12 = inlined_call_operand.vmem [shape: f32[1,128], index: 12, kind: input, shape index: {}]   ;;  %s11012_s13 = inlined_call_operand.vmem [shape: f32[1,128], index: 13, kind: input, shape index: {}]   ;;  %s11013_s14 = inlined_call_operand.<no memory space> [shape: f32[1,1], index: 14, kind: input, shape index: {}]   ;;  %s11014_s15 = inlined_call_operand.vmem [shape: f32[8,1], index: 15, kind: output, shape index: {}]  }
   0x1   :  { %v120_v0 = vld [vmem:[%s10999_s1 + $0x1e0] sm:$0xff]  ;;  %v121_v1 = vld [vmem:[%s10999_s1 + $0x1e8] sm:$0xff]  ;;  %v122_v2 = vld [vmem:[%s10999_s1 + $0x1f0] sm:$0xff] }
   0x2   :  { %134 = vmatpush.msra.mxu0 %v120_v0  ;;  %175 = vmatpush.msra.mxu1 %v121_v1  ;;  %v123_v3 = vld [vmem:[%s10999_s1 + $0x1f8] sm:$0xff]  ;;  %v116_v4 = vld [vmem:[%s10999_s1 + $0x1c0] sm:$0xff]  ;;  %v117_v5 = vld [vmem:[%s10999_s1 + $0x1c8] sm:$0xff] }
   0x3   :  { %216 = vmatpush.msra.mxu2 %v122_v2  ;;  %257 = vmatpush.msra.mxu3 %v123_v3  ;;  %v118_v6 = vld [vmem:[%s10999_s1 + $0x1d0] sm:$0xff]  ;;  %v119_v7 = vld [vmem:[%s10999_s1 + $0x1d8] sm:$0xff]  ;;  %v112_v8 = vld [vmem:[%s10999_s1 + $0x1a0] sm:$0xff] }
   0x4   :  { %135 = vmatpush.msra.mxu0 %v116_v4  ;;  %176 = vmatpush.msra.mxu1 %v117_v5  ;;  %v113_v9 = vld [vmem:[%s10999_s1 + $0x1a8] sm:$0xff]  ;;  %v114_v10 = vld [vmem:[%s10999_s1 + $0x1b0] sm:$0xff]  ;;  %v115_v11 = vld [vmem:[%s10999_s1 + $0x1b8] sm:$0xff] }
   0x5   :  { %217 = vmatpush.msra.mxu2 %v118_v6  ;;  %258 = vmatpush.msra.mxu3 %v119_v7  ;;  %v108_v12 = vld [vmem:[%s10999_s1 + $0x180] sm:$0xff]  ;;  %v109_v13 = vld [vmem:[%s10999_s1 + $0x188] sm:$0xff]  ;;  %v110_v14 = vld [vmem:[%s10999_s1 + $0x190] sm:$0xff] }
   0x6   :  { %136 = vmatpush.msra.mxu0 %v112_v8  ;;  %177 = vmatpush.msra.mxu1 %v113_v9  ;;  %v111_v15 = vld [vmem:[%s10999_s1 + $0x198] sm:$0xff]  ;;  %v104_v16 = vld [vmem:[%s10999_s1 + $0x160] sm:$0xff]  ;;  %v105_v17 = vld [vmem:[%s10999_s1 + $0x168] sm:$0xff] }
   0x7   :  { %218 = vmatpush.msra.mxu2 %v114_v10  ;;  %259 = vmatpush.msra.mxu3 %v115_v11  ;;  %v106_v18 = vld [vmem:[%s10999_s1 + $0x170] sm:$0xff]  ;;  %v107_v19 = vld [vmem:[%s10999_s1 + $0x178] sm:$0xff]  ;;  %v100_v20 = vld [vmem:[%s10999_s1 + $0x140] sm:$0xff] }
   0x8   :  { %137 = vmatpush.msra.mxu0 %v108_v12  ;;  %178 = vmatpush.msra.mxu1 %v109_v13  ;;  %v101_v21 = vld [vmem:[%s10999_s1 + $0x148] sm:$0xff]  ;;  %v102_v22 = vld [vmem:[%s10999_s1 + $0x150] sm:$0xff]  ;;  %v103_v23 = vld [vmem:[%s10999_s1 + $0x158] sm:$0xff] }
   0x9   :  { %219 = vmatpush.msra.mxu2 %v110_v14  ;;  %260 = vmatpush.msra.mxu3 %v111_v15  ;;  %v96_v24 = vld [vmem:[%s10999_s1 + $0x120] sm:$0xff]  ;;  %v97_v25 = vld [vmem:[%s10999_s1 + $0x128] sm:$0xff]  ;;  %v98_v26 = vld [vmem:[%s10999_s1 + $0x130] sm:$0xff] }
   0xa   :  { %138 = vmatpush.msra.mxu0 %v104_v16  ;;  %179 = vmatpush.msra.mxu1 %v105_v17  ;;  %v99_v27 = vld [vmem:[%s10999_s1 + $0x138] sm:$0xff]  ;;  %v92_v28 = vld [vmem:[%s10999_s1 + $0x100] sm:$0xff]  ;;  %v93_v29 = vld [vmem:[%s10999_s1 + $0x108] sm:$0xff] }
   0xb   :  { %220 = vmatpush.msra.mxu2 %v106_v18  ;;  %261 = vmatpush.msra.mxu3 %v107_v19  ;;  %v94_v30 = vld [vmem:[%s10999_s1 + $0x110] sm:$0xff]  ;;  %v95_v31 = vld [vmem:[%s10999_s1 + $0x118] sm:$0xff]  ;;  %v88_v32 = vld [vmem:[%s10999_s1 + $0xe0] sm:$0xff] }
   0xc   :  { %139 = vmatpush.msra.mxu0 %v100_v20  ;;  %180 = vmatpush.msra.mxu1 %v101_v21  ;;  %v89_v33 = vld [vmem:[%s10999_s1 + $0xe8] sm:$0xff]  ;;  %v90_v34 = vld [vmem:[%s10999_s1 + $0xf0] sm:$0xff]  ;;  %v91_v35 = vld [vmem:[%s10999_s1 + $0xf8] sm:$0xff] }
   0xd   :  { %221 = vmatpush.msra.mxu2 %v102_v22  ;;  %262 = vmatpush.msra.mxu3 %v103_v23  ;;  %v84_v36 = vld [vmem:[%s10999_s1 + $0xc0] sm:$0xff]  ;;  %v85_v37 = vld [vmem:[%s10999_s1 + $0xc8] sm:$0xff]  ;;  %v86_v38 = vld [vmem:[%s10999_s1 + $0xd0] sm:$0xff] }
   0xe   :  { %140 = vmatpush.msra.mxu0 %v96_v24  ;;  %181 = vmatpush.msra.mxu1 %v97_v25  ;;  %v87_v39 = vld [vmem:[%s10999_s1 + $0xd8] sm:$0xff]  ;;  %v80_v40 = vld [vmem:[%s10999_s1 + $0xa0] sm:$0xff]  ;;  %v81_v41 = vld [vmem:[%s10999_s1 + $0xa8] sm:$0xff] }
   0xf   :  { %222 = vmatpush.msra.mxu2 %v98_v26  ;;  %263 = vmatpush.msra.mxu3 %v99_v27  ;;  %v82_v42 = vld [vmem:[%s10999_s1 + $0xb0] sm:$0xff]  ;;  %v83_v43 = vld [vmem:[%s10999_s1 + $0xb8] sm:$0xff]  ;;  %v76_v44 = vld [vmem:[%s10999_s1 + $0x80] sm:$0xff] }
  0x10   :  { %141 = vmatpush.msra.mxu0 %v92_v28  ;;  %182 = vmatpush.msra.mxu1 %v93_v29  ;;  %v77_v45 = vld [vmem:[%s10999_s1 + $0x88] sm:$0xff]  ;;  %v78_v46 = vld [vmem:[%s10999_s1 + $0x90] sm:$0xff]  ;;  %v79_v47 = vld [vmem:[%s10999_s1 + $0x98] sm:$0xff] }
  0x11   :  { %223 = vmatpush.msra.mxu2 %v94_v30  ;;  %264 = vmatpush.msra.mxu3 %v95_v31  ;;  %v72_v48 = vld [vmem:[%s10999_s1 + $0x60] sm:$0xff]  ;;  %v73_v49 = vld [vmem:[%s10999_s1 + $0x68] sm:$0xff]  ;;  %v74_v50 = vld [vmem:[%s10999_s1 + $0x70] sm:$0xff] }
  0x12   :  { %142 = vmatpush.msra.mxu0 %v88_v32  ;;  %183 = vmatpush.msra.mxu1 %v89_v33  ;;  %v75_v51 = vld [vmem:[%s10999_s1 + $0x78] sm:$0xff]  ;;  %v68_v52 = vld [vmem:[%s10999_s1 + $0x40] sm:$0xff]  ;;  %v69_v53 = vld [vmem:[%s10999_s1 + $0x48] sm:$0xff] }
  0x13   :  { %224 = vmatpush.msra.mxu2 %v90_v34  ;;  %265 = vmatpush.msra.mxu3 %v91_v35  ;;  %v70_v54 = vld [vmem:[%s10999_s1 + $0x50] sm:$0xff]  ;;  %v71_v55 = vld [vmem:[%s10999_s1 + $0x58] sm:$0xff]  ;;  %v64_v56 = vld [vmem:[%s10999_s1 + $0x20] sm:$0xff] }
  0x14   :  { %143 = vmatpush.msra.mxu0 %v84_v36  ;;  %184 = vmatpush.msra.mxu1 %v85_v37  ;;  %v65_v57 = vld [vmem:[%s10999_s1 + $0x28] sm:$0xff]  ;;  %v66_v58 = vld [vmem:[%s10999_s1 + $0x30] sm:$0xff]  ;;  %v67_v59 = vld [vmem:[%s10999_s1 + $0x38] sm:$0xff] }
  0x15   :  { %225 = vmatpush.msra.mxu2 %v86_v38  ;;  %266 = vmatpush.msra.mxu3 %v87_v39  ;;  %v60_v60 = vld [vmem:[%s10999_s1] sm:$0xff]  ;;  %v61_v61 = vld [vmem:[%s10999_s1 + $0x8] sm:$0xff]  ;;  %v62_v62 = vld [vmem:[%s10999_s1 + $0x10] sm:$0xff] }
  0x16   :  { %144 = vmatpush.msra.mxu0 %v80_v40  ;;  %185 = vmatpush.msra.mxu1 %v81_v41  ;;  %v63_v63 = vld [vmem:[%s10999_s1 + $0x18] sm:$0xff]  ;;  %v52_v0 = vld [vmem:[%s11000_s0] sm:$0xff]  ;;  %v4803_v2 = vld [vmem:[%s11001_s2 + $0x1e8] sm:$0xff] }
  0x17   :  { %226 = vmatpush.msra.mxu2 %v82_v42  ;;  %267 = vmatpush.msra.mxu3 %v83_v43  ;;  %v4798_v1 = vld [vmem:[%s11001_s2 + $0x1e0] sm:$0xff]  ;;  %v4808_v3 = vld [vmem:[%s11001_s2 + $0x1f8] sm:$0xff]  ;;  %v4813_v4 = vld [vmem:[%s11001_s2 + $0x1f0] sm:$0xff] }
  0x18   :  { %145 = vmatpush.msra.mxu0 %v76_v44  ;;  %186 = vmatpush.msra.mxu1 %v77_v45  ;;  %v4818_v5 = vld [vmem:[%s11001_s2 + $0x1c0] sm:$0xff]  ;;  %v4823_v6 = vld [vmem:[%s11001_s2 + $0x1c8] sm:$0xff]  ;;  %v4830_v7 = vld [vmem:[%s11001_s2 + $0x1d8] sm:$0xff] }
  0x19   :  { %227 = vmatpush.msra.mxu2 %v78_v46  ;;  %268 = vmatpush.msra.mxu3 %v79_v47  ;;  %v4835_v8 = vld [vmem:[%s11001_s2 + $0x1d0] sm:$0xff]  ;;  %v4841_v9 = vld [vmem:[%s11001_s2 + $0x1a0] sm:$0xff]  ;;  %v4846_v10 = vld [vmem:[%s11001_s2 + $0x1a8] sm:$0xff] }
  0x1a   :  { %146 = vmatpush.msra.mxu0 %v72_v48  ;;  %187 = vmatpush.msra.mxu1 %v73_v49  ;;  %v4854_v11 = vld [vmem:[%s11001_s2 + $0x1b8] sm:$0xff]  ;;  %v4859_v12 = vld [vmem:[%s11001_s2 + $0x1b0] sm:$0xff]  ;;  %v53_v13 = vld [vmem:[%s11000_s0 + $0x8] sm:$0xff] }
  0x1b   :  { %228 = vmatpush.msra.mxu2 %v74_v50  ;;  %269 = vmatpush.msra.mxu3 %v75_v51  ;;  %v4871_v14 = vld [vmem:[%s11001_s2 + $0x180] sm:$0xff]  ;;  %v4876_v15 = vld [vmem:[%s11001_s2 + $0x188] sm:$0xff]  ;;  %v4883_v16 = vld [vmem:[%s11001_s2 + $0x198] sm:$0xff] }
  0x1c   :  { %147 = vmatpush.msra.mxu0 %v68_v52  ;;  %188 = vmatpush.msra.mxu1 %v69_v53  ;;  %v4888_v17 = vld [vmem:[%s11001_s2 + $0x190] sm:$0xff]  ;;  %v4893_v18 = vld [vmem:[%s11001_s2 + $0x160] sm:$0xff]  ;;  %v4898_v19 = vld [vmem:[%s11001_s2 + $0x168] sm:$0xff] }
  0x1d   :  { %229 = vmatpush.msra.mxu2 %v70_v54  ;;  %270 = vmatpush.msra.mxu3 %v71_v55  ;;  %v4905_v20 = vld [vmem:[%s11001_s2 + $0x178] sm:$0xff]  ;;  %v4910_v21 = vld [vmem:[%s11001_s2 + $0x170] sm:$0xff]  ;;  %v4916_v22 = vld [vmem:[%s11001_s2 + $0x140] sm:$0xff] }
  0x1e   :  { %148 = vmatpush.msra.mxu0 %v64_v56  ;;  %189 = vmatpush.msra.mxu1 %v65_v57  ;;  %v4921_v23 = vld [vmem:[%s11001_s2 + $0x148] sm:$0xff]  ;;  %v4929_v24 = vld [vmem:[%s11001_s2 + $0x158] sm:$0xff]  ;;  %v4934_v25 = vld [vmem:[%s11001_s2 + $0x150] sm:$0xff] }
  0x1f   :  { %230 = vmatpush.msra.mxu2 %v66_v58  ;;  %271 = vmatpush.msra.mxu3 %v67_v59  ;;  %v54_v26 = vld [vmem:[%s11000_s0 + $0x10] sm:$0xff]  ;;  %v4946_v27 = vld [vmem:[%s11001_s2 + $0x120] sm:$0xff]  ;;  %v4951_v28 = vld [vmem:[%s11001_s2 + $0x128] sm:$0xff] }
  0x20   :  { %149 = vmatpush.msra.mxu0 %v60_v60  ;;  %190 = vmatpush.msra.mxu1 %v61_v61  ;;  %v4958_v29 = vld [vmem:[%s11001_s2 + $0x138] sm:$0xff]  ;;  %v4963_v30 = vld [vmem:[%s11001_s2 + $0x130] sm:$0xff]  ;;  %v4968_v31 = vld [vmem:[%s11001_s2 + $0x100] sm:$0xff] }
  0x21   :  { %231 = vmatpush.msra.mxu2 %v62_v62  ;;  %272 = vmatpush.msra.mxu3 %v63_v63  ;;  %v4973_v32 = vld [vmem:[%s11001_s2 + $0x108] sm:$0xff]  ;;  %v4980_v33 = vld [vmem:[%s11001_s2 + $0x118] sm:$0xff]  ;;  %v4985_v34 = vld [vmem:[%s11001_s2 + $0x110] sm:$0xff] }
  0x22   :  { %150 = vmatmul.f32.vlgmr.msra.gmra.mxu0 %v52_v0  ;;  %191 = vmatmul.f32.vlgmr.msra.gmra.mxu1 %v52_v0  ;;  %v4991_v35 = vld [vmem:[%s11001_s2 + $0xe0] sm:$0xff]  ;;  %v4996_v36 = vld [vmem:[%s11001_s2 + $0xe8] sm:$0xff]  ;;  %v5004_v37 = vld [vmem:[%s11001_s2 + $0xf8] sm:$0xff] }
  0x23   :  { %232 = vmatmul.f32.vlgmr.msra.gmra.mxu2 %v52_v0  ;;  %273 = vmatmul.f32.vlgmr.msra.gmra.mxu3 %v52_v0  ;;  %v5009_v38 = vld [vmem:[%s11001_s2 + $0xf0] sm:$0xff]  ;;  %v55_v39 = vld [vmem:[%s11000_s0 + $0x18] sm:$0xff]  ;;  %v5021_v40 = vld [vmem:[%s11001_s2 + $0xc0] sm:$0xff] }
  0x24   :  { %500 = vmatpush.msrb.mxu0 %v4798_v1  ;;  %520 = vmatpush.msrb.mxu1 %v4803_v2  ;;  %v5026_v41 = vld [vmem:[%s11001_s2 + $0xc8] sm:$0xff]  ;;  %v5033_v42 = vld [vmem:[%s11001_s2 + $0xd8] sm:$0xff]  ;;  %v5038_v43 = vld [vmem:[%s11001_s2 + $0xd0] sm:$0xff] }
  0x25   :  { %560 = vmatpush.msrb.mxu3 %v4808_v3  ;;  %540 = vmatpush.msrb.mxu2 %v4813_v4  ;;  %v5043_v44 = vld [vmem:[%s11001_s2 + $0xa0] sm:$0xff]  ;;  %v5048_v45 = vld [vmem:[%s11001_s2 + $0xa8] sm:$0xff]  ;;  %v5055_v46 = vld [vmem:[%s11001_s2 + $0xb8] sm:$0xff] }
  0x26   :  { %501 = vmatpush.msrb.mxu0 %v4818_v5  ;;  %521 = vmatpush.msrb.mxu1 %v4823_v6  ;;  %v5060_v47 = vld [vmem:[%s11001_s2 + $0xb0] sm:$0xff]  ;;  %v5066_v48 = vld [vmem:[%s11001_s2 + $0x80] sm:$0xff]  ;;  %v5071_v49 = vld [vmem:[%s11001_s2 + $0x88] sm:$0xff] }
  0x27   :  { %561 = vmatpush.msrb.mxu3 %v4830_v7  ;;  %541 = vmatpush.msrb.mxu2 %v4835_v8  ;;  %v5079_v50 = vld [vmem:[%s11001_s2 + $0x98] sm:$0xff]  ;;  %v5084_v51 = vld [vmem:[%s11001_s2 + $0x90] sm:$0xff]  ;;  %v56_v52 = vld [vmem:[%s11000_s0 + $0x20] sm:$0xff] }
  0x28   :  { %502 = vmatpush.msrb.mxu0 %v4841_v9  ;;  %522 = vmatpush.msrb.mxu1 %v4846_v10  ;;  %v5096_v53 = vld [vmem:[%s11001_s2 + $0x60] sm:$0xff]  ;;  %v5101_v54 = vld [vmem:[%s11001_s2 + $0x68] sm:$0xff]  ;;  %v5108_v55 = vld [vmem:[%s11001_s2 + $0x78] sm:$0xff] }
  0x29   :  { %562 = vmatpush.msrb.mxu3 %v4854_v11  ;;  %542 = vmatpush.msrb.mxu2 %v4859_v12  ;;  %11663 = vst [vmem:[#allocation3_spill] sm:$0xff] %v5108_v55  ;;  %v5113_v56 = vld [vmem:[%s11001_s2 + $0x70] sm:$0xff]  ;;  %v5118_v57 = vld [vmem:[%s11001_s2 + $0x40] sm:$0xff]  ;;  %v5123_v58 = vld [vmem:[%s11001_s2 + $0x48] sm:$0xff] }
  0x2a   :  { %153 = vmatmul.f32.gmra.mxu0 %v53_v13  ;;  %194 = vmatmul.f32.gmra.mxu1 %v53_v13  ;;  %11664 = vst [vmem:[#allocation4_spill] sm:$0xff] %v5113_v56  ;;  %v5130_v59 = vld [vmem:[%s11001_s2 + $0x58] sm:$0xff]  ;;  %v5135_v60 = vld [vmem:[%s11001_s2 + $0x50] sm:$0xff]  ;;  %v5141_v61 = vld [vmem:[%s11001_s2 + $0x20] sm:$0xff] }
  0x2b   :  { %235 = vmatmul.f32.gmra.mxu2 %v53_v13  ;;  %276 = vmatmul.f32.gmra.mxu3 %v53_v13  ;;  %11665 = vst [vmem:[#allocation5_spill] sm:$0xff] %v5118_v57  ;;  %v5146_v62 = vld [vmem:[%s11001_s2 + $0x28] sm:$0xff]  ;;  %v5154_v63 = vld [vmem:[%s11001_s2 + $0x30] sm:$0xff]  ;;  %v5159_v0 = vld [vmem:[%s11001_s2 + $0x38] sm:$0xff] }
  0x2c   :  { %503 = vmatpush.msrb.mxu0 %v4871_v14  ;;  %523 = vmatpush.msrb.mxu1 %v4876_v15  ;;  %11666 = vst [vmem:[#allocation6_spill] sm:$0xff] %v5123_v58  ;;  %v57_v13 = vld [vmem:[%s11000_s0 + $0x28] sm:$0xff] }
  0x2d   :  { %563 = vmatpush.msrb.mxu3 %v4883_v16  ;;  %543 = vmatpush.msrb.mxu2 %v4888_v17  ;;  %11667 = vst [vmem:[#allocation7_spill] sm:$0xff] %v5130_v59 }
  0x2e   :  { %504 = vmatpush.msrb.mxu0 %v4893_v18  ;;  %524 = vmatpush.msrb.mxu1 %v4898_v19  ;;  %11668 = vst [vmem:[#allocation8_spill] sm:$0xff] %v5135_v60 }
  0x2f   :  { %564 = vmatpush.msrb.mxu3 %v4905_v20  ;;  %544 = vmatpush.msrb.mxu2 %v4910_v21  ;;  %11669 = vst [vmem:[#allocation9_spill] sm:$0xff] %v5141_v61 }
  0x30   :  { %505 = vmatpush.msrb.mxu0 %v4916_v22  ;;  %525 = vmatpush.msrb.mxu1 %v4921_v23  ;;  %11670 = vst [vmem:[#allocation10_spill] sm:$0xff] %v5146_v62 }
  0x31   :  { %565 = vmatpush.msrb.mxu3 %v4929_v24  ;;  %545 = vmatpush.msrb.mxu2 %v4934_v25  ;;  %11671 = vst [vmem:[#allocation11_spill] sm:$0xff] %v5154_v63 }
  0x32   :  { %156 = vmatmul.f32.gmra.mxu0 %v54_v26  ;;  %197 = vmatmul.f32.gmra.mxu1 %v54_v26  ;;  %11672 = vst [vmem:[#allocation12_spill] sm:$0xff] %v5159_v0 }
  0x33   :  { %238 = vmatmul.f32.gmra.mxu2 %v54_v26  ;;  %279 = vmatmul.f32.gmra.mxu3 %v54_v26  ;;  %v5171_v26 = vld [vmem:[%s11001_s2] sm:$0xff] }
  0x34   :  { %506 = vmatpush.msrb.mxu0 %v4946_v27  ;;  %526 = vmatpush.msrb.mxu1 %v4951_v28  ;;  %11673 = vst [vmem:[#allocation13_spill] sm:$0xff] %v5171_v26 }
  0x35   :  { %566 = vmatpush.msrb.mxu3 %v4958_v29  ;;  %546 = vmatpush.msrb.mxu2 %v4963_v30 }
  0x36   :  { %507 = vmatpush.msrb.mxu0 %v4968_v31  ;;  %527 = vmatpush.msrb.mxu1 %v4973_v32 }
  0x37   :  { %567 = vmatpush.msrb.mxu3 %v4980_v33  ;;  %547 = vmatpush.msrb.mxu2 %v4985_v34 }
  0x38   :  { %508 = vmatpush.msrb.mxu0 %v4991_v35  ;;  %528 = vmatpush.msrb.mxu1 %v4996_v36 }
  0x39   :  { %568 = vmatpush.msrb.mxu3 %v5004_v37  ;;  %548 = vmatpush.msrb.mxu2 %v5009_v38 }
  0x3a   :  { %159 = vmatmul.f32.gmra.mxu0 %v55_v39  ;;  %200 = vmatmul.f32.gmra.mxu1 %v55_v39 }
  0x3b   :  { %241 = vmatmul.f32.gmra.mxu2 %v55_v39  ;;  %282 = vmatmul.f32.gmra.mxu3 %v55_v39  ;;  %v5176_v39 = vld [vmem:[%s11001_s2 + $0x8] sm:$0xff] }
  0x3c   :  { %509 = vmatpush.msrb.mxu0 %v5021_v40  ;;  %529 = vmatpush.msrb.mxu1 %v5026_v41  ;;  %11674 = vst [vmem:[#allocation14_spill] sm:$0xff] %v5176_v39 }
  0x3d   :  { %569 = vmatpush.msrb.mxu3 %v5033_v42  ;;  %549 = vmatpush.msrb.mxu2 %v5038_v43 }
  0x3e   :  { %510 = vmatpush.msrb.mxu0 %v5043_v44  ;;  %530 = vmatpush.msrb.mxu1 %v5048_v45 }
  0x3f   :  { %570 = vmatpush.msrb.mxu3 %v5055_v46  ;;  %550 = vmatpush.msrb.mxu2 %v5060_v47 }
  0x40   :  { %511 = vmatpush.msrb.mxu0 %v5066_v48  ;;  %531 = vmatpush.msrb.mxu1 %v5071_v49 }
  0x41   :  { %571 = vmatpush.msrb.mxu3 %v5079_v50  ;;  %551 = vmatpush.msrb.mxu2 %v5084_v51 }
  0x42   :  { %162 = vmatmul.f32.gmra.mxu0 %v56_v52  ;;  %203 = vmatmul.f32.gmra.mxu1 %v56_v52 }
  0x43   :  { %244 = vmatmul.f32.gmra.mxu2 %v56_v52  ;;  %285 = vmatmul.f32.gmra.mxu3 %v56_v52  ;;  %v5183_v52 = vld [vmem:[%s11001_s2 + $0x10] sm:$0xff] }
  0x44   :  { %512 = vmatpush.msrb.mxu0 %v5096_v53  ;;  %532 = vmatpush.msrb.mxu1 %v5101_v54  ;;  %11675 = vst [vmem:[#allocation15_spill] sm:$0xff] %v5183_v52 }
  0x45   :  { %572 = vmatpush.msrb.mxu3 %v5108_v55  ;;  %552 = vmatpush.msrb.mxu2 %v5113_v56  ;;  %v5511_v55 = vld [vmem:[%s11002_s5 + $0x60] sm:$0xff] }
  0x46   :  { %513 = vmatpush.msrb.mxu0 %v5118_v57  ;;  %533 = vmatpush.msrb.mxu1 %v5123_v58  ;;  %v5407_v58 = vld [vmem:[%s11002_s5 + $0xe0] sm:$0xff]  ;;  %v5496_v57 = vld [vmem:[%s11002_s5 + $0x98] sm:$0xff]  ;;  %11729 = vst [vmem:[#allocation69_spill] sm:$0xff] %v5511_v55 }
  0x47   :  { %573 = vmatpush.msrb.mxu3 %v5130_v59  ;;  %553 = vmatpush.msrb.mxu2 %v5135_v60  ;;  %v5375_v59 = vld [vmem:[%s11002_s5 + $0x100] sm:$0xff]  ;;  %v5392_v60 = vld [vmem:[%s11002_s5 + $0x118] sm:$0xff]  ;;  %11709 = vst [vmem:[#allocation49_spill] sm:$0xff] %v5407_v58 }
  0x48   :  { %514 = vmatpush.msrb.mxu0 %v5141_v61  ;;  %534 = vmatpush.msrb.mxu1 %v5146_v62  ;;  %v5188_v62 = vld [vmem:[%s11001_s2 + $0x18] sm:$0xff]  ;;  %11705 = vst [vmem:[#allocation45_spill] sm:$0xff] %v5375_v59 }
  0x49   :  { %554 = vmatpush.msrb.mxu2 %v5154_v63  ;;  %574 = vmatpush.msrb.mxu3 %v5159_v0  ;;  %11676 = vst [vmem:[#allocation16_spill] sm:$0xff] %v5188_v62  ;;  %v58_v0 = vld [vmem:[%s11000_s0 + $0x30] sm:$0xff]  ;;  %v5275_v63 = vld [vmem:[%s11002_s5 + $0x180] sm:$0xff]  ;;  %v5292_v61 = vld [vmem:[%s11002_s5 + $0x198] sm:$0xff] }
  0x4a   :  { %165 = vmatmul.f32.gmra.mxu0 %v57_v13  ;;  %206 = vmatmul.f32.gmra.mxu1 %v57_v13  ;;  %11689 = vst [vmem:[#allocation29_spill] sm:$0xff] %v5275_v63 }
  0x4b   :  { %247 = vmatmul.f32.gmra.mxu2 %v57_v13  ;;  %288 = vmatmul.f32.gmra.mxu3 %v57_v13  ;;  %v59_v13 = vld [vmem:[%s11000_s0 + $0x38] sm:$0xff]  ;;  %11692 = vst [vmem:[#allocation32_spill] sm:$0xff] %v5292_v61 }
  0x4c   :  { %515 = vmatpush.msrb.mxu0 %v5171_v26  ;;  %535 = vmatpush.msrb.mxu1 %v5176_v39  ;;  %v11019_v39 = vmov 0.0   ;;  %v5258_v26 = vld [vmem:[%s11002_s5 + $0x1a8] sm:$0xff]  ;;  %11708 = vst [vmem:[#allocation48_spill] sm:$0xff] %v5392_v60 }
  0x4d   :  { %555 = vmatpush.msrb.mxu2 %v5183_v52  ;;  %575 = vmatpush.msrb.mxu3 %v5188_v62  ;;  %v5212_v62 = vld [vmem:[%s11002_s5 + $0x1e8] sm:$0xff]  ;;  %v5231_v52 = vld [vmem:[%s11002_s5 + $0x1c0] sm:$0xff]  ;;  %11686 = vst [vmem:[#allocation26_spill] sm:$0xff] %v5258_v26 }
  0x4e   :  { %11678 = vst [vmem:[#allocation18_spill] sm:$0xff] %v5212_v62  ;;  %667 = vmatpush.msra.mxu1 %v5212_v62  ;;  %v5241_v62 = vld [vmem:[%s11002_s5 + $0x1d0] sm:$0xff] }
  0x4f   :  { %11681 = vst [vmem:[#allocation21_spill] sm:$0xff] %v5231_v52 }
  0x50   :  { %11683 = vst [vmem:[#allocation23_spill] sm:$0xff] %v5241_v62 }
  0x51   :  { %11726 = vst [vmem:[#allocation66_spill] sm:$0xff] %v5496_v57 }
  0x52   :  { %168 = vmatmul.f32.gmra.mxu0 %v58_v0  ;;  %209 = vmatmul.f32.gmra.mxu1 %v58_v0 }
  0x53   :  { %250 = vmatmul.f32.gmra.mxu2 %v58_v0  ;;  %291 = vmatmul.f32.gmra.mxu3 %v58_v0  ;;  %v5207_v0 = vld [vmem:[%s11002_s5 + $0x1e0] sm:$0xff] }
  0x54   :  { %11677 = vst [vmem:[#allocation17_spill] sm:$0xff] %v5207_v0  ;;  %647 = vmatpush.msra.mxu0 %v5207_v0  ;;  %v5236_v0 = vld [vmem:[%s11002_s5 + $0x1c8] sm:$0xff] }
  0x55   :  { %11682 = vst [vmem:[#allocation22_spill] sm:$0xff] %v5236_v0  ;;  %668 = vmatpush.msra.mxu1 %v5236_v0  ;;  %v5265_v0 = vld [vmem:[%s11002_s5 + $0x1b0] sm:$0xff] }
  0x56   :  { %648 = vmatpush.msra.mxu0 %v5231_v52  ;;  %11687 = vst [vmem:[#allocation27_spill] sm:$0xff] %v5265_v0  ;;  %v5270_v52 = vld [vmem:[%s11002_s5 + $0x1b8] sm:$0xff] }
  0x57   :  { %11688 = vst [vmem:[#allocation28_spill] sm:$0xff] %v5270_v52  ;;  %669 = vmatpush.msra.mxu1 %v5258_v26  ;;  %v5303_v26 = vld [vmem:[%s11002_s5 + $0x160] sm:$0xff] }
  0x58   :  { %11693 = vst [vmem:[#allocation33_spill] sm:$0xff] %v5303_v26 }
  0x5a   :  { %171 = vmatmul.f32.gmra.mxu0 %v59_v13  ;;  %212 = vmatmul.f32.gmra.mxu1 %v59_v13 }
  0x5b   :  { %253 = vmatmul.f32.gmra.mxu2 %v59_v13  ;;  %294 = vmatmul.f32.gmra.mxu3 %v59_v13  ;;  %v5217_v13 = vld [vmem:[%s11002_s5 + $0x1f0] sm:$0xff] }
  0x5c   :  { %11679 = vst [vmem:[#allocation19_spill] sm:$0xff] %v5217_v13  ;;  %687 = vmatpush.msra.mxu2 %v5217_v13  ;;  %v5253_v13 = vld [vmem:[%s11002_s5 + $0x1a0] sm:$0xff] }
  0x5d   :  { %11685 = vst [vmem:[#allocation25_spill] sm:$0xff] %v5253_v13  ;;  %649 = vmatpush.msra.mxu0 %v5253_v13  ;;  %v5308_v13 = vld [vmem:[%s11002_s5 + $0x168] sm:$0xff] }
  0x5e   :  { %688 = vmatpush.msra.mxu2 %v5241_v62  ;;  %v5287_v62 = vld [vmem:[%s11002_s5 + $0x190] sm:$0xff]  ;;  %11694 = vst [vmem:[#allocation34_spill] sm:$0xff] %v5308_v13 }
  0x5f   :  { %11691 = vst [vmem:[#allocation31_spill] sm:$0xff] %v5287_v62  ;;  %650 = vmatpush.msra.mxu0 %v5275_v63  ;;  %v5313_v63 = vld [vmem:[%s11002_s5 + $0x170] sm:$0xff] }
  0x60   :  { %689 = vmatpush.msra.mxu2 %v5265_v0  ;;  %11695 = vst [vmem:[#allocation35_spill] sm:$0xff] %v5313_v63  ;;  %v5358_v0 = vld [vmem:[%s11002_s5 + $0x128] sm:$0xff] }
  0x61   :  { %651 = vmatpush.msra.mxu0 %v5303_v26  ;;  %v5336_v26 = vld [vmem:[%s11002_s5 + $0x148] sm:$0xff]  ;;  %11702 = vst [vmem:[#allocation42_spill] sm:$0xff] %v5358_v0 }
  0x62   :  { %516 = vmatmul.f32.vlgmr.msrb.gmra.mxu0 %v11019_v39  ;;  %536 = vmatmul.f32.vlgmr.msrb.gmra.mxu1 %v11019_v39  ;;  %11698 = vst [vmem:[#allocation38_spill] sm:$0xff] %v5336_v26 }
  0x63   :  { %556 = vmatmul.f32.vlgmr.msrb.gmra.mxu2 %v11019_v39  ;;  %576 = vmatmul.f32.vlgmr.msrb.gmra.mxu3 %v11019_v39  ;;  %v5224_v39 = vld [vmem:[%s11002_s5 + $0x1f8] sm:$0xff] }
  0x64   :  { %11680 = vst [vmem:[#allocation20_spill] sm:$0xff] %v5224_v39  ;;  %707 = vmatpush.msra.mxu3 %v5224_v39  ;;  %v5248_v39 = vld [vmem:[%s11002_s5 + $0x1d8] sm:$0xff]  ;;  %690 = vmatpush.msra.mxu2 %v5287_v62 }
  0x65   :  { %11684 = vst [vmem:[#allocation24_spill] sm:$0xff] %v5248_v39 }
  0x66   :  { %708 = vmatpush.msra.mxu3 %v5248_v39  ;;  %v5282_v39 = vld [vmem:[%s11002_s5 + $0x188] sm:$0xff]  ;;  %691 = vmatpush.msra.mxu2 %v5313_v63  ;;  %v5353_v63 = vld [vmem:[%s11002_s5 + $0x120] sm:$0xff] }
  0x67   :  { %11690 = vst [vmem:[#allocation30_spill] sm:$0xff] %v5282_v39  ;;  %670 = vmatpush.msra.mxu1 %v5282_v39 }
  0x68   :  { %709 = vmatpush.msra.mxu3 %v5270_v52  ;;  %v5331_v52 = vld [vmem:[%s11002_s5 + $0x140] sm:$0xff]  ;;  %11701 = vst [vmem:[#allocation41_spill] sm:$0xff] %v5353_v63 }
  0x69   :  { %671 = vmatpush.msra.mxu1 %v5308_v13  ;;  %11697 = vst [vmem:[#allocation37_spill] sm:$0xff] %v5331_v52  ;;  %v5341_v13 = vld [vmem:[%s11002_s5 + $0x150] sm:$0xff]  ;;  %652 = vmatpush.msra.mxu0 %v5331_v52  ;;  %v5370_v52 = vld [vmem:[%s11002_s5 + $0x138] sm:$0xff] }
  0x6a   :  { %710 = vmatpush.msra.mxu3 %v5292_v61  ;;  %v5324_v61 = vld [vmem:[%s11002_s5 + $0x178] sm:$0xff]  ;;  %11699 = vst [vmem:[#allocation39_spill] sm:$0xff] %v5341_v13  ;;  %692 = vmatpush.msra.mxu2 %v5341_v13  ;;  %v5387_v13 = vld [vmem:[%s11002_s5 + $0x110] sm:$0xff] }
  0x6b   :  { %11696 = vst [vmem:[#allocation36_spill] sm:$0xff] %v5324_v61  ;;  %672 = vmatpush.msra.mxu1 %v5336_v26  ;;  %v5365_v26 = vld [vmem:[%s11002_s5 + $0x130] sm:$0xff]  ;;  %653 = vmatpush.msra.mxu0 %v5353_v63 }
  0x6c   :  { %711 = vmatpush.msra.mxu3 %v5324_v61  ;;  %v5348_v61 = vld [vmem:[%s11002_s5 + $0x158] sm:$0xff]  ;;  %11703 = vst [vmem:[#allocation43_spill] sm:$0xff] %v5365_v26  ;;  %693 = vmatpush.msra.mxu2 %v5365_v26  ;;  %v5435_v26 = vld [vmem:[%s11002_s5 + $0xc0] sm:$0xff] }
  0x6d   :  { %11700 = vst [vmem:[#allocation40_spill] sm:$0xff] %v5348_v61  ;;  %673 = vmatpush.msra.mxu1 %v5358_v0  ;;  %654 = vmatpush.msra.mxu0 %v5375_v59 }
  0x6e   :  { %712 = vmatpush.msra.mxu3 %v5348_v61  ;;  %11704 = vst [vmem:[#allocation44_spill] sm:$0xff] %v5370_v52  ;;  %v5382_v61 = vld [vmem:[%s11002_s5 + $0x108] sm:$0xff]  ;;  %694 = vmatpush.msra.mxu2 %v5387_v13 }
  0x6f   :  { %11706 = vst [vmem:[#allocation46_spill] sm:$0xff] %v5382_v61  ;;  %674 = vmatpush.msra.mxu1 %v5382_v61  ;;  %v5417_v61 = vld [vmem:[%s11002_s5 + $0xf0] sm:$0xff]  ;;  %655 = vmatpush.msra.mxu0 %v5407_v58  ;;  %v5479_v58 = vld [vmem:[%s11002_s5 + $0x80] sm:$0xff] }
  0x70   :  { %11707 = vst [vmem:[#allocation47_spill] sm:$0xff] %v5387_v13  ;;  %713 = vmatpush.msra.mxu3 %v5370_v52  ;;  %v5412_v52 = vld [vmem:[%s11002_s5 + $0xe8] sm:$0xff]  ;;  %695 = vmatpush.msra.mxu2 %v5417_v61 }
  0x71   :  { %11710 = vst [vmem:[#allocation50_spill] sm:$0xff] %v5412_v52  ;;  %675 = vmatpush.msra.mxu1 %v5412_v52  ;;  %656 = vmatpush.msra.mxu0 %v5435_v26  ;;  %v5462_v52 = vld [vmem:[%s11002_s5 + $0xa8] sm:$0xff] }
  0x72   :  { %714 = vmatpush.msra.mxu3 %v5392_v60  ;;  %11711 = vst [vmem:[#allocation51_spill] sm:$0xff] %v5417_v61  ;;  %v5428_v60 = vld [vmem:[%s11002_s5 + $0xf8] sm:$0xff]  ;;  %v5457_v61 = vld [vmem:[%s11002_s5 + $0xa0] sm:$0xff] }
  0x73   :  { %11714 = vst [vmem:[#allocation54_spill] sm:$0xff] %v5428_v60  ;;  %657 = vmatpush.msra.mxu0 %v5457_v61 }
  0x74   :  { %715 = vmatpush.msra.mxu3 %v5428_v60  ;;  %11715 = vst [vmem:[#allocation55_spill] sm:$0xff] %v5435_v26  ;;  %v5452_v60 = vld [vmem:[%s11002_s5 + $0xd8] sm:$0xff] }
  0x75   :  { %11718 = vst [vmem:[#allocation58_spill] sm:$0xff] %v5452_v60  ;;  %v5474_v26 = vld [vmem:[%s11002_s5 + $0xb8] sm:$0xff]  ;;  %658 = vmatpush.msra.mxu0 %v5479_v58 }
  0x76   :  { %11719 = vst [vmem:[#allocation59_spill] sm:$0xff] %v5457_v61  ;;  %716 = vmatpush.msra.mxu3 %v5452_v60  ;;  %v5486_v60 = vld [vmem:[%s11002_s5 + $0x88] sm:$0xff] }
  0x77   :  { %11720 = vst [vmem:[#allocation60_spill] sm:$0xff] %v5462_v52  ;;  %659 = vmatpush.msra.mxu0 %v5511_v55  ;;  %v5583_v55 = vld [vmem:[%s11002_s5] sm:$0xff] }
  0x78   :  { %11722 = vst [vmem:[#allocation62_spill] sm:$0xff] %v5474_v26  ;;  %717 = vmatpush.msra.mxu3 %v5474_v26  ;;  %v5516_v26 = vld [vmem:[%s11002_s5 + $0x68] sm:$0xff] }
  0x79   :  { %11723 = vst [vmem:[#allocation63_spill] sm:$0xff] %v5479_v58  ;;  %v5600_v58 = vld [vmem:[%s11002_s5 + $0x18] sm:$0xff] }
  0x7a   :  { %11724 = vst [vmem:[#allocation64_spill] sm:$0xff] %v5486_v60  ;;  %718 = vmatpush.msra.mxu3 %v5496_v57  ;;  %v5532_v57 = vld [vmem:[%s11002_s5 + $0x78] sm:$0xff] }
  0x7b   :  { %11730 = vst [vmem:[#allocation70_spill] sm:$0xff] %v5516_v26 }
  0x7c   :  { %11734 = vst [vmem:[#allocation74_spill] sm:$0xff] %v5532_v57  ;;  %719 = vmatpush.msra.mxu3 %v5532_v57  ;;  %v5556_v57 = vld [vmem:[%s11002_s5 + $0x58] sm:$0xff] }
  0x7d   :  { %11738 = vst [vmem:[#allocation78_spill] sm:$0xff] %v5556_v57 }
  0x7e   :  { %720 = vmatpush.msra.mxu3 %v5556_v57  ;;  %11743 = vst [vmem:[#allocation83_spill] sm:$0xff] %v5583_v55  ;;  %v5590_v57 = vld [vmem:[%s11002_s5 + $0x8] sm:$0xff] }
  0x7f   :  { %11744 = vst [vmem:[#allocation84_spill] sm:$0xff] %v5590_v57 }
  0x80   :  { %11746 = vst [vmem:[#allocation86_spill] sm:$0xff] %v5600_v58 }
  0x9f   :  { %v5315_v39 = vpop.f32.mrf.mxu0  ;;  %v5317_v62 = vpop.f32.mrf.mxu1 }
  0xa6   :  { %v5398_v0 = vpop.f32.mrf.mxu2  ;;  %v5400_v63 = vpop.f32.mrf.mxu3 }
  0xa7   :  { %v5419_v59 = vpop.f32.mrf.mxu0  ;;  %v5421_v13 = vpop.f32.mrf.mxu1 }
  0xa8   :  { %11712 = vst [vmem:[#allocation52_spill] sm:$0xff] %v5419_v59  ;;  %v5445_v59 = vld [vmem:[%s11002_s5 + $0xd0] sm:$0xff] }
  0xa9   :  { %11713 = vst [vmem:[#allocation53_spill] sm:$0xff] %v5421_v13  ;;  %v5440_v13 = vld [vmem:[%s11002_s5 + $0xc8] sm:$0xff]  ;;  %696 = vmatpush.msra.mxu2 %v5445_v59 }
  0xaa   :  { %11716 = vst [vmem:[#allocation56_spill] sm:$0xff] %v5440_v13  ;;  %676 = vmatpush.msra.mxu1 %v5440_v13  ;;  %v5469_v13 = vld [vmem:[%s11002_s5 + $0xb0] sm:$0xff] }
  0xab   :  { %11717 = vst [vmem:[#allocation57_spill] sm:$0xff] %v5445_v59  ;;  %v5491_v59 = vld [vmem:[%s11002_s5 + $0x90] sm:$0xff]  ;;  %697 = vmatpush.msra.mxu2 %v5469_v13 }
  0xac   :  { %11721 = vst [vmem:[#allocation61_spill] sm:$0xff] %v5469_v13  ;;  %677 = vmatpush.msra.mxu1 %v5462_v52 }
  0xad   :  { %11725 = vst [vmem:[#allocation65_spill] sm:$0xff] %v5491_v59  ;;  %698 = vmatpush.msra.mxu2 %v5491_v59 }
  0xae   :  { %678 = vmatpush.msra.mxu1 %v5486_v60  ;;  %v5502_v52 = vpop.f32.mrf.mxu2  ;;  %v5504_v61 = vpop.f32.mrf.mxu3  ;;  %v5539_v60 = vld [vmem:[%s11002_s5 + $0x40] sm:$0xff] }
  0xaf   :  { %11727 = vst [vmem:[#allocation67_spill] sm:$0xff] %v5502_v52  ;;  %v5521_v52 = vld [vmem:[%s11002_s5 + $0x70] sm:$0xff]  ;;  %v5525_v59 = vpop.f32.mrf.mxu1  ;;  %660 = vmatpush.msra.mxu0 %v5539_v60 }
  0xb0   :  { %11728 = vst [vmem:[#allocation68_spill] sm:$0xff] %v5504_v61  ;;  %v5523_v61 = vpop.f32.mrf.mxu0  ;;  %679 = vmatpush.msra.mxu1 %v5516_v26  ;;  %699 = vmatpush.msra.mxu2 %v5521_v52  ;;  %v5566_v26 = vld [vmem:[%s11002_s5 + $0x28] sm:$0xff] }
  0xb1   :  { %11731 = vst [vmem:[#allocation71_spill] sm:$0xff] %v5521_v52  ;;  %v5561_v52 = vld [vmem:[%s11002_s5 + $0x20] sm:$0xff] }
  0xb2   :  { %11732 = vst [vmem:[#allocation72_spill] sm:$0xff] %v5523_v61  ;;  %v5549_v61 = vld [vmem:[%s11002_s5 + $0x50] sm:$0xff]  ;;  %661 = vmatpush.msra.mxu0 %v5561_v52 }
  0xb3   :  { %11733 = vst [vmem:[#allocation73_spill] sm:$0xff] %v5525_v59  ;;  %v5544_v59 = vld [vmem:[%s11002_s5 + $0x48] sm:$0xff]  ;;  %700 = vmatpush.msra.mxu2 %v5549_v61 }
  0xb4   :  { %11735 = vst [vmem:[#allocation75_spill] sm:$0xff] %v5539_v60  ;;  %680 = vmatpush.msra.mxu1 %v5544_v59  ;;  %v5578_v60 = vld [vmem:[%s11002_s5 + $0x38] sm:$0xff]  ;;  %662 = vmatpush.msra.mxu0 %v5583_v55 }
  0xb5   :  { %11736 = vst [vmem:[#allocation76_spill] sm:$0xff] %v5544_v59  ;;  %v5573_v59 = vld [vmem:[%s11002_s5 + $0x30] sm:$0xff]  ;;  %721 = vmatpush.msra.mxu3 %v5578_v60 }
  0xb6   :  { %11737 = vst [vmem:[#allocation77_spill] sm:$0xff] %v5549_v61  ;;  %681 = vmatpush.msra.mxu1 %v5566_v26  ;;  %v5595_v61 = vld [vmem:[%s11002_s5 + $0x10] sm:$0xff]  ;;  %701 = vmatpush.msra.mxu2 %v5573_v59  ;;  %v5623_v55 = vpop.f32.mrf.mxu3 }
  0xb7   :  { %11739 = vst [vmem:[#allocation79_spill] sm:$0xff] %v5561_v52  ;;  %v5614_v52 = vld [vmem:[%s11003_s4 + $0x1e8] sm:$0xff]  ;;  %722 = vmatpush.msra.mxu3 %v5600_v58  ;;  %v5634_v56 = vpop.f32.mrf.mxu1 }
  0xb8   :  { %11740 = vst [vmem:[#allocation80_spill] sm:$0xff] %v5566_v26  ;;  %682 = vmatpush.msra.mxu1 %v5590_v57  ;;  %v5609_v26 = vld [vmem:[%s11003_s4 + $0x1e0] sm:$0xff]  ;;  %702 = vmatpush.msra.mxu2 %v5595_v61  ;;  %v5630_v57 = vld [vmem:[%s11003_s4 + $0x1f8] sm:$0xff]  ;;  %v5632_v13 = vpop.f32.mrf.mxu0 }
  0xb9   :  { %11741 = vst [vmem:[#allocation81_spill] sm:$0xff] %v5573_v59  ;;  %v5619_v59 = vld [vmem:[%s11003_s4 + $0x1f0] sm:$0xff]  ;;  %727 = vmatpush.msrb.mxu0 %v5609_v26  ;;  %787 = vmatpush.msrb.mxu3 %v5630_v57 }
  0xba   :  { %11742 = vst [vmem:[#allocation82_spill] sm:$0xff] %v5578_v60  ;;  %v5621_v60 = vpop.f32.mrf.mxu2  ;;  %747 = vmatpush.msrb.mxu1 %v5614_v52  ;;  %767 = vmatpush.msrb.mxu2 %v5619_v59 }
  0xbb   :  { %11745 = vst [vmem:[#allocation85_spill] sm:$0xff] %v5595_v61 }
  0xbc   :  { %11747 = vst [vmem:[#allocation87_spill] sm:$0xff] %v5609_v26  ;;  %v5668_v26 = vld [vmem:[%s11003_s4 + $0x1a8] sm:$0xff] }
  0xbd   :  { %11748 = vst [vmem:[#allocation88_spill] sm:$0xff] %v5614_v52  ;;  %v5663_v52 = vld [vmem:[%s11003_s4 + $0x1a0] sm:$0xff] }
  0xbe   :  { %11749 = vst [vmem:[#allocation89_spill] sm:$0xff] %v5619_v59  ;;  %v5680_v59 = vld [vmem:[%s11003_s4 + $0x1b8] sm:$0xff] }
  0xbf   :  { %11750 = vst [vmem:[#allocation90_spill] sm:$0xff] %v5621_v60  ;;  %v5641_v60 = vld [vmem:[%s11003_s4 + $0x1c0] sm:$0xff]  ;;  %v5738_v61 = vpop.f32.mrf.mxu1 }
  0xc0   :  { %11751 = vst [vmem:[#allocation91_spill] sm:$0xff] %v5623_v55  ;;  %v5646_v55 = vld [vmem:[%s11003_s4 + $0x1c8] sm:$0xff]  ;;  %728 = vmatpush.msrb.mxu0 %v5641_v60  ;;  %v5736_v58 = vpop.f32.mrf.mxu0 }
  0xc1   :  { %11752 = vst [vmem:[#allocation92_spill] sm:$0xff] %v5630_v57  ;;  %748 = vmatpush.msrb.mxu1 %v5646_v55  ;;  %v5675_v57 = vld [vmem:[%s11003_s4 + $0x1b0] sm:$0xff] }
  0xc2   :  { %11753 = vst [vmem:[#allocation93_spill] sm:$0xff] %v5632_v13  ;;  %v5651_v13 = vld [vmem:[%s11003_s4 + $0x1d0] sm:$0xff]  ;;  %729 = vmatpush.msrb.mxu0 %v5663_v52 }
  0xc3   :  { %11754 = vst [vmem:[#allocation94_spill] sm:$0xff] %v5634_v56  ;;  %v5658_v56 = vld [vmem:[%s11003_s4 + $0x1d8] sm:$0xff]  ;;  %768 = vmatpush.msrb.mxu2 %v5651_v13  ;;  %749 = vmatpush.msrb.mxu1 %v5668_v26 }
  0xc4   :  { %11755 = vst [vmem:[#allocation95_spill] sm:$0xff] %v5641_v60  ;;  %788 = vmatpush.msrb.mxu3 %v5658_v56  ;;  %v5687_v60 = vld [vmem:[%s11003_s4 + $0x180] sm:$0xff] }
  0xc5   :  { %11756 = vst [vmem:[#allocation96_spill] sm:$0xff] %v5646_v55  ;;  %v5692_v55 = vld [vmem:[%s11003_s4 + $0x188] sm:$0xff]  ;;  %769 = vmatpush.msrb.mxu2 %v5675_v57  ;;  %730 = vmatpush.msrb.mxu0 %v5687_v60 }
  0xc6   :  { %11757 = vst [vmem:[#allocation97_spill] sm:$0xff] %v5651_v13  ;;  %v5699_v13 = vld [vmem:[%s11003_s4 + $0x190] sm:$0xff]  ;;  %789 = vmatpush.msrb.mxu3 %v5680_v59  ;;  %750 = vmatpush.msrb.mxu1 %v5692_v55 }
  0xc7   :  { %11758 = vst [vmem:[#allocation98_spill] sm:$0xff] %v5658_v56  ;;  %v5704_v56 = vld [vmem:[%s11003_s4 + $0x198] sm:$0xff]  ;;  %770 = vmatpush.msrb.mxu2 %v5699_v13 }
  0xc8   :  { %11759 = vst [vmem:[#allocation99_spill] sm:$0xff] %v5663_v52  ;;  %v5718_v52 = vld [vmem:[%s11003_s4 + $0x168] sm:$0xff]  ;;  %790 = vmatpush.msrb.mxu3 %v5704_v56 }
  0xc9   :  { %11760 = vst [vmem:[#allocation100_spill] sm:$0xff] %v5668_v26  ;;  %v5713_v26 = vld [vmem:[%s11003_s4 + $0x160] sm:$0xff]  ;;  %751 = vmatpush.msrb.mxu1 %v5718_v52 }
  0xca   :  { %11761 = vst [vmem:[#allocation101_spill] sm:$0xff] %v5675_v57  ;;  %v5723_v57 = vld [vmem:[%s11003_s4 + $0x170] sm:$0xff]  ;;  %731 = vmatpush.msrb.mxu0 %v5713_v26 }
  0xcb   :  { %11762 = vst [vmem:[#allocation102_spill] sm:$0xff] %v5680_v59  ;;  %v5725_v59 = vpop.f32.mrf.mxu2  ;;  %771 = vmatpush.msrb.mxu2 %v5723_v57 }
  0xcc   :  { %11763 = vst [vmem:[#allocation103_spill] sm:$0xff] %v5687_v60  ;;  %v5727_v60 = vpop.f32.mrf.mxu3 }
  0xcd   :  { %11764 = vst [vmem:[#allocation104_spill] sm:$0xff] %v5692_v55  ;;  %v5734_v55 = vld [vmem:[%s11003_s4 + $0x178] sm:$0xff] }
  0xce   :  { %11765 = vst [vmem:[#allocation105_spill] sm:$0xff] %v5718_v52  ;;  %791 = vmatpush.msrb.mxu3 %v5734_v55  ;;  %v5769_v52 = vld [vmem:[%s11003_s4 + $0x120] sm:$0xff] }
  0xcf   :  { %11766 = vst [vmem:[#allocation106_spill] sm:$0xff] %v5723_v57  ;;  %v5774_v57 = vld [vmem:[%s11003_s4 + $0x128] sm:$0xff] }
  0xd0   :  { %11767 = vst [vmem:[#allocation107_spill] sm:$0xff] %v5725_v59  ;;  %v5745_v59 = vld [vmem:[%s11003_s4 + $0x140] sm:$0xff] }
  0xd1   :  { %11768 = vst [vmem:[#allocation108_spill] sm:$0xff] %v5727_v60  ;;  %v5750_v60 = vld [vmem:[%s11003_s4 + $0x148] sm:$0xff]  ;;  %732 = vmatpush.msrb.mxu0 %v5745_v59 }
  0xd2   :  { %11769 = vst [vmem:[#allocation109_spill] sm:$0xff] %v5734_v55  ;;  %752 = vmatpush.msrb.mxu1 %v5750_v60  ;;  %v5779_v55 = vld [vmem:[%s11003_s4 + $0x130] sm:$0xff] }
  0xd3   :  { %11770 = vst [vmem:[#allocation110_spill] sm:$0xff] %v5736_v58  ;;  %v5755_v58 = vld [vmem:[%s11003_s4 + $0x150] sm:$0xff]  ;;  %733 = vmatpush.msrb.mxu0 %v5769_v52 }
  0xd4   :  { %11771 = vst [vmem:[#allocation111_spill] sm:$0xff] %v5738_v61  ;;  %v5762_v61 = vld [vmem:[%s11003_s4 + $0x158] sm:$0xff]  ;;  %772 = vmatpush.msrb.mxu2 %v5755_v58  ;;  %753 = vmatpush.msrb.mxu1 %v5774_v57 }
  0xd5   :  { %11772 = vst [vmem:[#allocation112_spill] sm:$0xff] %v5745_v59  ;;  %792 = vmatpush.msrb.mxu3 %v5762_v61  ;;  %v5793_v59 = vld [vmem:[%s11003_s4 + $0x100] sm:$0xff] }
  0xd6   :  { %11773 = vst [vmem:[#allocation113_spill] sm:$0xff] %v5750_v60  ;;  %v5786_v60 = vld [vmem:[%s11003_s4 + $0x138] sm:$0xff]  ;;  %773 = vmatpush.msrb.mxu2 %v5779_v55  ;;  %734 = vmatpush.msrb.mxu0 %v5793_v59 }
  0xd7   :  { %11774 = vst [vmem:[#allocation114_spill] sm:$0xff] %v5755_v58  ;;  %v5798_v58 = vld [vmem:[%s11003_s4 + $0x108] sm:$0xff]  ;;  %793 = vmatpush.msrb.mxu3 %v5786_v60 }
  0xd8   :  { %11775 = vst [vmem:[#allocation115_spill] sm:$0xff] %v5762_v61  ;;  %v5803_v61 = vld [vmem:[%s11003_s4 + $0x110] sm:$0xff]  ;;  %754 = vmatpush.msrb.mxu1 %v5798_v58 }
  0xd9   :  { %11776 = vst [vmem:[#allocation116_spill] sm:$0xff] %v5769_v52  ;;  %v5814_v52 = vpop.f32.mrf.mxu3  ;;  %774 = vmatpush.msrb.mxu2 %v5803_v61 }
  0xda   :  { %11777 = vst [vmem:[#allocation117_spill] sm:$0xff] %v5774_v57  ;;  %v5810_v57 = vld [vmem:[%s11003_s4 + $0x118] sm:$0xff] }
  0xdb   :  { %11778 = vst [vmem:[#allocation118_spill] sm:$0xff] %v5779_v55  ;;  %794 = vmatpush.msrb.mxu3 %v5810_v57  ;;  %v5821_v55 = vld [vmem:[%s11003_s4 + $0xe0] sm:$0xff] }
  0xdc   :  { %11779 = vst [vmem:[#allocation119_spill] sm:$0xff] %v5786_v60  ;;  %v5826_v60 = vld [vmem:[%s11003_s4 + $0xe8] sm:$0xff]  ;;  %735 = vmatpush.msrb.mxu0 %v5821_v55 }
  0xdd   :  { %11780 = vst [vmem:[#allocation120_spill] sm:$0xff] %v5793_v59  ;;  %755 = vmatpush.msrb.mxu1 %v5826_v60  ;;  %v5844_v59 = vpop.f32.mrf.mxu2 }
  0xde   :  { %11781 = vst [vmem:[#allocation121_spill] sm:$0xff] %v5798_v58  ;;  %v5831_v58 = vld [vmem:[%s11003_s4 + $0xf0] sm:$0xff] }
  0xdf   :  { %11782 = vst [vmem:[#allocation122_spill] sm:$0xff] %v5803_v61  ;;  %v5835_v61 = vpop.f32.mrf.mxu1  ;;  %775 = vmatpush.msrb.mxu2 %v5831_v58 }
  0xe0   :  { %11783 = vst [vmem:[#allocation123_spill] sm:$0xff] %v5810_v57  ;;  %v5842_v57 = vld [vmem:[%s11003_s4 + $0xf8] sm:$0xff] }
  0xe1   :  { %11784 = vst [vmem:[#allocation124_spill] sm:$0xff] %v5814_v52  ;;  %v5833_v52 = vpop.f32.mrf.mxu0  ;;  %795 = vmatpush.msrb.mxu3 %v5842_v57 }
  0xe2   :  { %11785 = vst [vmem:[#allocation125_spill] sm:$0xff] %v5821_v55  ;;  %v5953_v55 = vld [vmem:[%s11003_s4 + $0x40] sm:$0xff] }
  0xe3   :  { %11786 = vst [vmem:[#allocation126_spill] sm:$0xff] %v5826_v60  ;;  %v5861_v60 = vld [vmem:[%s11003_s4 + $0xd0] sm:$0xff] }
  0xe4   :  { %11787 = vst [vmem:[#allocation127_spill] sm:$0xff] %v5831_v58  ;;  %776 = vmatpush.msrb.mxu2 %v5861_v60  ;;  %v5925_v58 = vld [vmem:[%s11003_s4 + $0x60] sm:$0xff] }
  0xe5   :  { %11788 = vst [vmem:[#allocation128_spill] sm:$0xff] %v5833_v52  ;;  %v5851_v52 = vld [vmem:[%s11003_s4 + $0xc0] sm:$0xff] }
  0xe6   :  { %11789 = vst [vmem:[#allocation129_spill] sm:$0xff] %v5835_v61  ;;  %v5856_v61 = vld [vmem:[%s11003_s4 + $0xc8] sm:$0xff]  ;;  %736 = vmatpush.msrb.mxu0 %v5851_v52 }
  0xe7   :  { %11790 = vst [vmem:[#allocation130_spill] sm:$0xff] %v5842_v57  ;;  %756 = vmatpush.msrb.mxu1 %v5856_v61  ;;  %v5875_v57 = vld [vmem:[%s11003_s4 + $0xa0] sm:$0xff] }
  0xe8   :  { %11791 = vst [vmem:[#allocation131_spill] sm:$0xff] %v5844_v59  ;;  %v5868_v59 = vld [vmem:[%s11003_s4 + $0xd8] sm:$0xff]  ;;  %737 = vmatpush.msrb.mxu0 %v5875_v57 }
  0xe9   :  { %11792 = vst [vmem:[#allocation132_spill] sm:$0xff] %v5851_v52  ;;  %796 = vmatpush.msrb.mxu3 %v5868_v59  ;;  %v5880_v52 = vld [vmem:[%s11003_s4 + $0xa8] sm:$0xff] }
  0xea   :  { %11793 = vst [vmem:[#allocation133_spill] sm:$0xff] %v5856_v61  ;;  %v5885_v61 = vld [vmem:[%s11003_s4 + $0xb0] sm:$0xff]  ;;  %757 = vmatpush.msrb.mxu1 %v5880_v52 }
  0xeb   :  { %11794 = vst [vmem:[#allocation134_spill] sm:$0xff] %v5861_v60  ;;  %777 = vmatpush.msrb.mxu2 %v5885_v61  ;;  %v5899_v60 = vld [vmem:[%s11003_s4 + $0x80] sm:$0xff] }
  0xec   :  { %11795 = vst [vmem:[#allocation135_spill] sm:$0xff] %v5868_v59  ;;  %v5892_v59 = vld [vmem:[%s11003_s4 + $0xb8] sm:$0xff]  ;;  %738 = vmatpush.msrb.mxu0 %v5899_v60 }
  0xed   :  { %11796 = vst [vmem:[#allocation136_spill] sm:$0xff] %v5875_v57  ;;  %797 = vmatpush.msrb.mxu3 %v5892_v59  ;;  %v5904_v57 = vld [vmem:[%s11003_s4 + $0x88] sm:$0xff] }
  0xee   :  { %11797 = vst [vmem:[#allocation137_spill] sm:$0xff] %v5880_v52  ;;  %v5909_v52 = vld [vmem:[%s11003_s4 + $0x90] sm:$0xff]  ;;  %758 = vmatpush.msrb.mxu1 %v5904_v57  ;;  %739 = vmatpush.msrb.mxu0 %v5925_v58 }
  0xef   :  { %11798 = vst [vmem:[#allocation138_spill] sm:$0xff] %v5885_v61  ;;  %v5918_v61 = vpop.f32.mrf.mxu3  ;;  %778 = vmatpush.msrb.mxu2 %v5909_v52 }
  0xf0   :  { %11799 = vst [vmem:[#allocation139_spill] sm:$0xff] %v5892_v59  ;;  %v5916_v59 = vld [vmem:[%s11003_s4 + $0x98] sm:$0xff]  ;;  %740 = vmatpush.msrb.mxu0 %v5953_v55 }
  0xf1   :  { %11800 = vst [vmem:[#allocation140_spill] sm:$0xff] %v5899_v60  ;;  %798 = vmatpush.msrb.mxu3 %v5916_v59  ;;  %v5935_v60 = vld [vmem:[%s11003_s4 + $0x70] sm:$0xff] }
  0xf2   :  { %11801 = vst [vmem:[#allocation141_spill] sm:$0xff] %v5904_v57  ;;  %v5930_v57 = vld [vmem:[%s11003_s4 + $0x68] sm:$0xff]  ;;  %779 = vmatpush.msrb.mxu2 %v5935_v60 }
  0xf3   :  { %11802 = vst [vmem:[#allocation142_spill] sm:$0xff] %v5909_v52  ;;  %v5939_v52 = vpop.f32.mrf.mxu1  ;;  %759 = vmatpush.msrb.mxu1 %v5930_v57 }
  0xf4   :  { %11803 = vst [vmem:[#allocation143_spill] sm:$0xff] %v5916_v59  ;;  %v5946_v59 = vld [vmem:[%s11003_s4 + $0x78] sm:$0xff] }
  0xf5   :  { %11804 = vst [vmem:[#allocation144_spill] sm:$0xff] %v5918_v61  ;;  %v5937_v61 = vpop.f32.mrf.mxu0  ;;  %799 = vmatpush.msrb.mxu3 %v5946_v59 }
  0xf6   :  { %11805 = vst [vmem:[#allocation145_spill] sm:$0xff] %v5925_v58 }
  0xf7   :  { %11806 = vst [vmem:[#allocation146_spill] sm:$0xff] %v5930_v57  ;;  %v5979_v57 = vld [vmem:[%s11003_s4 + $0x20] sm:$0xff] }
  0xf8   :  { %11807 = vst [vmem:[#allocation147_spill] sm:$0xff] %v5935_v60  ;;  %v5972_v60 = vpop.f32.mrf.mxu2  ;;  %741 = vmatpush.msrb.mxu0 %v5979_v57 }
  0xf9   :  { %11808 = vst [vmem:[#allocation148_spill] sm:$0xff] %v5937_v61  ;;  %v5963_v61 = vld [vmem:[%s11003_s4 + $0x50] sm:$0xff] }
  0xfa   :  { %11809 = vst [vmem:[#allocation149_spill] sm:$0xff] %v5939_v52  ;;  %v5958_v52 = vld [vmem:[%s11003_s4 + $0x48] sm:$0xff]  ;;  %780 = vmatpush.msrb.mxu2 %v5963_v61 }
  0xfb   :  { %11810 = vst [vmem:[#allocation150_spill] sm:$0xff] %v5946_v59  ;;  %760 = vmatpush.msrb.mxu1 %v5958_v52  ;;  %v5970_v59 = vld [vmem:[%s11003_s4 + $0x58] sm:$0xff] }
  0xfc   :  { %11811 = vst [vmem:[#allocation151_spill] sm:$0xff] %v5953_v55  ;;  %800 = vmatpush.msrb.mxu3 %v5970_v59  ;;  %v5989_v55 = vld [vmem:[%s11003_s4 + $0x30] sm:$0xff] }
  0xfd   :  { %11812 = vst [vmem:[#allocation152_spill] sm:$0xff] %v5958_v52  ;;  %v5984_v52 = vld [vmem:[%s11003_s4 + $0x28] sm:$0xff]  ;;  %781 = vmatpush.msrb.mxu2 %v5989_v55  ;;  %v6031_v58 = vpop.f32.mrf.mxu0 }
  0xfe   :  { %11813 = vst [vmem:[#allocation153_spill] sm:$0xff] %v5963_v61  ;;  %761 = vmatpush.msrb.mxu1 %v5984_v52  ;;  %v6029_v61 = vld [vmem:[%s11004_s3] sm:$0xf] }
  0xff   :  { %11814 = vst [vmem:[#allocation154_spill] sm:$0xff] %v5970_v59  ;;  %v6003_v59 = vld [vmem:[%s11003_s4] sm:$0xff] }
 0x100   :  { %11815 = vst [vmem:[#allocation155_spill] sm:$0xff] %v5972_v60  ;;  %v5996_v60 = vld [vmem:[%s11003_s4 + $0x38] sm:$0xff]  ;;  %742 = vmatpush.msrb.mxu0 %v6003_v59 }
 0x101   :  { %11816 = vst [vmem:[#allocation156_spill] sm:$0xff] %v5979_v57  ;;  %801 = vmatpush.msrb.mxu3 %v5996_v60  ;;  %v6008_v57 = vld [vmem:[%s11003_s4 + $0x8] sm:$0xff] }
 0x102   :  { %11817 = vst [vmem:[#allocation157_spill] sm:$0xff] %v5984_v52  ;;  %v6013_v52 = vld [vmem:[%s11003_s4 + $0x10] sm:$0xff]  ;;  %762 = vmatpush.msrb.mxu1 %v6008_v57 }
 0x103   :  { %11818 = vst [vmem:[#allocation158_spill] sm:$0xff] %v5989_v55  ;;  %v6022_v55 = vpop.f32.mrf.mxu3  ;;  %782 = vmatpush.msrb.mxu2 %v6013_v52 }
 0x104   :  { %11819 = vst [vmem:[#allocation159_spill] sm:$0xff] %v5996_v60  ;;  %v6020_v60 = vld [vmem:[%s11003_s4 + $0x18] sm:$0xff] }
 0x105   :  { %11820 = vst [vmem:[#allocation160_spill] sm:$0xff] %v6003_v59  ;;  %802 = vmatpush.msrb.mxu3 %v6020_v60  ;;  %v6033_v59 = vpop.f32.mrf.mxu1 }
 0x106   :  { %11821 = vst [vmem:[#allocation161_spill] sm:$0xff] %v6008_v57  ;;  %v11826_v57 = vmov 0.0  }
 0x107   :  { %11822 = vst [vmem:[#allocation162_spill] sm:$0xff] %v6020_v60  ;;  %663 = vmatmul.f32.vlgmr.msra.gmra.mxu0 %v11826_v57  ;;  %683 = vmatmul.f32.vlgmr.msra.gmra.mxu1 %v11826_v57  ;;  %v6045_v60 = vperm.slane %v6029_v61, 1 }
 0x108   :  { %11823 = vst [vmem:[#allocation163_spill] sm:$0xff] %v6022_v55  ;;  %703 = vmatmul.f32.vlgmr.msra.gmra.mxu2 %v11826_v57  ;;  %723 = vmatmul.f32.vlgmr.msra.gmra.mxu3 %v11826_v57  ;;  %v6042_v55 = vperm.slane %v6029_v61, 0 }
 0x109   :  { %11824 = vst [vmem:[#allocation164_spill] sm:$0xff] %v6031_v58  ;;  %874 = vmatpush.msra.mxu0 %v4798_v1  ;;  %894 = vmatpush.msra.mxu1 %v4803_v2  ;;  %v193_v2 = vadd.f32 %v5317_v62, %v6045_v60  ;;  %v6695_v58 = vld [vmem:[%s11001_s2 + $0x78] sm:$0xff] }
 0x10a   :  { %11825 = vst [vmem:[#allocation165_spill] sm:$0xff] %v6033_v59  ;;  %914 = vmatpush.msra.mxu2 %v4813_v4  ;;  %934 = vmatpush.msra.mxu3 %v4808_v3  ;;  %v6051_v59 = vpop.f32.mrf.mxu2  ;;  %v152_v1 = vadd.f32 %v5315_v39, %v6042_v55  ;;  %v517_v4 = vpop.f32.mrf.mxu0 }
 0x10b   :  { %11827 = vst [vmem:[#allocation166_spill] sm:$0xff] %v6042_v55  ;;  %875 = vmatpush.msra.mxu0 %v4818_v5  ;;  %895 = vmatpush.msra.mxu1 %v4823_v6  ;;  %v6061_v3 = vpop.f32.mrf.mxu3 }
 0x10c   :  { %11828 = vst [vmem:[#allocation167_spill] sm:$0xff] %v6045_v60  ;;  %915 = vmatpush.msra.mxu2 %v4835_v8  ;;  %935 = vmatpush.msra.mxu3 %v4830_v7  ;;  %v580_v6 = vadd.f32 %v517_v4, %v152_v1  ;;  %v6070_v8 = vperm.slane %v6029_v61, 3 }
 0x10d   :  { %11829 = vst [vmem:[#allocation168_spill] sm:$0xff] %v6051_v59  ;;  %876 = vmatpush.msra.mxu0 %v4841_v9  ;;  %896 = vmatpush.msra.mxu1 %v4846_v10  ;;  %v537_v5 = vpop.f32.mrf.mxu1  ;;  %v6701_v59 = vld [vmem:[%s11001_s2 + $0x40] sm:$0xff] }
 0x10e   :  { %11830 = vst [vmem:[#allocation169_spill] sm:$0xff] %v6061_v3  ;;  %916 = vmatpush.msra.mxu2 %v4859_v12  ;;  %936 = vmatpush.msra.mxu3 %v4854_v11  ;;  %v581_v7 = vadd.f32 %v537_v5, %v193_v2  ;;  %v3633_v9 = vmul.f32 -1.442695, %v580_v6  ;;  %v275_v11 = vadd.f32 %v5400_v63, %v6070_v8  ;;  %v6689_v3 = vld [vmem:[%s11001_s2 + $0x70] sm:$0xff] }
 0x10f   :  { %877 = vmatpush.msra.mxu0 %v4871_v14  ;;  %897 = vmatpush.msra.mxu1 %v4876_v15  ;;  %11831 = vst [vmem:[#allocation170_spill] sm:$0xff] %v6070_v8 }
 0x110   :  { %917 = vmatpush.msra.mxu2 %v4888_v17  ;;  %937 = vmatpush.msra.mxu3 %v4883_v16  ;;  %v3634_v10 = vmul.f32 -1.442695, %v581_v7  ;;  %3687 = vpow2.f32 %v3633_v9 }
 0x111   :  { %878 = vmatpush.msra.mxu0 %v4893_v18  ;;  %898 = vmatpush.msra.mxu1 %v4898_v19 }
 0x112   :  { %918 = vmatpush.msra.mxu2 %v4910_v21  ;;  %938 = vmatpush.msra.mxu3 %v4905_v20  ;;  %3689 = vpow2.f32 %v3634_v10  ;;  %v6084_v12 = vpop.f32.mrf.mxu2  ;;  %v6105_v21 = vperm.slane %v6029_v61, 2 }
 0x113   :  { %879 = vmatpush.msra.mxu0 %v4916_v22  ;;  %899 = vmatpush.msra.mxu1 %v4921_v23  ;;  %11832 = vst [vmem:[#allocation171_spill] sm:$0xff] %v6084_v12  ;;  %v577_v14 = vpop.f32.mrf.mxu3  ;;  %v6683_v12 = vld [vmem:[%s11001_s2 + $0x68] sm:$0xff] }
 0x114   :  { %919 = vmatpush.msra.mxu2 %v4934_v25  ;;  %939 = vmatpush.msra.mxu3 %v4929_v24  ;;  %v583_v15 = vadd.f32 %v577_v14, %v275_v11  ;;  %v234_v24 = vadd.f32 %v5398_v0, %v6105_v21 }
 0x115   :  { %880 = vmatpush.msra.mxu0 %v4946_v27  ;;  %900 = vmatpush.msra.mxu1 %v4951_v28  ;;  %v11833_v27 = vld [vmem:[#allocation4_spill] sm:$0xff]  ;;  %v11834_v28 = vld [vmem:[#allocation3_spill] sm:$0xff] }
 0x116   :  { %920 = vmatpush.msra.mxu2 %v4963_v30  ;;  %940 = vmatpush.msra.mxu3 %v4958_v29  ;;  %v3635_v16 = vmul.f32 -1.442695, %v583_v15  ;;  %v3688_v17 = vpop.eup %3687 }
 0x117   :  { %881 = vmatpush.msra.mxu0 %v4968_v31  ;;  %901 = vmatpush.msra.mxu1 %v4973_v32  ;;  %v6096_v19 = vadd.f32 1.0, %v3688_v17  ;;  %v11835_v31 = vld [vmem:[#allocation5_spill] sm:$0xff]  ;;  %v11836_v32 = vld [vmem:[#allocation6_spill] sm:$0xff] }
 0x118   :  { %921 = vmatpush.msra.mxu2 %v4985_v34  ;;  %941 = vmatpush.msra.mxu3 %v4980_v33  ;;  %v3690_v18 = vpop.eup %3689  ;;  %3691 = vpow2.f32 %v3635_v16 }
 0x119   :  { %882 = vmatpush.msra.mxu0 %v4991_v35  ;;  %902 = vmatpush.msra.mxu1 %v4996_v36  ;;  %v6100_v20 = vadd.f32 1.0, %v3690_v18  ;;  %3693 = vrcp.f32 %v6096_v19  ;;  %v11837_v35 = vld [vmem:[#allocation8_spill] sm:$0xff]  ;;  %v11838_v36 = vld [vmem:[#allocation7_spill] sm:$0xff]  ;;  %vm593_vm2 = vweird.f32 %v6096_v19 }
 0x11a   :  { %922 = vmatpush.msra.mxu2 %v5009_v38  ;;  %942 = vmatpush.msra.mxu3 %v5004_v37  ;;  %v557_v22 = vpop.f32.mrf.mxu2  ;;  %v11839_v38 = vld [vmem:[#allocation9_spill] sm:$0xff] }
 0x11b   :  { %883 = vmatpush.msra.mxu0 %v5021_v40  ;;  %903 = vmatpush.msra.mxu1 %v5026_v41  ;;  %3695 = vrcp.f32 %v6100_v20  ;;  %v582_v30 = vadd.f32 %v557_v22, %v234_v24  ;;  %v11840_v40 = vld [vmem:[#allocation10_spill] sm:$0xff]  ;;  %v616_v57 = vand.u32 2147483647, %v6100_v20  ;;  %vm612_vm3 = vweird.f32 %v6100_v20 }
 0x11c   :  { %923 = vmatpush.msra.mxu2 %v5038_v43  ;;  %943 = vmatpush.msra.mxu3 %v5033_v42  ;;  %v11841_v42 = vld [vmem:[#allocation11_spill] sm:$0xff]  ;;  %v11842_v43 = vld [vmem:[#allocation12_spill] sm:$0xff] }
 0x11d   :  { %884 = vmatpush.msra.mxu0 %v5043_v44  ;;  %904 = vmatpush.msra.mxu1 %v5048_v45  ;;  %v599_v45 = vand.u32 2147483648, %v6096_v19  ;;  %vm617_vm7 = vcmp.eq.f32.partialorder %v616_v57, 8.507059e+37  ;;  %v11874_v57 = vld [vmem:[#allocation44_spill] sm:$0xff] }
 0x11e   :  { %924 = vmatpush.msra.mxu2 %v5060_v47  ;;  %944 = vmatpush.msra.mxu3 %v5055_v46  ;;  %v3692_v23 = vpop.eup %3691  ;;  %v11843_v46 = vld [vmem:[#allocation13_spill] sm:$0xff]  ;;  %v11844_v47 = vld [vmem:[#allocation14_spill] sm:$0xff] }
 0x11f   :  { %885 = vmatpush.msra.mxu0 %v5066_v48  ;;  %905 = vmatpush.msra.mxu1 %v5071_v49  ;;  %v6121_v25 = vadd.f32 1.0, %v3692_v23  ;;  %v3694_v29 = vpop.eup %3693  ;;  %v618_v48 = vand.u32 2147483648, %v6100_v20  ;;  %v600_v63 = vor.u32 1.1754944e-38, %v599_v45  ;;  %v11865_v45 = vld [vmem:[#allocation35_spill] sm:$0xff] }
 0x120   :  { %925 = vmatpush.msra.mxu2 %v5084_v51  ;;  %945 = vmatpush.msra.mxu3 %v5079_v50  ;;  %v589_v34 = vmul.f32 %v3694_v29, %v6096_v19  ;;  %vm594_vm0 = vweird.f32 %v3694_v29  ;;  %v597_v50 = vand.u32 2147483647, %v6096_v19  ;;  %v11845_v51 = vld [vmem:[#allocation15_spill] sm:$0xff] }
 0x121   :  { %886 = vmatpush.msra.mxu0 %v5096_v53  ;;  %906 = vmatpush.msra.mxu1 %v5101_v54  ;;  %v3696_v33 = vpop.eup %3695  ;;  %3697 = vrcp.f32 %v6121_v25  ;;  %v11846_v53 = vld [vmem:[#allocation16_spill] sm:$0xff]  ;;  %vm595_vm4 = vmor %vm593_vm2, %vm594_vm0  ;;  %v619_v1 = vor.u32 1.1754944e-38, %v618_v48  ;;  %v638_v17 = vand.u32 2147483648, %v6121_v25  ;;  %vm632_vm9 = vweird.f32 %v6121_v25  ;;  %v11868_v48 = vld [vmem:[#allocation38_spill] sm:$0xff] }
 0x122   :  { %926 = vmatpush.msra.mxu2 %v11833_v27  ;;  %946 = vmatpush.msra.mxu3 %v11834_v28  ;;  %v608_v37 = vmul.f32 %v3696_v33, %v6100_v20  ;;  %v590_v41 = vsub.f32 1.0, %v589_v34  ;;  %3699 = vtanh.f32 %v582_v30  ;;  %vm613_vm1 = vweird.f32 %v3696_v33  ;;  %v11847_v27 = vld [vmem:[#allocation17_spill] sm:$0xff]  ;;  %v11848_v28 = vld [vmem:[#allocation18_spill] sm:$0xff]  ;;  %v11850_v30 = vld [vmem:[#allocation20_spill] sm:$0xff] }
 0x123   :  { %887 = vmatpush.msra.mxu0 %v11835_v31  ;;  %907 = vmatpush.msra.mxu1 %v11836_v32  ;;  %vm598_vm5 = vcmp.eq.f32.partialorder %v597_v50, 8.507059e+37  ;;  %vm614_vm6 = vmor %vm612_vm3, %vm613_vm1  ;;  %v636_v18 = vand.u32 2147483647, %v6121_v25  ;;  %v639_v20 = vor.u32 1.1754944e-38, %v638_v17  ;;  %v11852_v31 = vld [vmem:[#allocation22_spill] sm:$0xff]  ;;  %v11853_v32 = vld [vmem:[#allocation23_spill] sm:$0xff] }
 0x124   :  { %927 = vmatpush.msra.mxu2 %v11837_v35  ;;  %947 = vmatpush.msra.mxu3 %v11838_v36  ;;  %v609_v44 = vsub.f32 1.0, %v608_v37  ;;  %v591_v49 = vmul.f32 %v3694_v29, %v590_v41  ;;  %v11855_v34 = vld [vmem:[#allocation25_spill] sm:$0xff]  ;;  %v11856_v35 = vld [vmem:[#allocation26_spill] sm:$0xff]  ;;  %v11857_v36 = vld [vmem:[#allocation27_spill] sm:$0xff] }
 0x125   :  { %888 = vmatpush.msra.mxu0 %v11839_v38  ;;  %908 = vmatpush.msra.mxu1 %v11840_v40  ;;  %vm637_vm11 = vcmp.eq.f32.partialorder %v636_v18, 8.507059e+37  ;;  %v11858_v37 = vld [vmem:[#allocation28_spill] sm:$0xff]  ;;  %v11859_v38 = vld [vmem:[#allocation29_spill] sm:$0xff]  ;;  %v11860_v40 = vld [vmem:[#allocation30_spill] sm:$0xff]  ;;  %12005 = vst [vmem:[#allocation25_spill] sm:$0xff] %v6689_v3 }
 0x126   :  { %928 = vmatpush.msra.mxu2 %v11841_v42  ;;  %948 = vmatpush.msra.mxu3 %v11842_v43  ;;  %v610_v54 = vmul.f32 %v3696_v33, %v609_v44  ;;  %v592_v62 = vadd.f32 %v3694_v29, %v591_v49  ;;  %v11861_v41 = vld [vmem:[#allocation31_spill] sm:$0xff]  ;;  %v11862_v42 = vld [vmem:[#allocation32_spill] sm:$0xff]  ;;  %v11863_v43 = vld [vmem:[#allocation33_spill] sm:$0xff]  ;;  %12006 = vst [vmem:[#allocation26_spill] sm:$0xff] %v6695_v58 }
 0x127   :  { %889 = vmatpush.msra.mxu0 %v11843_v46  ;;  %909 = vmatpush.msra.mxu1 %v11844_v47  ;;  %v3698_v61 = vpop.eup %3697  ;;  %v11864_v44 = vld [vmem:[#allocation34_spill] sm:$0xff]  ;;  %v11866_v46 = vld [vmem:[#allocation36_spill] sm:$0xff]  ;;  %v11867_v47 = vld [vmem:[#allocation37_spill] sm:$0xff]  ;;  %12007 = vst [vmem:[#allocation27_spill] sm:$0xff] %v6701_v59 }
 0x128   :  { %929 = vmatpush.msra.mxu2 %v11845_v51  ;;  %949 = vmatpush.msra.mxu3 %v11846_v53  ;;  %v611_v39 = vadd.f32 %v3696_v33, %v610_v54  ;;  %v628_v0 = vmul.f32 %v3698_v61, %v6121_v25  ;;  %v596_v2 = vsel %vm595_vm4, %v3694_v29, %v592_v62  ;;  %v3700_v4 = vpop.eup %3699  ;;  %vm633_vm8 = vweird.f32 %v3698_v61  ;;  %v11849_v29 = vld [vmem:[#allocation19_spill] sm:$0xff]  ;;  %v11851_v25 = vld [vmem:[#allocation21_spill] sm:$0xff]  ;;  %v11870_v50 = vld [vmem:[#allocation40_spill] sm:$0xff] }
 0x129   :  { %v601_v5 = vsel %vm598_vm5, %v600_v63, %v596_v2  ;;  %vm634_vm10 = vmor %vm632_vm9, %vm633_vm8  ;;  %v11869_v49 = vld [vmem:[#allocation39_spill] sm:$0xff]  ;;  %v11871_v51 = vld [vmem:[#allocation41_spill] sm:$0xff] }
 0x12a   :  { %v615_v6 = vsel %vm614_vm6, %v3696_v33, %v611_v39  ;;  %v629_v7 = vsub.f32 1.0, %v628_v0  ;;  %v643_v10 = vmul.f32 %v3700_v4, %v601_v5  ;;  %v11854_v33 = vld [vmem:[#allocation24_spill] sm:$0xff]  ;;  %v11872_v53 = vld [vmem:[#allocation42_spill] sm:$0xff]  ;;  %v11873_v54 = vld [vmem:[#allocation43_spill] sm:$0xff] }
 0x12b   :  { %v620_v9 = vsel %vm617_vm7, %v619_v1, %v615_v6  ;;  %v11876_v62 = vld [vmem:[#allocation46_spill] sm:$0xff]  ;;  %v11877_v63 = vld [vmem:[#allocation47_spill] sm:$0xff]  ;;  %v11878_v39 = vld [vmem:[#allocation48_spill] sm:$0xff]  ;;  %12004 = vst [vmem:[#allocation24_spill] sm:$0xff] %v6683_v12 }
 0x12c   :  { %v642_v11 = vmul.f32 0.0, %v620_v9  ;;  %v630_v14 = vmul.f32 %v3698_v61, %v629_v7  ;;  %v11879_v0 = vld [vmem:[#allocation49_spill] sm:$0xff]  ;;  %v11880_v1 = vld [vmem:[#allocation50_spill] sm:$0xff]  ;;  %v11881_v2 = vld [vmem:[#allocation51_spill] sm:$0xff] }
 0x12d   :  { %v11882_v4 = vld [vmem:[#allocation54_spill] sm:$0xff]  ;;  %v11883_v5 = vld [vmem:[#allocation55_spill] sm:$0xff]  ;;  %v11884_v6 = vld [vmem:[#allocation56_spill] sm:$0xff] }
 0x12e   :  { %v6147_v15 = vadd.f32 %v643_v10, %v642_v11  ;;  %v631_v16 = vadd.f32 %v3698_v61, %v630_v14  ;;  %v11885_v7 = vld [vmem:[#allocation57_spill] sm:$0xff]  ;;  %v11886_v9 = vld [vmem:[#allocation58_spill] sm:$0xff]  ;;  %v11887_v10 = vld [vmem:[#allocation59_spill] sm:$0xff] }
 0x12f   :  { %v11888_v11 = vld [vmem:[#allocation60_spill] sm:$0xff]  ;;  %v11889_v14 = vld [vmem:[#allocation61_spill] sm:$0xff]  ;;  %v11891_v17 = vld [vmem:[#allocation63_spill] sm:$0xff] }
 0x130   :  { %3701 = vtanh.f32 %v6147_v15  ;;  %v635_v19 = vsel %vm634_vm10, %v3698_v61, %v631_v16  ;;  %v11875_v61 = vld [vmem:[#allocation45_spill] sm:$0xff]  ;;  %v11890_v16 = vld [vmem:[#allocation62_spill] sm:$0xff]  ;;  %v11892_v18 = vld [vmem:[#allocation64_spill] sm:$0xff] }
 0x131   :  { %v640_v23 = vsel %vm637_vm11, %v639_v20, %v635_v19  ;;  %v11893_v19 = vld [vmem:[#allocation65_spill] sm:$0xff]  ;;  %v11894_v20 = vld [vmem:[#allocation66_spill] sm:$0xff] }
 0x136   :  { %v3702_v22 = vpop.eup %3701 }
 0x137   :  { %v646_v24 = vmul.f32 %v3702_v22, %v640_v23  ;;  %v11895_v22 = vld [vmem:[#allocation69_spill] sm:$0xff]  ;;  %v11896_v23 = vld [vmem:[#allocation70_spill] sm:$0xff] }
 0x139   :  { %743 = vmatmul.f32.vlgmr.msrb.gmra.mxu0 %v646_v24  ;;  %763 = vmatmul.f32.vlgmr.msrb.gmra.mxu1 %v646_v24 }
 0x13a   :  { %783 = vmatmul.f32.vlgmr.msrb.gmra.mxu2 %v646_v24  ;;  %803 = vmatmul.f32.vlgmr.msrb.gmra.mxu3 %v646_v24 }
 0x13b   :  { %1021 = vmatpush.msrb.mxu0 %v11847_v27  ;;  %1041 = vmatpush.msrb.mxu1 %v11848_v28  ;;  %v11898_v27 = vld [vmem:[#allocation74_spill] sm:$0xff]  ;;  %v11899_v28 = vld [vmem:[#allocation75_spill] sm:$0xff] }
 0x13c   :  { %1061 = vmatpush.msrb.mxu2 %v11849_v29  ;;  %1081 = vmatpush.msrb.mxu3 %v11850_v30  ;;  %v11900_v29 = vld [vmem:[#allocation76_spill] sm:$0xff]  ;;  %v11901_v30 = vld [vmem:[#allocation77_spill] sm:$0xff] }
 0x13d   :  { %1022 = vmatpush.msrb.mxu0 %v11851_v25  ;;  %1042 = vmatpush.msrb.mxu1 %v11852_v31  ;;  %v11902_v25 = vld [vmem:[#allocation78_spill] sm:$0xff]  ;;  %v11903_v31 = vld [vmem:[#allocation79_spill] sm:$0xff] }
 0x13e   :  { %1062 = vmatpush.msrb.mxu2 %v11853_v32  ;;  %1082 = vmatpush.msrb.mxu3 %v11854_v33  ;;  %v11904_v32 = vld [vmem:[#allocation80_spill] sm:$0xff]  ;;  %v11905_v33 = vld [vmem:[#allocation81_spill] sm:$0xff] }
 0x13f   :  { %1023 = vmatpush.msrb.mxu0 %v11855_v34  ;;  %1043 = vmatpush.msrb.mxu1 %v11856_v35  ;;  %v11906_v34 = vld [vmem:[#allocation82_spill] sm:$0xff]  ;;  %v11907_v35 = vld [vmem:[#allocation83_spill] sm:$0xff] }
 0x140   :  { %1063 = vmatpush.msrb.mxu2 %v11857_v36  ;;  %1083 = vmatpush.msrb.mxu3 %v11858_v37  ;;  %v11908_v36 = vld [vmem:[#allocation84_spill] sm:$0xff]  ;;  %v11909_v37 = vld [vmem:[#allocation85_spill] sm:$0xff] }
 0x141   :  { %890 = vmatmul.f32.vlgmr.msra.gmra.mxu0 %v646_v24  ;;  %910 = vmatmul.f32.vlgmr.msra.gmra.mxu1 %v646_v24 }
 0x142   :  { %930 = vmatmul.f32.vlgmr.msra.gmra.mxu2 %v646_v24  ;;  %950 = vmatmul.f32.vlgmr.msra.gmra.mxu3 %v646_v24  ;;  %v11897_v24 = vld [vmem:[#allocation71_spill] sm:$0xff] }
 0x143   :  { %1024 = vmatpush.msrb.mxu0 %v11859_v38  ;;  %1044 = vmatpush.msrb.mxu1 %v11860_v40  ;;  %v11910_v38 = vld [vmem:[#allocation86_spill] sm:$0xff]  ;;  %v11911_v40 = vld [vmem:[#allocation87_spill] sm:$0xff] }
 0x144   :  { %1064 = vmatpush.msrb.mxu2 %v11861_v41  ;;  %1084 = vmatpush.msrb.mxu3 %v11862_v42  ;;  %v11912_v41 = vld [vmem:[#allocation88_spill] sm:$0xff]  ;;  %v11913_v42 = vld [vmem:[#allocation89_spill] sm:$0xff] }
 0x145   :  { %1025 = vmatpush.msrb.mxu0 %v11863_v43  ;;  %1045 = vmatpush.msrb.mxu1 %v11864_v44  ;;  %v11914_v43 = vld [vmem:[#allocation92_spill] sm:$0xff]  ;;  %v11915_v44 = vld [vmem:[#allocation95_spill] sm:$0xff] }
 0x146   :  { %1065 = vmatpush.msrb.mxu2 %v11865_v45  ;;  %1085 = vmatpush.msrb.mxu3 %v11866_v46  ;;  %v11916_v45 = vld [vmem:[#allocation96_spill] sm:$0xff]  ;;  %v11917_v46 = vld [vmem:[#allocation97_spill] sm:$0xff] }
 0x147   :  { %1026 = vmatpush.msrb.mxu0 %v11867_v47  ;;  %1046 = vmatpush.msrb.mxu1 %v11868_v48  ;;  %v11918_v47 = vld [vmem:[#allocation98_spill] sm:$0xff]  ;;  %v11919_v48 = vld [vmem:[#allocation99_spill] sm:$0xff] }
 0x148   :  { %1066 = vmatpush.msrb.mxu2 %v11869_v49  ;;  %1086 = vmatpush.msrb.mxu3 %v11870_v50  ;;  %v11920_v49 = vld [vmem:[#allocation100_spill] sm:$0xff]  ;;  %v11921_v50 = vld [vmem:[#allocation101_spill] sm:$0xff] }
 0x149   :  { %1027 = vmatpush.msrb.mxu0 %v11871_v51  ;;  %1047 = vmatpush.msrb.mxu1 %v11872_v53  ;;  %v11922_v51 = vld [vmem:[#allocation102_spill] sm:$0xff]  ;;  %v11923_v53 = vld [vmem:[#allocation103_spill] sm:$0xff] }
 0x14a   :  { %1067 = vmatpush.msrb.mxu2 %v11873_v54  ;;  %1087 = vmatpush.msrb.mxu3 %v11874_v57  ;;  %v11924_v54 = vld [vmem:[#allocation104_spill] sm:$0xff]  ;;  %v11925_v57 = vld [vmem:[#allocation105_spill] sm:$0xff] }
 0x14b   :  { %1028 = vmatpush.msrb.mxu0 %v11875_v61  ;;  %1048 = vmatpush.msrb.mxu1 %v11876_v62  ;;  %v11926_v61 = vld [vmem:[#allocation106_spill] sm:$0xff]  ;;  %v11927_v62 = vld [vmem:[#allocation109_spill] sm:$0xff] }
 0x14c   :  { %1068 = vmatpush.msrb.mxu2 %v11877_v63  ;;  %1088 = vmatpush.msrb.mxu3 %v11878_v39  ;;  %v11928_v63 = vld [vmem:[#allocation112_spill] sm:$0xff]  ;;  %v11929_v39 = vld [vmem:[#allocation113_spill] sm:$0xff] }
 0x14d   :  { %1029 = vmatpush.msrb.mxu0 %v11879_v0  ;;  %1049 = vmatpush.msrb.mxu1 %v11880_v1  ;;  %v11930_v0 = vld [vmem:[#allocation114_spill] sm:$0xff]  ;;  %v11931_v1 = vld [vmem:[#allocation115_spill] sm:$0xff] }
 0x14e   :  { %1069 = vmatpush.msrb.mxu2 %v11881_v2  ;;  %1089 = vmatpush.msrb.mxu3 %v11882_v4  ;;  %v11932_v2 = vld [vmem:[#allocation116_spill] sm:$0xff] }
 0x14f   :  { %1030 = vmatpush.msrb.mxu0 %v11883_v5  ;;  %1050 = vmatpush.msrb.mxu1 %v11884_v6  ;;  %v11936_v4 = vld [vmem:[#allocation120_spill] sm:$0xff]  ;;  %v11937_v5 = vld [vmem:[#allocation121_spill] sm:$0xff]  ;;  %v11938_v6 = vld [vmem:[#allocation122_spill] sm:$0xff] }
 0x150   :  { %1070 = vmatpush.msrb.mxu2 %v11885_v7  ;;  %1090 = vmatpush.msrb.mxu3 %v11886_v9  ;;  %v11939_v7 = vld [vmem:[#allocation123_spill] sm:$0xff]  ;;  %v11940_v9 = vld [vmem:[#allocation125_spill] sm:$0xff] }
 0x151   :  { %1031 = vmatpush.msrb.mxu0 %v11887_v10  ;;  %1051 = vmatpush.msrb.mxu1 %v11888_v11  ;;  %v11941_v10 = vld [vmem:[#allocation126_spill] sm:$0xff]  ;;  %v11942_v11 = vld [vmem:[#allocation127_spill] sm:$0xff] }
 0x152   :  { %1071 = vmatpush.msrb.mxu2 %v11889_v14  ;;  %1091 = vmatpush.msrb.mxu3 %v11890_v16  ;;  %v11943_v14 = vld [vmem:[#allocation130_spill] sm:$0xff]  ;;  %v11944_v16 = vld [vmem:[#allocation132_spill] sm:$0xff] }
 0x153   :  { %1032 = vmatpush.msrb.mxu0 %v11891_v17  ;;  %1052 = vmatpush.msrb.mxu1 %v11892_v18  ;;  %v11945_v17 = vld [vmem:[#allocation133_spill] sm:$0xff]  ;;  %v11946_v18 = vld [vmem:[#allocation134_spill] sm:$0xff] }
 0x154   :  { %1072 = vmatpush.msrb.mxu2 %v11893_v19  ;;  %1092 = vmatpush.msrb.mxu3 %v11894_v20  ;;  %v11947_v19 = vld [vmem:[#allocation135_spill] sm:$0xff]  ;;  %v11948_v20 = vld [vmem:[#allocation136_spill] sm:$0xff] }
 0x155   :  { %1033 = vmatpush.msrb.mxu0 %v11895_v22  ;;  %1053 = vmatpush.msrb.mxu1 %v11896_v23  ;;  %v11949_v22 = vld [vmem:[#allocation137_spill] sm:$0xff]  ;;  %v11950_v23 = vld [vmem:[#allocation138_spill] sm:$0xff] }
 0x156   :  { %1073 = vmatpush.msrb.mxu2 %v11897_v24  ;;  %1093 = vmatpush.msrb.mxu3 %v11898_v27  ;;  %v11951_v24 = vld [vmem:[#allocation139_spill] sm:$0xff]  ;;  %v11952_v27 = vld [vmem:[#allocation140_spill] sm:$0xff] }
 0x157   :  { %1034 = vmatpush.msrb.mxu0 %v11899_v28  ;;  %1054 = vmatpush.msrb.mxu1 %v11900_v29  ;;  %v11953_v28 = vld [vmem:[#allocation141_spill] sm:$0xff]  ;;  %v11954_v29 = vld [vmem:[#allocation142_spill] sm:$0xff] }
 0x158   :  { %1074 = vmatpush.msrb.mxu2 %v11901_v30  ;;  %1094 = vmatpush.msrb.mxu3 %v11902_v25  ;;  %v11955_v30 = vld [vmem:[#allocation143_spill] sm:$0xff]  ;;  %v11956_v25 = vld [vmem:[#allocation145_spill] sm:$0xff] }
 0x159   :  { %1035 = vmatpush.msrb.mxu0 %v11903_v31  ;;  %1055 = vmatpush.msrb.mxu1 %v11904_v32  ;;  %v11957_v31 = vld [vmem:[#allocation146_spill] sm:$0xff]  ;;  %v11958_v32 = vld [vmem:[#allocation147_spill] sm:$0xff] }
 0x15a   :  { %1075 = vmatpush.msrb.mxu2 %v11905_v33  ;;  %1095 = vmatpush.msrb.mxu3 %v11906_v34  ;;  %v11959_v33 = vld [vmem:[#allocation150_spill] sm:$0xff]  ;;  %v11960_v34 = vld [vmem:[#allocation151_spill] sm:$0xff] }
 0x15b   :  { %1036 = vmatpush.msrb.mxu0 %v11907_v35  ;;  %1056 = vmatpush.msrb.mxu1 %v11908_v36  ;;  %v11961_v35 = vld [vmem:[#allocation152_spill] sm:$0xff]  ;;  %v11962_v36 = vld [vmem:[#allocation153_spill] sm:$0xff] }
 0x15c   :  { %1076 = vmatpush.msrb.mxu2 %v11909_v37  ;;  %1096 = vmatpush.msrb.mxu3 %v11910_v38  ;;  %v11963_v37 = vld [vmem:[#allocation154_spill] sm:$0xff]  ;;  %v11964_v38 = vld [vmem:[#allocation156_spill] sm:$0xff] }
 0x15d   :  { %1101 = vmatpush.msra.mxu0 %v11911_v40  ;;  %1121 = vmatpush.msra.mxu1 %v11912_v41  ;;  %v11965_v40 = vld [vmem:[#allocation157_spill] sm:$0xff]  ;;  %v11966_v41 = vld [vmem:[#allocation158_spill] sm:$0xff] }
 0x15e   :  { %1141 = vmatpush.msra.mxu2 %v11913_v42  ;;  %1161 = vmatpush.msra.mxu3 %v11914_v43  ;;  %v11967_v42 = vld [vmem:[#allocation159_spill] sm:$0xff]  ;;  %v11968_v43 = vld [vmem:[#allocation160_spill] sm:$0xff] }
 0x15f   :  { %1102 = vmatpush.msra.mxu0 %v11915_v44  ;;  %1122 = vmatpush.msra.mxu1 %v11916_v45  ;;  %v11969_v44 = vld [vmem:[#allocation161_spill] sm:$0xff]  ;;  %v11970_v45 = vld [vmem:[#allocation162_spill] sm:$0xff] }
 0x160   :  { %1142 = vmatpush.msra.mxu2 %v11917_v46  ;;  %1162 = vmatpush.msra.mxu3 %v11918_v47 }
 0x161   :  { %1103 = vmatpush.msra.mxu0 %v11919_v48  ;;  %1123 = vmatpush.msra.mxu1 %v11920_v49  ;;  %v490_v48 = vld [vmem:[%s11005_s6] sm:$0xf] }
 0x162   :  { %1143 = vmatpush.msra.mxu2 %v11921_v50  ;;  %1163 = vmatpush.msra.mxu3 %v11922_v51  ;;  %v6284_v50 = vperm.slane %v490_v48, 0  ;;  %v6286_v51 = vperm.slane %v490_v48, 1 }
 0x163   :  { %1104 = vmatpush.msra.mxu0 %v11923_v53  ;;  %1124 = vmatpush.msra.mxu1 %v11924_v54 }
 0x164   :  { %1144 = vmatpush.msra.mxu2 %v5699_v13  ;;  %1164 = vmatpush.msra.mxu3 %v5704_v56  ;;  %v11933_v13 = vld [vmem:[#allocation117_spill] sm:$0xff]  ;;  %v11934_v56 = vld [vmem:[#allocation118_spill] sm:$0xff]  ;;  %11971 = vst [vmem:[#allocation4_spill] sm:$0xff] %v6284_v50 }
 0x165   :  { %1105 = vmatpush.msra.mxu0 %v5713_v26  ;;  %1125 = vmatpush.msra.mxu1 %v11925_v57  ;;  %v11935_v26 = vld [vmem:[#allocation119_spill] sm:$0xff]  ;;  %11972 = vst [vmem:[#allocation3_spill] sm:$0xff] %v6286_v51 }
 0x166   :  { %1145 = vmatpush.msra.mxu2 %v11926_v61  ;;  %1165 = vmatpush.msra.mxu3 %v11927_v62 }
 0x167   :  { %1106 = vmatpush.msra.mxu0 %v11928_v63  ;;  %1126 = vmatpush.msra.mxu1 %v11929_v39 }
 0x168   :  { %1146 = vmatpush.msra.mxu2 %v11930_v0  ;;  %1166 = vmatpush.msra.mxu3 %v11931_v1  ;;  %v6290_v1 = vperm.slane %v490_v48, 3 }
 0x169   :  { %1107 = vmatpush.msra.mxu0 %v11932_v2  ;;  %1127 = vmatpush.msra.mxu1 %v11933_v13  ;;  %v11974_v2 = vld [vmem:[#allocation52_spill] sm:$0xff] }
 0x16a   :  { %1147 = vmatpush.msra.mxu2 %v11934_v56  ;;  %1167 = vmatpush.msra.mxu3 %v11935_v26  ;;  %11973 = vst [vmem:[#allocation5_spill] sm:$0xff] %v6290_v1  ;;  %v155_v13 = vadd.f32 %v11974_v2, %v6042_v55  ;;  %v11975_v56 = vld [vmem:[#allocation53_spill] sm:$0xff] }
 0x16b   :  { %1108 = vmatpush.msra.mxu0 %v11936_v4  ;;  %1128 = vmatpush.msra.mxu1 %v11937_v5  ;;  %v196_v26 = vadd.f32 %v11975_v56, %v6045_v60 }
 0x16c   :  { %1148 = vmatpush.msra.mxu2 %v11938_v6  ;;  %1168 = vmatpush.msra.mxu3 %v11939_v7 }
 0x16d   :  { %1109 = vmatpush.msra.mxu0 %v11940_v9  ;;  %1129 = vmatpush.msra.mxu1 %v11941_v10 }
 0x16e   :  { %1149 = vmatpush.msra.mxu2 %v11942_v11  ;;  %1169 = vmatpush.msra.mxu3 %v11943_v14 }
 0x16f   :  { %1110 = vmatpush.msra.mxu0 %v11944_v16  ;;  %1130 = vmatpush.msra.mxu1 %v11945_v17 }
 0x170   :  { %1150 = vmatpush.msra.mxu2 %v11946_v18  ;;  %1170 = vmatpush.msra.mxu3 %v11947_v19 }
 0x171   :  { %1111 = vmatpush.msra.mxu0 %v11948_v20  ;;  %1131 = vmatpush.msra.mxu1 %v11949_v22 }
 0x172   :  { %1151 = vmatpush.msra.mxu2 %v11950_v23  ;;  %1171 = vmatpush.msra.mxu3 %v11951_v24 }
 0x173   :  { %1112 = vmatpush.msra.mxu0 %v11952_v27  ;;  %1132 = vmatpush.msra.mxu1 %v11953_v28  ;;  %v11976_v27 = vld [vmem:[#allocation68_spill] sm:$0xff] }
 0x174   :  { %1152 = vmatpush.msra.mxu2 %v11954_v29  ;;  %1172 = vmatpush.msra.mxu3 %v11955_v30  ;;  %v278_v28 = vadd.f32 %v11976_v27, %v6070_v8  ;;  %v6299_v29 = vperm.slane %v490_v48, 2 }
 0x175   :  { %1113 = vmatpush.msra.mxu0 %v11956_v25  ;;  %1133 = vmatpush.msra.mxu1 %v11957_v31 }
 0x176   :  { %1153 = vmatpush.msra.mxu2 %v11958_v32  ;;  %1173 = vmatpush.msra.mxu3 %v11959_v33  ;;  %11977 = vst [vmem:[#allocation6_spill] sm:$0xff] %v6299_v29 }
 0x177   :  { %1114 = vmatpush.msra.mxu0 %v11960_v34  ;;  %1134 = vmatpush.msra.mxu1 %v11961_v35  ;;  %v11978_v35 = vld [vmem:[#allocation67_spill] sm:$0xff] }
 0x178   :  { %1154 = vmatpush.msra.mxu2 %v11962_v36  ;;  %1174 = vmatpush.msra.mxu3 %v11963_v37  ;;  %v237_v36 = vadd.f32 %v11978_v35, %v6105_v21 }
 0x179   :  { %1115 = vmatpush.msra.mxu0 %v11964_v38  ;;  %1135 = vmatpush.msra.mxu1 %v11965_v40 }
 0x17a   :  { %1155 = vmatpush.msra.mxu2 %v11966_v41  ;;  %1175 = vmatpush.msra.mxu3 %v11967_v42 }
 0x17b   :  { %1116 = vmatpush.msra.mxu0 %v11968_v43  ;;  %1136 = vmatpush.msra.mxu1 %v11969_v44 }
 0x17c   :  { %1156 = vmatpush.msra.mxu2 %v6013_v52  ;;  %1176 = vmatpush.msra.mxu3 %v11970_v45 }
 0x184   :  { %v664_v46 = vpop.f32.mrf.mxu0  ;;  %v684_v47 = vpop.f32.mrf.mxu1 }
 0x18b   :  { %v724_v49 = vpop.f32.mrf.mxu3  ;;  %v704_v57 = vpop.f32.mrf.mxu2 }
 0x1b6   :  { %v744_v53 = vpop.f32.mrf.mxu0  ;;  %v764_v54 = vpop.f32.mrf.mxu1 }
 0x1b7   :  { %v745_v61 = vadd.f32 %v744_v53, %v664_v46  ;;  %v765_v62 = vadd.f32 %v764_v54, %v684_v47 }
 0x1b9   :  { %v807_v52 = vadd.f32 %v745_v61, %v6284_v50  ;;  %v808_v63 = vadd.f32 %v765_v62, %v6286_v51 }
 0x1bb   :  { %v3636_v39 = vmul.f32 -1.442695, %v807_v52  ;;  %v3637_v0 = vmul.f32 -1.442695, %v808_v63 }
 0x1bd   :  { %3703 = vpow2.f32 %v3636_v39  ;;  %v804_v4 = vpop.f32.mrf.mxu3  ;;  %v784_v14 = vpop.f32.mrf.mxu2 }
 0x1be   :  { %3705 = vpow2.f32 %v3637_v0  ;;  %v805_v5 = vadd.f32 %v804_v4, %v724_v49  ;;  %v891_v6 = vpop.f32.mrf.mxu0  ;;  %v911_v7 = vpop.f32.mrf.mxu1  ;;  %v785_v30 = vadd.f32 %v784_v14, %v704_v57 }
 0x1bf   :  { %v954_v9 = vadd.f32 %v891_v6, %v155_v13  ;;  %v955_v10 = vadd.f32 %v911_v7, %v196_v26 }
 0x1c0   :  { %v810_v11 = vadd.f32 %v805_v5, %v6290_v1  ;;  %v809_v37 = vadd.f32 %v785_v30, %v6299_v29 }
 0x1c1   :  { %v3639_v16 = vmul.f32 -1.442695, %v954_v9  ;;  %v3640_v17 = vmul.f32 -1.442695, %v955_v10 }
 0x1c2   :  { %v3638_v18 = vmul.f32 -1.442695, %v810_v11 }
 0x1c3   :  { %v3704_v19 = vpop.eup %3703  ;;  %3707 = vpow2.f32 %v3639_v16 }
 0x1c4   :  { %v3706_v20 = vpop.eup %3705  ;;  %v814_v22 = vadd.f32 1.0, %v3704_v19  ;;  %3709 = vpow2.f32 %v3638_v18 }
 0x1c5   :  { %v833_v23 = vadd.f32 1.0, %v3706_v20  ;;  %3711 = vpow2.f32 %v3640_v17  ;;  %v951_v24 = vpop.f32.mrf.mxu3  ;;  %v931_v40 = vpop.f32.mrf.mxu2 }
 0x1c6   :  { %3713 = vrcp.f32 %v814_v22  ;;  %v957_v25 = vadd.f32 %v951_v24, %v278_v28  ;;  %v824_v42 = vand.u32 2147483647, %v814_v22  ;;  %v826_v48 = vand.u32 2147483648, %v814_v22 }
 0x1c7   :  { %3715 = vrcp.f32 %v833_v23  ;;  %v845_v47 = vand.u32 2147483648, %v833_v23  ;;  %v843_v53 = vand.u32 2147483647, %v833_v23  ;;  %v956_v54 = vadd.f32 %v931_v40, %v237_v36 }
 0x1c8   :  { %v3641_v44 = vmul.f32 -1.442695, %v957_v25  ;;  %vm820_vm12 = vweird.f32 %v814_v22  ;;  %vm839_vm13 = vweird.f32 %v833_v23  ;;  %vm6313_vm14 = vcmp.eq.f32.partialorder %v824_v42, 8.507059e+37 }
 0x1c9   :  { %v3708_v31 = vpop.eup %3707  ;;  %v846_v52 = vor.u32 1.1754944e-38, %v845_v47  ;;  %v827_v39 = vor.u32 1.1754944e-38, %v826_v48  ;;  %vm6317_vm1 = vcmp.eq.f32.partialorder %v843_v53, 8.507059e+37 }
 0x1ca   :  { %v3710_v32 = vpop.eup %3709  ;;  %v6301_v33 = vadd.f32 1.0, %v3708_v31 }
 0x1cb   :  { %v3712_v34 = vpop.eup %3711  ;;  %v6306_v38 = vadd.f32 1.0, %v3710_v32  ;;  %v6469_v32 = vld [vmem:[%s11001_s2 + $0x190] sm:$0xff] }
 0x1cc   :  { %v3714_v41 = vpop.eup %3713  ;;  %3717 = vrcp.f32 %v6301_v33  ;;  %v6309_v43 = vadd.f32 1.0, %v3712_v34  ;;  %vm967_vm2 = vweird.f32 %v6301_v33  ;;  %v971_v5 = vand.u32 2147483647, %v6301_v33 }
 0x1cd   :  { %v3716_v45 = vpop.eup %3715  ;;  %v816_v46 = vmul.f32 %v3714_v41, %v814_v22  ;;  %3719 = vrcp.f32 %v6306_v38  ;;  %vm821_vm15 = vweird.f32 %v3714_v41  ;;  %v973_v10 = vand.u32 2147483648, %v6301_v33 }
 0x1ce   :  { %v835_v49 = vmul.f32 %v3716_v45, %v833_v23  ;;  %3721 = vrcp.f32 %v6309_v43  ;;  %vm840_vm0 = vweird.f32 %v3716_v45  ;;  %vm822_vm3 = vmor %vm820_vm12, %vm821_vm15  ;;  %vm986_vm4 = vweird.f32 %v6309_v43 }
 0x1cf   :  { %v817_v57 = vsub.f32 1.0, %v816_v46  ;;  %3723 = vtanh.f32 %v809_v37  ;;  %vm841_vm5 = vmor %vm839_vm13, %vm840_vm0  ;;  %v992_v18 = vand.u32 2147483648, %v6309_v43  ;;  %vm6339_vm7 = vcmp.eq.f32.partialorder %v971_v5, 8.507059e+37  ;;  %v6377_v5 = vld [vmem:[%s11001_s2 + $0x1e0] sm:$0xff] }
 0x1d0   :  { %v836_v61 = vsub.f32 1.0, %v835_v49  ;;  %3725 = vpow2.f32 %v3641_v44  ;;  %v990_v40 = vand.u32 2147483647, %v6309_v43  ;;  %v974_v42 = vor.u32 1.1754944e-38, %v973_v10  ;;  %v6399_v10 = vld [vmem:[%s11001_s2 + $0x1f8] sm:$0xff] }
 0x1d1   :  { %v818_v63 = vmul.f32 %v3714_v41, %v817_v57  ;;  %3727 = vtanh.f32 %v956_v54  ;;  %vm859_vm10 = vweird.f32 %v6306_v38  ;;  %v993_v47 = vor.u32 1.1754944e-38, %v992_v18 }
 0x1d2   :  { %v3718_v0 = vpop.eup %3717  ;;  %v837_v2 = vmul.f32 %v3716_v45, %v836_v61  ;;  %v865_v48 = vand.u32 2147483648, %v6306_v38  ;;  %vm991_vm13 = vcmp.eq.f32.partialorder %v990_v40, 8.507059e+37  ;;  %v863_v54 = vand.u32 2147483647, %v6306_v38  ;;  %v6503_v40 = vld [vmem:[%s11001_s2 + $0x178] sm:$0xff] }
 0x1d3   :  { %v6321_v56 = vpop.eup %3719  ;;  %v819_v26 = vadd.f32 %v3714_v41, %v818_v63  ;;  %v963_v4 = vmul.f32 %v3718_v0, %v6301_v33  ;;  %vm968_vm6 = vweird.f32 %v3718_v0 }
 0x1d4   :  { %v3722_v6 = vpop.eup %3721  ;;  %v838_v7 = vadd.f32 %v3716_v45, %v837_v2  ;;  %v855_v9 = vmul.f32 %v6321_v56, %v6306_v38  ;;  %vm969_vm9 = vmor %vm967_vm2, %vm968_vm6  ;;  %vm860_vm11 = vweird.f32 %v6321_v56  ;;  %vm864_vm15 = vcmp.eq.f32.partialorder %v863_v54, 8.507059e+37  ;;  %v6563_v54 = vld [vmem:[%s11001_s2 + $0x108] sm:$0xff] }
 0x1d5   :  { %v3724_v11 = vpop.eup %3723  ;;  %v823_v14 = vsel %vm822_vm3, %v3714_v41, %v819_v26  ;;  %v964_v16 = vsub.f32 1.0, %v963_v4  ;;  %v982_v17 = vmul.f32 %v3722_v6, %v6309_v43  ;;  %vm987_vm8 = vweird.f32 %v3722_v6 }
 0x1d6   :  { %v3726_v19 = vpop.eup %3725  ;;  %v828_v20 = vsel %vm6313_vm14, %v827_v39, %v823_v14  ;;  %v842_v22 = vsel %vm841_vm5, %v3716_v45, %v838_v7  ;;  %v856_v24 = vsub.f32 1.0, %v855_v9  ;;  %vm988_vm12 = vmor %vm986_vm4, %vm987_vm8  ;;  %v6393_v9 = vld [vmem:[%s11001_s2 + $0x1f0] sm:$0xff]  ;;  %v6407_v14 = vld [vmem:[%s11001_s2 + $0x1c0] sm:$0xff] }
 0x1d7   :  { %v847_v27 = vsel %vm6317_vm1, %v846_v52, %v842_v22  ;;  %v870_v28 = vmul.f32 %v3724_v11, %v828_v20  ;;  %v983_v30 = vsub.f32 1.0, %v982_v17  ;;  %v965_v25 = vmul.f32 %v3718_v0, %v964_v16  ;;  %v3728_v23 = vpop.eup %3727  ;;  %vm861_vm14 = vmor %vm859_vm10, %vm860_vm11  ;;  %v6413_v16 = vld [vmem:[%s11001_s2 + $0x1c8] sm:$0xff]  ;;  %v6425_v20 = vld [vmem:[%s11001_s2 + $0x1d8] sm:$0xff] }
 0x1d8   :  { %v869_v31 = vmul.f32 0.0, %v847_v27  ;;  %v6343_v34 = vadd.f32 1.0, %v3726_v19  ;;  %v857_v35 = vmul.f32 %v6321_v56, %v856_v24  ;;  %v866_v52 = vor.u32 1.1754944e-38, %v865_v48  ;;  %v6419_v19 = vld [vmem:[%s11001_s2 + $0x1d0] sm:$0xff]  ;;  %v6431_v22 = vld [vmem:[%s11001_s2 + $0x1a0] sm:$0xff]  ;;  %v6437_v24 = vld [vmem:[%s11001_s2 + $0x1a8] sm:$0xff] }
 0x1d9   :  { %v984_v36 = vmul.f32 %v3722_v6, %v983_v30  ;;  %v966_v37 = vadd.f32 %v3718_v0, %v965_v25  ;;  %v6449_v30 = vld [vmem:[%s11001_s2 + $0x1b8] sm:$0xff]  ;;  %v6545_v48 = vld [vmem:[%s11001_s2 + $0x130] sm:$0xff]  ;;  %v6653_v7 = vld [vmem:[%s11001_s2 + $0x80] sm:$0xff] }
 0x1da   :  { %v6347_v41 = vadd.f32 %v870_v28, %v869_v31  ;;  %3729 = vrcp.f32 %v6343_v34  ;;  %v858_v46 = vadd.f32 %v6321_v56, %v857_v35  ;;  %vm1006_vm1 = vweird.f32 %v6343_v34  ;;  %v6443_v28 = vld [vmem:[%s11001_s2 + $0x1b0] sm:$0xff]  ;;  %v6463_v31 = vld [vmem:[%s11001_s2 + $0x188] sm:$0xff]  ;;  %v6485_v35 = vld [vmem:[%s11001_s2 + $0x160] sm:$0xff]  ;;  %11999 = vst [vmem:[#allocation19_spill] sm:$0xff] %v6653_v7 }
 0x1db   :  { %v970_v44 = vsel %vm969_vm9, %v3718_v0, %v966_v37  ;;  %v985_v45 = vadd.f32 %v3722_v6, %v984_v36  ;;  %v6491_v36 = vld [vmem:[%s11001_s2 + $0x168] sm:$0xff]  ;;  %v6497_v37 = vld [vmem:[%s11001_s2 + $0x170] sm:$0xff] }
 0x1dc   :  { %3731 = vtanh.f32 %v6347_v41  ;;  %v975_v33 = vsel %vm6339_vm7, %v974_v42, %v970_v44  ;;  %v862_v43 = vsel %vm861_vm14, %v6321_v56, %v858_v46  ;;  %v1010_v56 = vand.u32 2147483647, %v6343_v34  ;;  %v6509_v42 = vld [vmem:[%s11001_s2 + $0x140] sm:$0xff]  ;;  %v6515_v44 = vld [vmem:[%s11001_s2 + $0x148] sm:$0xff]  ;;  %v6527_v46 = vld [vmem:[%s11001_s2 + $0x158] sm:$0xff] }
 0x1dd   :  { %v989_v49 = vsel %vm988_vm12, %v3722_v6, %v985_v45  ;;  %v1017_v53 = vmul.f32 %v3728_v23, %v975_v33  ;;  %v867_v2 = vsel %vm864_vm15, %v866_v52, %v862_v43  ;;  %v6383_v6 = vld [vmem:[%s11001_s2 + $0x1e8] sm:$0xff]  ;;  %v6457_v23 = vld [vmem:[%s11001_s2 + $0x180] sm:$0xff]  ;;  %v6521_v45 = vld [vmem:[%s11001_s2 + $0x150] sm:$0xff] }
 0x1de   :  { %v994_v57 = vsel %vm991_vm13, %v993_v47, %v989_v49  ;;  %vm1011_vm3 = vcmp.eq.f32.partialorder %v1010_v56, 8.507059e+37  ;;  %v6533_v47 = vld [vmem:[%s11001_s2 + $0x120] sm:$0xff]  ;;  %v6539_v33 = vld [vmem:[%s11001_s2 + $0x128] sm:$0xff]  ;;  %v6551_v49 = vld [vmem:[%s11001_s2 + $0x138] sm:$0xff] }
 0x1df   :  { %v1016_v61 = vmul.f32 %v994_v57, %v6147_v15  ;;  %v1012_v15 = vand.u32 2147483648, %v6343_v34  ;;  %v6569_v57 = vld [vmem:[%s11001_s2 + $0x110] sm:$0xff]  ;;  %v6581_v43 = vld [vmem:[%s11001_s2 + $0xe0] sm:$0xff]  ;;  %v6647_v56 = vld [vmem:[%s11001_s2 + $0xb8] sm:$0xff] }
 0x1e0   :  { %v3730_v62 = vpop.eup %3729  ;;  %11987 = vst [vmem:[#allocation8_spill] sm:$0xff] %v6581_v43  ;;  %v6593_v52 = vld [vmem:[%s11001_s2 + $0xf0] sm:$0xff] }
 0x1e1   :  { %v6367_v63 = vadd.f32 %v1017_v53, %v1016_v61  ;;  %v1002_v39 = vmul.f32 %v3730_v62, %v6343_v34  ;;  %vm1007_vm0 = vweird.f32 %v3730_v62  ;;  %v1013_v18 = vor.u32 1.1754944e-38, %v1012_v15  ;;  %v6475_v34 = vld [vmem:[%s11001_s2 + $0x198] sm:$0xff]  ;;  %v6557_v53 = vld [vmem:[%s11001_s2 + $0x100] sm:$0xff]  ;;  %11989 = vst [vmem:[#allocation9_spill] sm:$0xff] %v6593_v52  ;;  %v6635_v15 = vld [vmem:[%s11001_s2 + $0xa8] sm:$0xff] }
 0x1e2   :  { %v3732_v0 = vpop.eup %3731  ;;  %vm6386_vm2 = vmor %vm1006_vm1, %vm1007_vm0  ;;  %v6575_v61 = vld [vmem:[%s11001_s2 + $0x118] sm:$0xff]  ;;  %11996 = vst [vmem:[#allocation16_spill] sm:$0xff] %v6635_v15 }
 0x1e3   :  { %v1003_v13 = vsub.f32 1.0, %v1002_v39  ;;  %v873_v26 = vmul.f32 %v3732_v0, %v867_v2  ;;  %3733 = vtanh.f32 %v6367_v63  ;;  %v6599_v39 = vld [vmem:[%s11001_s2 + $0xf8] sm:$0xff]  ;;  %v6605_v0 = vld [vmem:[%s11001_s2 + $0xc0] sm:$0xff]  ;;  %v6611_v2 = vld [vmem:[%s11001_s2 + $0xc8] sm:$0xff]  ;;  %11998 = vst [vmem:[#allocation18_spill] sm:$0xff] %v6647_v56 }
 0x1e4   :  { %11990 = vst [vmem:[#allocation10_spill] sm:$0xff] %v6599_v39 }
 0x1e5   :  { %v1004_v4 = vmul.f32 %v3730_v62, %v1003_v13  ;;  %1037 = vmatmul.f32.vlgmr.msrb.gmra.mxu0 %v873_v26  ;;  %1057 = vmatmul.f32.vlgmr.msrb.gmra.mxu1 %v873_v26  ;;  %11991 = vst [vmem:[#allocation11_spill] sm:$0xff] %v6605_v0  ;;  %v6617_v13 = vld [vmem:[%s11001_s2 + $0xd0] sm:$0xff] }
 0x1e6   :  { %1077 = vmatmul.f32.vlgmr.msrb.gmra.mxu2 %v873_v26  ;;  %1097 = vmatmul.f32.vlgmr.msrb.gmra.mxu3 %v873_v26  ;;  %11992 = vst [vmem:[#allocation12_spill] sm:$0xff] %v6611_v2  ;;  %v6623_v26 = vld [vmem:[%s11001_s2 + $0xd8] sm:$0xff] }
 0x1e7   :  { %v1005_v38 = vadd.f32 %v3730_v62, %v1004_v4  ;;  %1248 = vmatpush.msrb.mxu0 %v6377_v5  ;;  %1268 = vmatpush.msrb.mxu1 %v6383_v6  ;;  %11993 = vst [vmem:[#allocation13_spill] sm:$0xff] %v6617_v13  ;;  %v6629_v4 = vld [vmem:[%s11001_s2 + $0xa0] sm:$0xff] }
 0x1e8   :  { %1288 = vmatpush.msrb.mxu2 %v6393_v9  ;;  %1308 = vmatpush.msrb.mxu3 %v6399_v10  ;;  %11994 = vst [vmem:[#allocation14_spill] sm:$0xff] %v6623_v26 }
 0x1e9   :  { %v1009_v11 = vsel %vm6386_vm2, %v3730_v62, %v1005_v38  ;;  %1249 = vmatpush.msrb.mxu0 %v6407_v14  ;;  %1269 = vmatpush.msrb.mxu1 %v6413_v16  ;;  %v3734_v17 = vpop.eup %3733  ;;  %v6587_v62 = vld [vmem:[%s11001_s2 + $0xe8] sm:$0xff]  ;;  %11995 = vst [vmem:[#allocation15_spill] sm:$0xff] %v6629_v4  ;;  %v6641_v38 = vld [vmem:[%s11001_s2 + $0xb0] sm:$0xff] }
 0x1ea   :  { %1289 = vmatpush.msrb.mxu2 %v6419_v19  ;;  %1309 = vmatpush.msrb.mxu3 %v6425_v20  ;;  %v1014_v27 = vsel %vm1011_vm3, %v1013_v18, %v1009_v11  ;;  %11988 = vst [vmem:[#allocation7_spill] sm:$0xff] %v6587_v62  ;;  %v6659_v11 = vld [vmem:[%s11001_s2 + $0x88] sm:$0xff]  ;;  %v6671_v18 = vld [vmem:[%s11001_s2 + $0x98] sm:$0xff] }
 0x1eb   :  { %1250 = vmatpush.msrb.mxu0 %v6431_v22  ;;  %1270 = vmatpush.msrb.mxu1 %v6437_v24  ;;  %v6452_v25 = vmul.f32 %v3734_v17, %v1014_v27  ;;  %11997 = vst [vmem:[#allocation17_spill] sm:$0xff] %v6641_v38  ;;  %v6665_v17 = vld [vmem:[%s11001_s2 + $0x90] sm:$0xff]  ;;  %v6677_v27 = vld [vmem:[%s11001_s2 + $0x60] sm:$0xff] }
 0x1ec   :  { %1290 = vmatpush.msrb.mxu2 %v6443_v28  ;;  %1310 = vmatpush.msrb.mxu3 %v6449_v30  ;;  %12000 = vst [vmem:[#allocation20_spill] sm:$0xff] %v6659_v11 }
 0x1ed   :  { %1251 = vmatpush.msrb.mxu0 %v6457_v23  ;;  %1271 = vmatpush.msrb.mxu1 %v6463_v31  ;;  %12001 = vst [vmem:[#allocation21_spill] sm:$0xff] %v6665_v17 }
 0x1ee   :  { %1291 = vmatpush.msrb.mxu2 %v6469_v32  ;;  %1311 = vmatpush.msrb.mxu3 %v6475_v34  ;;  %12002 = vst [vmem:[#allocation22_spill] sm:$0xff] %v6671_v18 }
 0x1ef   :  { %1117 = vmatmul.f32.vlgmr.msra.gmra.mxu0 %v6452_v25  ;;  %1137 = vmatmul.f32.vlgmr.msra.gmra.mxu1 %v6452_v25  ;;  %12003 = vst [vmem:[#allocation23_spill] sm:$0xff] %v6677_v27 }
 0x1f0   :  { %1157 = vmatmul.f32.vlgmr.msra.gmra.mxu2 %v6452_v25  ;;  %1177 = vmatmul.f32.vlgmr.msra.gmra.mxu3 %v6452_v25 }
 0x1f1   :  { %1252 = vmatpush.msrb.mxu0 %v6485_v35  ;;  %1272 = vmatpush.msrb.mxu1 %v6491_v36 }
 0x1f2   :  { %1292 = vmatpush.msrb.mxu2 %v6497_v37  ;;  %1312 = vmatpush.msrb.mxu3 %v6503_v40 }
 0x1f3   :  { %1253 = vmatpush.msrb.mxu0 %v6509_v42  ;;  %1273 = vmatpush.msrb.mxu1 %v6515_v44 }
 0x1f4   :  { %1293 = vmatpush.msrb.mxu2 %v6521_v45  ;;  %1313 = vmatpush.msrb.mxu3 %v6527_v46 }
 0x1f5   :  { %1254 = vmatpush.msrb.mxu0 %v6533_v47  ;;  %1274 = vmatpush.msrb.mxu1 %v6539_v33 }
 0x1f6   :  { %1294 = vmatpush.msrb.mxu2 %v6545_v48  ;;  %1314 = vmatpush.msrb.mxu3 %v6551_v49 }
 0x1f7   :  { %1255 = vmatpush.msrb.mxu0 %v6557_v53  ;;  %1275 = vmatpush.msrb.mxu1 %v6563_v54 }
 0x1f8   :  { %1295 = vmatpush.msrb.mxu2 %v6569_v57  ;;  %1315 = vmatpush.msrb.mxu3 %v6575_v61 }
 0x1f9   :  { %1256 = vmatpush.msrb.mxu0 %v6581_v43  ;;  %1276 = vmatpush.msrb.mxu1 %v6587_v62 }
 0x1fa   :  { %1296 = vmatpush.msrb.mxu2 %v6593_v52  ;;  %1316 = vmatpush.msrb.mxu3 %v6599_v39 }
 0x1fb   :  { %1257 = vmatpush.msrb.mxu0 %v6605_v0  ;;  %1277 = vmatpush.msrb.mxu1 %v6611_v2 }
 0x1fc   :  { %1297 = vmatpush.msrb.mxu2 %v6617_v13  ;;  %1317 = vmatpush.msrb.mxu3 %v6623_v26 }
 0x1fd   :  { %1258 = vmatpush.msrb.mxu0 %v6629_v4  ;;  %1278 = vmatpush.msrb.mxu1 %v6635_v15 }
 0x1fe   :  { %1298 = vmatpush.msrb.mxu2 %v6641_v38  ;;  %1318 = vmatpush.msrb.mxu3 %v6647_v56 }
 0x1ff   :  { %1259 = vmatpush.msrb.mxu0 %v6653_v7  ;;  %1279 = vmatpush.msrb.mxu1 %v6659_v11 }
 0x200   :  { %1299 = vmatpush.msrb.mxu2 %v6665_v17  ;;  %1319 = vmatpush.msrb.mxu3 %v6671_v18 }
 0x201   :  { %1260 = vmatpush.msrb.mxu0 %v6677_v27  ;;  %1280 = vmatpush.msrb.mxu1 %v6683_v12  ;;  %v6707_v12 = vld [vmem:[%s11001_s2 + $0x48] sm:$0xff] }
 0x202   :  { %1300 = vmatpush.msrb.mxu2 %v6689_v3  ;;  %1320 = vmatpush.msrb.mxu3 %v6695_v58  ;;  %12008 = vst [vmem:[#allocation28_spill] sm:$0xff] %v6707_v12  ;;  %v6713_v3 = vld [vmem:[%s11001_s2 + $0x50] sm:$0xff]  ;;  %v6719_v58 = vld [vmem:[%s11001_s2 + $0x58] sm:$0xff] }
 0x203   :  { %1261 = vmatpush.msrb.mxu0 %v6701_v59  ;;  %1281 = vmatpush.msrb.mxu1 %v6707_v12  ;;  %12009 = vst [vmem:[#allocation29_spill] sm:$0xff] %v6713_v3  ;;  %v6725_v59 = vld [vmem:[%s11001_s2 + $0x20] sm:$0xff]  ;;  %v6731_v12 = vld [vmem:[%s11001_s2 + $0x28] sm:$0xff] }
 0x204   :  { %1301 = vmatpush.msrb.mxu2 %v6713_v3  ;;  %12010 = vst [vmem:[#allocation30_spill] sm:$0xff] %v6719_v58  ;;  %1321 = vmatpush.msrb.mxu3 %v6719_v58  ;;  %v6737_v3 = vld [vmem:[%s11001_s2 + $0x30] sm:$0xff]  ;;  %v6743_v58 = vld [vmem:[%s11001_s2 + $0x38] sm:$0xff] }
 0x205   :  { %12011 = vst [vmem:[#allocation31_spill] sm:$0xff] %v6725_v59  ;;  %1262 = vmatpush.msrb.mxu0 %v6725_v59  ;;  %1282 = vmatpush.msrb.mxu1 %v6731_v12  ;;  %v6749_v59 = vld [vmem:[%s11001_s2] sm:$0xff] }
 0x206   :  { %12012 = vst [vmem:[#allocation32_spill] sm:$0xff] %v6731_v12  ;;  %1302 = vmatpush.msrb.mxu2 %v6737_v3  ;;  %1322 = vmatpush.msrb.mxu3 %v6743_v58  ;;  %v6755_v12 = vld [vmem:[%s11001_s2 + $0x8] sm:$0xff] }
 0x207   :  { %12013 = vst [vmem:[#allocation33_spill] sm:$0xff] %v6737_v3  ;;  %1263 = vmatpush.msrb.mxu0 %v6749_v59  ;;  %1283 = vmatpush.msrb.mxu1 %v6755_v12  ;;  %v6761_v3 = vld [vmem:[%s11001_s2 + $0x10] sm:$0xff] }
 0x208   :  { %12014 = vst [vmem:[#allocation34_spill] sm:$0xff] %v6743_v58  ;;  %1303 = vmatpush.msrb.mxu2 %v6761_v3  ;;  %v6767_v58 = vld [vmem:[%s11001_s2 + $0x18] sm:$0xff]  ;;  %1264 = vmatmul.f32.vlgmr.msrb.gmra.mxu0 %v6452_v25 }
 0x209   :  { %12015 = vst [vmem:[#allocation35_spill] sm:$0xff] %v6749_v59  ;;  %1323 = vmatpush.msrb.mxu3 %v6767_v58  ;;  %1284 = vmatmul.f32.vlgmr.msrb.gmra.mxu1 %v6452_v25 }
 0x20a   :  { %12016 = vst [vmem:[#allocation36_spill] sm:$0xff] %v6755_v12  ;;  %1304 = vmatmul.f32.vlgmr.msrb.gmra.mxu2 %v6452_v25  ;;  %1324 = vmatmul.f32.vlgmr.msrb.gmra.mxu3 %v6452_v25  ;;  %v6777_v12 = vld [vmem:[%s11002_s5 + $0x1e0] sm:$0xff]  ;;  %v6795_v25 = vld [vmem:[%s11002_s5 + $0x1f8] sm:$0xff] }
 0x20b   :  { %12017 = vst [vmem:[#allocation37_spill] sm:$0xff] %v6761_v3  ;;  %1395 = vmatpush.msra.mxu0 %v6777_v12  ;;  %v6783_v3 = vld [vmem:[%s11002_s5 + $0x1e8] sm:$0xff]  ;;  %1455 = vmatpush.msra.mxu3 %v6795_v25 }
 0x20c   :  { %12018 = vst [vmem:[#allocation38_spill] sm:$0xff] %v6767_v58  ;;  %1415 = vmatpush.msra.mxu1 %v6783_v3  ;;  %v6789_v58 = vld [vmem:[%s11002_s5 + $0x1f0] sm:$0xff] }
 0x20d   :  { %12019 = vst [vmem:[#allocation39_spill] sm:$0xff] %v6777_v12  ;;  %1435 = vmatpush.msra.mxu2 %v6789_v58  ;;  %v6801_v12 = vld [vmem:[%s11002_s5 + $0x1c0] sm:$0xff] }
 0x20e   :  { %12020 = vst [vmem:[#allocation40_spill] sm:$0xff] %v6783_v3  ;;  %1396 = vmatpush.msra.mxu0 %v6801_v12  ;;  %v6807_v3 = vld [vmem:[%s11002_s5 + $0x1c8] sm:$0xff] }
 0x20f   :  { %12021 = vst [vmem:[#allocation41_spill] sm:$0xff] %v6789_v58  ;;  %1416 = vmatpush.msra.mxu1 %v6807_v3  ;;  %v6813_v58 = vld [vmem:[%s11002_s5 + $0x1d0] sm:$0xff] }
 0x210   :  { %12022 = vst [vmem:[#allocation42_spill] sm:$0xff] %v6795_v25  ;;  %1436 = vmatpush.msra.mxu2 %v6813_v58  ;;  %v6819_v25 = vld [vmem:[%s11002_s5 + $0x1d8] sm:$0xff] }
 0x211   :  { %12023 = vst [vmem:[#allocation43_spill] sm:$0xff] %v6801_v12  ;;  %1456 = vmatpush.msra.mxu3 %v6819_v25  ;;  %v6825_v12 = vld [vmem:[%s11002_s5 + $0x1a0] sm:$0xff] }
 0x212   :  { %12024 = vst [vmem:[#allocation44_spill] sm:$0xff] %v6807_v3  ;;  %1397 = vmatpush.msra.mxu0 %v6825_v12  ;;  %v6831_v3 = vld [vmem:[%s11002_s5 + $0x1a8] sm:$0xff] }
 0x213   :  { %12025 = vst [vmem:[#allocation45_spill] sm:$0xff] %v6813_v58  ;;  %1417 = vmatpush.msra.mxu1 %v6831_v3  ;;  %v6837_v58 = vld [vmem:[%s11002_s5 + $0x1b0] sm:$0xff] }
 0x214   :  { %12026 = vst [vmem:[#allocation46_spill] sm:$0xff] %v6819_v25  ;;  %1437 = vmatpush.msra.mxu2 %v6837_v58  ;;  %v6843_v25 = vld [vmem:[%s11002_s5 + $0x1b8] sm:$0xff] }
 0x215   :  { %12027 = vst [vmem:[#allocation47_spill] sm:$0xff] %v6825_v12  ;;  %1457 = vmatpush.msra.mxu3 %v6843_v25  ;;  %v6849_v12 = vld [vmem:[%s11002_s5 + $0x180] sm:$0xff] }
 0x216   :  { %12028 = vst [vmem:[#allocation48_spill] sm:$0xff] %v6831_v3  ;;  %1398 = vmatpush.msra.mxu0 %v6849_v12  ;;  %v6855_v3 = vld [vmem:[%s11002_s5 + $0x188] sm:$0xff] }
 0x217   :  { %12029 = vst [vmem:[#allocation49_spill] sm:$0xff] %v6837_v58  ;;  %1418 = vmatpush.msra.mxu1 %v6855_v3  ;;  %v6861_v58 = vld [vmem:[%s11002_s5 + $0x190] sm:$0xff] }
 0x218   :  { %12030 = vst [vmem:[#allocation50_spill] sm:$0xff] %v6843_v25  ;;  %1438 = vmatpush.msra.mxu2 %v6861_v58  ;;  %v6867_v25 = vld [vmem:[%s11002_s5 + $0x198] sm:$0xff] }
 0x219   :  { %12031 = vst [vmem:[#allocation51_spill] sm:$0xff] %v6849_v12  ;;  %1458 = vmatpush.msra.mxu3 %v6867_v25  ;;  %v6873_v12 = vld [vmem:[%s11002_s5 + $0x160] sm:$0xff] }
 0x21a   :  { %12032 = vst [vmem:[#allocation54_spill] sm:$0xff] %v6855_v3  ;;  %1399 = vmatpush.msra.mxu0 %v6873_v12  ;;  %v6879_v3 = vld [vmem:[%s11002_s5 + $0x168] sm:$0xff] }
 0x21b   :  { %12033 = vst [vmem:[#allocation55_spill] sm:$0xff] %v6861_v58  ;;  %1419 = vmatpush.msra.mxu1 %v6879_v3  ;;  %v6885_v58 = vld [vmem:[%s11002_s5 + $0x170] sm:$0xff] }
 0x21c   :  { %12034 = vst [vmem:[#allocation56_spill] sm:$0xff] %v6867_v25  ;;  %1439 = vmatpush.msra.mxu2 %v6885_v58  ;;  %v6891_v25 = vld [vmem:[%s11002_s5 + $0x178] sm:$0xff] }
 0x21d   :  { %12035 = vst [vmem:[#allocation57_spill] sm:$0xff] %v6873_v12  ;;  %1459 = vmatpush.msra.mxu3 %v6891_v25  ;;  %v6897_v12 = vld [vmem:[%s11002_s5 + $0x140] sm:$0xff] }
 0x21e   :  { %12036 = vst [vmem:[#allocation58_spill] sm:$0xff] %v6879_v3  ;;  %1400 = vmatpush.msra.mxu0 %v6897_v12  ;;  %v6903_v3 = vld [vmem:[%s11002_s5 + $0x148] sm:$0xff] }
 0x21f   :  { %12037 = vst [vmem:[#allocation59_spill] sm:$0xff] %v6885_v58  ;;  %1420 = vmatpush.msra.mxu1 %v6903_v3  ;;  %v6909_v58 = vld [vmem:[%s11002_s5 + $0x150] sm:$0xff] }
 0x220   :  { %12038 = vst [vmem:[#allocation60_spill] sm:$0xff] %v6891_v25  ;;  %1440 = vmatpush.msra.mxu2 %v6909_v58  ;;  %v6915_v25 = vld [vmem:[%s11002_s5 + $0x158] sm:$0xff] }
 0x221   :  { %12039 = vst [vmem:[#allocation61_spill] sm:$0xff] %v6897_v12  ;;  %1460 = vmatpush.msra.mxu3 %v6915_v25  ;;  %v6921_v12 = vld [vmem:[%s11002_s5 + $0x120] sm:$0xff] }
 0x222   :  { %12040 = vst [vmem:[#allocation62_spill] sm:$0xff] %v6903_v3  ;;  %1401 = vmatpush.msra.mxu0 %v6921_v12  ;;  %v6927_v3 = vld [vmem:[%s11002_s5 + $0x128] sm:$0xff] }
 0x223   :  { %12041 = vst [vmem:[#allocation63_spill] sm:$0xff] %v6909_v58  ;;  %1421 = vmatpush.msra.mxu1 %v6927_v3  ;;  %v6933_v58 = vld [vmem:[%s11002_s5 + $0x130] sm:$0xff] }
 0x224   :  { %12042 = vst [vmem:[#allocation64_spill] sm:$0xff] %v6915_v25  ;;  %1441 = vmatpush.msra.mxu2 %v6933_v58  ;;  %v6939_v25 = vld [vmem:[%s11002_s5 + $0x138] sm:$0xff] }
 0x225   :  { %12043 = vst [vmem:[#allocation65_spill] sm:$0xff] %v6921_v12  ;;  %1461 = vmatpush.msra.mxu3 %v6939_v25  ;;  %v6945_v12 = vld [vmem:[%s11002_s5 + $0x100] sm:$0xff] }
 0x226   :  { %12044 = vst [vmem:[#allocation66_spill] sm:$0xff] %v6927_v3  ;;  %1402 = vmatpush.msra.mxu0 %v6945_v12  ;;  %v6951_v3 = vld [vmem:[%s11002_s5 + $0x108] sm:$0xff] }
 0x227   :  { %12045 = vst [vmem:[#allocation69_spill] sm:$0xff] %v6933_v58  ;;  %1422 = vmatpush.msra.mxu1 %v6951_v3  ;;  %v6957_v58 = vld [vmem:[%s11002_s5 + $0x110] sm:$0xff] }
 0x228   :  { %12046 = vst [vmem:[#allocation70_spill] sm:$0xff] %v6939_v25  ;;  %1442 = vmatpush.msra.mxu2 %v6957_v58  ;;  %v6963_v25 = vld [vmem:[%s11002_s5 + $0x118] sm:$0xff] }
 0x229   :  { %12047 = vst [vmem:[#allocation71_spill] sm:$0xff] %v6945_v12  ;;  %1462 = vmatpush.msra.mxu3 %v6963_v25  ;;  %v6969_v12 = vld [vmem:[%s11002_s5 + $0xe0] sm:$0xff] }
 0x22a   :  { %12048 = vst [vmem:[#allocation74_spill] sm:$0xff] %v6951_v3  ;;  %1403 = vmatpush.msra.mxu0 %v6969_v12  ;;  %v6975_v3 = vld [vmem:[%s11002_s5 + $0xe8] sm:$0xff] }
 0x22b   :  { %12049 = vst [vmem:[#allocation75_spill] sm:$0xff] %v6957_v58  ;;  %1423 = vmatpush.msra.mxu1 %v6975_v3  ;;  %v6981_v58 = vld [vmem:[%s11002_s5 + $0xf0] sm:$0xff] }
 0x22c   :  { %12050 = vst [vmem:[#allocation76_spill] sm:$0xff] %v6963_v25  ;;  %1443 = vmatpush.msra.mxu2 %v6981_v58  ;;  %v6987_v25 = vld [vmem:[%s11002_s5 + $0xf8] sm:$0xff] }
 0x22d   :  { %12051 = vst [vmem:[#allocation77_spill] sm:$0xff] %v6969_v12  ;;  %1463 = vmatpush.msra.mxu3 %v6987_v25  ;;  %v6993_v12 = vld [vmem:[%s11002_s5 + $0xc0] sm:$0xff] }
 0x22e   :  { %12052 = vst [vmem:[#allocation78_spill] sm:$0xff] %v6975_v3  ;;  %1404 = vmatpush.msra.mxu0 %v6993_v12  ;;  %v6999_v3 = vld [vmem:[%s11002_s5 + $0xc8] sm:$0xff] }
 0x22f   :  { %12053 = vst [vmem:[#allocation79_spill] sm:$0xff] %v6981_v58  ;;  %1424 = vmatpush.msra.mxu1 %v6999_v3  ;;  %v7005_v58 = vld [vmem:[%s11002_s5 + $0xd0] sm:$0xff] }
 0x230   :  { %12054 = vst [vmem:[#allocation80_spill] sm:$0xff] %v6987_v25  ;;  %1444 = vmatpush.msra.mxu2 %v7005_v58  ;;  %v7011_v25 = vld [vmem:[%s11002_s5 + $0xd8] sm:$0xff] }
 0x231   :  { %12055 = vst [vmem:[#allocation81_spill] sm:$0xff] %v6993_v12  ;;  %1464 = vmatpush.msra.mxu3 %v7011_v25  ;;  %v7017_v12 = vld [vmem:[%s11002_s5 + $0xa0] sm:$0xff] }
 0x232   :  { %12056 = vst [vmem:[#allocation82_spill] sm:$0xff] %v6999_v3  ;;  %1405 = vmatpush.msra.mxu0 %v7017_v12  ;;  %v7023_v3 = vld [vmem:[%s11002_s5 + $0xa8] sm:$0xff] }
 0x233   :  { %12057 = vst [vmem:[#allocation83_spill] sm:$0xff] %v7005_v58  ;;  %1425 = vmatpush.msra.mxu1 %v7023_v3  ;;  %v7029_v58 = vld [vmem:[%s11002_s5 + $0xb0] sm:$0xff] }
 0x234   :  { %12058 = vst [vmem:[#allocation84_spill] sm:$0xff] %v7011_v25  ;;  %1445 = vmatpush.msra.mxu2 %v7029_v58  ;;  %v7035_v25 = vld [vmem:[%s11002_s5 + $0xb8] sm:$0xff] }
 0x235   :  { %12059 = vst [vmem:[#allocation85_spill] sm:$0xff] %v7017_v12  ;;  %1465 = vmatpush.msra.mxu3 %v7035_v25  ;;  %v7041_v12 = vld [vmem:[%s11002_s5 + $0x80] sm:$0xff] }
 0x236   :  { %12060 = vst [vmem:[#allocation86_spill] sm:$0xff] %v7023_v3  ;;  %1406 = vmatpush.msra.mxu0 %v7041_v12  ;;  %v7047_v3 = vld [vmem:[%s11002_s5 + $0x88] sm:$0xff] }
 0x237   :  { %12061 = vst [vmem:[#allocation87_spill] sm:$0xff] %v7029_v58  ;;  %1426 = vmatpush.msra.mxu1 %v7047_v3  ;;  %v7053_v58 = vld [vmem:[%s11002_s5 + $0x90] sm:$0xff] }
 0x238   :  { %12062 = vst [vmem:[#allocation88_spill] sm:$0xff] %v7035_v25  ;;  %1446 = vmatpush.msra.mxu2 %v7053_v58  ;;  %v7059_v25 = vld [vmem:[%s11002_s5 + $0x98] sm:$0xff] }
 0x239   :  { %12063 = vst [vmem:[#allocation89_spill] sm:$0xff] %v7041_v12  ;;  %1466 = vmatpush.msra.mxu3 %v7059_v25  ;;  %v7065_v12 = vld [vmem:[%s11002_s5 + $0x60] sm:$0xff] }
 0x23a   :  { %12064 = vst [vmem:[#allocation92_spill] sm:$0xff] %v7047_v3  ;;  %1407 = vmatpush.msra.mxu0 %v7065_v12  ;;  %v7071_v3 = vld [vmem:[%s11002_s5 + $0x68] sm:$0xff] }
 0x23b   :  { %12065 = vst [vmem:[#allocation95_spill] sm:$0xff] %v7053_v58  ;;  %1427 = vmatpush.msra.mxu1 %v7071_v3  ;;  %v7077_v58 = vld [vmem:[%s11002_s5 + $0x70] sm:$0xff] }
 0x23c   :  { %12066 = vst [vmem:[#allocation96_spill] sm:$0xff] %v7059_v25  ;;  %1447 = vmatpush.msra.mxu2 %v7077_v58  ;;  %v7083_v25 = vld [vmem:[%s11002_s5 + $0x78] sm:$0xff] }
 0x23d   :  { %12067 = vst [vmem:[#allocation97_spill] sm:$0xff] %v7065_v12  ;;  %1467 = vmatpush.msra.mxu3 %v7083_v25  ;;  %v7089_v12 = vld [vmem:[%s11002_s5 + $0x40] sm:$0xff] }
 0x23e   :  { %12068 = vst [vmem:[#allocation98_spill] sm:$0xff] %v7071_v3  ;;  %1408 = vmatpush.msra.mxu0 %v7089_v12  ;;  %v7095_v3 = vld [vmem:[%s11002_s5 + $0x48] sm:$0xff] }
 0x23f   :  { %12069 = vst [vmem:[#allocation99_spill] sm:$0xff] %v7077_v58  ;;  %1428 = vmatpush.msra.mxu1 %v7095_v3  ;;  %v7101_v58 = vld [vmem:[%s11002_s5 + $0x50] sm:$0xff] }
 0x240   :  { %12070 = vst [vmem:[#allocation100_spill] sm:$0xff] %v7083_v25  ;;  %1448 = vmatpush.msra.mxu2 %v7101_v58  ;;  %v7107_v25 = vld [vmem:[%s11002_s5 + $0x58] sm:$0xff] }
 0x241   :  { %12071 = vst [vmem:[#allocation101_spill] sm:$0xff] %v7089_v12  ;;  %1468 = vmatpush.msra.mxu3 %v7107_v25  ;;  %v7113_v12 = vld [vmem:[%s11002_s5 + $0x20] sm:$0xff] }
 0x242   :  { %12072 = vst [vmem:[#allocation102_spill] sm:$0xff] %v7095_v3  ;;  %1409 = vmatpush.msra.mxu0 %v7113_v12  ;;  %v7119_v3 = vld [vmem:[%s11002_s5 + $0x28] sm:$0xff] }
 0x243   :  { %12073 = vst [vmem:[#allocation103_spill] sm:$0xff] %v7101_v58  ;;  %1429 = vmatpush.msra.mxu1 %v7119_v3  ;;  %v7125_v58 = vld [vmem:[%s11002_s5 + $0x30] sm:$0xff] }
 0x244   :  { %12074 = vst [vmem:[#allocation104_spill] sm:$0xff] %v7107_v25  ;;  %1449 = vmatpush.msra.mxu2 %v7125_v58  ;;  %v7131_v25 = vld [vmem:[%s11002_s5 + $0x38] sm:$0xff] }
 0x245   :  { %12075 = vst [vmem:[#allocation105_spill] sm:$0xff] %v7113_v12  ;;  %1469 = vmatpush.msra.mxu3 %v7131_v25  ;;  %v7137_v12 = vld [vmem:[%s11002_s5] sm:$0xff] }
 0x246   :  { %12076 = vst [vmem:[#allocation106_spill] sm:$0xff] %v7119_v3  ;;  %1410 = vmatpush.msra.mxu0 %v7137_v12  ;;  %v7143_v3 = vld [vmem:[%s11002_s5 + $0x8] sm:$0xff] }
 0x247   :  { %12077 = vst [vmem:[#allocation109_spill] sm:$0xff] %v7125_v58  ;;  %1430 = vmatpush.msra.mxu1 %v7143_v3  ;;  %v7149_v58 = vld [vmem:[%s11002_s5 + $0x10] sm:$0xff] }
 0x248   :  { %12078 = vst [vmem:[#allocation112_spill] sm:$0xff] %v7131_v25  ;;  %1450 = vmatpush.msra.mxu2 %v7149_v58  ;;  %v7155_v25 = vld [vmem:[%s11002_s5 + $0x18] sm:$0xff] }
 0x249   :  { %12079 = vst [vmem:[#allocation113_spill] sm:$0xff] %v7137_v12  ;;  %1470 = vmatpush.msra.mxu3 %v7155_v25  ;;  %v7161_v12 = vld [vmem:[%s11003_s4 + $0x1e0] sm:$0xff] }
 0x24a   :  { %12080 = vst [vmem:[#allocation114_spill] sm:$0xff] %v7143_v3  ;;  %1475 = vmatpush.msrb.mxu0 %v7161_v12  ;;  %v7167_v3 = vld [vmem:[%s11003_s4 + $0x1e8] sm:$0xff] }
 0x24b   :  { %12081 = vst [vmem:[#allocation115_spill] sm:$0xff] %v7149_v58  ;;  %1495 = vmatpush.msrb.mxu1 %v7167_v3  ;;  %v7173_v58 = vld [vmem:[%s11003_s4 + $0x1f0] sm:$0xff] }
 0x24c   :  { %12082 = vst [vmem:[#allocation116_spill] sm:$0xff] %v7155_v25  ;;  %1515 = vmatpush.msrb.mxu2 %v7173_v58  ;;  %v7179_v25 = vld [vmem:[%s11003_s4 + $0x1f8] sm:$0xff] }
 0x24d   :  { %12083 = vst [vmem:[#allocation117_spill] sm:$0xff] %v7161_v12  ;;  %1535 = vmatpush.msrb.mxu3 %v7179_v25  ;;  %v7185_v12 = vld [vmem:[%s11003_s4 + $0x1c0] sm:$0xff] }
 0x24e   :  { %12084 = vst [vmem:[#allocation118_spill] sm:$0xff] %v7167_v3  ;;  %1476 = vmatpush.msrb.mxu0 %v7185_v12  ;;  %v7191_v3 = vld [vmem:[%s11003_s4 + $0x1c8] sm:$0xff] }
 0x24f   :  { %12085 = vst [vmem:[#allocation119_spill] sm:$0xff] %v7173_v58  ;;  %1496 = vmatpush.msrb.mxu1 %v7191_v3  ;;  %v7197_v58 = vld [vmem:[%s11003_s4 + $0x1d0] sm:$0xff] }
 0x250   :  { %12086 = vst [vmem:[#allocation120_spill] sm:$0xff] %v7179_v25  ;;  %1516 = vmatpush.msrb.mxu2 %v7197_v58  ;;  %v7203_v25 = vld [vmem:[%s11003_s4 + $0x1d8] sm:$0xff] }
 0x251   :  { %12087 = vst [vmem:[#allocation121_spill] sm:$0xff] %v7185_v12  ;;  %1536 = vmatpush.msrb.mxu3 %v7203_v25  ;;  %v7209_v12 = vld [vmem:[%s11003_s4 + $0x1a0] sm:$0xff] }
 0x252   :  { %12088 = vst [vmem:[#allocation122_spill] sm:$0xff] %v7191_v3  ;;  %1477 = vmatpush.msrb.mxu0 %v7209_v12  ;;  %v7215_v3 = vld [vmem:[%s11003_s4 + $0x1a8] sm:$0xff] }
 0x253   :  { %12089 = vst [vmem:[#allocation123_spill] sm:$0xff] %v7197_v58  ;;  %1497 = vmatpush.msrb.mxu1 %v7215_v3  ;;  %v7221_v58 = vld [vmem:[%s11003_s4 + $0x1b0] sm:$0xff] }
 0x254   :  { %12090 = vst [vmem:[#allocation125_spill] sm:$0xff] %v7203_v25  ;;  %1517 = vmatpush.msrb.mxu2 %v7221_v58  ;;  %v7227_v25 = vld [vmem:[%s11003_s4 + $0x1b8] sm:$0xff] }
 0x255   :  { %12091 = vst [vmem:[#allocation126_spill] sm:$0xff] %v7209_v12  ;;  %1537 = vmatpush.msrb.mxu3 %v7227_v25  ;;  %v7233_v12 = vld [vmem:[%s11003_s4 + $0x180] sm:$0xff] }
 0x256   :  { %12092 = vst [vmem:[#allocation127_spill] sm:$0xff] %v7215_v3  ;;  %1478 = vmatpush.msrb.mxu0 %v7233_v12  ;;  %v7239_v3 = vld [vmem:[%s11003_s4 + $0x188] sm:$0xff] }
 0x257   :  { %12093 = vst [vmem:[#allocation130_spill] sm:$0xff] %v7221_v58  ;;  %1498 = vmatpush.msrb.mxu1 %v7239_v3  ;;  %v7245_v58 = vld [vmem:[%s11003_s4 + $0x190] sm:$0xff] }
 0x258   :  { %12094 = vst [vmem:[#allocation132_spill] sm:$0xff] %v7227_v25  ;;  %1518 = vmatpush.msrb.mxu2 %v7245_v58  ;;  %v7251_v25 = vld [vmem:[%s11003_s4 + $0x198] sm:$0xff] }
 0x259   :  { %12095 = vst [vmem:[#allocation133_spill] sm:$0xff] %v7233_v12  ;;  %1538 = vmatpush.msrb.mxu3 %v7251_v25  ;;  %v7257_v12 = vld [vmem:[%s11003_s4 + $0x160] sm:$0xff] }
 0x25a   :  { %12096 = vst [vmem:[#allocation134_spill] sm:$0xff] %v7239_v3  ;;  %1479 = vmatpush.msrb.mxu0 %v7257_v12  ;;  %v7263_v3 = vld [vmem:[%s11003_s4 + $0x168] sm:$0xff] }
 0x25b   :  { %12097 = vst [vmem:[#allocation135_spill] sm:$0xff] %v7245_v58  ;;  %1499 = vmatpush.msrb.mxu1 %v7263_v3  ;;  %v7269_v58 = vld [vmem:[%s11003_s4 + $0x170] sm:$0xff] }
 0x25c   :  { %12098 = vst [vmem:[#allocation136_spill] sm:$0xff] %v7251_v25  ;;  %1519 = vmatpush.msrb.mxu2 %v7269_v58  ;;  %v7275_v25 = vld [vmem:[%s11003_s4 + $0x178] sm:$0xff] }
 0x25d   :  { %12099 = vst [vmem:[#allocation137_spill] sm:$0xff] %v7257_v12  ;;  %1539 = vmatpush.msrb.mxu3 %v7275_v25  ;;  %v7281_v12 = vld [vmem:[%s11003_s4 + $0x140] sm:$0xff] }
 0x25e   :  { %12100 = vst [vmem:[#allocation138_spill] sm:$0xff] %v7263_v3  ;;  %1480 = vmatpush.msrb.mxu0 %v7281_v12  ;;  %v7287_v3 = vld [vmem:[%s11003_s4 + $0x148] sm:$0xff] }
 0x25f   :  { %12101 = vst [vmem:[#allocation139_spill] sm:$0xff] %v7269_v58  ;;  %1500 = vmatpush.msrb.mxu1 %v7287_v3  ;;  %v7293_v58 = vld [vmem:[%s11003_s4 + $0x150] sm:$0xff] }
 0x260   :  { %12102 = vst [vmem:[#allocation140_spill] sm:$0xff] %v7275_v25  ;;  %1520 = vmatpush.msrb.mxu2 %v7293_v58  ;;  %v7299_v25 = vld [vmem:[%s11003_s4 + $0x158] sm:$0xff] }
 0x261   :  { %12103 = vst [vmem:[#allocation141_spill] sm:$0xff] %v7281_v12  ;;  %1540 = vmatpush.msrb.mxu3 %v7299_v25  ;;  %v7305_v12 = vld [vmem:[%s11003_s4 + $0x120] sm:$0xff] }
 0x262   :  { %12104 = vst [vmem:[#allocation142_spill] sm:$0xff] %v7287_v3  ;;  %1481 = vmatpush.msrb.mxu0 %v7305_v12  ;;  %v7311_v3 = vld [vmem:[%s11003_s4 + $0x128] sm:$0xff]  ;;  %v1058_v59 = vpop.f32.mrf.mxu1 }
 0x263   :  { %12105 = vst [vmem:[#allocation143_spill] sm:$0xff] %v7293_v58  ;;  %1501 = vmatpush.msrb.mxu1 %v7311_v3  ;;  %v7317_v58 = vld [vmem:[%s11003_s4 + $0x130] sm:$0xff] }
 0x264   :  { %12106 = vst [vmem:[#allocation145_spill] sm:$0xff] %v7299_v25  ;;  %1521 = vmatpush.msrb.mxu2 %v7317_v58  ;;  %v7323_v25 = vld [vmem:[%s11003_s4 + $0x138] sm:$0xff] }
 0x265   :  { %12107 = vst [vmem:[#allocation146_spill] sm:$0xff] %v7305_v12  ;;  %1541 = vmatpush.msrb.mxu3 %v7323_v25  ;;  %v7329_v12 = vld [vmem:[%s11003_s4 + $0x100] sm:$0xff] }
 0x266   :  { %12108 = vst [vmem:[#allocation147_spill] sm:$0xff] %v7311_v3  ;;  %1482 = vmatpush.msrb.mxu0 %v7329_v12  ;;  %v7335_v3 = vld [vmem:[%s11003_s4 + $0x108] sm:$0xff] }
 0x267   :  { %12109 = vst [vmem:[#allocation150_spill] sm:$0xff] %v7317_v58  ;;  %1502 = vmatpush.msrb.mxu1 %v7335_v3  ;;  %v7341_v58 = vld [vmem:[%s11003_s4 + $0x110] sm:$0xff] }
 0x268   :  { %12110 = vst [vmem:[#allocation151_spill] sm:$0xff] %v7323_v25  ;;  %1522 = vmatpush.msrb.mxu2 %v7341_v58  ;;  %v7347_v25 = vld [vmem:[%s11003_s4 + $0x118] sm:$0xff] }
 0x269   :  { %12111 = vst [vmem:[#allocation152_spill] sm:$0xff] %v7329_v12  ;;  %1542 = vmatpush.msrb.mxu3 %v7347_v25  ;;  %v7353_v12 = vld [vmem:[%s11003_s4 + $0xe0] sm:$0xff]  ;;  %v1098_v27 = vpop.f32.mrf.mxu3  ;;  %v1078_v38 = vpop.f32.mrf.mxu2 }
 0x26a   :  { %12112 = vst [vmem:[#allocation153_spill] sm:$0xff] %v7335_v3  ;;  %1483 = vmatpush.msrb.mxu0 %v7353_v12  ;;  %v7359_v3 = vld [vmem:[%s11003_s4 + $0xe8] sm:$0xff] }
 0x26b   :  { %12113 = vst [vmem:[#allocation154_spill] sm:$0xff] %v7341_v58  ;;  %1503 = vmatpush.msrb.mxu1 %v7359_v3  ;;  %v7365_v58 = vld [vmem:[%s11003_s4 + $0xf0] sm:$0xff] }
 0x26c   :  { %12114 = vst [vmem:[#allocation156_spill] sm:$0xff] %v7347_v25  ;;  %1523 = vmatpush.msrb.mxu2 %v7365_v58  ;;  %v7371_v25 = vld [vmem:[%s11003_s4 + $0xf8] sm:$0xff]  ;;  %v1138_v17 = vpop.f32.mrf.mxu1 }
 0x26d   :  { %12115 = vst [vmem:[#allocation157_spill] sm:$0xff] %v7353_v12  ;;  %1543 = vmatpush.msrb.mxu3 %v7371_v25  ;;  %v7377_v12 = vld [vmem:[%s11003_s4 + $0xc0] sm:$0xff]  ;;  %v1139_v11 = vadd.f32 %v1138_v17, %v1058_v59 }
 0x26e   :  { %12116 = vst [vmem:[#allocation158_spill] sm:$0xff] %v7359_v3  ;;  %1484 = vmatpush.msrb.mxu0 %v7377_v12  ;;  %v7383_v3 = vld [vmem:[%s11003_s4 + $0xc8] sm:$0xff] }
 0x26f   :  { %12117 = vst [vmem:[#allocation159_spill] sm:$0xff] %v7365_v58  ;;  %1504 = vmatpush.msrb.mxu1 %v7383_v3  ;;  %v7389_v58 = vld [vmem:[%s11003_s4 + $0xd0] sm:$0xff]  ;;  %v1182_v56 = vadd.f32 %v1139_v11, %v6286_v51 }
 0x270   :  { %12118 = vst [vmem:[#allocation160_spill] sm:$0xff] %v7371_v25  ;;  %1524 = vmatpush.msrb.mxu2 %v7389_v58  ;;  %v7395_v25 = vld [vmem:[%s11003_s4 + $0xd8] sm:$0xff] }
 0x271   :  { %12119 = vst [vmem:[#allocation161_spill] sm:$0xff] %v7377_v12  ;;  %1544 = vmatpush.msrb.mxu3 %v7395_v25  ;;  %v7401_v12 = vld [vmem:[%s11003_s4 + $0xa0] sm:$0xff]  ;;  %v3643_v15 = vmul.f32 -1.442695, %v1182_v56 }
 0x272   :  { %12120 = vst [vmem:[#allocation162_spill] sm:$0xff] %v7383_v3  ;;  %1485 = vmatpush.msrb.mxu0 %v7401_v12  ;;  %v7407_v3 = vld [vmem:[%s11003_s4 + $0xa8] sm:$0xff] }
 0x273   :  { %12121 = vst [vmem:[#allocation52_spill] sm:$0xff] %v7389_v58  ;;  %1505 = vmatpush.msrb.mxu1 %v7407_v3  ;;  %v7413_v58 = vld [vmem:[%s11003_s4 + $0xb0] sm:$0xff]  ;;  %v1178_v4 = vpop.f32.mrf.mxu3  ;;  %v1158_v52 = vpop.f32.mrf.mxu2 }
 0x274   :  { %12122 = vst [vmem:[#allocation53_spill] sm:$0xff] %v7395_v25  ;;  %1525 = vmatpush.msrb.mxu2 %v7413_v58  ;;  %v7419_v25 = vld [vmem:[%s11003_s4 + $0xb8] sm:$0xff]  ;;  %v1179_v26 = vadd.f32 %v1178_v4, %v1098_v27 }
 0x275   :  { %12123 = vst [vmem:[#allocation68_spill] sm:$0xff] %v7401_v12  ;;  %1545 = vmatpush.msrb.mxu3 %v7419_v25  ;;  %v7425_v12 = vld [vmem:[%s11003_s4 + $0x80] sm:$0xff] }
 0x276   :  { %12124 = vst [vmem:[#allocation67_spill] sm:$0xff] %v7407_v3  ;;  %1486 = vmatpush.msrb.mxu0 %v7425_v12  ;;  %v7431_v3 = vld [vmem:[%s11003_s4 + $0x88] sm:$0xff] }
 0x277   :  { %12125 = vst [vmem:[#allocation172_spill] sm:$0xff] %v7413_v58  ;;  %1506 = vmatpush.msrb.mxu1 %v7431_v3  ;;  %v7437_v58 = vld [vmem:[%s11003_s4 + $0x90] sm:$0xff] }
 0x278   :  { %12126 = vst [vmem:[#allocation173_spill] sm:$0xff] %v7419_v25  ;;  %1526 = vmatpush.msrb.mxu2 %v7437_v58  ;;  %v7443_v25 = vld [vmem:[%s11003_s4 + $0x98] sm:$0xff] }
 0x279   :  { %12127 = vst [vmem:[#allocation174_spill] sm:$0xff] %v7425_v12  ;;  %1546 = vmatpush.msrb.mxu3 %v7443_v25  ;;  %v7449_v12 = vld [vmem:[%s11003_s4 + $0x60] sm:$0xff] }
 0x27a   :  { %12128 = vst [vmem:[#allocation175_spill] sm:$0xff] %v7431_v3  ;;  %1487 = vmatpush.msrb.mxu0 %v7449_v12  ;;  %v7455_v3 = vld [vmem:[%s11003_s4 + $0x68] sm:$0xff] }
 0x27b   :  { %12129 = vst [vmem:[#allocation176_spill] sm:$0xff] %v7437_v58  ;;  %1507 = vmatpush.msrb.mxu1 %v7455_v3  ;;  %v7461_v58 = vld [vmem:[%s11003_s4 + $0x70] sm:$0xff] }
 0x27c   :  { %12130 = vst [vmem:[#allocation177_spill] sm:$0xff] %v7443_v25  ;;  %1527 = vmatpush.msrb.mxu2 %v7461_v58  ;;  %v7467_v25 = vld [vmem:[%s11003_s4 + $0x78] sm:$0xff] }
 0x27d   :  { %12131 = vst [vmem:[#allocation178_spill] sm:$0xff] %v7449_v12  ;;  %1547 = vmatpush.msrb.mxu3 %v7467_v25  ;;  %v7473_v12 = vld [vmem:[%s11003_s4 + $0x40] sm:$0xff] }
 0x27e   :  { %12132 = vst [vmem:[#allocation179_spill] sm:$0xff] %v7455_v3  ;;  %1488 = vmatpush.msrb.mxu0 %v7473_v12  ;;  %v7479_v3 = vld [vmem:[%s11003_s4 + $0x48] sm:$0xff] }
 0x27f   :  { %12133 = vst [vmem:[#allocation180_spill] sm:$0xff] %v7461_v58  ;;  %1508 = vmatpush.msrb.mxu1 %v7479_v3  ;;  %v7485_v58 = vld [vmem:[%s11003_s4 + $0x50] sm:$0xff] }
 0x280   :  { %12134 = vst [vmem:[#allocation181_spill] sm:$0xff] %v7467_v25  ;;  %1528 = vmatpush.msrb.mxu2 %v7485_v58  ;;  %v7491_v25 = vld [vmem:[%s11003_s4 + $0x58] sm:$0xff] }
 0x281   :  { %12135 = vst [vmem:[#allocation182_spill] sm:$0xff] %v7473_v12  ;;  %1548 = vmatpush.msrb.mxu3 %v7491_v25  ;;  %v7497_v12 = vld [vmem:[%s11003_s4 + $0x20] sm:$0xff] }
 0x282   :  { %12136 = vst [vmem:[#allocation183_spill] sm:$0xff] %v7479_v3  ;;  %1489 = vmatpush.msrb.mxu0 %v7497_v12  ;;  %v7503_v3 = vld [vmem:[%s11003_s4 + $0x28] sm:$0xff] }
 0x283   :  { %12137 = vst [vmem:[#allocation184_spill] sm:$0xff] %v7485_v58  ;;  %1509 = vmatpush.msrb.mxu1 %v7503_v3  ;;  %v7509_v58 = vld [vmem:[%s11003_s4 + $0x30] sm:$0xff] }
 0x284   :  { %12138 = vst [vmem:[#allocation185_spill] sm:$0xff] %v7491_v25  ;;  %1529 = vmatpush.msrb.mxu2 %v7509_v58  ;;  %v7515_v25 = vld [vmem:[%s11003_s4 + $0x38] sm:$0xff] }
 0x285   :  { %12139 = vst [vmem:[#allocation186_spill] sm:$0xff] %v7497_v12  ;;  %1549 = vmatpush.msrb.mxu3 %v7515_v25  ;;  %v7521_v12 = vld [vmem:[%s11003_s4] sm:$0xff] }
 0x286   :  { %12140 = vst [vmem:[#allocation187_spill] sm:$0xff] %v7503_v3  ;;  %1490 = vmatpush.msrb.mxu0 %v7521_v12  ;;  %v7527_v3 = vld [vmem:[%s11003_s4 + $0x8] sm:$0xff] }
 0x287   :  { %12141 = vst [vmem:[#allocation188_spill] sm:$0xff] %v7509_v58  ;;  %1510 = vmatpush.msrb.mxu1 %v7527_v3  ;;  %v7533_v58 = vld [vmem:[%s11003_s4 + $0x10] sm:$0xff] }
 0x288   :  { %12142 = vst [vmem:[#allocation189_spill] sm:$0xff] %v7515_v25  ;;  %1530 = vmatpush.msrb.mxu2 %v7533_v58  ;;  %v7539_v25 = vld [vmem:[%s11003_s4 + $0x18] sm:$0xff] }
 0x289   :  { %12143 = vst [vmem:[#allocation190_spill] sm:$0xff] %v7521_v12  ;;  %1550 = vmatpush.msrb.mxu3 %v7539_v25  ;;  %v1038_v12 = vpop.f32.mrf.mxu0 }
 0x28a   :  { %12144 = vst [vmem:[#allocation191_spill] sm:$0xff] %v7527_v3 }
 0x28b   :  { %12145 = vst [vmem:[#allocation192_spill] sm:$0xff] %v7533_v58 }
 0x28c   :  { %12146 = vst [vmem:[#allocation193_spill] sm:$0xff] %v7539_v25  ;;  %v1184_v25 = vadd.f32 %v1179_v26, %v6290_v1  ;;  %v12147_v26 = vld [vmem:[#allocation72_spill] sm:$0xff] }
 0x28d   :  { %v158_v11 = vadd.f32 %v12147_v26, %v6042_v55 }
 0x28e   :  { %v3644_v13 = vmul.f32 -1.442695, %v1184_v25 }
 0x291   :  { %v1118_v18 = vpop.f32.mrf.mxu0 }
 0x292   :  { %v1119_v3 = vadd.f32 %v1118_v18, %v1038_v12 }
 0x294   :  { %v1181_v7 = vadd.f32 %v1119_v3, %v6284_v50  ;;  %v1159_v3 = vadd.f32 %v1158_v52, %v1078_v38  ;;  %v12149_v50 = vld [vmem:[#allocation91_spill] sm:$0xff] }
 0x295   :  { %v281_v26 = vadd.f32 %v12149_v50, %v6070_v8 }
 0x296   :  { %v3642_v58 = vmul.f32 -1.442695, %v1181_v7  ;;  %v1183_v7 = vadd.f32 %v1159_v3, %v6299_v29 }
 0x298   :  { %3735 = vpow2.f32 %v3642_v58 }
 0x299   :  { %3737 = vpow2.f32 %v3643_v15  ;;  %v1265_v3 = vpop.f32.mrf.mxu0 }
 0x29a   :  { %3739 = vpow2.f32 %v3644_v13  ;;  %v12148_v13 = vld [vmem:[#allocation73_spill] sm:$0xff]  ;;  %v1328_v1 = vadd.f32 %v1265_v3, %v158_v11 }
 0x29e   :  { %v3736_v2 = vpop.eup %3735 }
 0x29f   :  { %v3738_v0 = vpop.eup %3737  ;;  %v1188_v39 = vadd.f32 1.0, %v3736_v2 }
 0x2a0   :  { %v1207_v59 = vadd.f32 1.0, %v3738_v0  ;;  %v3740_v12 = vpop.eup %3739  ;;  %v199_v0 = vadd.f32 %v12148_v13, %v6045_v60 }
 0x2a1   :  { %3741 = vrcp.f32 %v1188_v39  ;;  %v7546_v56 = vadd.f32 1.0, %v3740_v12  ;;  %v1198_v18 = vand.u32 2147483647, %v1188_v39  ;;  %v1200_v27 = vand.u32 2147483648, %v1188_v39  ;;  %v1285_v12 = vpop.f32.mrf.mxu1 }
 0x2a2   :  { %3743 = vrcp.f32 %v1207_v59  ;;  %v1219_v38 = vand.u32 2147483648, %v1207_v59  ;;  %v1217_v25 = vand.u32 2147483647, %v1207_v59  ;;  %v1329_v51 = vadd.f32 %v1285_v12, %v199_v0 }
 0x2a3   :  { %3745 = vrcp.f32 %v7546_v56  ;;  %vm1194_vm6 = vweird.f32 %v1188_v39  ;;  %vm1213_vm7 = vweird.f32 %v1207_v59  ;;  %vm1199_vm9 = vcmp.eq.f32.partialorder %v1198_v18, 8.507059e+37 }
 0x2a4   :  { %3747 = vtanh.f32 %v1183_v7  ;;  %v3645_v7 = vmul.f32 -1.442695, %v1328_v1  ;;  %v1201_v60 = vor.u32 1.1754944e-38, %v1200_v27  ;;  %v1220_v11 = vor.u32 1.1754944e-38, %v1219_v38  ;;  %v1325_v1 = vpop.f32.mrf.mxu3 }
 0x2a5   :  { %vm1218_vm11 = vcmp.eq.f32.partialorder %v1217_v25, 8.507059e+37  ;;  %v1331_v18 = vadd.f32 %v1325_v1, %v281_v26  ;;  %vm1233_vm13 = vweird.f32 %v7546_v56  ;;  %v1305_v25 = vpop.f32.mrf.mxu2 }
 0x2a6   :  { %3749 = vpow2.f32 %v3645_v7 }
 0x2a7   :  { %v3742_v58 = vpop.eup %3741  ;;  %v3647_v3 = vmul.f32 -1.442695, %v1331_v18 }
 0x2a8   :  { %v3744_v15 = vpop.eup %3743  ;;  %v1190_v4 = vmul.f32 %v3742_v58, %v1188_v39  ;;  %vm1195_vm4 = vweird.f32 %v3742_v58 }
 0x2a9   :  { %v1209_v2 = vmul.f32 %v3744_v15, %v1207_v59  ;;  %vm1214_vm5 = vweird.f32 %v3744_v15  ;;  %v3746_v13 = vpop.eup %3745  ;;  %vm1196_vm8 = vmor %vm1194_vm6, %vm1195_vm4 }
 0x2aa   :  { %v1191_v17 = vsub.f32 1.0, %v1190_v4  ;;  %v3748_v43 = vpop.eup %3747  ;;  %vm1215_vm10 = vmor %vm1213_vm7, %vm1214_vm5  ;;  %vm1234_vm12 = vweird.f32 %v3746_v13 }
 0x2ab   :  { %v1210_v52 = vsub.f32 1.0, %v1209_v2  ;;  %v3646_v2 = vmul.f32 -1.442695, %v1329_v51  ;;  %vm1235_vm14 = vmor %vm1233_vm13, %vm1234_vm12 }
 0x2ac   :  { %v1192_v29 = vmul.f32 %v3742_v58, %v1191_v17  ;;  %v1229_v17 = vmul.f32 %v3746_v13, %v7546_v56  ;;  %v3750_v12 = vpop.eup %3749 }
 0x2ad   :  { %v1211_v55 = vmul.f32 %v3744_v15, %v1210_v52  ;;  %3751 = vpow2.f32 %v3646_v2 }
 0x2ae   :  { %v1193_v4 = vadd.f32 %v3742_v58, %v1192_v29  ;;  %v1230_v39 = vsub.f32 1.0, %v1229_v17 }
 0x2af   :  { %v1212_v62 = vadd.f32 %v3744_v15, %v1211_v55 }
 0x2b0   :  { %v1197_v0 = vsel %vm1196_vm8, %v3742_v58, %v1193_v4  ;;  %v1231_v27 = vmul.f32 %v3746_v13, %v1230_v39  ;;  %v12150_v4 = vld [vmem:[#allocation90_spill] sm:$0xff] }
 0x2b1   :  { %v1202_v50 = vsel %vm1199_vm9, %v1201_v60, %v1197_v0  ;;  %v1216_v52 = vsel %vm1215_vm10, %v3744_v15, %v1212_v62  ;;  %v7560_v60 = vadd.f32 1.0, %v3750_v12  ;;  %v1239_v62 = vand.u32 2147483648, %v7546_v56 }
 0x2b2   :  { %v1221_v59 = vsel %vm1218_vm11, %v1220_v11, %v1216_v52  ;;  %v1244_v29 = vmul.f32 %v3748_v43, %v1202_v50  ;;  %v1232_v8 = vadd.f32 %v3746_v13, %v1231_v27  ;;  %v240_v7 = vadd.f32 %v12150_v4, %v6105_v21  ;;  %v12170_v4 = vld [vmem:[#allocation26_spill] sm:$0xff] }
 0x2b3   :  { %v1243_v51 = vmul.f32 %v1221_v59, %v6347_v41  ;;  %v3752_v58 = vpop.eup %3751  ;;  %v1237_v41 = vand.u32 2147483647, %v7546_v56  ;;  %v1240_v38 = vor.u32 1.1754944e-38, %v1239_v62  ;;  %v1345_v18 = vand.u32 2147483647, %v7560_v60  ;;  %v12163_v62 = vld [vmem:[#allocation19_spill] sm:$0xff] }
 0x2b4   :  { %v7563_v15 = vadd.f32 1.0, %v3752_v58  ;;  %v1236_v43 = vsel %vm1235_vm14, %v3746_v13, %v1232_v8  ;;  %v1330_v50 = vadd.f32 %v1305_v25, %v240_v7  ;;  %vm1341_vm2 = vweird.f32 %v7560_v60  ;;  %v12168_v25 = vld [vmem:[#allocation24_spill] sm:$0xff]  ;;  %v12171_v7 = vld [vmem:[#allocation27_spill] sm:$0xff] }
 0x2b5   :  { %v7557_v55 = vadd.f32 %v1244_v29, %v1243_v51  ;;  %vm1238_vm15 = vcmp.eq.f32.partialorder %v1237_v41, 8.507059e+37  ;;  %v1347_v29 = vand.u32 2147483648, %v7560_v60  ;;  %vm1346_vm6 = vcmp.eq.f32.partialorder %v1345_v18, 8.507059e+37  ;;  %v12165_v41 = vld [vmem:[#allocation21_spill] sm:$0xff]  ;;  %v12186_v18 = vld [vmem:[#allocation42_spill] sm:$0xff] }
 0x2b6   :  { %v1241_v2 = vsel %vm1238_vm15, %v1240_v38, %v1236_v43  ;;  %v1366_v1 = vand.u32 2147483648, %v7563_v15  ;;  %vm1360_vm3 = vweird.f32 %v7563_v15  ;;  %v12166_v43 = vld [vmem:[#allocation22_spill] sm:$0xff]  ;;  %v12167_v38 = vld [vmem:[#allocation23_spill] sm:$0xff] }
 0x2b7   :  { %3753 = vtanh.f32 %v7557_v55 }
 0x2b8   :  { %3755 = vpow2.f32 %v3647_v3 }
 0x2b9   :  { %3757 = vrcp.f32 %v7560_v60 }
 0x2ba   :  { %3759 = vrcp.f32 %v7563_v15 }
 0x2bd   :  { %v3754_v26 = vpop.eup %3753 }
 0x2be   :  { %v3756_v17 = vpop.eup %3755  ;;  %v1247_v11 = vmul.f32 %v3754_v26, %v1241_v2  ;;  %v12169_v26 = vld [vmem:[#allocation25_spill] sm:$0xff]  ;;  %v12172_v2 = vld [vmem:[#allocation28_spill] sm:$0xff] }
 0x2bf   :  { %v3758_v0 = vpop.eup %3757  ;;  %v7571_v52 = vadd.f32 1.0, %v3756_v17  ;;  %v12173_v17 = vld [vmem:[#allocation29_spill] sm:$0xff] }
 0x2c0   :  { %v3760_v56 = vpop.eup %3759  ;;  %v1337_v39 = vmul.f32 %v3758_v0, %v7560_v60  ;;  %1411 = vmatmul.f32.vlgmr.msra.gmra.mxu0 %v1247_v11  ;;  %1431 = vmatmul.f32.vlgmr.msra.gmra.mxu1 %v1247_v11  ;;  %vm1342_vm0 = vweird.f32 %v3758_v0  ;;  %v12162_v60 = vld [vmem:[#allocation18_spill] sm:$0xff] }
 0x2c1   :  { %v1356_v8 = vmul.f32 %v3760_v56, %v7563_v15  ;;  %3761 = vrcp.f32 %v7571_v52  ;;  %1451 = vmatmul.f32.vlgmr.msra.gmra.mxu2 %v1247_v11  ;;  %1471 = vmatmul.f32.vlgmr.msra.gmra.mxu3 %v1247_v11  ;;  %vm1361_vm1 = vweird.f32 %v3760_v56  ;;  %vm1343_vm4 = vmor %vm1341_vm2, %vm1342_vm0  ;;  %vm1380_vm9 = vweird.f32 %v7571_v52  ;;  %v12174_v11 = vld [vmem:[#allocation30_spill] sm:$0xff] }
 0x2c2   :  { %v1338_v13 = vsub.f32 1.0, %v1337_v39  ;;  %1622 = vmatpush.msra.mxu0 %v6377_v5  ;;  %1642 = vmatpush.msra.mxu1 %v6383_v6  ;;  %3763 = vtanh.f32 %v1330_v50  ;;  %v1364_v6 = vand.u32 2147483647, %v7563_v15  ;;  %vm1362_vm5 = vmor %vm1360_vm3, %vm1361_vm1  ;;  %v12164_v15 = vld [vmem:[#allocation20_spill] sm:$0xff]  ;;  %v12179_v39 = vld [vmem:[#allocation35_spill] sm:$0xff] }
 0x2c3   :  { %v1357_v59 = vsub.f32 1.0, %v1356_v8  ;;  %1662 = vmatpush.msra.mxu2 %v6393_v9  ;;  %1682 = vmatpush.msra.mxu3 %v6399_v10  ;;  %v12176_v50 = vld [vmem:[#allocation32_spill] sm:$0xff] }
 0x2c4   :  { %v1339_v51 = vmul.f32 %v3758_v0, %v1338_v13  ;;  %1623 = vmatpush.msra.mxu0 %v6407_v14  ;;  %1643 = vmatpush.msra.mxu1 %v6413_v16  ;;  %v1348_v14 = vor.u32 1.1754944e-38, %v1347_v29  ;;  %vm1365_vm7 = vcmp.eq.f32.partialorder %v1364_v6, 8.507059e+37  ;;  %v12180_v8 = vld [vmem:[#allocation36_spill] sm:$0xff]  ;;  %v12181_v13 = vld [vmem:[#allocation37_spill] sm:$0xff]  ;;  %v12183_v29 = vld [vmem:[#allocation39_spill] sm:$0xff] }
 0x2c5   :  { %v1358_v5 = vmul.f32 %v3760_v56, %v1357_v59  ;;  %1663 = vmatpush.msra.mxu2 %v6419_v19  ;;  %1683 = vmatpush.msra.mxu3 %v6425_v20  ;;  %v1367_v19 = vor.u32 1.1754944e-38, %v1366_v1  ;;  %v12182_v59 = vld [vmem:[#allocation38_spill] sm:$0xff]  ;;  %v12184_v1 = vld [vmem:[#allocation40_spill] sm:$0xff] }
 0x2c6   :  { %v1340_v9 = vadd.f32 %v3758_v0, %v1339_v51  ;;  %1624 = vmatpush.msra.mxu0 %v6431_v22  ;;  %1644 = vmatpush.msra.mxu1 %v6437_v24  ;;  %v12185_v51 = vld [vmem:[#allocation41_spill] sm:$0xff]  ;;  %v12188_v6 = vld [vmem:[#allocation44_spill] sm:$0xff] }
 0x2c7   :  { %v3762_v10 = vpop.eup %3761  ;;  %v1359_v16 = vadd.f32 %v3760_v56, %v1358_v5  ;;  %1664 = vmatpush.msra.mxu2 %v6443_v28  ;;  %1684 = vmatpush.msra.mxu3 %v6449_v30  ;;  %v12187_v5 = vld [vmem:[#allocation43_spill] sm:$0xff] }
 0x2c8   :  { %v1344_v20 = vsel %vm1343_vm4, %v3758_v0, %v1340_v9  ;;  %v1376_v22 = vmul.f32 %v3762_v10, %v7571_v52  ;;  %1625 = vmatpush.msra.mxu0 %v6457_v23  ;;  %1645 = vmatpush.msra.mxu1 %v6463_v31  ;;  %v3764_v24 = vpop.eup %3763  ;;  %vm1381_vm8 = vweird.f32 %v3762_v10  ;;  %v12175_v0 = vld [vmem:[#allocation31_spill] sm:$0xff]  ;;  %v12189_v9 = vld [vmem:[#allocation45_spill] sm:$0xff] }
 0x2c9   :  { %v1349_v27 = vsel %vm1346_vm6, %v1348_v14, %v1344_v20  ;;  %v1363_v3 = vsel %vm1362_vm5, %v3760_v56, %v1359_v16  ;;  %1665 = vmatpush.msra.mxu2 %v6469_v32  ;;  %1685 = vmatpush.msra.mxu3 %v6475_v34  ;;  %v1384_v34 = vand.u32 2147483647, %v7571_v52  ;;  %vm1382_vm10 = vmor %vm1380_vm9, %vm1381_vm8  ;;  %v12178_v56 = vld [vmem:[#allocation34_spill] sm:$0xff]  ;;  %v12191_v14 = vld [vmem:[#allocation47_spill] sm:$0xff] }
 0x2ca   :  { %v1368_v28 = vsel %vm1365_vm7, %v1367_v19, %v1363_v3  ;;  %v1391_v30 = vmul.f32 %v3764_v24, %v1349_v27  ;;  %v1377_v12 = vsub.f32 1.0, %v1376_v22  ;;  %1626 = vmatpush.msra.mxu0 %v6485_v35  ;;  %1646 = vmatpush.msra.mxu1 %v6491_v36  ;;  %v12151_v36 = vld [vmem:[#allocation8_spill] sm:$0xff]  ;;  %v12193_v19 = vld [vmem:[#allocation49_spill] sm:$0xff]  ;;  %v12194_v20 = vld [vmem:[#allocation50_spill] sm:$0xff] }
 0x2cb   :  { %v1390_v58 = vmul.f32 %v1368_v28, %v6367_v63  ;;  %1666 = vmatpush.msra.mxu2 %v6497_v37  ;;  %1686 = vmatpush.msra.mxu3 %v6503_v40  ;;  %v1386_v63 = vand.u32 2147483648, %v7571_v52  ;;  %v12152_v37 = vld [vmem:[#allocation7_spill] sm:$0xff]  ;;  %vm1385_vm11 = vcmp.eq.f32.partialorder %v1384_v34, 8.507059e+37  ;;  %v12177_v52 = vld [vmem:[#allocation33_spill] sm:$0xff]  ;;  %v12192_v16 = vld [vmem:[#allocation48_spill] sm:$0xff] }
 0x2cc   :  { %v1378_v23 = vmul.f32 %v3762_v10, %v1377_v12  ;;  %1627 = vmatpush.msra.mxu0 %v6509_v42  ;;  %1647 = vmatpush.msra.mxu1 %v6515_v44  ;;  %v12153_v42 = vld [vmem:[#allocation9_spill] sm:$0xff]  ;;  %v12154_v44 = vld [vmem:[#allocation10_spill] sm:$0xff]  ;;  %v12195_v22 = vld [vmem:[#allocation51_spill] sm:$0xff] }
 0x2cd   :  { %v7608_v31 = vadd.f32 %v1391_v30, %v1390_v58  ;;  %1667 = vmatpush.msra.mxu2 %v6521_v45  ;;  %1687 = vmatpush.msra.mxu3 %v6527_v46  ;;  %v1387_v40 = vor.u32 1.1754944e-38, %v1386_v63  ;;  %v12155_v45 = vld [vmem:[#allocation11_spill] sm:$0xff]  ;;  %v12156_v46 = vld [vmem:[#allocation12_spill] sm:$0xff]  ;;  %v12196_v24 = vld [vmem:[#allocation54_spill] sm:$0xff] }
 0x2ce   :  { %v1379_v32 = vadd.f32 %v3762_v10, %v1378_v23  ;;  %1628 = vmatpush.msra.mxu0 %v6533_v47  ;;  %1648 = vmatpush.msra.mxu1 %v6539_v33  ;;  %v12197_v27 = vld [vmem:[#allocation55_spill] sm:$0xff]  ;;  %v12198_v3 = vld [vmem:[#allocation56_spill] sm:$0xff]  ;;  %v12199_v28 = vld [vmem:[#allocation57_spill] sm:$0xff] }
 0x2cf   :  { %3765 = vtanh.f32 %v7608_v31  ;;  %1668 = vmatpush.msra.mxu2 %v6545_v48  ;;  %1688 = vmatpush.msra.mxu3 %v6551_v49  ;;  %v12157_v48 = vld [vmem:[#allocation13_spill] sm:$0xff]  ;;  %v12158_v49 = vld [vmem:[#allocation14_spill] sm:$0xff]  ;;  %v12201_v12 = vld [vmem:[#allocation59_spill] sm:$0xff] }
 0x2d0   :  { %1629 = vmatpush.msra.mxu0 %v6557_v53  ;;  %1649 = vmatpush.msra.mxu1 %v6563_v54  ;;  %v1383_v35 = vsel %vm1382_vm10, %v3762_v10, %v1379_v32  ;;  %v12159_v54 = vld [vmem:[#allocation15_spill] sm:$0xff]  ;;  %v12190_v10 = vld [vmem:[#allocation46_spill] sm:$0xff]  ;;  %v12202_v58 = vld [vmem:[#allocation60_spill] sm:$0xff] }
 0x2d1   :  { %1669 = vmatpush.msra.mxu2 %v6569_v57  ;;  %1689 = vmatpush.msra.mxu3 %v6575_v61  ;;  %v1388_v33 = vsel %vm1385_vm11, %v1387_v40, %v1383_v35  ;;  %v12160_v57 = vld [vmem:[#allocation16_spill] sm:$0xff]  ;;  %v12161_v61 = vld [vmem:[#allocation17_spill] sm:$0xff]  ;;  %v12200_v30 = vld [vmem:[#allocation58_spill] sm:$0xff] }
 0x2d2   :  { %1630 = vmatpush.msra.mxu0 %v12151_v36  ;;  %1650 = vmatpush.msra.mxu1 %v12152_v37  ;;  %v12203_v23 = vld [vmem:[#allocation61_spill] sm:$0xff]  ;;  %v12204_v32 = vld [vmem:[#allocation62_spill] sm:$0xff]  ;;  %v12205_v63 = vld [vmem:[#allocation63_spill] sm:$0xff] }
 0x2d3   :  { %1670 = vmatpush.msra.mxu2 %v12153_v42  ;;  %1690 = vmatpush.msra.mxu3 %v12154_v44  ;;  %v12206_v34 = vld [vmem:[#allocation64_spill] sm:$0xff]  ;;  %v12207_v35 = vld [vmem:[#allocation65_spill] sm:$0xff]  ;;  %v12208_v36 = vld [vmem:[#allocation66_spill] sm:$0xff] }
 0x2d4   :  { %1631 = vmatpush.msra.mxu0 %v12155_v45  ;;  %1651 = vmatpush.msra.mxu1 %v12156_v46  ;;  %v12209_v37 = vld [vmem:[#allocation69_spill] sm:$0xff]  ;;  %v12210_v40 = vld [vmem:[#allocation70_spill] sm:$0xff]  ;;  %v12211_v42 = vld [vmem:[#allocation71_spill] sm:$0xff] }
 0x2d5   :  { %v3766_v47 = vpop.eup %3765  ;;  %1671 = vmatpush.msra.mxu2 %v12157_v48  ;;  %1691 = vmatpush.msra.mxu3 %v12158_v49  ;;  %v12212_v44 = vld [vmem:[#allocation74_spill] sm:$0xff]  ;;  %v12213_v45 = vld [vmem:[#allocation75_spill] sm:$0xff]  ;;  %v12214_v46 = vld [vmem:[#allocation76_spill] sm:$0xff] }
 0x2d6   :  { %v1394_v53 = vmul.f32 %v3766_v47, %v1388_v33  ;;  %1632 = vmatpush.msra.mxu0 %v12159_v54  ;;  %1652 = vmatpush.msra.mxu1 %v12160_v57  ;;  %v12215_v47 = vld [vmem:[#allocation77_spill] sm:$0xff]  ;;  %v12216_v33 = vld [vmem:[#allocation78_spill] sm:$0xff]  ;;  %v12217_v48 = vld [vmem:[#allocation79_spill] sm:$0xff] }
 0x2d7   :  { %1672 = vmatpush.msra.mxu2 %v12161_v61  ;;  %1692 = vmatpush.msra.mxu3 %v12162_v60  ;;  %v12218_v49 = vld [vmem:[#allocation80_spill] sm:$0xff]  ;;  %v12220_v54 = vld [vmem:[#allocation82_spill] sm:$0xff]  ;;  %v12221_v57 = vld [vmem:[#allocation83_spill] sm:$0xff] }
 0x2d8   :  { %1491 = vmatmul.f32.vlgmr.msrb.gmra.mxu0 %v1394_v53  ;;  %1511 = vmatmul.f32.vlgmr.msrb.gmra.mxu1 %v1394_v53  ;;  %v12222_v61 = vld [vmem:[#allocation84_spill] sm:$0xff]  ;;  %v12223_v60 = vld [vmem:[#allocation85_spill] sm:$0xff] }
 0x2d9   :  { %1531 = vmatmul.f32.vlgmr.msrb.gmra.mxu2 %v1394_v53  ;;  %1551 = vmatmul.f32.vlgmr.msrb.gmra.mxu3 %v1394_v53 }
 0x2da   :  { %1633 = vmatpush.msra.mxu0 %v12163_v62  ;;  %1653 = vmatpush.msra.mxu1 %v12164_v15  ;;  %v12224_v62 = vld [vmem:[#allocation86_spill] sm:$0xff]  ;;  %v12225_v15 = vld [vmem:[#allocation87_spill] sm:$0xff] }
 0x2db   :  { %1673 = vmatpush.msra.mxu2 %v12165_v41  ;;  %1693 = vmatpush.msra.mxu3 %v12166_v43  ;;  %v12226_v41 = vld [vmem:[#allocation88_spill] sm:$0xff]  ;;  %v12227_v43 = vld [vmem:[#allocation89_spill] sm:$0xff] }
 0x2dc   :  { %1634 = vmatpush.msra.mxu0 %v12167_v38  ;;  %1654 = vmatpush.msra.mxu1 %v12168_v25  ;;  %v12228_v38 = vld [vmem:[#allocation92_spill] sm:$0xff]  ;;  %v12229_v25 = vld [vmem:[#allocation95_spill] sm:$0xff] }
 0x2dd   :  { %1674 = vmatpush.msra.mxu2 %v12169_v26  ;;  %1694 = vmatpush.msra.mxu3 %v12170_v4  ;;  %v12230_v26 = vld [vmem:[#allocation96_spill] sm:$0xff]  ;;  %v12231_v4 = vld [vmem:[#allocation97_spill] sm:$0xff] }
 0x2de   :  { %1635 = vmatpush.msra.mxu0 %v12171_v7  ;;  %1655 = vmatpush.msra.mxu1 %v12172_v2  ;;  %v12232_v7 = vld [vmem:[#allocation98_spill] sm:$0xff]  ;;  %v12233_v2 = vld [vmem:[#allocation99_spill] sm:$0xff] }
 0x2df   :  { %1675 = vmatpush.msra.mxu2 %v12173_v17  ;;  %1695 = vmatpush.msra.mxu3 %v12174_v11  ;;  %v12234_v17 = vld [vmem:[#allocation100_spill] sm:$0xff]  ;;  %v12235_v11 = vld [vmem:[#allocation101_spill] sm:$0xff] }
 0x2e0   :  { %1636 = vmatpush.msra.mxu0 %v12175_v0  ;;  %1656 = vmatpush.msra.mxu1 %v12176_v50  ;;  %v12236_v0 = vld [vmem:[#allocation102_spill] sm:$0xff]  ;;  %v12237_v50 = vld [vmem:[#allocation103_spill] sm:$0xff] }
 0x2e1   :  { %1676 = vmatpush.msra.mxu2 %v12177_v52  ;;  %1696 = vmatpush.msra.mxu3 %v12178_v56  ;;  %v12238_v52 = vld [vmem:[#allocation104_spill] sm:$0xff]  ;;  %v12239_v56 = vld [vmem:[#allocation105_spill] sm:$0xff] }
 0x2e2   :  { %1637 = vmatpush.msra.mxu0 %v12179_v39  ;;  %1657 = vmatpush.msra.mxu1 %v12180_v8  ;;  %v12240_v39 = vld [vmem:[#allocation106_spill] sm:$0xff]  ;;  %v12241_v8 = vld [vmem:[#allocation109_spill] sm:$0xff] }
 0x2e3   :  { %1677 = vmatpush.msra.mxu2 %v12181_v13  ;;  %1697 = vmatpush.msra.mxu3 %v12182_v59  ;;  %v12242_v13 = vld [vmem:[#allocation112_spill] sm:$0xff]  ;;  %v12243_v59 = vld [vmem:[#allocation113_spill] sm:$0xff] }
 0x2e4   :  { %1638 = vmatmul.f32.vlgmr.msra.gmra.mxu0 %v1394_v53  ;;  %1658 = vmatmul.f32.vlgmr.msra.gmra.mxu1 %v1394_v53 }
 0x2e5   :  { %1678 = vmatmul.f32.vlgmr.msra.gmra.mxu2 %v1394_v53  ;;  %1698 = vmatmul.f32.vlgmr.msra.gmra.mxu3 %v1394_v53  ;;  %v12219_v53 = vld [vmem:[#allocation81_spill] sm:$0xff] }
 0x2e6   :  { %1769 = vmatpush.msrb.mxu0 %v12183_v29  ;;  %1789 = vmatpush.msrb.mxu1 %v12184_v1  ;;  %v12244_v29 = vld [vmem:[#allocation114_spill] sm:$0xff]  ;;  %v12245_v1 = vld [vmem:[#allocation115_spill] sm:$0xff] }
 0x2e7   :  { %1809 = vmatpush.msrb.mxu2 %v12185_v51  ;;  %1829 = vmatpush.msrb.mxu3 %v12186_v18  ;;  %v12246_v51 = vld [vmem:[#allocation116_spill] sm:$0xff]  ;;  %v12247_v18 = vld [vmem:[#allocation117_spill] sm:$0xff] }
 0x2e8   :  { %1770 = vmatpush.msrb.mxu0 %v12187_v5  ;;  %1790 = vmatpush.msrb.mxu1 %v12188_v6  ;;  %v12248_v5 = vld [vmem:[#allocation118_spill] sm:$0xff]  ;;  %v12249_v6 = vld [vmem:[#allocation119_spill] sm:$0xff] }
 0x2e9   :  { %1810 = vmatpush.msrb.mxu2 %v12189_v9  ;;  %1830 = vmatpush.msrb.mxu3 %v12190_v10  ;;  %v12250_v9 = vld [vmem:[#allocation120_spill] sm:$0xff]  ;;  %v12251_v10 = vld [vmem:[#allocation121_spill] sm:$0xff] }
 0x2ea   :  { %1771 = vmatpush.msrb.mxu0 %v12191_v14  ;;  %1791 = vmatpush.msrb.mxu1 %v12192_v16  ;;  %v12252_v14 = vld [vmem:[#allocation122_spill] sm:$0xff]  ;;  %v12253_v16 = vld [vmem:[#allocation123_spill] sm:$0xff] }
 0x2eb   :  { %1811 = vmatpush.msrb.mxu2 %v12193_v19  ;;  %1831 = vmatpush.msrb.mxu3 %v12194_v20  ;;  %v12254_v19 = vld [vmem:[#allocation125_spill] sm:$0xff]  ;;  %v12255_v20 = vld [vmem:[#allocation126_spill] sm:$0xff] }
 0x2ec   :  { %1772 = vmatpush.msrb.mxu0 %v12195_v22  ;;  %1792 = vmatpush.msrb.mxu1 %v12196_v24  ;;  %v12256_v22 = vld [vmem:[#allocation127_spill] sm:$0xff]  ;;  %v12257_v24 = vld [vmem:[#allocation130_spill] sm:$0xff] }
 0x2ed   :  { %1812 = vmatpush.msrb.mxu2 %v12197_v27  ;;  %1832 = vmatpush.msrb.mxu3 %v12198_v3  ;;  %v12258_v27 = vld [vmem:[#allocation132_spill] sm:$0xff]  ;;  %v12259_v3 = vld [vmem:[#allocation133_spill] sm:$0xff] }
 0x2ee   :  { %1773 = vmatpush.msrb.mxu0 %v12199_v28  ;;  %1793 = vmatpush.msrb.mxu1 %v12200_v30  ;;  %v12260_v28 = vld [vmem:[#allocation134_spill] sm:$0xff]  ;;  %v12261_v30 = vld [vmem:[#allocation135_spill] sm:$0xff] }
 0x2ef   :  { %1813 = vmatpush.msrb.mxu2 %v12201_v12  ;;  %1833 = vmatpush.msrb.mxu3 %v12202_v58  ;;  %v12262_v12 = vld [vmem:[#allocation136_spill] sm:$0xff]  ;;  %v12263_v58 = vld [vmem:[#allocation137_spill] sm:$0xff] }
 0x2f0   :  { %1774 = vmatpush.msrb.mxu0 %v12203_v23  ;;  %1794 = vmatpush.msrb.mxu1 %v12204_v32  ;;  %v12264_v23 = vld [vmem:[#allocation138_spill] sm:$0xff]  ;;  %v12265_v32 = vld [vmem:[#allocation139_spill] sm:$0xff] }
 0x2f1   :  { %1814 = vmatpush.msrb.mxu2 %v12205_v63  ;;  %1834 = vmatpush.msrb.mxu3 %v12206_v34  ;;  %v12266_v63 = vld [vmem:[#allocation140_spill] sm:$0xff]  ;;  %v12267_v34 = vld [vmem:[#allocation141_spill] sm:$0xff] }
 0x2f2   :  { %1775 = vmatpush.msrb.mxu0 %v12207_v35  ;;  %1795 = vmatpush.msrb.mxu1 %v12208_v36  ;;  %v12268_v35 = vld [vmem:[#allocation142_spill] sm:$0xff]  ;;  %v12269_v36 = vld [vmem:[#allocation143_spill] sm:$0xff] }
 0x2f3   :  { %1815 = vmatpush.msrb.mxu2 %v12209_v37  ;;  %1835 = vmatpush.msrb.mxu3 %v12210_v40  ;;  %v12270_v37 = vld [vmem:[#allocation145_spill] sm:$0xff]  ;;  %v12271_v40 = vld [vmem:[#allocation146_spill] sm:$0xff] }
 0x2f4   :  { %1776 = vmatpush.msrb.mxu0 %v12211_v42  ;;  %1796 = vmatpush.msrb.mxu1 %v12212_v44  ;;  %v12272_v42 = vld [vmem:[#allocation147_spill] sm:$0xff]  ;;  %v12273_v44 = vld [vmem:[#allocation150_spill] sm:$0xff] }
 0x2f5   :  { %1816 = vmatpush.msrb.mxu2 %v12213_v45  ;;  %1836 = vmatpush.msrb.mxu3 %v12214_v46  ;;  %v12274_v45 = vld [vmem:[#allocation151_spill] sm:$0xff]  ;;  %v12275_v46 = vld [vmem:[#allocation152_spill] sm:$0xff] }
 0x2f6   :  { %1777 = vmatpush.msrb.mxu0 %v12215_v47  ;;  %1797 = vmatpush.msrb.mxu1 %v12216_v33  ;;  %v12276_v47 = vld [vmem:[#allocation153_spill] sm:$0xff]  ;;  %v12277_v33 = vld [vmem:[#allocation154_spill] sm:$0xff] }
 0x2f7   :  { %1817 = vmatpush.msrb.mxu2 %v12217_v48  ;;  %1837 = vmatpush.msrb.mxu3 %v12218_v49  ;;  %v12278_v48 = vld [vmem:[#allocation156_spill] sm:$0xff]  ;;  %v12279_v49 = vld [vmem:[#allocation157_spill] sm:$0xff] }
 0x2f8   :  { %1778 = vmatpush.msrb.mxu0 %v12219_v53  ;;  %1798 = vmatpush.msrb.mxu1 %v12220_v54  ;;  %v12280_v53 = vld [vmem:[#allocation158_spill] sm:$0xff]  ;;  %v12281_v54 = vld [vmem:[#allocation159_spill] sm:$0xff] }
 0x2f9   :  { %1818 = vmatpush.msrb.mxu2 %v12221_v57  ;;  %1838 = vmatpush.msrb.mxu3 %v12222_v61  ;;  %v12282_v57 = vld [vmem:[#allocation160_spill] sm:$0xff]  ;;  %v12283_v61 = vld [vmem:[#allocation161_spill] sm:$0xff] }
 0x2fa   :  { %1779 = vmatpush.msrb.mxu0 %v12223_v60  ;;  %1799 = vmatpush.msrb.mxu1 %v12224_v62  ;;  %v12284_v60 = vld [vmem:[#allocation162_spill] sm:$0xff]  ;;  %v12285_v62 = vld [vmem:[#allocation52_spill] sm:$0xff] }
 0x2fb   :  { %1819 = vmatpush.msrb.mxu2 %v12225_v15  ;;  %1839 = vmatpush.msrb.mxu3 %v12226_v41  ;;  %v12286_v15 = vld [vmem:[#allocation53_spill] sm:$0xff]  ;;  %v12287_v41 = vld [vmem:[#allocation68_spill] sm:$0xff] }
 0x2fc   :  { %1780 = vmatpush.msrb.mxu0 %v12227_v43  ;;  %1800 = vmatpush.msrb.mxu1 %v12228_v38  ;;  %v12288_v43 = vld [vmem:[#allocation67_spill] sm:$0xff]  ;;  %v12289_v38 = vld [vmem:[#allocation172_spill] sm:$0xff] }
 0x2fd   :  { %1820 = vmatpush.msrb.mxu2 %v12229_v25  ;;  %1840 = vmatpush.msrb.mxu3 %v12230_v26  ;;  %v12290_v25 = vld [vmem:[#allocation173_spill] sm:$0xff]  ;;  %v12291_v26 = vld [vmem:[#allocation174_spill] sm:$0xff] }
 0x2fe   :  { %1781 = vmatpush.msrb.mxu0 %v12231_v4  ;;  %1801 = vmatpush.msrb.mxu1 %v12232_v7  ;;  %v12292_v4 = vld [vmem:[#allocation175_spill] sm:$0xff]  ;;  %v12293_v7 = vld [vmem:[#allocation176_spill] sm:$0xff] }
 0x2ff   :  { %1821 = vmatpush.msrb.mxu2 %v12233_v2  ;;  %1841 = vmatpush.msrb.mxu3 %v12234_v17  ;;  %v12294_v2 = vld [vmem:[#allocation177_spill] sm:$0xff]  ;;  %v12295_v17 = vld [vmem:[#allocation178_spill] sm:$0xff] }
 0x300   :  { %1782 = vmatpush.msrb.mxu0 %v12235_v11  ;;  %1802 = vmatpush.msrb.mxu1 %v12236_v0  ;;  %v12296_v11 = vld [vmem:[#allocation179_spill] sm:$0xff]  ;;  %v12297_v0 = vld [vmem:[#allocation180_spill] sm:$0xff] }
 0x301   :  { %1822 = vmatpush.msrb.mxu2 %v12237_v50  ;;  %1842 = vmatpush.msrb.mxu3 %v12238_v52  ;;  %v12298_v50 = vld [vmem:[#allocation181_spill] sm:$0xff]  ;;  %v12299_v52 = vld [vmem:[#allocation182_spill] sm:$0xff] }
 0x302   :  { %1783 = vmatpush.msrb.mxu0 %v12239_v56  ;;  %1803 = vmatpush.msrb.mxu1 %v12240_v39  ;;  %v12300_v56 = vld [vmem:[#allocation183_spill] sm:$0xff]  ;;  %v12301_v39 = vld [vmem:[#allocation184_spill] sm:$0xff] }
 0x303   :  { %1823 = vmatpush.msrb.mxu2 %v12241_v8  ;;  %1843 = vmatpush.msrb.mxu3 %v12242_v13  ;;  %v12302_v8 = vld [vmem:[#allocation185_spill] sm:$0xff]  ;;  %v12303_v13 = vld [vmem:[#allocation186_spill] sm:$0xff] }
 0x304   :  { %1784 = vmatpush.msrb.mxu0 %v12243_v59  ;;  %1804 = vmatpush.msrb.mxu1 %v12244_v29  ;;  %v12304_v59 = vld [vmem:[#allocation187_spill] sm:$0xff]  ;;  %v12305_v29 = vld [vmem:[#allocation188_spill] sm:$0xff] }
 0x305   :  { %1824 = vmatpush.msrb.mxu2 %v12245_v1  ;;  %1844 = vmatpush.msrb.mxu3 %v12246_v51  ;;  %v12306_v1 = vld [vmem:[#allocation189_spill] sm:$0xff]  ;;  %v12307_v51 = vld [vmem:[#allocation190_spill] sm:$0xff] }
 0x306   :  { %1849 = vmatpush.msra.mxu0 %v12247_v18  ;;  %1869 = vmatpush.msra.mxu1 %v12248_v5  ;;  %v12308_v18 = vld [vmem:[#allocation191_spill] sm:$0xff]  ;;  %v12309_v5 = vld [vmem:[#allocation192_spill] sm:$0xff] }
 0x307   :  { %1889 = vmatpush.msra.mxu2 %v12249_v6  ;;  %1909 = vmatpush.msra.mxu3 %v12250_v9  ;;  %v12310_v6 = vld [vmem:[#allocation193_spill] sm:$0xff] }
 0x308   :  { %1850 = vmatpush.msra.mxu0 %v12251_v10  ;;  %1870 = vmatpush.msra.mxu1 %v12252_v14 }
 0x309   :  { %1890 = vmatpush.msra.mxu2 %v12253_v16  ;;  %1910 = vmatpush.msra.mxu3 %v12254_v19 }
 0x30a   :  { %1851 = vmatpush.msra.mxu0 %v12255_v20  ;;  %1871 = vmatpush.msra.mxu1 %v12256_v22 }
 0x30b   :  { %1891 = vmatpush.msra.mxu2 %v12257_v24  ;;  %1911 = vmatpush.msra.mxu3 %v12258_v27  ;;  %v12311_v24 = vld [vmem:[#allocation4_spill] sm:$0xff] }
 0x30c   :  { %1852 = vmatpush.msra.mxu0 %v12259_v3  ;;  %1872 = vmatpush.msra.mxu1 %v12260_v28  ;;  %v12312_v3 = vld [vmem:[#allocation3_spill] sm:$0xff] }
 0x30d   :  { %1892 = vmatpush.msra.mxu2 %v12261_v30  ;;  %1912 = vmatpush.msra.mxu3 %v12262_v12 }
 0x30e   :  { %1853 = vmatpush.msra.mxu0 %v12263_v58  ;;  %1873 = vmatpush.msra.mxu1 %v12264_v23 }
 0x30f   :  { %1893 = vmatpush.msra.mxu2 %v12265_v32  ;;  %1913 = vmatpush.msra.mxu3 %v12266_v63  ;;  %v12313_v63 = vld [vmem:[#allocation5_spill] sm:$0xff] }
 0x310   :  { %1854 = vmatpush.msra.mxu0 %v12267_v34  ;;  %1874 = vmatpush.msra.mxu1 %v12268_v35  ;;  %v12314_v35 = vld [vmem:[#allocation166_spill] sm:$0xff] }
 0x311   :  { %1894 = vmatpush.msra.mxu2 %v12269_v36  ;;  %1914 = vmatpush.msra.mxu3 %v12270_v37  ;;  %v12315_v36 = vld [vmem:[#allocation93_spill] sm:$0xff] }
 0x312   :  { %1855 = vmatpush.msra.mxu0 %v12271_v40  ;;  %1875 = vmatpush.msra.mxu1 %v12272_v42  ;;  %v161_v37 = vadd.f32 %v12315_v36, %v12314_v35  ;;  %v12316_v40 = vld [vmem:[#allocation167_spill] sm:$0xff]  ;;  %v12317_v42 = vld [vmem:[#allocation94_spill] sm:$0xff] }
 0x313   :  { %1895 = vmatpush.msra.mxu2 %v12273_v44  ;;  %1915 = vmatpush.msra.mxu3 %v12274_v45  ;;  %v202_v44 = vadd.f32 %v12317_v42, %v12316_v40 }
 0x314   :  { %1856 = vmatpush.msra.mxu0 %v12275_v46  ;;  %1876 = vmatpush.msra.mxu1 %v12276_v47 }
 0x315   :  { %1896 = vmatpush.msra.mxu2 %v12277_v33  ;;  %1916 = vmatpush.msra.mxu3 %v12278_v48 }
 0x316   :  { %1857 = vmatpush.msra.mxu0 %v12279_v49  ;;  %1877 = vmatpush.msra.mxu1 %v12280_v53 }
 0x317   :  { %1897 = vmatpush.msra.mxu2 %v12281_v54  ;;  %1917 = vmatpush.msra.mxu3 %v12282_v57 }
 0x318   :  { %1858 = vmatpush.msra.mxu0 %v12283_v61  ;;  %1878 = vmatpush.msra.mxu1 %v12284_v60 }
 0x319   :  { %1898 = vmatpush.msra.mxu2 %v12285_v62  ;;  %1918 = vmatpush.msra.mxu3 %v12286_v15 }
 0x31a   :  { %1859 = vmatpush.msra.mxu0 %v12287_v41  ;;  %1879 = vmatpush.msra.mxu1 %v12288_v43  ;;  %v12318_v41 = vld [vmem:[#allocation170_spill] sm:$0xff]  ;;  %v12319_v43 = vld [vmem:[#allocation108_spill] sm:$0xff] }
 0x31b   :  { %1899 = vmatpush.msra.mxu2 %v12289_v38  ;;  %1919 = vmatpush.msra.mxu3 %v12290_v25  ;;  %v284_v38 = vadd.f32 %v12319_v43, %v12318_v41 }
 0x31c   :  { %1860 = vmatpush.msra.mxu0 %v12291_v26  ;;  %1880 = vmatpush.msra.mxu1 %v12292_v4 }
 0x31d   :  { %1900 = vmatpush.msra.mxu2 %v12293_v7  ;;  %1920 = vmatpush.msra.mxu3 %v12294_v2  ;;  %v12320_v7 = vld [vmem:[#allocation6_spill] sm:$0xff] }
 0x31e   :  { %1861 = vmatpush.msra.mxu0 %v12295_v17  ;;  %1881 = vmatpush.msra.mxu1 %v12296_v11 }
 0x31f   :  { %1901 = vmatpush.msra.mxu2 %v12297_v0  ;;  %1921 = vmatpush.msra.mxu3 %v12298_v50 }
 0x320   :  { %1862 = vmatpush.msra.mxu0 %v12299_v52  ;;  %1882 = vmatpush.msra.mxu1 %v12300_v56 }
 0x321   :  { %1902 = vmatpush.msra.mxu2 %v12301_v39  ;;  %1922 = vmatpush.msra.mxu3 %v12302_v8 }
 0x322   :  { %1863 = vmatpush.msra.mxu0 %v12303_v13  ;;  %1883 = vmatpush.msra.mxu1 %v12304_v59 }
 0x323   :  { %1903 = vmatpush.msra.mxu2 %v12305_v29  ;;  %1923 = vmatpush.msra.mxu3 %v12306_v1 }
 0x324   :  { %1864 = vmatpush.msra.mxu0 %v12307_v51  ;;  %1884 = vmatpush.msra.mxu1 %v12308_v18 }
 0x325   :  { %1904 = vmatpush.msra.mxu2 %v12309_v5  ;;  %1924 = vmatpush.msra.mxu3 %v12310_v6 }
 0x33d   :  { %v1412_v9 = vpop.f32.mrf.mxu0  ;;  %v1432_v10 = vpop.f32.mrf.mxu1 }
 0x344   :  { %v1472_v14 = vpop.f32.mrf.mxu3  ;;  %v1452_v58 = vpop.f32.mrf.mxu2 }
 0x355   :  { %v1492_v16 = vpop.f32.mrf.mxu0  ;;  %v1512_v19 = vpop.f32.mrf.mxu1 }
 0x356   :  { %v1493_v20 = vadd.f32 %v1492_v16, %v1412_v9  ;;  %v1513_v22 = vadd.f32 %v1512_v19, %v1432_v10  ;;  %v12321_v19 = vld [vmem:[#allocation107_spill] sm:$0xff] }
 0x358   :  { %v1555_v27 = vadd.f32 %v1493_v20, %v12311_v24  ;;  %v1556_v28 = vadd.f32 %v1513_v22, %v12312_v3  ;;  %v243_v20 = vadd.f32 %v12321_v19, %v6105_v21 }
 0x35a   :  { %v3648_v30 = vmul.f32 -1.442695, %v1555_v27  ;;  %v3649_v12 = vmul.f32 -1.442695, %v1556_v28 }
 0x35c   :  { %3767 = vpow2.f32 %v3648_v30  ;;  %v1552_v23 = vpop.f32.mrf.mxu3  ;;  %v1532_v57 = vpop.f32.mrf.mxu2 }
 0x35d   :  { %3769 = vpow2.f32 %v3649_v12  ;;  %v1553_v32 = vadd.f32 %v1552_v23, %v1472_v14  ;;  %v1533_v15 = vadd.f32 %v1532_v57, %v1452_v58 }
 0x35f   :  { %v1558_v34 = vadd.f32 %v1553_v32, %v12313_v63  ;;  %v1557_v2 = vadd.f32 %v1533_v15, %v12320_v7 }
 0x361   :  { %v3650_v45 = vmul.f32 -1.442695, %v1558_v34  ;;  %v1639_v46 = vpop.f32.mrf.mxu0  ;;  %v1659_v47 = vpop.f32.mrf.mxu1 }
 0x362   :  { %v3768_v33 = vpop.eup %3767  ;;  %v1702_v48 = vadd.f32 %v1639_v46, %v161_v37  ;;  %v1703_v49 = vadd.f32 %v1659_v47, %v202_v44 }
 0x363   :  { %v3770_v53 = vpop.eup %3769  ;;  %v1562_v54 = vadd.f32 1.0, %v3768_v33  ;;  %3771 = vpow2.f32 %v3650_v45 }
 0x364   :  { %v1581_v61 = vadd.f32 1.0, %v3770_v53  ;;  %v3651_v60 = vmul.f32 -1.442695, %v1702_v48  ;;  %v3652_v62 = vmul.f32 -1.442695, %v1703_v49 }
 0x365   :  { %3773 = vrcp.f32 %v1562_v54  ;;  %v1572_v1 = vand.u32 2147483647, %v1562_v54  ;;  %v1574_v51 = vand.u32 2147483648, %v1562_v54  ;;  %vm1568_vm15 = vweird.f32 %v1562_v54 }
 0x366   :  { %3775 = vrcp.f32 %v1581_v61  ;;  %v1593_v5 = vand.u32 2147483648, %v1581_v61  ;;  %v1591_v10 = vand.u32 2147483647, %v1581_v61  ;;  %vm1587_vm14 = vweird.f32 %v1581_v61 }
 0x367   :  { %3777 = vpow2.f32 %v3651_v60  ;;  %vm1573_vm1 = vcmp.eq.f32.partialorder %v1572_v1, 8.507059e+37  ;;  %v1575_v28 = vor.u32 1.1754944e-38, %v1574_v51 }
 0x368   :  { %3779 = vpow2.f32 %v3652_v62  ;;  %v1699_v25 = vpop.f32.mrf.mxu3  ;;  %v1679_v14 = vpop.f32.mrf.mxu2  ;;  %v1594_v23 = vor.u32 1.1754944e-38, %v1593_v5  ;;  %vm1592_vm3 = vcmp.eq.f32.partialorder %v1591_v10, 8.507059e+37 }
 0x369   :  { %v3772_v26 = vpop.eup %3771  ;;  %v1705_v4 = vadd.f32 %v1699_v25, %v284_v38  ;;  %v1704_v34 = vadd.f32 %v1679_v14, %v243_v20 }
 0x36a   :  { %v7794_v17 = vadd.f32 1.0, %v3772_v26 }
 0x36b   :  { %v3774_v11 = vpop.eup %3773  ;;  %v3653_v0 = vmul.f32 -1.442695, %v1705_v4 }
 0x36c   :  { %v3776_v50 = vpop.eup %3775  ;;  %v1564_v52 = vmul.f32 %v3774_v11, %v1562_v54  ;;  %3781 = vrcp.f32 %v7794_v17  ;;  %vm1569_vm12 = vweird.f32 %v3774_v11  ;;  %vm1607_vm4 = vweird.f32 %v7794_v17 }
 0x36d   :  { %v3778_v56 = vpop.eup %3777  ;;  %v1583_v39 = vmul.f32 %v3776_v50, %v1581_v61  ;;  %3783 = vpow2.f32 %v3653_v0  ;;  %vm1588_vm13 = vweird.f32 %v3776_v50  ;;  %vm1570_vm0 = vmor %vm1568_vm15, %vm1569_vm12  ;;  %v1613_v62 = vand.u32 2147483648, %v7794_v17 }
 0x36e   :  { %v3780_v8 = vpop.eup %3779  ;;  %v1565_v13 = vsub.f32 1.0, %v1564_v52  ;;  %3785 = vtanh.f32 %v1557_v2  ;;  %v7797_v59 = vadd.f32 1.0, %v3778_v56  ;;  %vm1589_vm2 = vmor %vm1587_vm14, %vm1588_vm13  ;;  %v8034_v52 = vld [vmem:[%s11001_s2 + $0x138] sm:$0xff] }
 0x36f   :  { %v1584_v29 = vsub.f32 1.0, %v1583_v39  ;;  %v7799_v18 = vadd.f32 1.0, %v3780_v8  ;;  %v1614_v51 = vor.u32 1.1754944e-38, %v1613_v62  ;;  %v7958_v62 = vld [vmem:[%s11001_s2 + $0x198] sm:$0xff] }
 0x370   :  { %v1566_v6 = vmul.f32 %v3774_v11, %v1565_v13  ;;  %3787 = vrcp.f32 %v7797_v59  ;;  %v1719_v60 = vand.u32 2147483647, %v7797_v59  ;;  %v1721_v43 = vand.u32 2147483648, %v7797_v59 }
 0x371   :  { %v1585_v9 = vmul.f32 %v3776_v50, %v1584_v29  ;;  %3789 = vrcp.f32 %v7799_v18  ;;  %v1740_v38 = vand.u32 2147483648, %v7799_v18  ;;  %v1738_v2 = vand.u32 2147483647, %v7799_v18 }
 0x372   :  { %v7803_v16 = vpop.eup %3781  ;;  %v1567_v22 = vadd.f32 %v3774_v11, %v1566_v6  ;;  %vm1734_vm8 = vweird.f32 %v7799_v18  ;;  %vm1715_vm9 = vweird.f32 %v7797_v59  ;;  %vm1720_vm12 = vcmp.eq.f32.partialorder %v1719_v60, 8.507059e+37  ;;  %v7952_v60 = vld [vmem:[%s11001_s2 + $0x190] sm:$0xff] }
 0x373   :  { %v3784_v27 = vpop.eup %3783  ;;  %v1586_v30 = vadd.f32 %v3776_v50, %v1585_v9  ;;  %v1603_v12 = vmul.f32 %v7803_v16, %v7794_v17  ;;  %vm1608_vm5 = vweird.f32 %v7803_v16  ;;  %v1722_v39 = vor.u32 1.1754944e-38, %v1721_v43  ;;  %v7970_v43 = vld [vmem:[%s11001_s2 + $0x168] sm:$0xff] }
 0x374   :  { %v3786_v58 = vpop.eup %3785  ;;  %v1571_v32 = vsel %vm1570_vm0, %v3774_v11, %v1567_v22  ;;  %v7810_v36 = vadd.f32 1.0, %v3784_v27  ;;  %v1611_v11 = vand.u32 2147483647, %v7794_v17  ;;  %vm7837_vm10 = vmor %vm1607_vm4, %vm1608_vm5  ;;  %vm1739_vm14 = vcmp.eq.f32.partialorder %v1738_v2, 8.507059e+37  ;;  %v8010_v2 = vld [vmem:[%s11001_s2 + $0x158] sm:$0xff] }
 0x375   :  { %v1576_v37 = vsel %vm1573_vm1, %v1575_v28, %v1571_v32  ;;  %v1590_v42 = vsel %vm1589_vm2, %v3776_v50, %v1586_v30  ;;  %v1604_v44 = vsub.f32 1.0, %v1603_v12  ;;  %v7855_v28 = vld [vmem:[%s11001_s2 + $0x1e0] sm:$0xff]  ;;  %v7869_v12 = vld [vmem:[%s11001_s2 + $0x1f0] sm:$0xff] }
 0x376   :  { %v3788_v45 = vpop.eup %3787  ;;  %v1595_v46 = vsel %vm1592_vm3, %v1594_v23, %v1590_v42  ;;  %v1618_v47 = vmul.f32 %v3786_v58, %v1576_v37  ;;  %3791 = vrcp.f32 %v7810_v36  ;;  %vm1612_vm15 = vcmp.eq.f32.partialorder %v1611_v11, 8.507059e+37  ;;  %v7875_v58 = vld [vmem:[%s11001_s2 + $0x1f8] sm:$0xff]  ;;  %v7887_v32 = vld [vmem:[%s11001_s2 + $0x1c0] sm:$0xff]  ;;  %v7902_v37 = vld [vmem:[%s11001_s2 + $0x1d0] sm:$0xff] }
 0x377   :  { %v3790_v33 = vpop.eup %3789  ;;  %v1617_v48 = vmul.f32 %v1595_v46, %v7557_v55  ;;  %v1711_v49 = vmul.f32 %v3788_v45, %v7797_v59  ;;  %3793 = vtanh.f32 %v1704_v34  ;;  %v1605_v54 = vmul.f32 %v7803_v16, %v1604_v44  ;;  %v7893_v34 = vld [vmem:[%s11001_s2 + $0x1c8] sm:$0xff]  ;;  %v7908_v42 = vld [vmem:[%s11001_s2 + $0x1d8] sm:$0xff]  ;;  %v8016_v11 = vld [vmem:[%s11001_s2 + $0x120] sm:$0xff] }
 0x378   :  { %v1730_v53 = vmul.f32 %v3790_v33, %v7799_v18  ;;  %vm1716_vm6 = vweird.f32 %v3788_v45  ;;  %vm1735_vm7 = vweird.f32 %v3790_v33  ;;  %v1741_v59 = vor.u32 1.1754944e-38, %v1740_v38  ;;  %v7920_v46 = vld [vmem:[%s11001_s2 + $0x1a8] sm:$0xff]  ;;  %v7986_v38 = vld [vmem:[%s11001_s2 + $0x178] sm:$0xff]  ;;  %v8160_v23 = vld [vmem:[%s11001_s2 + $0x60] sm:$0xff] }
 0x379   :  { %v7818_v57 = vadd.f32 %v1618_v47, %v1617_v48  ;;  %v1712_v61 = vsub.f32 1.0, %v1711_v49  ;;  %v1606_v55 = vadd.f32 %v7803_v16, %v1605_v54  ;;  %vm1717_vm11 = vmor %vm1715_vm9, %vm1716_vm6  ;;  %v1760_v27 = vand.u32 2147483648, %v7810_v36  ;;  %v7926_v47 = vld [vmem:[%s11001_s2 + $0x1b0] sm:$0xff]  ;;  %v7944_v54 = vld [vmem:[%s11001_s2 + $0x188] sm:$0xff]  ;;  %12342 = vst [vmem:[#allocation19_spill] sm:$0xff] %v8160_v23 }
 0x37a   :  { %v1731_v15 = vsub.f32 1.0, %v1730_v53  ;;  %vm1736_vm13 = vmor %vm1734_vm8, %vm1735_vm7  ;;  %vm1754_vm1 = vweird.f32 %v7810_v36  ;;  %v1758_v30 = vand.u32 2147483647, %v7810_v36  ;;  %v7938_v53 = vld [vmem:[%s11001_s2 + $0x180] sm:$0xff] }
 0x37b   :  { %3795 = vtanh.f32 %v7818_v57  ;;  %v1713_v25 = vmul.f32 %v3788_v45, %v1712_v61  ;;  %v1610_v13 = vsel %vm7837_vm10, %v7803_v16, %v1606_v55  ;;  %v1761_v44 = vor.u32 1.1754944e-38, %v1760_v27  ;;  %v7980_v55 = vld [vmem:[%s11001_s2 + $0x170] sm:$0xff] }
 0x37c   :  { %v7827_v26 = vpop.eup %3791  ;;  %v1732_v4 = vmul.f32 %v3790_v33, %v1731_v15  ;;  %v1615_v14 = vsel %vm1612_vm15, %v1614_v51, %v1610_v13  ;;  %vm1759_vm3 = vcmp.eq.f32.partialorder %v1758_v30, 8.507059e+37  ;;  %v7964_v15 = vld [vmem:[%s11001_s2 + $0x160] sm:$0xff]  ;;  %v8058_v13 = vld [vmem:[%s11001_s2 + $0x118] sm:$0xff]  ;;  %v8148_v27 = vld [vmem:[%s11001_s2 + $0x90] sm:$0xff] }
 0x37d   :  { %v1714_v0 = vadd.f32 %v3788_v45, %v1713_v25  ;;  %v1750_v50 = vmul.f32 %v7827_v26, %v7810_v36  ;;  %v3794_v56 = vpop.eup %3793  ;;  %vm1755_vm0 = vweird.f32 %v7827_v26  ;;  %v7992_v25 = vld [vmem:[%s11001_s2 + $0x140] sm:$0xff]  ;;  %v8082_v51 = vld [vmem:[%s11001_s2 + $0xf8] sm:$0xff]  ;;  %12340 = vst [vmem:[#allocation17_spill] sm:$0xff] %v8148_v27 }
 0x37e   :  { %v1733_v8 = vadd.f32 %v3790_v33, %v1732_v4  ;;  %vm7880_vm2 = vmor %vm1754_vm1, %vm1755_vm0  ;;  %v8004_v4 = vld [vmem:[%s11001_s2 + $0x150] sm:$0xff]  ;;  %12329 = vst [vmem:[#allocation90_spill] sm:$0xff] %v8082_v51  ;;  %v8154_v30 = vld [vmem:[%s11001_s2 + $0x98] sm:$0xff] }
 0x37f   :  { %v1718_v29 = vsel %vm1717_vm11, %v3788_v45, %v1714_v0  ;;  %v1751_v1 = vsub.f32 1.0, %v1750_v50  ;;  %v7914_v45 = vld [vmem:[%s11001_s2 + $0x1a0] sm:$0xff]  ;;  %v8022_v0 = vld [vmem:[%s11001_s2 + $0x128] sm:$0xff]  ;;  %v8028_v50 = vld [vmem:[%s11001_s2 + $0x130] sm:$0xff]  ;;  %12341 = vst [vmem:[#allocation18_spill] sm:$0xff] %v8154_v30 }
 0x380   :  { %v1723_v18 = vsel %vm1720_vm12, %v1722_v39, %v1718_v29  ;;  %v1737_v17 = vsel %vm1736_vm13, %v3790_v33, %v1733_v8  ;;  %v7932_v33 = vld [vmem:[%s11001_s2 + $0x1b8] sm:$0xff]  ;;  %v8046_v39 = vld [vmem:[%s11001_s2 + $0x108] sm:$0xff]  ;;  %v8052_v8 = vld [vmem:[%s11001_s2 + $0x110] sm:$0xff] }
 0x381   :  { %v3796_v5 = vpop.eup %3795  ;;  %v1742_v6 = vsel %vm1739_vm14, %v1741_v59, %v1737_v17  ;;  %v1765_v9 = vmul.f32 %v3794_v56, %v1723_v18  ;;  %v1752_v10 = vmul.f32 %v7827_v26, %v1751_v1  ;;  %v8040_v56 = vld [vmem:[%s11001_s2 + $0x100] sm:$0xff]  ;;  %v8070_v29 = vld [vmem:[%s11001_s2 + $0xe8] sm:$0xff]  ;;  %v8076_v1 = vld [vmem:[%s11001_s2 + $0xf0] sm:$0xff] }
 0x382   :  { %v1764_v19 = vmul.f32 %v1742_v6, %v7608_v31  ;;  %v1621_v20 = vmul.f32 %v3796_v5, %v1615_v14  ;;  %v7861_v31 = vld [vmem:[%s11001_s2 + $0x1e8] sm:$0xff]  ;;  %v8064_v59 = vld [vmem:[%s11001_s2 + $0xe0] sm:$0xff]  ;;  %12327 = vst [vmem:[#allocation73_spill] sm:$0xff] %v8070_v29  ;;  %v8100_v5 = vld [vmem:[%s11001_s2 + $0xd0] sm:$0xff] }
 0x383   :  { %v1753_v16 = vadd.f32 %v7827_v26, %v1752_v10  ;;  %12326 = vst [vmem:[#allocation72_spill] sm:$0xff] %v8064_v59  ;;  %v8088_v18 = vld [vmem:[%s11001_s2 + $0xc0] sm:$0xff]  ;;  %v8094_v17 = vld [vmem:[%s11001_s2 + $0xc8] sm:$0xff]  ;;  %v8106_v6 = vld [vmem:[%s11001_s2 + $0xd8] sm:$0xff] }
 0x384   :  { %v7846_v22 = vadd.f32 %v1765_v9, %v1764_v19  ;;  %1785 = vmatmul.f32.vlgmr.msrb.gmra.mxu0 %v1621_v20  ;;  %1805 = vmatmul.f32.vlgmr.msrb.gmra.mxu1 %v1621_v20  ;;  %12328 = vst [vmem:[#allocation91_spill] sm:$0xff] %v8076_v1  ;;  %v8112_v9 = vld [vmem:[%s11001_s2 + $0xa0] sm:$0xff]  ;;  %v8118_v10 = vld [vmem:[%s11001_s2 + $0xa8] sm:$0xff]  ;;  %v8124_v14 = vld [vmem:[%s11001_s2 + $0xb0] sm:$0xff] }
 0x385   :  { %1825 = vmatmul.f32.vlgmr.msrb.gmra.mxu2 %v1621_v20  ;;  %1845 = vmatmul.f32.vlgmr.msrb.gmra.mxu3 %v1621_v20  ;;  %v1757_v36 = vsel %vm7880_vm2, %v7827_v26, %v1753_v16  ;;  %v7998_v26 = vld [vmem:[%s11001_s2 + $0x148] sm:$0xff]  ;;  %12330 = vst [vmem:[#allocation8_spill] sm:$0xff] %v8088_v18  ;;  %v8130_v19 = vld [vmem:[%s11001_s2 + $0xb8] sm:$0xff]  ;;  %v8136_v20 = vld [vmem:[%s11001_s2 + $0x80] sm:$0xff] }
 0x386   :  { %3797 = vtanh.f32 %v7846_v22  ;;  %1996 = vmatpush.msrb.mxu0 %v7855_v28  ;;  %2016 = vmatpush.msrb.mxu1 %v7861_v31  ;;  %v1762_v49 = vsel %vm1759_vm3, %v1761_v44, %v1757_v36  ;;  %12331 = vst [vmem:[#allocation7_spill] sm:$0xff] %v8094_v17  ;;  %v8142_v16 = vld [vmem:[%s11001_s2 + $0x88] sm:$0xff]  ;;  %v8172_v44 = vld [vmem:[%s11001_s2 + $0x70] sm:$0xff] }
 0x387   :  { %2036 = vmatpush.msrb.mxu2 %v7869_v12  ;;  %2056 = vmatpush.msrb.mxu3 %v7875_v58  ;;  %12332 = vst [vmem:[#allocation9_spill] sm:$0xff] %v8100_v5  ;;  %v8166_v36 = vld [vmem:[%s11001_s2 + $0x68] sm:$0xff] }
 0x388   :  { %1997 = vmatpush.msrb.mxu0 %v7887_v32  ;;  %2017 = vmatpush.msrb.mxu1 %v7893_v34  ;;  %12333 = vst [vmem:[#allocation10_spill] sm:$0xff] %v8106_v6 }
 0x389   :  { %2037 = vmatpush.msrb.mxu2 %v7902_v37  ;;  %2057 = vmatpush.msrb.mxu3 %v7908_v42  ;;  %12334 = vst [vmem:[#allocation11_spill] sm:$0xff] %v8112_v9 }
 0x38a   :  { %1998 = vmatpush.msrb.mxu0 %v7914_v45  ;;  %2018 = vmatpush.msrb.mxu1 %v7920_v46  ;;  %12335 = vst [vmem:[#allocation12_spill] sm:$0xff] %v8118_v10 }
 0x38b   :  { %2038 = vmatpush.msrb.mxu2 %v7926_v47  ;;  %2058 = vmatpush.msrb.mxu3 %v7932_v33  ;;  %12336 = vst [vmem:[#allocation13_spill] sm:$0xff] %v8124_v14 }
 0x38c   :  { %v3798_v48 = vpop.eup %3797  ;;  %1999 = vmatpush.msrb.mxu0 %v7938_v53  ;;  %2019 = vmatpush.msrb.mxu1 %v7944_v54  ;;  %12337 = vst [vmem:[#allocation14_spill] sm:$0xff] %v8130_v19 }
 0x38d   :  { %v7947_v61 = vmul.f32 %v3798_v48, %v1762_v49  ;;  %2039 = vmatpush.msrb.mxu2 %v7952_v60  ;;  %2059 = vmatpush.msrb.mxu3 %v7958_v62  ;;  %12338 = vst [vmem:[#allocation15_spill] sm:$0xff] %v8136_v20  ;;  %v8178_v48 = vld [vmem:[%s11001_s2 + $0x78] sm:$0xff]  ;;  %v8184_v49 = vld [vmem:[%s11001_s2 + $0x40] sm:$0xff] }
 0x38e   :  { %2000 = vmatpush.msrb.mxu0 %v7964_v15  ;;  %2020 = vmatpush.msrb.mxu1 %v7970_v43  ;;  %12339 = vst [vmem:[#allocation16_spill] sm:$0xff] %v8142_v16 }
 0x38f   :  { %1865 = vmatmul.f32.vlgmr.msra.gmra.mxu0 %v7947_v61  ;;  %1885 = vmatmul.f32.vlgmr.msra.gmra.mxu1 %v7947_v61  ;;  %12343 = vst [vmem:[#allocation20_spill] sm:$0xff] %v8166_v36 }
 0x390   :  { %1905 = vmatmul.f32.vlgmr.msra.gmra.mxu2 %v7947_v61  ;;  %1925 = vmatmul.f32.vlgmr.msra.gmra.mxu3 %v7947_v61  ;;  %12344 = vst [vmem:[#allocation21_spill] sm:$0xff] %v8172_v44 }
 0x391   :  { %2040 = vmatpush.msrb.mxu2 %v7980_v55  ;;  %2060 = vmatpush.msrb.mxu3 %v7986_v38  ;;  %12345 = vst [vmem:[#allocation22_spill] sm:$0xff] %v8178_v48 }
 0x392   :  { %2001 = vmatpush.msrb.mxu0 %v7992_v25  ;;  %2021 = vmatpush.msrb.mxu1 %v7998_v26  ;;  %12346 = vst [vmem:[#allocation23_spill] sm:$0xff] %v8184_v49 }
 0x393   :  { %2041 = vmatpush.msrb.mxu2 %v8004_v4  ;;  %2061 = vmatpush.msrb.mxu3 %v8010_v2 }
 0x394   :  { %2002 = vmatpush.msrb.mxu0 %v8016_v11  ;;  %2022 = vmatpush.msrb.mxu1 %v8022_v0 }
 0x395   :  { %2042 = vmatpush.msrb.mxu2 %v8028_v50  ;;  %2062 = vmatpush.msrb.mxu3 %v8034_v52 }
 0x396   :  { %2003 = vmatpush.msrb.mxu0 %v8040_v56  ;;  %2023 = vmatpush.msrb.mxu1 %v8046_v39 }
 0x397   :  { %2043 = vmatpush.msrb.mxu2 %v8052_v8  ;;  %2063 = vmatpush.msrb.mxu3 %v8058_v13 }
 0x398   :  { %2004 = vmatpush.msrb.mxu0 %v8064_v59  ;;  %2024 = vmatpush.msrb.mxu1 %v8070_v29 }
 0x399   :  { %2044 = vmatpush.msrb.mxu2 %v8076_v1  ;;  %2064 = vmatpush.msrb.mxu3 %v8082_v51 }
 0x39a   :  { %2005 = vmatpush.msrb.mxu0 %v8088_v18  ;;  %2025 = vmatpush.msrb.mxu1 %v8094_v17 }
 0x39b   :  { %2045 = vmatpush.msrb.mxu2 %v8100_v5  ;;  %2065 = vmatpush.msrb.mxu3 %v8106_v6 }
 0x39c   :  { %2006 = vmatpush.msrb.mxu0 %v8112_v9  ;;  %2026 = vmatpush.msrb.mxu1 %v8118_v10 }
 0x39d   :  { %2046 = vmatpush.msrb.mxu2 %v8124_v14  ;;  %2066 = vmatpush.msrb.mxu3 %v8130_v19 }
 0x39e   :  { %2007 = vmatpush.msrb.mxu0 %v8136_v20  ;;  %2027 = vmatpush.msrb.mxu1 %v8142_v16 }
 0x39f   :  { %2047 = vmatpush.msrb.mxu2 %v8148_v27  ;;  %2067 = vmatpush.msrb.mxu3 %v8154_v30 }
 0x3a0   :  { %2008 = vmatpush.msrb.mxu0 %v8160_v23  ;;  %2028 = vmatpush.msrb.mxu1 %v8166_v36  ;;  %v8190_v36 = vld [vmem:[%s11001_s2 + $0x48] sm:$0xff] }
 0x3a1   :  { %2048 = vmatpush.msrb.mxu2 %v8172_v44  ;;  %2068 = vmatpush.msrb.mxu3 %v8178_v48  ;;  %12347 = vst [vmem:[#allocation24_spill] sm:$0xff] %v8190_v36  ;;  %v8196_v44 = vld [vmem:[%s11001_s2 + $0x50] sm:$0xff]  ;;  %v8202_v48 = vld [vmem:[%s11001_s2 + $0x58] sm:$0xff] }
 0x3a2   :  { %2009 = vmatpush.msrb.mxu0 %v8184_v49  ;;  %2029 = vmatpush.msrb.mxu1 %v8190_v36  ;;  %12348 = vst [vmem:[#allocation25_spill] sm:$0xff] %v8196_v44  ;;  %v8208_v49 = vld [vmem:[%s11001_s2 + $0x20] sm:$0xff]  ;;  %v8214_v36 = vld [vmem:[%s11001_s2 + $0x28] sm:$0xff] }
 0x3a3   :  { %2049 = vmatpush.msrb.mxu2 %v8196_v44  ;;  %12349 = vst [vmem:[#allocation26_spill] sm:$0xff] %v8202_v48  ;;  %2069 = vmatpush.msrb.mxu3 %v8202_v48  ;;  %v8220_v44 = vld [vmem:[%s11001_s2 + $0x30] sm:$0xff]  ;;  %v8226_v48 = vld [vmem:[%s11001_s2 + $0x38] sm:$0xff] }
 0x3a4   :  { %12350 = vst [vmem:[#allocation27_spill] sm:$0xff] %v8208_v49  ;;  %2010 = vmatpush.msrb.mxu0 %v8208_v49  ;;  %2030 = vmatpush.msrb.mxu1 %v8214_v36  ;;  %v8232_v49 = vld [vmem:[%s11001_s2] sm:$0xff] }
 0x3a5   :  { %12351 = vst [vmem:[#allocation28_spill] sm:$0xff] %v8214_v36  ;;  %2050 = vmatpush.msrb.mxu2 %v8220_v44  ;;  %2070 = vmatpush.msrb.mxu3 %v8226_v48  ;;  %v8238_v36 = vld [vmem:[%s11001_s2 + $0x8] sm:$0xff] }
 0x3a6   :  { %12352 = vst [vmem:[#allocation29_spill] sm:$0xff] %v8220_v44  ;;  %2011 = vmatpush.msrb.mxu0 %v8232_v49  ;;  %2031 = vmatpush.msrb.mxu1 %v8238_v36  ;;  %v8244_v44 = vld [vmem:[%s11001_s2 + $0x10] sm:$0xff] }
 0x3a7   :  { %12353 = vst [vmem:[#allocation30_spill] sm:$0xff] %v8226_v48  ;;  %2051 = vmatpush.msrb.mxu2 %v8244_v44  ;;  %v8250_v48 = vld [vmem:[%s11001_s2 + $0x18] sm:$0xff]  ;;  %2012 = vmatmul.f32.vlgmr.msrb.gmra.mxu0 %v7947_v61 }
 0x3a8   :  { %12354 = vst [vmem:[#allocation31_spill] sm:$0xff] %v8232_v49  ;;  %2071 = vmatpush.msrb.mxu3 %v8250_v48  ;;  %2032 = vmatmul.f32.vlgmr.msrb.gmra.mxu1 %v7947_v61 }
 0x3a9   :  { %12355 = vst [vmem:[#allocation32_spill] sm:$0xff] %v8238_v36  ;;  %2052 = vmatmul.f32.vlgmr.msrb.gmra.mxu2 %v7947_v61  ;;  %2072 = vmatmul.f32.vlgmr.msrb.gmra.mxu3 %v7947_v61  ;;  %v8260_v36 = vld [vmem:[%s11002_s5 + $0x1e0] sm:$0xff]  ;;  %v8278_v61 = vld [vmem:[%s11002_s5 + $0x1f8] sm:$0xff] }
 0x3aa   :  { %12356 = vst [vmem:[#allocation33_spill] sm:$0xff] %v8244_v44  ;;  %2143 = vmatpush.msra.mxu0 %v8260_v36  ;;  %v8266_v44 = vld [vmem:[%s11002_s5 + $0x1e8] sm:$0xff]  ;;  %2203 = vmatpush.msra.mxu3 %v8278_v61 }
 0x3ab   :  { %12357 = vst [vmem:[#allocation34_spill] sm:$0xff] %v8250_v48  ;;  %2163 = vmatpush.msra.mxu1 %v8266_v44  ;;  %v8272_v48 = vld [vmem:[%s11002_s5 + $0x1f0] sm:$0xff] }
 0x3ac   :  { %12358 = vst [vmem:[#allocation35_spill] sm:$0xff] %v8260_v36  ;;  %2183 = vmatpush.msra.mxu2 %v8272_v48  ;;  %v8284_v36 = vld [vmem:[%s11002_s5 + $0x1c0] sm:$0xff] }
 0x3ad   :  { %12359 = vst [vmem:[#allocation36_spill] sm:$0xff] %v8266_v44  ;;  %2144 = vmatpush.msra.mxu0 %v8284_v36  ;;  %v8290_v44 = vld [vmem:[%s11002_s5 + $0x1c8] sm:$0xff] }
 0x3ae   :  { %12360 = vst [vmem:[#allocation37_spill] sm:$0xff] %v8272_v48  ;;  %2164 = vmatpush.msra.mxu1 %v8290_v44  ;;  %v8296_v48 = vld [vmem:[%s11002_s5 + $0x1d0] sm:$0xff] }
 0x3af   :  { %12361 = vst [vmem:[#allocation38_spill] sm:$0xff] %v8278_v61  ;;  %2184 = vmatpush.msra.mxu2 %v8296_v48  ;;  %v8302_v61 = vld [vmem:[%s11002_s5 + $0x1d8] sm:$0xff] }
 0x3b0   :  { %12362 = vst [vmem:[#allocation39_spill] sm:$0xff] %v8284_v36  ;;  %2204 = vmatpush.msra.mxu3 %v8302_v61  ;;  %v8308_v36 = vld [vmem:[%s11002_s5 + $0x1a0] sm:$0xff] }
 0x3b1   :  { %12363 = vst [vmem:[#allocation40_spill] sm:$0xff] %v8290_v44  ;;  %2145 = vmatpush.msra.mxu0 %v8308_v36  ;;  %v8314_v44 = vld [vmem:[%s11002_s5 + $0x1a8] sm:$0xff] }
 0x3b2   :  { %12364 = vst [vmem:[#allocation41_spill] sm:$0xff] %v8296_v48  ;;  %2165 = vmatpush.msra.mxu1 %v8314_v44  ;;  %v8320_v48 = vld [vmem:[%s11002_s5 + $0x1b0] sm:$0xff] }
 0x3b3   :  { %12365 = vst [vmem:[#allocation42_spill] sm:$0xff] %v8302_v61  ;;  %2185 = vmatpush.msra.mxu2 %v8320_v48  ;;  %v8326_v61 = vld [vmem:[%s11002_s5 + $0x1b8] sm:$0xff] }
 0x3b4   :  { %12366 = vst [vmem:[#allocation43_spill] sm:$0xff] %v8308_v36  ;;  %2205 = vmatpush.msra.mxu3 %v8326_v61  ;;  %v8332_v36 = vld [vmem:[%s11002_s5 + $0x180] sm:$0xff] }
 0x3b5   :  { %12367 = vst [vmem:[#allocation44_spill] sm:$0xff] %v8314_v44  ;;  %2146 = vmatpush.msra.mxu0 %v8332_v36  ;;  %v8338_v44 = vld [vmem:[%s11002_s5 + $0x188] sm:$0xff] }
 0x3b6   :  { %12368 = vst [vmem:[#allocation45_spill] sm:$0xff] %v8320_v48  ;;  %2166 = vmatpush.msra.mxu1 %v8338_v44  ;;  %v8344_v48 = vld [vmem:[%s11002_s5 + $0x190] sm:$0xff] }
 0x3b7   :  { %12369 = vst [vmem:[#allocation46_spill] sm:$0xff] %v8326_v61  ;;  %2186 = vmatpush.msra.mxu2 %v8344_v48  ;;  %v8350_v61 = vld [vmem:[%s11002_s5 + $0x198] sm:$0xff] }
 0x3b8   :  { %12370 = vst [vmem:[#allocation47_spill] sm:$0xff] %v8332_v36  ;;  %2206 = vmatpush.msra.mxu3 %v8350_v61  ;;  %v8356_v36 = vld [vmem:[%s11002_s5 + $0x160] sm:$0xff] }
 0x3b9   :  { %12371 = vst [vmem:[#allocation48_spill] sm:$0xff] %v8338_v44  ;;  %2147 = vmatpush.msra.mxu0 %v8356_v36  ;;  %v8362_v44 = vld [vmem:[%s11002_s5 + $0x168] sm:$0xff] }
 0x3ba   :  { %12372 = vst [vmem:[#allocation49_spill] sm:$0xff] %v8344_v48  ;;  %2167 = vmatpush.msra.mxu1 %v8362_v44  ;;  %v8368_v48 = vld [vmem:[%s11002_s5 + $0x170] sm:$0xff] }
 0x3bb   :  { %12373 = vst [vmem:[#allocation50_spill] sm:$0xff] %v8350_v61  ;;  %2187 = vmatpush.msra.mxu2 %v8368_v48  ;;  %v8374_v61 = vld [vmem:[%s11002_s5 + $0x178] sm:$0xff] }
 0x3bc   :  { %12374 = vst [vmem:[#allocation51_spill] sm:$0xff] %v8356_v36  ;;  %2207 = vmatpush.msra.mxu3 %v8374_v61  ;;  %v8380_v36 = vld [vmem:[%s11002_s5 + $0x140] sm:$0xff] }
 0x3bd   :  { %12375 = vst [vmem:[#allocation54_spill] sm:$0xff] %v8362_v44  ;;  %2148 = vmatpush.msra.mxu0 %v8380_v36  ;;  %v8386_v44 = vld [vmem:[%s11002_s5 + $0x148] sm:$0xff] }
 0x3be   :  { %12376 = vst [vmem:[#allocation55_spill] sm:$0xff] %v8368_v48  ;;  %2168 = vmatpush.msra.mxu1 %v8386_v44  ;;  %v8392_v48 = vld [vmem:[%s11002_s5 + $0x150] sm:$0xff] }
 0x3bf   :  { %12377 = vst [vmem:[#allocation56_spill] sm:$0xff] %v8374_v61  ;;  %2188 = vmatpush.msra.mxu2 %v8392_v48  ;;  %v8398_v61 = vld [vmem:[%s11002_s5 + $0x158] sm:$0xff] }
 0x3c0   :  { %12378 = vst [vmem:[#allocation57_spill] sm:$0xff] %v8380_v36  ;;  %2208 = vmatpush.msra.mxu3 %v8398_v61  ;;  %v8404_v36 = vld [vmem:[%s11002_s5 + $0x120] sm:$0xff] }
 0x3c1   :  { %12379 = vst [vmem:[#allocation58_spill] sm:$0xff] %v8386_v44  ;;  %2149 = vmatpush.msra.mxu0 %v8404_v36  ;;  %v8410_v44 = vld [vmem:[%s11002_s5 + $0x128] sm:$0xff] }
 0x3c2   :  { %12380 = vst [vmem:[#allocation59_spill] sm:$0xff] %v8392_v48  ;;  %2169 = vmatpush.msra.mxu1 %v8410_v44  ;;  %v8416_v48 = vld [vmem:[%s11002_s5 + $0x130] sm:$0xff] }
 0x3c3   :  { %12381 = vst [vmem:[#allocation60_spill] sm:$0xff] %v8398_v61  ;;  %2189 = vmatpush.msra.mxu2 %v8416_v48  ;;  %v8422_v61 = vld [vmem:[%s11002_s5 + $0x138] sm:$0xff] }
 0x3c4   :  { %12382 = vst [vmem:[#allocation61_spill] sm:$0xff] %v8404_v36  ;;  %2209 = vmatpush.msra.mxu3 %v8422_v61  ;;  %v8428_v36 = vld [vmem:[%s11002_s5 + $0x100] sm:$0xff] }
 0x3c5   :  { %12383 = vst [vmem:[#allocation62_spill] sm:$0xff] %v8410_v44  ;;  %2150 = vmatpush.msra.mxu0 %v8428_v36  ;;  %v8434_v44 = vld [vmem:[%s11002_s5 + $0x108] sm:$0xff] }
 0x3c6   :  { %12384 = vst [vmem:[#allocation63_spill] sm:$0xff] %v8416_v48  ;;  %2170 = vmatpush.msra.mxu1 %v8434_v44  ;;  %v8440_v48 = vld [vmem:[%s11002_s5 + $0x110] sm:$0xff] }
 0x3c7   :  { %12385 = vst [vmem:[#allocation64_spill] sm:$0xff] %v8422_v61  ;;  %2190 = vmatpush.msra.mxu2 %v8440_v48  ;;  %v8446_v61 = vld [vmem:[%s11002_s5 + $0x118] sm:$0xff] }
 0x3c8   :  { %12386 = vst [vmem:[#allocation65_spill] sm:$0xff] %v8428_v36  ;;  %2210 = vmatpush.msra.mxu3 %v8446_v61  ;;  %v8452_v36 = vld [vmem:[%s11002_s5 + $0xe0] sm:$0xff] }
 0x3c9   :  { %12387 = vst [vmem:[#allocation66_spill] sm:$0xff] %v8434_v44  ;;  %2151 = vmatpush.msra.mxu0 %v8452_v36  ;;  %v8458_v44 = vld [vmem:[%s11002_s5 + $0xe8] sm:$0xff] }
 0x3ca   :  { %12388 = vst [vmem:[#allocation69_spill] sm:$0xff] %v8440_v48  ;;  %2171 = vmatpush.msra.mxu1 %v8458_v44  ;;  %v8464_v48 = vld [vmem:[%s11002_s5 + $0xf0] sm:$0xff] }
 0x3cb   :  { %12389 = vst [vmem:[#allocation70_spill] sm:$0xff] %v8446_v61  ;;  %2191 = vmatpush.msra.mxu2 %v8464_v48  ;;  %v8470_v61 = vld [vmem:[%s11002_s5 + $0xf8] sm:$0xff] }
 0x3cc   :  { %12390 = vst [vmem:[#allocation71_spill] sm:$0xff] %v8452_v36  ;;  %2211 = vmatpush.msra.mxu3 %v8470_v61  ;;  %v8476_v36 = vld [vmem:[%s11002_s5 + $0xc0] sm:$0xff] }
 0x3cd   :  { %12391 = vst [vmem:[#allocation74_spill] sm:$0xff] %v8458_v44  ;;  %2152 = vmatpush.msra.mxu0 %v8476_v36  ;;  %v8482_v44 = vld [vmem:[%s11002_s5 + $0xc8] sm:$0xff] }
 0x3ce   :  { %12392 = vst [vmem:[#allocation75_spill] sm:$0xff] %v8464_v48  ;;  %2172 = vmatpush.msra.mxu1 %v8482_v44  ;;  %v8488_v48 = vld [vmem:[%s11002_s5 + $0xd0] sm:$0xff] }
 0x3cf   :  { %12393 = vst [vmem:[#allocation76_spill] sm:$0xff] %v8470_v61  ;;  %2192 = vmatpush.msra.mxu2 %v8488_v48  ;;  %v8494_v61 = vld [vmem:[%s11002_s5 + $0xd8] sm:$0xff] }
 0x3d0   :  { %12394 = vst [vmem:[#allocation77_spill] sm:$0xff] %v8476_v36  ;;  %2212 = vmatpush.msra.mxu3 %v8494_v61  ;;  %v8500_v36 = vld [vmem:[%s11002_s5 + $0xa0] sm:$0xff] }
 0x3d1   :  { %12395 = vst [vmem:[#allocation78_spill] sm:$0xff] %v8482_v44  ;;  %2153 = vmatpush.msra.mxu0 %v8500_v36  ;;  %v8506_v44 = vld [vmem:[%s11002_s5 + $0xa8] sm:$0xff] }
 0x3d2   :  { %12396 = vst [vmem:[#allocation79_spill] sm:$0xff] %v8488_v48  ;;  %2173 = vmatpush.msra.mxu1 %v8506_v44  ;;  %v8512_v48 = vld [vmem:[%s11002_s5 + $0xb0] sm:$0xff] }
 0x3d3   :  { %12397 = vst [vmem:[#allocation80_spill] sm:$0xff] %v8494_v61  ;;  %2193 = vmatpush.msra.mxu2 %v8512_v48  ;;  %v8518_v61 = vld [vmem:[%s11002_s5 + $0xb8] sm:$0xff] }
 0x3d4   :  { %12398 = vst [vmem:[#allocation81_spill] sm:$0xff] %v8500_v36  ;;  %2213 = vmatpush.msra.mxu3 %v8518_v61  ;;  %v8524_v36 = vld [vmem:[%s11002_s5 + $0x80] sm:$0xff] }
 0x3d5   :  { %12399 = vst [vmem:[#allocation82_spill] sm:$0xff] %v8506_v44  ;;  %2154 = vmatpush.msra.mxu0 %v8524_v36  ;;  %v8530_v44 = vld [vmem:[%s11002_s5 + $0x88] sm:$0xff] }
 0x3d6   :  { %12400 = vst [vmem:[#allocation83_spill] sm:$0xff] %v8512_v48  ;;  %2174 = vmatpush.msra.mxu1 %v8530_v44  ;;  %v8536_v48 = vld [vmem:[%s11002_s5 + $0x90] sm:$0xff] }
 0x3d7   :  { %12401 = vst [vmem:[#allocation84_spill] sm:$0xff] %v8518_v61  ;;  %2194 = vmatpush.msra.mxu2 %v8536_v48  ;;  %v8542_v61 = vld [vmem:[%s11002_s5 + $0x98] sm:$0xff] }
 0x3d8   :  { %12402 = vst [vmem:[#allocation85_spill] sm:$0xff] %v8524_v36  ;;  %2214 = vmatpush.msra.mxu3 %v8542_v61  ;;  %v8548_v36 = vld [vmem:[%s11002_s5 + $0x60] sm:$0xff] }
 0x3d9   :  { %12403 = vst [vmem:[#allocation86_spill] sm:$0xff] %v8530_v44  ;;  %2155 = vmatpush.msra.mxu0 %v8548_v36  ;;  %v8554_v44 = vld [vmem:[%s11002_s5 + $0x68] sm:$0xff] }
 0x3da   :  { %12404 = vst [vmem:[#allocation87_spill] sm:$0xff] %v8536_v48  ;;  %2175 = vmatpush.msra.mxu1 %v8554_v44  ;;  %v8560_v48 = vld [vmem:[%s11002_s5 + $0x70] sm:$0xff] }
 0x3db   :  { %12405 = vst [vmem:[#allocation88_spill] sm:$0xff] %v8542_v61  ;;  %2195 = vmatpush.msra.mxu2 %v8560_v48  ;;  %v8566_v61 = vld [vmem:[%s11002_s5 + $0x78] sm:$0xff] }
 0x3dc   :  { %12406 = vst [vmem:[#allocation89_spill] sm:$0xff] %v8548_v36  ;;  %2215 = vmatpush.msra.mxu3 %v8566_v61  ;;  %v8572_v36 = vld [vmem:[%s11002_s5 + $0x40] sm:$0xff] }
 0x3dd   :  { %12407 = vst [vmem:[#allocation92_spill] sm:$0xff] %v8554_v44  ;;  %2156 = vmatpush.msra.mxu0 %v8572_v36  ;;  %v8578_v44 = vld [vmem:[%s11002_s5 + $0x48] sm:$0xff] }
 0x3de   :  { %12408 = vst [vmem:[#allocation95_spill] sm:$0xff] %v8560_v48  ;;  %2176 = vmatpush.msra.mxu1 %v8578_v44  ;;  %v8584_v48 = vld [vmem:[%s11002_s5 + $0x50] sm:$0xff] }
 0x3df   :  { %12409 = vst [vmem:[#allocation96_spill] sm:$0xff] %v8566_v61  ;;  %2196 = vmatpush.msra.mxu2 %v8584_v48  ;;  %v8590_v61 = vld [vmem:[%s11002_s5 + $0x58] sm:$0xff] }
 0x3e0   :  { %12410 = vst [vmem:[#allocation97_spill] sm:$0xff] %v8572_v36  ;;  %2216 = vmatpush.msra.mxu3 %v8590_v61  ;;  %v8596_v36 = vld [vmem:[%s11002_s5 + $0x20] sm:$0xff] }
 0x3e1   :  { %12411 = vst [vmem:[#allocation98_spill] sm:$0xff] %v8578_v44  ;;  %2157 = vmatpush.msra.mxu0 %v8596_v36  ;;  %v8602_v44 = vld [vmem:[%s11002_s5 + $0x28] sm:$0xff] }
 0x3e2   :  { %12412 = vst [vmem:[#allocation99_spill] sm:$0xff] %v8584_v48  ;;  %2177 = vmatpush.msra.mxu1 %v8602_v44  ;;  %v8608_v48 = vld [vmem:[%s11002_s5 + $0x30] sm:$0xff] }
 0x3e3   :  { %12413 = vst [vmem:[#allocation100_spill] sm:$0xff] %v8590_v61  ;;  %2197 = vmatpush.msra.mxu2 %v8608_v48  ;;  %v8614_v61 = vld [vmem:[%s11002_s5 + $0x38] sm:$0xff] }
 0x3e4   :  { %12414 = vst [vmem:[#allocation101_spill] sm:$0xff] %v8596_v36  ;;  %2217 = vmatpush.msra.mxu3 %v8614_v61  ;;  %v8620_v36 = vld [vmem:[%s11002_s5] sm:$0xff] }
 0x3e5   :  { %12415 = vst [vmem:[#allocation102_spill] sm:$0xff] %v8602_v44  ;;  %2158 = vmatpush.msra.mxu0 %v8620_v36  ;;  %v8626_v44 = vld [vmem:[%s11002_s5 + $0x8] sm:$0xff] }
 0x3e6   :  { %12416 = vst [vmem:[#allocation103_spill] sm:$0xff] %v8608_v48  ;;  %2178 = vmatpush.msra.mxu1 %v8626_v44  ;;  %v8632_v48 = vld [vmem:[%s11002_s5 + $0x10] sm:$0xff] }
 0x3e7   :  { %12417 = vst [vmem:[#allocation104_spill] sm:$0xff] %v8614_v61  ;;  %2198 = vmatpush.msra.mxu2 %v8632_v48  ;;  %v8638_v61 = vld [vmem:[%s11002_s5 + $0x18] sm:$0xff] }
 0x3e8   :  { %12418 = vst [vmem:[#allocation105_spill] sm:$0xff] %v8620_v36  ;;  %2218 = vmatpush.msra.mxu3 %v8638_v61  ;;  %v8644_v36 = vld [vmem:[%s11003_s4 + $0x1e0] sm:$0xff] }
 0x3e9   :  { %12419 = vst [vmem:[#allocation106_spill] sm:$0xff] %v8626_v44  ;;  %2223 = vmatpush.msrb.mxu0 %v8644_v36  ;;  %v8650_v44 = vld [vmem:[%s11003_s4 + $0x1e8] sm:$0xff] }
 0x3ea   :  { %12420 = vst [vmem:[#allocation109_spill] sm:$0xff] %v8632_v48  ;;  %2243 = vmatpush.msrb.mxu1 %v8650_v44  ;;  %v8656_v48 = vld [vmem:[%s11003_s4 + $0x1f0] sm:$0xff] }
 0x3eb   :  { %12421 = vst [vmem:[#allocation112_spill] sm:$0xff] %v8638_v61  ;;  %2263 = vmatpush.msrb.mxu2 %v8656_v48  ;;  %v8662_v61 = vld [vmem:[%s11003_s4 + $0x1f8] sm:$0xff] }
 0x3ec   :  { %12422 = vst [vmem:[#allocation113_spill] sm:$0xff] %v8644_v36  ;;  %2283 = vmatpush.msrb.mxu3 %v8662_v61  ;;  %v8668_v36 = vld [vmem:[%s11003_s4 + $0x1c0] sm:$0xff] }
 0x3ed   :  { %12423 = vst [vmem:[#allocation114_spill] sm:$0xff] %v8650_v44  ;;  %2224 = vmatpush.msrb.mxu0 %v8668_v36  ;;  %v8674_v44 = vld [vmem:[%s11003_s4 + $0x1c8] sm:$0xff] }
 0x3ee   :  { %12424 = vst [vmem:[#allocation115_spill] sm:$0xff] %v8656_v48  ;;  %2244 = vmatpush.msrb.mxu1 %v8674_v44  ;;  %v8680_v48 = vld [vmem:[%s11003_s4 + $0x1d0] sm:$0xff] }
 0x3ef   :  { %12425 = vst [vmem:[#allocation116_spill] sm:$0xff] %v8662_v61  ;;  %2264 = vmatpush.msrb.mxu2 %v8680_v48  ;;  %v8686_v61 = vld [vmem:[%s11003_s4 + $0x1d8] sm:$0xff] }
 0x3f0   :  { %12426 = vst [vmem:[#allocation117_spill] sm:$0xff] %v8668_v36  ;;  %2284 = vmatpush.msrb.mxu3 %v8686_v61  ;;  %v8692_v36 = vld [vmem:[%s11003_s4 + $0x1a0] sm:$0xff] }
 0x3f1   :  { %12427 = vst [vmem:[#allocation118_spill] sm:$0xff] %v8674_v44  ;;  %2225 = vmatpush.msrb.mxu0 %v8692_v36  ;;  %v8698_v44 = vld [vmem:[%s11003_s4 + $0x1a8] sm:$0xff] }
 0x3f2   :  { %12428 = vst [vmem:[#allocation119_spill] sm:$0xff] %v8680_v48  ;;  %2245 = vmatpush.msrb.mxu1 %v8698_v44  ;;  %v8704_v48 = vld [vmem:[%s11003_s4 + $0x1b0] sm:$0xff] }
 0x3f3   :  { %12429 = vst [vmem:[#allocation120_spill] sm:$0xff] %v8686_v61  ;;  %2265 = vmatpush.msrb.mxu2 %v8704_v48  ;;  %v8710_v61 = vld [vmem:[%s11003_s4 + $0x1b8] sm:$0xff] }
 0x3f4   :  { %12430 = vst [vmem:[#allocation121_spill] sm:$0xff] %v8692_v36  ;;  %2285 = vmatpush.msrb.mxu3 %v8710_v61  ;;  %v8716_v36 = vld [vmem:[%s11003_s4 + $0x180] sm:$0xff] }
 0x3f5   :  { %12431 = vst [vmem:[#allocation122_spill] sm:$0xff] %v8698_v44  ;;  %2226 = vmatpush.msrb.mxu0 %v8716_v36  ;;  %v8722_v44 = vld [vmem:[%s11003_s4 + $0x188] sm:$0xff] }
 0x3f6   :  { %12432 = vst [vmem:[#allocation123_spill] sm:$0xff] %v8704_v48  ;;  %2246 = vmatpush.msrb.mxu1 %v8722_v44  ;;  %v8728_v48 = vld [vmem:[%s11003_s4 + $0x190] sm:$0xff] }
 0x3f7   :  { %12433 = vst [vmem:[#allocation125_spill] sm:$0xff] %v8710_v61  ;;  %2266 = vmatpush.msrb.mxu2 %v8728_v48  ;;  %v8734_v61 = vld [vmem:[%s11003_s4 + $0x198] sm:$0xff] }
 0x3f8   :  { %12434 = vst [vmem:[#allocation126_spill] sm:$0xff] %v8716_v36  ;;  %2286 = vmatpush.msrb.mxu3 %v8734_v61  ;;  %v8740_v36 = vld [vmem:[%s11003_s4 + $0x160] sm:$0xff] }
 0x3f9   :  { %12435 = vst [vmem:[#allocation127_spill] sm:$0xff] %v8722_v44  ;;  %2227 = vmatpush.msrb.mxu0 %v8740_v36  ;;  %v8746_v44 = vld [vmem:[%s11003_s4 + $0x168] sm:$0xff] }
 0x3fa   :  { %12436 = vst [vmem:[#allocation130_spill] sm:$0xff] %v8728_v48  ;;  %2247 = vmatpush.msrb.mxu1 %v8746_v44  ;;  %v8752_v48 = vld [vmem:[%s11003_s4 + $0x170] sm:$0xff] }
 0x3fb   :  { %12437 = vst [vmem:[#allocation132_spill] sm:$0xff] %v8734_v61  ;;  %2267 = vmatpush.msrb.mxu2 %v8752_v48  ;;  %v8758_v61 = vld [vmem:[%s11003_s4 + $0x178] sm:$0xff] }
 0x3fc   :  { %12438 = vst [vmem:[#allocation133_spill] sm:$0xff] %v8740_v36  ;;  %2287 = vmatpush.msrb.mxu3 %v8758_v61  ;;  %v8764_v36 = vld [vmem:[%s11003_s4 + $0x140] sm:$0xff] }
 0x3fd   :  { %12439 = vst [vmem:[#allocation134_spill] sm:$0xff] %v8746_v44  ;;  %2228 = vmatpush.msrb.mxu0 %v8764_v36  ;;  %v8770_v44 = vld [vmem:[%s11003_s4 + $0x148] sm:$0xff] }
 0x3fe   :  { %12440 = vst [vmem:[#allocation135_spill] sm:$0xff] %v8752_v48  ;;  %2248 = vmatpush.msrb.mxu1 %v8770_v44  ;;  %v8776_v48 = vld [vmem:[%s11003_s4 + $0x150] sm:$0xff] }
 0x3ff   :  { %12441 = vst [vmem:[#allocation136_spill] sm:$0xff] %v8758_v61  ;;  %2268 = vmatpush.msrb.mxu2 %v8776_v48  ;;  %v8782_v61 = vld [vmem:[%s11003_s4 + $0x158] sm:$0xff] }
 0x400   :  { %12442 = vst [vmem:[#allocation137_spill] sm:$0xff] %v8764_v36  ;;  %2288 = vmatpush.msrb.mxu3 %v8782_v61  ;;  %v8788_v36 = vld [vmem:[%s11003_s4 + $0x120] sm:$0xff] }
 0x401   :  { %12443 = vst [vmem:[#allocation138_spill] sm:$0xff] %v8770_v44  ;;  %2229 = vmatpush.msrb.mxu0 %v8788_v36  ;;  %v8794_v44 = vld [vmem:[%s11003_s4 + $0x128] sm:$0xff]  ;;  %v1806_v49 = vpop.f32.mrf.mxu1 }
 0x402   :  { %12444 = vst [vmem:[#allocation139_spill] sm:$0xff] %v8776_v48  ;;  %2249 = vmatpush.msrb.mxu1 %v8794_v44  ;;  %v8800_v48 = vld [vmem:[%s11003_s4 + $0x130] sm:$0xff] }
 0x403   :  { %12445 = vst [vmem:[#allocation140_spill] sm:$0xff] %v8782_v61  ;;  %2269 = vmatpush.msrb.mxu2 %v8800_v48  ;;  %v8806_v61 = vld [vmem:[%s11003_s4 + $0x138] sm:$0xff] }
 0x404   :  { %12446 = vst [vmem:[#allocation141_spill] sm:$0xff] %v8788_v36  ;;  %2289 = vmatpush.msrb.mxu3 %v8806_v61  ;;  %v8812_v36 = vld [vmem:[%s11003_s4 + $0x100] sm:$0xff] }
 0x405   :  { %12447 = vst [vmem:[#allocation142_spill] sm:$0xff] %v8794_v44  ;;  %2230 = vmatpush.msrb.mxu0 %v8812_v36  ;;  %v8818_v44 = vld [vmem:[%s11003_s4 + $0x108] sm:$0xff] }
 0x406   :  { %12448 = vst [vmem:[#allocation143_spill] sm:$0xff] %v8800_v48  ;;  %2250 = vmatpush.msrb.mxu1 %v8818_v44  ;;  %v8824_v48 = vld [vmem:[%s11003_s4 + $0x110] sm:$0xff] }
 0x407   :  { %12449 = vst [vmem:[#allocation145_spill] sm:$0xff] %v8806_v61  ;;  %2270 = vmatpush.msrb.mxu2 %v8824_v48  ;;  %v8830_v61 = vld [vmem:[%s11003_s4 + $0x118] sm:$0xff] }
 0x408   :  { %12450 = vst [vmem:[#allocation146_spill] sm:$0xff] %v8812_v36  ;;  %2290 = vmatpush.msrb.mxu3 %v8830_v61  ;;  %v8836_v36 = vld [vmem:[%s11003_s4 + $0xe0] sm:$0xff]  ;;  %v1846_v23 = vpop.f32.mrf.mxu3  ;;  %v1826_v14 = vpop.f32.mrf.mxu2 }
 0x409   :  { %12451 = vst [vmem:[#allocation147_spill] sm:$0xff] %v8818_v44  ;;  %2231 = vmatpush.msrb.mxu0 %v8836_v36  ;;  %v8842_v44 = vld [vmem:[%s11003_s4 + $0xe8] sm:$0xff] }
 0x40a   :  { %12452 = vst [vmem:[#allocation150_spill] sm:$0xff] %v8824_v48  ;;  %2251 = vmatpush.msrb.mxu1 %v8842_v44  ;;  %v8848_v48 = vld [vmem:[%s11003_s4 + $0xf0] sm:$0xff] }
 0x40b   :  { %12453 = vst [vmem:[#allocation151_spill] sm:$0xff] %v8830_v61  ;;  %2271 = vmatpush.msrb.mxu2 %v8848_v48  ;;  %v8854_v61 = vld [vmem:[%s11003_s4 + $0xf8] sm:$0xff] }
 0x40c   :  { %12454 = vst [vmem:[#allocation152_spill] sm:$0xff] %v8836_v36  ;;  %2291 = vmatpush.msrb.mxu3 %v8854_v61  ;;  %v8860_v36 = vld [vmem:[%s11003_s4 + $0xc0] sm:$0xff]  ;;  %v1886_v27 = vpop.f32.mrf.mxu1 }
 0x40d   :  { %12455 = vst [vmem:[#allocation153_spill] sm:$0xff] %v8842_v44  ;;  %2232 = vmatpush.msrb.mxu0 %v8860_v36  ;;  %v8866_v44 = vld [vmem:[%s11003_s4 + $0xc8] sm:$0xff]  ;;  %v1887_v16 = vadd.f32 %v1886_v27, %v1806_v49 }
 0x40e   :  { %12456 = vst [vmem:[#allocation154_spill] sm:$0xff] %v8848_v48  ;;  %2252 = vmatpush.msrb.mxu1 %v8866_v44  ;;  %v8872_v48 = vld [vmem:[%s11003_s4 + $0xd0] sm:$0xff] }
 0x40f   :  { %12457 = vst [vmem:[#allocation156_spill] sm:$0xff] %v8854_v61  ;;  %2272 = vmatpush.msrb.mxu2 %v8872_v48  ;;  %v8878_v61 = vld [vmem:[%s11003_s4 + $0xd8] sm:$0xff]  ;;  %v1930_v19 = vadd.f32 %v1887_v16, %v12312_v3 }
 0x410   :  { %12458 = vst [vmem:[#allocation157_spill] sm:$0xff] %v8860_v36  ;;  %2292 = vmatpush.msrb.mxu3 %v8878_v61  ;;  %v8884_v36 = vld [vmem:[%s11003_s4 + $0xa0] sm:$0xff] }
 0x411   :  { %12459 = vst [vmem:[#allocation158_spill] sm:$0xff] %v8866_v44  ;;  %2233 = vmatpush.msrb.mxu0 %v8884_v36  ;;  %v8890_v44 = vld [vmem:[%s11003_s4 + $0xa8] sm:$0xff]  ;;  %v3655_v10 = vmul.f32 -1.442695, %v1930_v19 }
 0x412   :  { %12460 = vst [vmem:[#allocation159_spill] sm:$0xff] %v8872_v48  ;;  %2253 = vmatpush.msrb.mxu1 %v8890_v44  ;;  %v8896_v48 = vld [vmem:[%s11003_s4 + $0xb0] sm:$0xff] }
 0x413   :  { %12461 = vst [vmem:[#allocation160_spill] sm:$0xff] %v8878_v61  ;;  %2273 = vmatpush.msrb.mxu2 %v8896_v48  ;;  %v8902_v61 = vld [vmem:[%s11003_s4 + $0xb8] sm:$0xff]  ;;  %v1926_v9 = vpop.f32.mrf.mxu3  ;;  %v1906_v1 = vpop.f32.mrf.mxu2 }
 0x414   :  { %12462 = vst [vmem:[#allocation161_spill] sm:$0xff] %v8884_v36  ;;  %2293 = vmatpush.msrb.mxu3 %v8902_v61  ;;  %v8908_v36 = vld [vmem:[%s11003_s4 + $0x80] sm:$0xff]  ;;  %v1927_v6 = vadd.f32 %v1926_v9, %v1846_v23 }
 0x415   :  { %12463 = vst [vmem:[#allocation162_spill] sm:$0xff] %v8890_v44  ;;  %2234 = vmatpush.msrb.mxu0 %v8908_v36  ;;  %v8914_v44 = vld [vmem:[%s11003_s4 + $0x88] sm:$0xff] }
 0x416   :  { %12464 = vst [vmem:[#allocation52_spill] sm:$0xff] %v8896_v48  ;;  %2254 = vmatpush.msrb.mxu1 %v8914_v44  ;;  %v8920_v48 = vld [vmem:[%s11003_s4 + $0x90] sm:$0xff] }
 0x417   :  { %12465 = vst [vmem:[#allocation53_spill] sm:$0xff] %v8902_v61  ;;  %2274 = vmatpush.msrb.mxu2 %v8920_v48  ;;  %v8926_v61 = vld [vmem:[%s11003_s4 + $0x98] sm:$0xff] }
 0x418   :  { %12466 = vst [vmem:[#allocation68_spill] sm:$0xff] %v8908_v36  ;;  %2294 = vmatpush.msrb.mxu3 %v8926_v61  ;;  %v8932_v36 = vld [vmem:[%s11003_s4 + $0x60] sm:$0xff] }
 0x419   :  { %12467 = vst [vmem:[#allocation67_spill] sm:$0xff] %v8914_v44  ;;  %2235 = vmatpush.msrb.mxu0 %v8932_v36  ;;  %v8938_v44 = vld [vmem:[%s11003_s4 + $0x68] sm:$0xff] }
 0x41a   :  { %12468 = vst [vmem:[#allocation172_spill] sm:$0xff] %v8920_v48  ;;  %2255 = vmatpush.msrb.mxu1 %v8938_v44  ;;  %v8944_v48 = vld [vmem:[%s11003_s4 + $0x70] sm:$0xff] }
 0x41b   :  { %12469 = vst [vmem:[#allocation173_spill] sm:$0xff] %v8926_v61  ;;  %2275 = vmatpush.msrb.mxu2 %v8944_v48  ;;  %v8950_v61 = vld [vmem:[%s11003_s4 + $0x78] sm:$0xff] }
 0x41c   :  { %12470 = vst [vmem:[#allocation174_spill] sm:$0xff] %v8932_v36  ;;  %2295 = vmatpush.msrb.mxu3 %v8950_v61  ;;  %v8956_v36 = vld [vmem:[%s11003_s4 + $0x40] sm:$0xff] }
 0x41d   :  { %12471 = vst [vmem:[#allocation175_spill] sm:$0xff] %v8938_v44  ;;  %2236 = vmatpush.msrb.mxu0 %v8956_v36  ;;  %v8962_v44 = vld [vmem:[%s11003_s4 + $0x48] sm:$0xff] }
 0x41e   :  { %12472 = vst [vmem:[#allocation176_spill] sm:$0xff] %v8944_v48  ;;  %2256 = vmatpush.msrb.mxu1 %v8962_v44  ;;  %v8968_v48 = vld [vmem:[%s11003_s4 + $0x50] sm:$0xff] }
 0x41f   :  { %12473 = vst [vmem:[#allocation177_spill] sm:$0xff] %v8950_v61  ;;  %2276 = vmatpush.msrb.mxu2 %v8968_v48  ;;  %v8974_v61 = vld [vmem:[%s11003_s4 + $0x58] sm:$0xff] }
 0x420   :  { %12474 = vst [vmem:[#allocation178_spill] sm:$0xff] %v8956_v36  ;;  %2296 = vmatpush.msrb.mxu3 %v8974_v61  ;;  %v8980_v36 = vld [vmem:[%s11003_s4 + $0x20] sm:$0xff] }
 0x421   :  { %12475 = vst [vmem:[#allocation179_spill] sm:$0xff] %v8962_v44  ;;  %2237 = vmatpush.msrb.mxu0 %v8980_v36  ;;  %v8986_v44 = vld [vmem:[%s11003_s4 + $0x28] sm:$0xff] }
 0x422   :  { %12476 = vst [vmem:[#allocation180_spill] sm:$0xff] %v8968_v48  ;;  %2257 = vmatpush.msrb.mxu1 %v8986_v44  ;;  %v8992_v48 = vld [vmem:[%s11003_s4 + $0x30] sm:$0xff] }
 0x423   :  { %12477 = vst [vmem:[#allocation181_spill] sm:$0xff] %v8974_v61  ;;  %2277 = vmatpush.msrb.mxu2 %v8992_v48  ;;  %v8998_v61 = vld [vmem:[%s11003_s4 + $0x38] sm:$0xff] }
 0x424   :  { %12478 = vst [vmem:[#allocation182_spill] sm:$0xff] %v8980_v36  ;;  %2297 = vmatpush.msrb.mxu3 %v8998_v61  ;;  %v9004_v36 = vld [vmem:[%s11003_s4] sm:$0xff] }
 0x425   :  { %12479 = vst [vmem:[#allocation183_spill] sm:$0xff] %v8986_v44  ;;  %2238 = vmatpush.msrb.mxu0 %v9004_v36  ;;  %v9010_v44 = vld [vmem:[%s11003_s4 + $0x8] sm:$0xff] }
 0x426   :  { %12480 = vst [vmem:[#allocation184_spill] sm:$0xff] %v8992_v48  ;;  %2258 = vmatpush.msrb.mxu1 %v9010_v44  ;;  %v9016_v48 = vld [vmem:[%s11003_s4 + $0x10] sm:$0xff] }
 0x427   :  { %12481 = vst [vmem:[#allocation185_spill] sm:$0xff] %v8998_v61  ;;  %2278 = vmatpush.msrb.mxu2 %v9016_v48  ;;  %v9022_v61 = vld [vmem:[%s11003_s4 + $0x18] sm:$0xff] }
 0x428   :  { %12482 = vst [vmem:[#allocation186_spill] sm:$0xff] %v9004_v36  ;;  %2298 = vmatpush.msrb.mxu3 %v9022_v61  ;;  %v1786_v36 = vpop.f32.mrf.mxu0 }
 0x429   :  { %12483 = vst [vmem:[#allocation187_spill] sm:$0xff] %v9010_v44 }
 0x42a   :  { %12484 = vst [vmem:[#allocation188_spill] sm:$0xff] %v9016_v48 }
 0x42b   :  { %12485 = vst [vmem:[#allocation189_spill] sm:$0xff] %v9022_v61  ;;  %v1932_v61 = vadd.f32 %v1927_v6, %v12313_v63  ;;  %v12486_v6 = vld [vmem:[#allocation110_spill] sm:$0xff] }
 0x42c   :  { %v164_v23 = vadd.f32 %v12486_v6, %v12314_v35 }
 0x42d   :  { %v3656_v5 = vmul.f32 -1.442695, %v1932_v61 }
 0x430   :  { %v1866_v30 = vpop.f32.mrf.mxu0 }
 0x431   :  { %v1867_v44 = vadd.f32 %v1866_v30, %v1786_v36  ;;  %v1907_v30 = vadd.f32 %v1906_v1, %v1826_v14  ;;  %v2033_v14 = vpop.f32.mrf.mxu1 }
 0x433   :  { %v1929_v20 = vadd.f32 %v1867_v44, %v12311_v24 }
 0x435   :  { %v3654_v48 = vmul.f32 -1.442695, %v1929_v20  ;;  %v1931_v20 = vadd.f32 %v1907_v30, %v12320_v7 }
 0x437   :  { %3799 = vpow2.f32 %v3654_v48 }
 0x438   :  { %3801 = vpow2.f32 %v3655_v10  ;;  %v2013_v1 = vpop.f32.mrf.mxu0 }
 0x439   :  { %3803 = vpow2.f32 %v3656_v5  ;;  %v2076_v30 = vadd.f32 %v2013_v1, %v164_v23 }
 0x43b   :  { %v3657_v6 = vmul.f32 -1.442695, %v2076_v30 }
 0x43d   :  { %v3800_v17 = vpop.eup %3799 }
 0x43e   :  { %v3802_v18 = vpop.eup %3801  ;;  %v1936_v51 = vadd.f32 1.0, %v3800_v17  ;;  %v12487_v17 = vld [vmem:[#allocation111_spill] sm:$0xff] }
 0x43f   :  { %v1955_v27 = vadd.f32 1.0, %v3802_v18  ;;  %v3804_v16 = vpop.eup %3803  ;;  %v205_v5 = vadd.f32 %v12487_v17, %v12316_v40  ;;  %v12488_v17 = vld [vmem:[#allocation124_spill] sm:$0xff] }
 0x440   :  { %3805 = vrcp.f32 %v1936_v51  ;;  %v9029_v19 = vadd.f32 1.0, %v3804_v16  ;;  %v1946_v48 = vand.u32 2147483647, %v1936_v51  ;;  %v1948_v61 = vand.u32 2147483648, %v1936_v51 }
 0x441   :  { %3807 = vrcp.f32 %v1955_v27  ;;  %v2077_v16 = vadd.f32 %v2033_v14, %v205_v5  ;;  %v1967_v7 = vand.u32 2147483648, %v1955_v27  ;;  %v1965_v3 = vand.u32 2147483647, %v1955_v27 }
 0x442   :  { %3809 = vrcp.f32 %v9029_v19  ;;  %vm1961_vm6 = vweird.f32 %v1955_v27  ;;  %vm1942_vm7 = vweird.f32 %v1936_v51  ;;  %vm1947_vm10 = vcmp.eq.f32.partialorder %v1946_v48, 8.507059e+37 }
 0x443   :  { %3811 = vtanh.f32 %v1931_v20  ;;  %v3658_v35 = vmul.f32 -1.442695, %v2077_v16  ;;  %vm1966_vm11 = vcmp.eq.f32.partialorder %v1965_v3, 8.507059e+37  ;;  %v2073_v16 = vpop.f32.mrf.mxu3  ;;  %vm1981_vm13 = vweird.f32 %v9029_v19 }
 0x444   :  { %3813 = vpow2.f32 %v3657_v6 }
 0x445   :  { %3815 = vpow2.f32 %v3658_v35 }
 0x446   :  { %v3806_v36 = vpop.eup %3805 }
 0x447   :  { %v3808_v10 = vpop.eup %3807  ;;  %v1938_v9 = vmul.f32 %v3806_v36, %v1936_v51  ;;  %vm1943_vm4 = vweird.f32 %v3806_v36 }
 0x448   :  { %v1957_v18 = vmul.f32 %v3808_v10, %v1955_v27  ;;  %vm1962_vm5 = vweird.f32 %v3808_v10  ;;  %v3810_v29 = vpop.eup %3809  ;;  %vm1944_vm8 = vmor %vm1942_vm7, %vm1943_vm4 }
 0x449   :  { %v1939_v44 = vsub.f32 1.0, %v1938_v9  ;;  %v287_v9 = vadd.f32 %v12488_v17, %v12318_v41  ;;  %v1977_v23 = vmul.f32 %v3810_v29, %v9029_v19  ;;  %v3812_v5 = vpop.eup %3811  ;;  %vm1963_vm9 = vmor %vm1961_vm6, %vm1962_vm5  ;;  %vm1982_vm12 = vweird.f32 %v3810_v29 }
 0x44a   :  { %v1958_v49 = vsub.f32 1.0, %v1957_v18  ;;  %v1949_v18 = vor.u32 1.1754944e-38, %v1948_v61  ;;  %v3814_v41 = vpop.eup %3813  ;;  %vm1983_vm14 = vmor %vm1981_vm13, %vm1982_vm12 }
 0x44b   :  { %v1940_v63 = vmul.f32 %v3806_v36, %v1939_v44  ;;  %v1968_v44 = vor.u32 1.1754944e-38, %v1967_v7  ;;  %v1978_v30 = vsub.f32 1.0, %v1977_v23  ;;  %v2079_v51 = vadd.f32 %v2073_v16, %v287_v9  ;;  %v3816_v59 = vpop.eup %3815  ;;  %v12489_v9 = vld [vmem:[#allocation131_spill] sm:$0xff] }
 0x44c   :  { %v1959_v24 = vmul.f32 %v3808_v10, %v1958_v49  ;;  %v9042_v7 = vadd.f32 1.0, %v3814_v41  ;;  %v9045_v3 = vadd.f32 1.0, %v3816_v59 }
 0x44d   :  { %v1941_v20 = vadd.f32 %v3806_v36, %v1940_v63  ;;  %v3659_v17 = vmul.f32 -1.442695, %v2079_v51 }
 0x44e   :  { %v1960_v40 = vadd.f32 %v3808_v10, %v1959_v24  ;;  %v1979_v24 = vmul.f32 %v3810_v29, %v1978_v30  ;;  %v2095_v16 = vand.u32 2147483648, %v9042_v7  ;;  %v2093_v51 = vand.u32 2147483647, %v9042_v7 }
 0x44f   :  { %v1945_v1 = vsel %vm1944_vm8, %v3806_v36, %v1941_v20  ;;  %3817 = vpow2.f32 %v3659_v17  ;;  %v2053_v36 = vpop.f32.mrf.mxu2  ;;  %v246_v20 = vadd.f32 %v12489_v9, %v6105_v21  ;;  %vm2089_vm2 = vweird.f32 %v9042_v7  ;;  %v12509_v9 = vld [vmem:[#allocation22_spill] sm:$0xff] }
 0x450   :  { %v1950_v14 = vsel %vm1947_vm10, %v1949_v18, %v1945_v1  ;;  %v1964_v49 = vsel %vm1963_vm9, %v3808_v10, %v1960_v40  ;;  %v1980_v35 = vadd.f32 %v3810_v29, %v1979_v24  ;;  %v1987_v40 = vand.u32 2147483648, %v9029_v19 }
 0x451   :  { %v1969_v27 = vsel %vm1966_vm11, %v1968_v44, %v1964_v49  ;;  %v1992_v63 = vmul.f32 %v3812_v5, %v1950_v14  ;;  %v2078_v44 = vadd.f32 %v2053_v36, %v246_v20  ;;  %v2112_v24 = vand.u32 2147483647, %v9045_v3  ;;  %v12506_v36 = vld [vmem:[#allocation19_spill] sm:$0xff] }
 0x452   :  { %v1991_v61 = vmul.f32 %v1969_v27, %v7818_v57  ;;  %v1985_v57 = vand.u32 2147483647, %v9029_v19  ;;  %v1984_v41 = vsel %vm1983_vm14, %v3810_v29, %v1980_v35  ;;  %v1988_v10 = vor.u32 1.1754944e-38, %v1987_v40  ;;  %v12503_v40 = vld [vmem:[#allocation16_spill] sm:$0xff]  ;;  %v12510_v20 = vld [vmem:[#allocation23_spill] sm:$0xff] }
 0x453   :  { %v2114_v27 = vand.u32 2147483648, %v9045_v3  ;;  %vm2108_vm3 = vweird.f32 %v9045_v3  ;;  %vm2094_vm6 = vcmp.eq.f32.partialorder %v2093_v51, 8.507059e+37  ;;  %vm2113_vm7 = vcmp.eq.f32.partialorder %v2112_v24, 8.507059e+37  ;;  %v12525_v51 = vld [vmem:[#allocation38_spill] sm:$0xff]  ;;  %v12527_v24 = vld [vmem:[#allocation40_spill] sm:$0xff] }
 0x454   :  { %v9040_v6 = vadd.f32 %v1992_v63, %v1991_v61  ;;  %vm1986_vm15 = vcmp.eq.f32.partialorder %v1985_v57, 8.507059e+37  ;;  %v12504_v57 = vld [vmem:[#allocation17_spill] sm:$0xff] }
 0x455   :  { %v3818_v48 = vpop.eup %3817  ;;  %v1989_v23 = vsel %vm1986_vm15, %v1988_v10, %v1984_v41  ;;  %v12505_v41 = vld [vmem:[#allocation18_spill] sm:$0xff]  ;;  %v12507_v10 = vld [vmem:[#allocation20_spill] sm:$0xff] }
 0x456   :  { %3819 = vtanh.f32 %v9040_v6  ;;  %v9054_v18 = vadd.f32 1.0, %v3818_v48  ;;  %v12508_v48 = vld [vmem:[#allocation21_spill] sm:$0xff] }
 0x457   :  { %3821 = vrcp.f32 %v9042_v7 }
 0x458   :  { %3823 = vrcp.f32 %v9045_v3  ;;  %vm2128_vm9 = vweird.f32 %v9054_v18 }
 0x459   :  { %3825 = vrcp.f32 %v9054_v18 }
 0x45a   :  { %3827 = vtanh.f32 %v2078_v44  ;;  %v12515_v44 = vld [vmem:[#allocation28_spill] sm:$0xff] }
 0x45c   :  { %v3820_v59 = vpop.eup %3819 }
 0x45d   :  { %v3822_v5 = vpop.eup %3821  ;;  %v1995_v1 = vmul.f32 %v3820_v59, %v1989_v23  ;;  %v12511_v59 = vld [vmem:[#allocation24_spill] sm:$0xff]  ;;  %v12513_v23 = vld [vmem:[#allocation26_spill] sm:$0xff] }
 0x45e   :  { %v3824_v14 = vpop.eup %3823  ;;  %v2085_v19 = vmul.f32 %v3822_v5, %v9042_v7  ;;  %vm2090_vm0 = vweird.f32 %v3822_v5 }
 0x45f   :  { %v2104_v29 = vmul.f32 %v3824_v14, %v9045_v3  ;;  %2159 = vmatmul.f32.vlgmr.msra.gmra.mxu0 %v1995_v1  ;;  %2179 = vmatmul.f32.vlgmr.msra.gmra.mxu1 %v1995_v1  ;;  %vm2109_vm1 = vweird.f32 %v3824_v14  ;;  %vm2091_vm4 = vmor %vm2089_vm2, %vm2090_vm0 }
 0x460   :  { %v2086_v49 = vsub.f32 1.0, %v2085_v19  ;;  %2199 = vmatmul.f32.vlgmr.msra.gmra.mxu2 %v1995_v1  ;;  %2219 = vmatmul.f32.vlgmr.msra.gmra.mxu3 %v1995_v1  ;;  %vm2110_vm5 = vmor %vm2108_vm3, %vm2109_vm1  ;;  %v12516_v1 = vld [vmem:[#allocation29_spill] sm:$0xff]  ;;  %v12518_v19 = vld [vmem:[#allocation31_spill] sm:$0xff] }
 0x461   :  { %v2105_v30 = vsub.f32 1.0, %v2104_v29  ;;  %2370 = vmatpush.msra.mxu0 %v7855_v28  ;;  %2390 = vmatpush.msra.mxu1 %v7861_v31  ;;  %v9069_v28 = vpop.eup %3825  ;;  %v12519_v29 = vld [vmem:[#allocation32_spill] sm:$0xff] }
 0x462   :  { %v2087_v63 = vmul.f32 %v3822_v5, %v2086_v49  ;;  %2410 = vmatpush.msra.mxu2 %v7869_v12  ;;  %2430 = vmatpush.msra.mxu3 %v7875_v58  ;;  %v2096_v12 = vor.u32 1.1754944e-38, %v2095_v16  ;;  %vm2129_vm8 = vweird.f32 %v9069_v28  ;;  %v12520_v49 = vld [vmem:[#allocation33_spill] sm:$0xff]  ;;  %v12522_v16 = vld [vmem:[#allocation35_spill] sm:$0xff] }
 0x463   :  { %v2106_v61 = vmul.f32 %v3824_v14, %v2105_v30  ;;  %2371 = vmatpush.msra.mxu0 %v7887_v32  ;;  %2391 = vmatpush.msra.mxu1 %v7893_v34  ;;  %v2124_v32 = vmul.f32 %v9069_v28, %v9054_v18  ;;  %v2115_v34 = vor.u32 1.1754944e-38, %v2114_v27  ;;  %vm2130_vm10 = vmor %vm2128_vm9, %vm2129_vm8  ;;  %v12521_v30 = vld [vmem:[#allocation34_spill] sm:$0xff]  ;;  %v12523_v27 = vld [vmem:[#allocation36_spill] sm:$0xff] }
 0x464   :  { %v2088_v31 = vadd.f32 %v3822_v5, %v2087_v63  ;;  %2411 = vmatpush.msra.mxu2 %v7902_v37  ;;  %2431 = vmatpush.msra.mxu3 %v7908_v42  ;;  %v3828_v37 = vpop.eup %3827  ;;  %v12524_v63 = vld [vmem:[#allocation37_spill] sm:$0xff] }
 0x465   :  { %v2107_v58 = vadd.f32 %v3824_v14, %v2106_v61  ;;  %2372 = vmatpush.msra.mxu0 %v7914_v45  ;;  %2392 = vmatpush.msra.mxu1 %v7920_v46  ;;  %v2125_v35 = vsub.f32 1.0, %v2124_v32  ;;  %v12526_v61 = vld [vmem:[#allocation39_spill] sm:$0xff]  ;;  %v12532_v32 = vld [vmem:[#allocation45_spill] sm:$0xff] }
 0x466   :  { %v2092_v17 = vsel %vm2091_vm4, %v3822_v5, %v2088_v31  ;;  %2412 = vmatpush.msra.mxu2 %v7926_v47  ;;  %2432 = vmatpush.msra.mxu3 %v7932_v33  ;;  %v12514_v5 = vld [vmem:[#allocation27_spill] sm:$0xff]  ;;  %v12529_v31 = vld [vmem:[#allocation42_spill] sm:$0xff] }
 0x467   :  { %v2097_v42 = vsel %vm2094_vm6, %v2096_v12, %v2092_v17  ;;  %v2111_v7 = vsel %vm2110_vm5, %v3824_v14, %v2107_v58  ;;  %2373 = vmatpush.msra.mxu0 %v7938_v53  ;;  %2393 = vmatpush.msra.mxu1 %v7944_v54  ;;  %v2126_v47 = vmul.f32 %v9069_v28, %v2125_v35  ;;  %v2132_v54 = vand.u32 2147483647, %v9054_v18  ;;  %v12517_v14 = vld [vmem:[#allocation30_spill] sm:$0xff]  ;;  %v12530_v12 = vld [vmem:[#allocation43_spill] sm:$0xff]  ;;  %v12531_v58 = vld [vmem:[#allocation44_spill] sm:$0xff] }
 0x468   :  { %v2116_v45 = vsel %vm2113_vm7, %v2115_v34, %v2111_v7  ;;  %v2139_v46 = vmul.f32 %v3828_v37, %v2097_v42  ;;  %2413 = vmatpush.msra.mxu2 %v7952_v60  ;;  %2433 = vmatpush.msra.mxu3 %v7958_v62  ;;  %v12533_v34 = vld [vmem:[#allocation46_spill] sm:$0xff]  ;;  %v12534_v17 = vld [vmem:[#allocation47_spill] sm:$0xff]  ;;  %v12535_v37 = vld [vmem:[#allocation48_spill] sm:$0xff] }
 0x469   :  { %v2138_v3 = vmul.f32 %v2116_v45, %v7846_v22  ;;  %2374 = vmatpush.msra.mxu0 %v7964_v15  ;;  %2394 = vmatpush.msra.mxu1 %v7970_v43  ;;  %v2127_v53 = vadd.f32 %v9069_v28, %v2126_v47  ;;  %v2134_v22 = vand.u32 2147483648, %v9054_v18  ;;  %v12490_v15 = vld [vmem:[#allocation72_spill] sm:$0xff]  ;;  %v12491_v43 = vld [vmem:[#allocation73_spill] sm:$0xff]  ;;  %vm2133_vm11 = vcmp.eq.f32.partialorder %v2132_v54, 8.507059e+37  ;;  %v12537_v7 = vld [vmem:[#allocation50_spill] sm:$0xff] }
 0x46a   :  { %2414 = vmatpush.msra.mxu2 %v7980_v55  ;;  %2434 = vmatpush.msra.mxu3 %v7986_v38  ;;  %v12492_v55 = vld [vmem:[#allocation91_spill] sm:$0xff]  ;;  %v12493_v38 = vld [vmem:[#allocation90_spill] sm:$0xff]  ;;  %v12512_v18 = vld [vmem:[#allocation25_spill] sm:$0xff] }
 0x46b   :  { %v9093_v33 = vadd.f32 %v2139_v46, %v2138_v3  ;;  %2375 = vmatpush.msra.mxu0 %v7992_v25  ;;  %2395 = vmatpush.msra.mxu1 %v7998_v26  ;;  %v2131_v60 = vsel %vm2130_vm10, %v9069_v28, %v2127_v53  ;;  %v2135_v62 = vor.u32 1.1754944e-38, %v2134_v22  ;;  %v12528_v28 = vld [vmem:[#allocation41_spill] sm:$0xff]  ;;  %v12538_v35 = vld [vmem:[#allocation51_spill] sm:$0xff]  ;;  %v12539_v45 = vld [vmem:[#allocation54_spill] sm:$0xff] }
 0x46c   :  { %2415 = vmatpush.msra.mxu2 %v8004_v4  ;;  %2435 = vmatpush.msra.mxu3 %v8010_v2  ;;  %v12494_v4 = vld [vmem:[#allocation8_spill] sm:$0xff]  ;;  %v12495_v2 = vld [vmem:[#allocation7_spill] sm:$0xff]  ;;  %v12536_v42 = vld [vmem:[#allocation49_spill] sm:$0xff] }
 0x46d   :  { %3829 = vtanh.f32 %v9093_v33  ;;  %2376 = vmatpush.msra.mxu0 %v8016_v11  ;;  %2396 = vmatpush.msra.mxu1 %v8022_v0  ;;  %v2136_v26 = vsel %vm2133_vm11, %v2135_v62, %v2131_v60  ;;  %v12496_v0 = vld [vmem:[#allocation9_spill] sm:$0xff]  ;;  %v12540_v46 = vld [vmem:[#allocation55_spill] sm:$0xff]  ;;  %v12541_v3 = vld [vmem:[#allocation56_spill] sm:$0xff] }
 0x46e   :  { %2416 = vmatpush.msra.mxu2 %v8028_v50  ;;  %2436 = vmatpush.msra.mxu3 %v8034_v52  ;;  %v12497_v50 = vld [vmem:[#allocation10_spill] sm:$0xff]  ;;  %v12498_v52 = vld [vmem:[#allocation11_spill] sm:$0xff]  ;;  %v12542_v47 = vld [vmem:[#allocation57_spill] sm:$0xff] }
 0x46f   :  { %2377 = vmatpush.msra.mxu0 %v8040_v56  ;;  %2397 = vmatpush.msra.mxu1 %v8046_v39  ;;  %v12499_v56 = vld [vmem:[#allocation12_spill] sm:$0xff]  ;;  %v12500_v39 = vld [vmem:[#allocation13_spill] sm:$0xff]  ;;  %v12543_v53 = vld [vmem:[#allocation58_spill] sm:$0xff] }
 0x470   :  { %2417 = vmatpush.msra.mxu2 %v8052_v8  ;;  %2437 = vmatpush.msra.mxu3 %v8058_v13  ;;  %v12501_v8 = vld [vmem:[#allocation14_spill] sm:$0xff]  ;;  %v12502_v13 = vld [vmem:[#allocation15_spill] sm:$0xff]  ;;  %v12545_v54 = vld [vmem:[#allocation60_spill] sm:$0xff] }
 0x471   :  { %2378 = vmatpush.msra.mxu0 %v12490_v15  ;;  %2398 = vmatpush.msra.mxu1 %v12491_v43  ;;  %v12544_v22 = vld [vmem:[#allocation59_spill] sm:$0xff]  ;;  %v12546_v60 = vld [vmem:[#allocation61_spill] sm:$0xff]  ;;  %v12547_v62 = vld [vmem:[#allocation62_spill] sm:$0xff] }
 0x472   :  { %2418 = vmatpush.msra.mxu2 %v12492_v55  ;;  %2438 = vmatpush.msra.mxu3 %v12493_v38  ;;  %v12548_v15 = vld [vmem:[#allocation63_spill] sm:$0xff]  ;;  %v12549_v43 = vld [vmem:[#allocation64_spill] sm:$0xff]  ;;  %v12550_v55 = vld [vmem:[#allocation65_spill] sm:$0xff] }
 0x473   :  { %v3830_v25 = vpop.eup %3829  ;;  %2379 = vmatpush.msra.mxu0 %v12494_v4  ;;  %2399 = vmatpush.msra.mxu1 %v12495_v2  ;;  %v12551_v38 = vld [vmem:[#allocation66_spill] sm:$0xff]  ;;  %v12554_v4 = vld [vmem:[#allocation71_spill] sm:$0xff] }
 0x474   :  { %v2142_v11 = vmul.f32 %v3830_v25, %v2136_v26  ;;  %2419 = vmatpush.msra.mxu2 %v12496_v0  ;;  %2439 = vmatpush.msra.mxu3 %v12497_v50  ;;  %v12552_v25 = vld [vmem:[#allocation69_spill] sm:$0xff]  ;;  %v12553_v26 = vld [vmem:[#allocation70_spill] sm:$0xff]  ;;  %v12557_v0 = vld [vmem:[#allocation76_spill] sm:$0xff] }
 0x475   :  { %2380 = vmatpush.msra.mxu0 %v12498_v52  ;;  %2400 = vmatpush.msra.mxu1 %v12499_v56  ;;  %v12555_v2 = vld [vmem:[#allocation74_spill] sm:$0xff]  ;;  %v12558_v50 = vld [vmem:[#allocation77_spill] sm:$0xff]  ;;  %v12560_v56 = vld [vmem:[#allocation79_spill] sm:$0xff] }
 0x476   :  { %2420 = vmatpush.msra.mxu2 %v12500_v39  ;;  %2440 = vmatpush.msra.mxu3 %v12501_v8  ;;  %v12559_v52 = vld [vmem:[#allocation78_spill] sm:$0xff]  ;;  %v12561_v39 = vld [vmem:[#allocation80_spill] sm:$0xff]  ;;  %v12562_v8 = vld [vmem:[#allocation81_spill] sm:$0xff] }
 0x477   :  { %2239 = vmatmul.f32.vlgmr.msrb.gmra.mxu0 %v2142_v11  ;;  %2259 = vmatmul.f32.vlgmr.msrb.gmra.mxu1 %v2142_v11 }
 0x478   :  { %2279 = vmatmul.f32.vlgmr.msrb.gmra.mxu2 %v2142_v11  ;;  %2299 = vmatmul.f32.vlgmr.msrb.gmra.mxu3 %v2142_v11 }
 0x479   :  { %2381 = vmatpush.msra.mxu0 %v12502_v13  ;;  %2401 = vmatpush.msra.mxu1 %v12503_v40  ;;  %v12563_v13 = vld [vmem:[#allocation82_spill] sm:$0xff]  ;;  %v12564_v40 = vld [vmem:[#allocation83_spill] sm:$0xff] }
 0x47a   :  { %2421 = vmatpush.msra.mxu2 %v12504_v57  ;;  %2441 = vmatpush.msra.mxu3 %v12505_v41  ;;  %v12565_v57 = vld [vmem:[#allocation84_spill] sm:$0xff]  ;;  %v12566_v41 = vld [vmem:[#allocation85_spill] sm:$0xff] }
 0x47b   :  { %2382 = vmatpush.msra.mxu0 %v12506_v36  ;;  %2402 = vmatpush.msra.mxu1 %v12507_v10  ;;  %v12567_v36 = vld [vmem:[#allocation86_spill] sm:$0xff]  ;;  %v12568_v10 = vld [vmem:[#allocation87_spill] sm:$0xff] }
 0x47c   :  { %2422 = vmatpush.msra.mxu2 %v12508_v48  ;;  %2442 = vmatpush.msra.mxu3 %v12509_v9  ;;  %v12569_v48 = vld [vmem:[#allocation88_spill] sm:$0xff]  ;;  %v12570_v9 = vld [vmem:[#allocation89_spill] sm:$0xff] }
 0x47d   :  { %2383 = vmatpush.msra.mxu0 %v12510_v20  ;;  %2403 = vmatpush.msra.mxu1 %v12511_v59  ;;  %v12571_v20 = vld [vmem:[#allocation92_spill] sm:$0xff]  ;;  %v12572_v59 = vld [vmem:[#allocation95_spill] sm:$0xff] }
 0x47e   :  { %2423 = vmatpush.msra.mxu2 %v12512_v18  ;;  %2443 = vmatpush.msra.mxu3 %v12513_v23  ;;  %v12573_v18 = vld [vmem:[#allocation96_spill] sm:$0xff]  ;;  %v12574_v23 = vld [vmem:[#allocation97_spill] sm:$0xff] }
 0x47f   :  { %2384 = vmatpush.msra.mxu0 %v12514_v5  ;;  %2404 = vmatpush.msra.mxu1 %v12515_v44  ;;  %v12575_v5 = vld [vmem:[#allocation98_spill] sm:$0xff]  ;;  %v12576_v44 = vld [vmem:[#allocation99_spill] sm:$0xff] }
 0x480   :  { %2424 = vmatpush.msra.mxu2 %v12516_v1  ;;  %2444 = vmatpush.msra.mxu3 %v12517_v14  ;;  %v12577_v1 = vld [vmem:[#allocation100_spill] sm:$0xff]  ;;  %v12578_v14 = vld [vmem:[#allocation101_spill] sm:$0xff] }
 0x481   :  { %2385 = vmatpush.msra.mxu0 %v12518_v19  ;;  %2405 = vmatpush.msra.mxu1 %v12519_v29  ;;  %v12579_v19 = vld [vmem:[#allocation102_spill] sm:$0xff]  ;;  %v12580_v29 = vld [vmem:[#allocation103_spill] sm:$0xff] }
 0x482   :  { %2425 = vmatpush.msra.mxu2 %v12520_v49  ;;  %2445 = vmatpush.msra.mxu3 %v12521_v30  ;;  %v12581_v49 = vld [vmem:[#allocation104_spill] sm:$0xff]  ;;  %v12582_v30 = vld [vmem:[#allocation105_spill] sm:$0xff] }
 0x483   :  { %2386 = vmatmul.f32.vlgmr.msra.gmra.mxu0 %v2142_v11  ;;  %2406 = vmatmul.f32.vlgmr.msra.gmra.mxu1 %v2142_v11 }
 0x484   :  { %2426 = vmatmul.f32.vlgmr.msra.gmra.mxu2 %v2142_v11  ;;  %2446 = vmatmul.f32.vlgmr.msra.gmra.mxu3 %v2142_v11  ;;  %v12556_v11 = vld [vmem:[#allocation75_spill] sm:$0xff] }
 0x485   :  { %2517 = vmatpush.msrb.mxu0 %v12522_v16  ;;  %2537 = vmatpush.msrb.mxu1 %v12523_v27  ;;  %v12583_v16 = vld [vmem:[#allocation106_spill] sm:$0xff]  ;;  %v12584_v27 = vld [vmem:[#allocation109_spill] sm:$0xff] }
 0x486   :  { %2557 = vmatpush.msrb.mxu2 %v12524_v63  ;;  %2577 = vmatpush.msrb.mxu3 %v12525_v51  ;;  %v12585_v63 = vld [vmem:[#allocation112_spill] sm:$0xff]  ;;  %v12586_v51 = vld [vmem:[#allocation113_spill] sm:$0xff] }
 0x487   :  { %2518 = vmatpush.msrb.mxu0 %v12526_v61  ;;  %2538 = vmatpush.msrb.mxu1 %v12527_v24  ;;  %v12587_v61 = vld [vmem:[#allocation114_spill] sm:$0xff]  ;;  %v12588_v24 = vld [vmem:[#allocation115_spill] sm:$0xff] }
 0x488   :  { %2558 = vmatpush.msrb.mxu2 %v12528_v28  ;;  %2578 = vmatpush.msrb.mxu3 %v12529_v31  ;;  %v12589_v28 = vld [vmem:[#allocation116_spill] sm:$0xff]  ;;  %v12590_v31 = vld [vmem:[#allocation117_spill] sm:$0xff] }
 0x489   :  { %2519 = vmatpush.msrb.mxu0 %v12530_v12  ;;  %2539 = vmatpush.msrb.mxu1 %v12531_v58  ;;  %v12591_v12 = vld [vmem:[#allocation118_spill] sm:$0xff]  ;;  %v12592_v58 = vld [vmem:[#allocation119_spill] sm:$0xff] }
 0x48a   :  { %2559 = vmatpush.msrb.mxu2 %v12532_v32  ;;  %2579 = vmatpush.msrb.mxu3 %v12533_v34  ;;  %v12593_v32 = vld [vmem:[#allocation120_spill] sm:$0xff]  ;;  %v12594_v34 = vld [vmem:[#allocation121_spill] sm:$0xff] }
 0x48b   :  { %2520 = vmatpush.msrb.mxu0 %v12534_v17  ;;  %2540 = vmatpush.msrb.mxu1 %v12535_v37  ;;  %v12595_v17 = vld [vmem:[#allocation122_spill] sm:$0xff]  ;;  %v12596_v37 = vld [vmem:[#allocation123_spill] sm:$0xff] }
 0x48c   :  { %2560 = vmatpush.msrb.mxu2 %v12536_v42  ;;  %2580 = vmatpush.msrb.mxu3 %v12537_v7  ;;  %v12597_v42 = vld [vmem:[#allocation125_spill] sm:$0xff]  ;;  %v12598_v7 = vld [vmem:[#allocation126_spill] sm:$0xff] }
 0x48d   :  { %2521 = vmatpush.msrb.mxu0 %v12538_v35  ;;  %2541 = vmatpush.msrb.mxu1 %v12539_v45  ;;  %v12599_v35 = vld [vmem:[#allocation127_spill] sm:$0xff]  ;;  %v12600_v45 = vld [vmem:[#allocation130_spill] sm:$0xff] }
 0x48e   :  { %2561 = vmatpush.msrb.mxu2 %v12540_v46  ;;  %2581 = vmatpush.msrb.mxu3 %v12541_v3  ;;  %v12601_v46 = vld [vmem:[#allocation132_spill] sm:$0xff]  ;;  %v12602_v3 = vld [vmem:[#allocation133_spill] sm:$0xff] }
 0x48f   :  { %2522 = vmatpush.msrb.mxu0 %v12542_v47  ;;  %2542 = vmatpush.msrb.mxu1 %v12543_v53  ;;  %v12603_v47 = vld [vmem:[#allocation134_spill] sm:$0xff]  ;;  %v12604_v53 = vld [vmem:[#allocation135_spill] sm:$0xff] }
 0x490   :  { %2562 = vmatpush.msrb.mxu2 %v12544_v22  ;;  %2582 = vmatpush.msrb.mxu3 %v12545_v54  ;;  %v12605_v22 = vld [vmem:[#allocation136_spill] sm:$0xff]  ;;  %v12606_v54 = vld [vmem:[#allocation137_spill] sm:$0xff] }
 0x491   :  { %2523 = vmatpush.msrb.mxu0 %v12546_v60  ;;  %2543 = vmatpush.msrb.mxu1 %v12547_v62  ;;  %v12607_v60 = vld [vmem:[#allocation138_spill] sm:$0xff]  ;;  %v12608_v62 = vld [vmem:[#allocation139_spill] sm:$0xff] }
 0x492   :  { %2563 = vmatpush.msrb.mxu2 %v12548_v15  ;;  %2583 = vmatpush.msrb.mxu3 %v12549_v43  ;;  %v12609_v15 = vld [vmem:[#allocation140_spill] sm:$0xff]  ;;  %v12610_v43 = vld [vmem:[#allocation141_spill] sm:$0xff] }
 0x493   :  { %2524 = vmatpush.msrb.mxu0 %v12550_v55  ;;  %2544 = vmatpush.msrb.mxu1 %v12551_v38  ;;  %v12611_v55 = vld [vmem:[#allocation142_spill] sm:$0xff]  ;;  %v12612_v38 = vld [vmem:[#allocation143_spill] sm:$0xff] }
 0x494   :  { %2564 = vmatpush.msrb.mxu2 %v12552_v25  ;;  %2584 = vmatpush.msrb.mxu3 %v12553_v26  ;;  %v12613_v25 = vld [vmem:[#allocation145_spill] sm:$0xff]  ;;  %v12614_v26 = vld [vmem:[#allocation146_spill] sm:$0xff] }
 0x495   :  { %2525 = vmatpush.msrb.mxu0 %v12554_v4  ;;  %2545 = vmatpush.msrb.mxu1 %v12555_v2  ;;  %v12615_v4 = vld [vmem:[#allocation147_spill] sm:$0xff]  ;;  %v12616_v2 = vld [vmem:[#allocation150_spill] sm:$0xff] }
 0x496   :  { %2565 = vmatpush.msrb.mxu2 %v12556_v11  ;;  %2585 = vmatpush.msrb.mxu3 %v12557_v0  ;;  %v12617_v11 = vld [vmem:[#allocation151_spill] sm:$0xff]  ;;  %v12618_v0 = vld [vmem:[#allocation152_spill] sm:$0xff] }
 0x497   :  { %2526 = vmatpush.msrb.mxu0 %v12558_v50  ;;  %2546 = vmatpush.msrb.mxu1 %v12559_v52  ;;  %v12619_v50 = vld [vmem:[#allocation153_spill] sm:$0xff]  ;;  %v12620_v52 = vld [vmem:[#allocation154_spill] sm:$0xff] }
 0x498   :  { %2566 = vmatpush.msrb.mxu2 %v12560_v56  ;;  %2586 = vmatpush.msrb.mxu3 %v12561_v39  ;;  %v12621_v56 = vld [vmem:[#allocation156_spill] sm:$0xff]  ;;  %v12622_v39 = vld [vmem:[#allocation157_spill] sm:$0xff] }
 0x499   :  { %2527 = vmatpush.msrb.mxu0 %v12562_v8  ;;  %2547 = vmatpush.msrb.mxu1 %v12563_v13  ;;  %v12623_v8 = vld [vmem:[#allocation158_spill] sm:$0xff]  ;;  %v12624_v13 = vld [vmem:[#allocation159_spill] sm:$0xff] }
 0x49a   :  { %2567 = vmatpush.msrb.mxu2 %v12564_v40  ;;  %2587 = vmatpush.msrb.mxu3 %v12565_v57  ;;  %v12625_v40 = vld [vmem:[#allocation160_spill] sm:$0xff]  ;;  %v12626_v57 = vld [vmem:[#allocation161_spill] sm:$0xff] }
 0x49b   :  { %2528 = vmatpush.msrb.mxu0 %v12566_v41  ;;  %2548 = vmatpush.msrb.mxu1 %v12567_v36  ;;  %v12627_v41 = vld [vmem:[#allocation162_spill] sm:$0xff]  ;;  %v12628_v36 = vld [vmem:[#allocation52_spill] sm:$0xff] }
 0x49c   :  { %2568 = vmatpush.msrb.mxu2 %v12568_v10  ;;  %2588 = vmatpush.msrb.mxu3 %v12569_v48  ;;  %v12629_v10 = vld [vmem:[#allocation53_spill] sm:$0xff]  ;;  %v12630_v48 = vld [vmem:[#allocation68_spill] sm:$0xff] }
 0x49d   :  { %2529 = vmatpush.msrb.mxu0 %v12570_v9  ;;  %2549 = vmatpush.msrb.mxu1 %v12571_v20  ;;  %v12631_v9 = vld [vmem:[#allocation67_spill] sm:$0xff]  ;;  %v12632_v20 = vld [vmem:[#allocation172_spill] sm:$0xff] }
 0x49e   :  { %2569 = vmatpush.msrb.mxu2 %v12572_v59  ;;  %2589 = vmatpush.msrb.mxu3 %v12573_v18  ;;  %v12633_v59 = vld [vmem:[#allocation173_spill] sm:$0xff]  ;;  %v12634_v18 = vld [vmem:[#allocation174_spill] sm:$0xff] }
 0x49f   :  { %2530 = vmatpush.msrb.mxu0 %v12574_v23  ;;  %2550 = vmatpush.msrb.mxu1 %v12575_v5  ;;  %v12635_v23 = vld [vmem:[#allocation175_spill] sm:$0xff]  ;;  %v12636_v5 = vld [vmem:[#allocation176_spill] sm:$0xff] }
 0x4a0   :  { %2570 = vmatpush.msrb.mxu2 %v12576_v44  ;;  %2590 = vmatpush.msrb.mxu3 %v12577_v1  ;;  %v12637_v44 = vld [vmem:[#allocation177_spill] sm:$0xff]  ;;  %v12638_v1 = vld [vmem:[#allocation178_spill] sm:$0xff] }
 0x4a1   :  { %2531 = vmatpush.msrb.mxu0 %v12578_v14  ;;  %2551 = vmatpush.msrb.mxu1 %v12579_v19  ;;  %v12639_v14 = vld [vmem:[#allocation179_spill] sm:$0xff]  ;;  %v12640_v19 = vld [vmem:[#allocation180_spill] sm:$0xff] }
 0x4a2   :  { %2571 = vmatpush.msrb.mxu2 %v12580_v29  ;;  %2591 = vmatpush.msrb.mxu3 %v12581_v49  ;;  %v12641_v29 = vld [vmem:[#allocation181_spill] sm:$0xff]  ;;  %v12642_v49 = vld [vmem:[#allocation182_spill] sm:$0xff] }
 0x4a3   :  { %2532 = vmatpush.msrb.mxu0 %v12582_v30  ;;  %2552 = vmatpush.msrb.mxu1 %v12583_v16  ;;  %v12643_v30 = vld [vmem:[#allocation183_spill] sm:$0xff]  ;;  %v12644_v16 = vld [vmem:[#allocation184_spill] sm:$0xff] }
 0x4a4   :  { %2572 = vmatpush.msrb.mxu2 %v12584_v27  ;;  %2592 = vmatpush.msrb.mxu3 %v12585_v63  ;;  %v12645_v27 = vld [vmem:[#allocation185_spill] sm:$0xff]  ;;  %v12646_v63 = vld [vmem:[#allocation186_spill] sm:$0xff] }
 0x4a5   :  { %2597 = vmatpush.msra.mxu0 %v12586_v51  ;;  %2617 = vmatpush.msra.mxu1 %v12587_v61  ;;  %v12647_v51 = vld [vmem:[#allocation187_spill] sm:$0xff]  ;;  %v12648_v61 = vld [vmem:[#allocation188_spill] sm:$0xff] }
 0x4a6   :  { %2637 = vmatpush.msra.mxu2 %v12588_v24  ;;  %2657 = vmatpush.msra.mxu3 %v12589_v28  ;;  %v12649_v24 = vld [vmem:[#allocation189_spill] sm:$0xff] }
 0x4a7   :  { %2598 = vmatpush.msra.mxu0 %v12590_v31  ;;  %2618 = vmatpush.msra.mxu1 %v12591_v12 }
 0x4a8   :  { %2638 = vmatpush.msra.mxu2 %v12592_v58  ;;  %2658 = vmatpush.msra.mxu3 %v12593_v32 }
 0x4a9   :  { %2599 = vmatpush.msra.mxu0 %v12594_v34  ;;  %2619 = vmatpush.msra.mxu1 %v12595_v17 }
 0x4aa   :  { %2639 = vmatpush.msra.mxu2 %v12596_v37  ;;  %2659 = vmatpush.msra.mxu3 %v12597_v42  ;;  %v12650_v37 = vld [vmem:[#allocation4_spill] sm:$0xff] }
 0x4ab   :  { %2600 = vmatpush.msra.mxu0 %v12598_v7  ;;  %2620 = vmatpush.msra.mxu1 %v12599_v35  ;;  %v12651_v7 = vld [vmem:[#allocation3_spill] sm:$0xff] }
 0x4ac   :  { %2640 = vmatpush.msra.mxu2 %v12600_v45  ;;  %2660 = vmatpush.msra.mxu3 %v12601_v46 }
 0x4ad   :  { %2601 = vmatpush.msra.mxu0 %v12602_v3  ;;  %2621 = vmatpush.msra.mxu1 %v12603_v47 }
 0x4ae   :  { %2641 = vmatpush.msra.mxu2 %v12604_v53  ;;  %2661 = vmatpush.msra.mxu3 %v12605_v22  ;;  %v12652_v22 = vld [vmem:[#allocation5_spill] sm:$0xff] }
 0x4af   :  { %2602 = vmatpush.msra.mxu0 %v12606_v54  ;;  %2622 = vmatpush.msra.mxu1 %v12607_v60  ;;  %v12653_v60 = vld [vmem:[#allocation166_spill] sm:$0xff] }
 0x4b0   :  { %2642 = vmatpush.msra.mxu2 %v12608_v62  ;;  %2662 = vmatpush.msra.mxu3 %v12609_v15  ;;  %v12654_v62 = vld [vmem:[#allocation128_spill] sm:$0xff] }
 0x4b1   :  { %2603 = vmatpush.msra.mxu0 %v12610_v43  ;;  %2623 = vmatpush.msra.mxu1 %v12611_v55  ;;  %v167_v15 = vadd.f32 %v12654_v62, %v12653_v60  ;;  %v12655_v43 = vld [vmem:[#allocation167_spill] sm:$0xff]  ;;  %v12656_v55 = vld [vmem:[#allocation129_spill] sm:$0xff] }
 0x4b2   :  { %2643 = vmatpush.msra.mxu2 %v12612_v38  ;;  %2663 = vmatpush.msra.mxu3 %v12613_v25  ;;  %v208_v38 = vadd.f32 %v12656_v55, %v12655_v43 }
 0x4b3   :  { %2604 = vmatpush.msra.mxu0 %v12614_v26  ;;  %2624 = vmatpush.msra.mxu1 %v12615_v4 }
 0x4b4   :  { %2644 = vmatpush.msra.mxu2 %v12616_v2  ;;  %2664 = vmatpush.msra.mxu3 %v12617_v11 }
 0x4b5   :  { %2605 = vmatpush.msra.mxu0 %v12618_v0  ;;  %2625 = vmatpush.msra.mxu1 %v12619_v50 }
 0x4b6   :  { %2645 = vmatpush.msra.mxu2 %v12620_v52  ;;  %2665 = vmatpush.msra.mxu3 %v12621_v56 }
 0x4b7   :  { %2606 = vmatpush.msra.mxu0 %v12622_v39  ;;  %2626 = vmatpush.msra.mxu1 %v12623_v8 }
 0x4b8   :  { %2646 = vmatpush.msra.mxu2 %v12624_v13  ;;  %2666 = vmatpush.msra.mxu3 %v12625_v40 }
 0x4b9   :  { %2607 = vmatpush.msra.mxu0 %v12626_v57  ;;  %2627 = vmatpush.msra.mxu1 %v12627_v41  ;;  %v12657_v57 = vld [vmem:[#allocation170_spill] sm:$0xff]  ;;  %v12658_v41 = vld [vmem:[#allocation144_spill] sm:$0xff] }
 0x4ba   :  { %2647 = vmatpush.msra.mxu2 %v12628_v36  ;;  %2667 = vmatpush.msra.mxu3 %v12629_v10  ;;  %v290_v36 = vadd.f32 %v12658_v41, %v12657_v57 }
 0x4bb   :  { %2608 = vmatpush.msra.mxu0 %v12630_v48  ;;  %2628 = vmatpush.msra.mxu1 %v12631_v9 }
 0x4bc   :  { %2648 = vmatpush.msra.mxu2 %v12632_v20  ;;  %2668 = vmatpush.msra.mxu3 %v12633_v59  ;;  %v12659_v20 = vld [vmem:[#allocation6_spill] sm:$0xff] }
 0x4bd   :  { %2609 = vmatpush.msra.mxu0 %v12634_v18  ;;  %2629 = vmatpush.msra.mxu1 %v12635_v23 }
 0x4be   :  { %2649 = vmatpush.msra.mxu2 %v12636_v5  ;;  %2669 = vmatpush.msra.mxu3 %v12637_v44 }
 0x4bf   :  { %2610 = vmatpush.msra.mxu0 %v12638_v1  ;;  %2630 = vmatpush.msra.mxu1 %v12639_v14 }
 0x4c0   :  { %2650 = vmatpush.msra.mxu2 %v12640_v19  ;;  %2670 = vmatpush.msra.mxu3 %v12641_v29 }
 0x4c1   :  { %2611 = vmatpush.msra.mxu0 %v12642_v49  ;;  %2631 = vmatpush.msra.mxu1 %v12643_v30 }
 0x4c2   :  { %2651 = vmatpush.msra.mxu2 %v12644_v16  ;;  %2671 = vmatpush.msra.mxu3 %v12645_v27 }
 0x4c3   :  { %2612 = vmatpush.msra.mxu0 %v12646_v63  ;;  %2632 = vmatpush.msra.mxu1 %v12647_v51 }
 0x4c4   :  { %2652 = vmatpush.msra.mxu2 %v12648_v61  ;;  %2672 = vmatpush.msra.mxu3 %v12649_v24 }
 0x4dc   :  { %v2160_v28 = vpop.f32.mrf.mxu0  ;;  %v2180_v31 = vpop.f32.mrf.mxu1 }
 0x4e3   :  { %v2220_v12 = vpop.f32.mrf.mxu3  ;;  %v2200_v3 = vpop.f32.mrf.mxu2 }
 0x4f4   :  { %v2240_v58 = vpop.f32.mrf.mxu0  ;;  %v2260_v32 = vpop.f32.mrf.mxu1 }
 0x4f5   :  { %v2241_v34 = vadd.f32 %v2240_v58, %v2160_v28  ;;  %v2261_v17 = vadd.f32 %v2260_v32, %v2180_v31  ;;  %v12660_v32 = vld [vmem:[#allocation155_spill] sm:$0xff] }
 0x4f7   :  { %v2303_v42 = vadd.f32 %v2241_v34, %v12650_v37  ;;  %v2304_v35 = vadd.f32 %v2261_v17, %v12651_v7  ;;  %v249_v34 = vadd.f32 %v12660_v32, %v6105_v21 }
 0x4f9   :  { %v3660_v45 = vmul.f32 -1.442695, %v2303_v42  ;;  %v3661_v46 = vmul.f32 -1.442695, %v2304_v35 }
 0x4fb   :  { %3831 = vpow2.f32 %v3660_v45  ;;  %v2300_v47 = vpop.f32.mrf.mxu3  ;;  %v2280_v56 = vpop.f32.mrf.mxu2 }
 0x4fc   :  { %3833 = vpow2.f32 %v3661_v46  ;;  %v2301_v53 = vadd.f32 %v2300_v47, %v2220_v12  ;;  %v2281_v40 = vadd.f32 %v2280_v56, %v2200_v3 }
 0x4fe   :  { %v2306_v54 = vadd.f32 %v2301_v53, %v12652_v22  ;;  %v2305_v59 = vadd.f32 %v2281_v40, %v12659_v20 }
 0x500   :  { %v3662_v25 = vmul.f32 -1.442695, %v2306_v54  ;;  %v2387_v26 = vpop.f32.mrf.mxu0  ;;  %v2407_v4 = vpop.f32.mrf.mxu1 }
 0x501   :  { %v3832_v2 = vpop.eup %3831  ;;  %v2450_v11 = vadd.f32 %v2387_v26, %v167_v15  ;;  %v2451_v0 = vadd.f32 %v2407_v4, %v208_v38 }
 0x502   :  { %v3834_v50 = vpop.eup %3833  ;;  %v2310_v52 = vadd.f32 1.0, %v3832_v2  ;;  %3835 = vpow2.f32 %v3662_v25 }
 0x503   :  { %v2329_v39 = vadd.f32 1.0, %v3834_v50  ;;  %v3663_v8 = vmul.f32 -1.442695, %v2450_v11  ;;  %v3664_v13 = vmul.f32 -1.442695, %v2451_v0 }
 0x504   :  { %3837 = vrcp.f32 %v2310_v52  ;;  %v2320_v27 = vand.u32 2147483647, %v2310_v52  ;;  %v2322_v63 = vand.u32 2147483648, %v2310_v52  ;;  %vm2316_vm15 = vweird.f32 %v2310_v52 }
 0x505   :  { %3839 = vrcp.f32 %v2329_v39  ;;  %v2341_v61 = vand.u32 2147483648, %v2329_v39  ;;  %v2339_v31 = vand.u32 2147483647, %v2329_v39  ;;  %vm2335_vm14 = vweird.f32 %v2329_v39 }
 0x506   :  { %3841 = vpow2.f32 %v3663_v8  ;;  %vm2321_vm1 = vcmp.eq.f32.partialorder %v2320_v27, 8.507059e+37  ;;  %v2323_v35 = vor.u32 1.1754944e-38, %v2322_v63 }
 0x507   :  { %3843 = vpow2.f32 %v3664_v13  ;;  %v2447_v10 = vpop.f32.mrf.mxu3  ;;  %v2427_v12 = vpop.f32.mrf.mxu2  ;;  %v2342_v47 = vor.u32 1.1754944e-38, %v2341_v61  ;;  %vm2340_vm3 = vcmp.eq.f32.partialorder %v2339_v31, 8.507059e+37 }
 0x508   :  { %v3836_v48 = vpop.eup %3835  ;;  %v2453_v9 = vadd.f32 %v2447_v10, %v290_v36  ;;  %v2452_v54 = vadd.f32 %v2427_v12, %v249_v34 }
 0x509   :  { %v9284_v18 = vadd.f32 1.0, %v3836_v48 }
 0x50a   :  { %v3838_v23 = vpop.eup %3837  ;;  %v3665_v5 = vmul.f32 -1.442695, %v2453_v9 }
 0x50b   :  { %v3840_v44 = vpop.eup %3839  ;;  %v2312_v1 = vmul.f32 %v3838_v23, %v2310_v52  ;;  %3845 = vrcp.f32 %v9284_v18  ;;  %vm2317_vm12 = vweird.f32 %v3838_v23  ;;  %vm2355_vm4 = vweird.f32 %v9284_v18 }
 0x50c   :  { %v3842_v14 = vpop.eup %3841  ;;  %v2331_v19 = vmul.f32 %v3840_v44, %v2329_v39  ;;  %3847 = vpow2.f32 %v3665_v5  ;;  %vm2336_vm13 = vweird.f32 %v3840_v44  ;;  %vm2318_vm0 = vmor %vm2316_vm15, %vm2317_vm12  ;;  %v2361_v39 = vand.u32 2147483648, %v9284_v18 }
 0x50d   :  { %v3844_v29 = vpop.eup %3843  ;;  %v2313_v49 = vsub.f32 1.0, %v2312_v1  ;;  %3849 = vtanh.f32 %v2305_v59  ;;  %v9287_v30 = vadd.f32 1.0, %v3842_v14  ;;  %vm2337_vm2 = vmor %vm2335_vm14, %vm2336_vm13  ;;  %v9524_v1 = vld [vmem:[%s11001_s2 + $0x138] sm:$0xff] }
 0x50e   :  { %v2332_v16 = vsub.f32 1.0, %v2331_v19  ;;  %v9289_v51 = vadd.f32 1.0, %v3844_v29  ;;  %v2362_v14 = vor.u32 1.1754944e-38, %v2361_v39 }
 0x50f   :  { %v2314_v24 = vmul.f32 %v3838_v23, %v2313_v49  ;;  %3851 = vrcp.f32 %v9287_v30  ;;  %v2467_v13 = vand.u32 2147483647, %v9287_v30  ;;  %v2469_v41 = vand.u32 2147483648, %v9287_v30 }
 0x510   :  { %v2333_v28 = vmul.f32 %v3840_v44, %v2332_v16  ;;  %3853 = vrcp.f32 %v9289_v51  ;;  %v2488_v36 = vand.u32 2147483648, %v9289_v51  ;;  %v2486_v59 = vand.u32 2147483647, %v9289_v51 }
 0x511   :  { %v9293_v58 = vpop.eup %3845  ;;  %v2315_v17 = vadd.f32 %v3838_v23, %v2314_v24  ;;  %vm2463_vm8 = vweird.f32 %v9287_v30  ;;  %vm2482_vm10 = vweird.f32 %v9289_v51  ;;  %v2470_v29 = vor.u32 1.1754944e-38, %v2469_v41  ;;  %v9460_v41 = vld [vmem:[%s11001_s2 + $0x168] sm:$0xff] }
 0x512   :  { %v3848_v42 = vpop.eup %3847  ;;  %v2334_v45 = vadd.f32 %v3840_v44, %v2333_v28  ;;  %v2351_v46 = vmul.f32 %v9293_v58, %v9284_v18  ;;  %vm2356_vm5 = vweird.f32 %v9293_v58  ;;  %v2489_v16 = vor.u32 1.1754944e-38, %v2488_v36  ;;  %v9476_v36 = vld [vmem:[%s11001_s2 + $0x178] sm:$0xff] }
 0x513   :  { %v3850_v3 = vpop.eup %3849  ;;  %v2319_v53 = vsel %vm2318_vm0, %v3838_v23, %v2315_v17  ;;  %v9300_v62 = vadd.f32 1.0, %v3848_v42  ;;  %v2359_v23 = vand.u32 2147483647, %v9284_v18  ;;  %vm9326_vm9 = vmor %vm2355_vm4, %vm2356_vm5  ;;  %vm2468_vm13 = vcmp.eq.f32.partialorder %v2467_v13, 8.507059e+37  ;;  %v9448_v13 = vld [vmem:[%s11001_s2 + $0x198] sm:$0xff] }
 0x514   :  { %v2324_v15 = vsel %vm2321_vm1, %v2323_v35, %v2319_v53  ;;  %v2338_v55 = vsel %vm2337_vm2, %v3840_v44, %v2334_v45  ;;  %v2352_v38 = vsub.f32 1.0, %v2351_v46  ;;  %vm2487_vm14 = vcmp.eq.f32.partialorder %v2486_v59, 8.507059e+37  ;;  %v9345_v35 = vld [vmem:[%s11001_s2 + $0x1e0] sm:$0xff]  ;;  %v9359_v46 = vld [vmem:[%s11001_s2 + $0x1f0] sm:$0xff]  ;;  %v9500_v59 = vld [vmem:[%s11001_s2 + $0x158] sm:$0xff] }
 0x515   :  { %v3852_v25 = vpop.eup %3851  ;;  %v2343_v26 = vsel %vm2340_vm3, %v2342_v47, %v2338_v55  ;;  %v2366_v4 = vmul.f32 %v3850_v3, %v2324_v15  ;;  %3855 = vrcp.f32 %v9300_v62  ;;  %vm2360_vm15 = vcmp.eq.f32.partialorder %v2359_v23, 8.507059e+37  ;;  %v9365_v3 = vld [vmem:[%s11001_s2 + $0x1f8] sm:$0xff]  ;;  %v9377_v53 = vld [vmem:[%s11001_s2 + $0x1c0] sm:$0xff]  ;;  %v9392_v15 = vld [vmem:[%s11001_s2 + $0x1d0] sm:$0xff] }
 0x516   :  { %v3854_v2 = vpop.eup %3853  ;;  %v2365_v11 = vmul.f32 %v2343_v26, %v9040_v6  ;;  %v2353_v0 = vmul.f32 %v9293_v58, %v2352_v38  ;;  %v2459_v50 = vmul.f32 %v3852_v25, %v9287_v30  ;;  %3857 = vtanh.f32 %v2452_v54  ;;  %v9383_v54 = vld [vmem:[%s11001_s2 + $0x1c8] sm:$0xff]  ;;  %v9398_v55 = vld [vmem:[%s11001_s2 + $0x1d8] sm:$0xff]  ;;  %v9506_v23 = vld [vmem:[%s11001_s2 + $0x120] sm:$0xff] }
 0x517   :  { %v2478_v52 = vmul.f32 %v3854_v2, %v9289_v51  ;;  %vm2464_vm6 = vweird.f32 %v3852_v25  ;;  %vm2483_vm7 = vweird.f32 %v3854_v2  ;;  %v2508_v42 = vand.u32 2147483648, %v9300_v62  ;;  %v9410_v26 = vld [vmem:[%s11001_s2 + $0x1a8] sm:$0xff]  ;;  %v9650_v47 = vld [vmem:[%s11001_s2 + $0x60] sm:$0xff] }
 0x518   :  { %v9308_v56 = vadd.f32 %v2366_v4, %v2365_v11  ;;  %v2460_v8 = vsub.f32 1.0, %v2459_v50  ;;  %v2354_v6 = vadd.f32 %v9293_v58, %v2353_v0  ;;  %vm2465_vm11 = vmor %vm2463_vm8, %vm2464_vm6  ;;  %vm2502_vm1 = vweird.f32 %v9300_v62  ;;  %v9416_v4 = vld [vmem:[%s11001_s2 + $0x1b0] sm:$0xff]  ;;  %v9428_v50 = vld [vmem:[%s11001_s2 + $0x180] sm:$0xff]  ;;  %12681 = vst [vmem:[#allocation8_spill] sm:$0xff] %v9650_v47 }
 0x519   :  { %v2479_v40 = vsub.f32 1.0, %v2478_v52  ;;  %vm2484_vm12 = vmor %vm2482_vm10, %vm2483_vm7  ;;  %v2506_v45 = vand.u32 2147483647, %v9300_v62  ;;  %v2509_v38 = vor.u32 1.1754944e-38, %v2508_v42  ;;  %v9434_v52 = vld [vmem:[%s11001_s2 + $0x188] sm:$0xff]  ;;  %v9638_v42 = vld [vmem:[%s11001_s2 + $0x90] sm:$0xff] }
 0x51a   :  { %3859 = vtanh.f32 %v9308_v56  ;;  %v2461_v10 = vmul.f32 %v3852_v25, %v2460_v8  ;;  %v2358_v30 = vsel %vm9326_vm9, %v9293_v58, %v2354_v6  ;;  %v9442_v8 = vld [vmem:[%s11001_s2 + $0x190] sm:$0xff]  ;;  %12679 = vst [vmem:[#allocation91_spill] sm:$0xff] %v9638_v42 }
 0x51b   :  { %v9317_v48 = vpop.eup %3855  ;;  %v2480_v9 = vmul.f32 %v3854_v2, %v2479_v40  ;;  %v2363_v12 = vsel %vm2360_vm15, %v2362_v14, %v2358_v30  ;;  %vm2507_vm3 = vcmp.eq.f32.partialorder %v2506_v45, 8.507059e+37  ;;  %v9454_v40 = vld [vmem:[%s11001_s2 + $0x160] sm:$0xff]  ;;  %v9470_v6 = vld [vmem:[%s11001_s2 + $0x170] sm:$0xff]  ;;  %v9644_v45 = vld [vmem:[%s11001_s2 + $0x98] sm:$0xff] }
 0x51c   :  { %v2462_v5 = vadd.f32 %v3852_v25, %v2461_v10  ;;  %v2498_v44 = vmul.f32 %v9317_v48, %v9300_v62  ;;  %v3858_v19 = vpop.eup %3857  ;;  %vm2503_vm0 = vweird.f32 %v9317_v48  ;;  %v9482_v10 = vld [vmem:[%s11001_s2 + $0x140] sm:$0xff]  ;;  %12680 = vst [vmem:[#allocation90_spill] sm:$0xff] %v9644_v45 }
 0x51d   :  { %v2481_v49 = vadd.f32 %v3854_v2, %v2480_v9  ;;  %vm9370_vm2 = vmor %vm2502_vm1, %vm2503_vm0  ;;  %v9494_v9 = vld [vmem:[%s11001_s2 + $0x150] sm:$0xff]  ;;  %v9530_v14 = vld [vmem:[%s11001_s2 + $0x100] sm:$0xff] }
 0x51e   :  { %v2466_v27 = vsel %vm2465_vm11, %v3852_v25, %v2462_v5  ;;  %v2499_v18 = vsub.f32 1.0, %v2498_v44  ;;  %v9404_v25 = vld [vmem:[%s11001_s2 + $0x1a0] sm:$0xff]  ;;  %v9512_v5 = vld [vmem:[%s11001_s2 + $0x128] sm:$0xff]  ;;  %v9518_v44 = vld [vmem:[%s11001_s2 + $0x130] sm:$0xff] }
 0x51f   :  { %v2471_v63 = vsel %vm2468_vm13, %v2470_v29, %v2466_v27  ;;  %v2485_v61 = vsel %vm2484_vm12, %v3854_v2, %v2481_v49  ;;  %v9422_v2 = vld [vmem:[%s11001_s2 + $0x1b8] sm:$0xff]  ;;  %v9542_v29 = vld [vmem:[%s11001_s2 + $0x110] sm:$0xff]  ;;  %v9554_v30 = vld [vmem:[%s11001_s2 + $0xe0] sm:$0xff] }
 0x520   :  { %v3860_v24 = vpop.eup %3859  ;;  %v2490_v28 = vsel %vm2487_vm14, %v2489_v16, %v2485_v61  ;;  %v2513_v31 = vmul.f32 %v3858_v19, %v2471_v63  ;;  %v2500_v51 = vmul.f32 %v9317_v48, %v2499_v18  ;;  %v9536_v19 = vld [vmem:[%s11001_s2 + $0x108] sm:$0xff]  ;;  %v9548_v49 = vld [vmem:[%s11001_s2 + $0x118] sm:$0xff]  ;;  %12665 = vst [vmem:[#allocation190_spill] sm:$0xff] %v9554_v30  ;;  %v9566_v27 = vld [vmem:[%s11001_s2 + $0xf0] sm:$0xff] }
 0x521   :  { %v2512_v32 = vmul.f32 %v2490_v28, %v9093_v33  ;;  %v2369_v34 = vmul.f32 %v3860_v24, %v2363_v12  ;;  %v9351_v33 = vld [vmem:[%s11001_s2 + $0x1e8] sm:$0xff]  ;;  %12667 = vst [vmem:[#allocation192_spill] sm:$0xff] %v9566_v27  ;;  %v9572_v18 = vld [vmem:[%s11001_s2 + $0xf8] sm:$0xff]  ;;  %v9578_v63 = vld [vmem:[%s11001_s2 + $0xc0] sm:$0xff] }
 0x522   :  { %v2501_v58 = vadd.f32 %v9317_v48, %v2500_v51  ;;  %v9560_v16 = vld [vmem:[%s11001_s2 + $0xe8] sm:$0xff]  ;;  %12668 = vst [vmem:[#allocation193_spill] sm:$0xff] %v9572_v18  ;;  %v9590_v24 = vld [vmem:[%s11001_s2 + $0xd0] sm:$0xff]  ;;  %v9596_v28 = vld [vmem:[%s11001_s2 + $0xd8] sm:$0xff] }
 0x523   :  { %v9336_v17 = vadd.f32 %v2513_v31, %v2512_v32  ;;  %2533 = vmatmul.f32.vlgmr.msrb.gmra.mxu0 %v2369_v34  ;;  %2553 = vmatmul.f32.vlgmr.msrb.gmra.mxu1 %v2369_v34  ;;  %12666 = vst [vmem:[#allocation191_spill] sm:$0xff] %v9560_v16  ;;  %v9584_v61 = vld [vmem:[%s11001_s2 + $0xc8] sm:$0xff]  ;;  %v9602_v31 = vld [vmem:[%s11001_s2 + $0xa0] sm:$0xff]  ;;  %v9614_v12 = vld [vmem:[%s11001_s2 + $0xb0] sm:$0xff] }
 0x524   :  { %2573 = vmatmul.f32.vlgmr.msrb.gmra.mxu2 %v2369_v34  ;;  %2593 = vmatmul.f32.vlgmr.msrb.gmra.mxu3 %v2369_v34  ;;  %v2505_v62 = vsel %vm9370_vm2, %v9317_v48, %v2501_v58  ;;  %v9488_v48 = vld [vmem:[%s11001_s2 + $0x148] sm:$0xff]  ;;  %12669 = vst [vmem:[#allocation93_spill] sm:$0xff] %v9578_v63  ;;  %v9620_v32 = vld [vmem:[%s11001_s2 + $0xb8] sm:$0xff]  ;;  %v9626_v34 = vld [vmem:[%s11001_s2 + $0x80] sm:$0xff] }
 0x525   :  { %3861 = vtanh.f32 %v9336_v17  ;;  %2744 = vmatpush.msrb.mxu0 %v9345_v35  ;;  %2764 = vmatpush.msrb.mxu1 %v9351_v33  ;;  %v2510_v0 = vsel %vm2507_vm3, %v2509_v38, %v2505_v62  ;;  %12670 = vst [vmem:[#allocation94_spill] sm:$0xff] %v9584_v61  ;;  %v9608_v51 = vld [vmem:[%s11001_s2 + $0xa8] sm:$0xff]  ;;  %v9662_v38 = vld [vmem:[%s11001_s2 + $0x70] sm:$0xff] }
 0x526   :  { %2784 = vmatpush.msrb.mxu2 %v9359_v46  ;;  %2804 = vmatpush.msrb.mxu3 %v9365_v3  ;;  %12671 = vst [vmem:[#allocation108_spill] sm:$0xff] %v9590_v24  ;;  %v9632_v58 = vld [vmem:[%s11001_s2 + $0x88] sm:$0xff] }
 0x527   :  { %2745 = vmatpush.msrb.mxu0 %v9377_v53  ;;  %2765 = vmatpush.msrb.mxu1 %v9383_v54  ;;  %12672 = vst [vmem:[#allocation107_spill] sm:$0xff] %v9596_v28  ;;  %v9656_v62 = vld [vmem:[%s11001_s2 + $0x68] sm:$0xff] }
 0x528   :  { %2785 = vmatpush.msrb.mxu2 %v9392_v15  ;;  %2805 = vmatpush.msrb.mxu3 %v9398_v55  ;;  %12673 = vst [vmem:[#allocation110_spill] sm:$0xff] %v9602_v31 }
 0x529   :  { %2746 = vmatpush.msrb.mxu0 %v9404_v25  ;;  %2766 = vmatpush.msrb.mxu1 %v9410_v26  ;;  %12674 = vst [vmem:[#allocation111_spill] sm:$0xff] %v9608_v51 }
 0x52a   :  { %2786 = vmatpush.msrb.mxu2 %v9416_v4  ;;  %2806 = vmatpush.msrb.mxu3 %v9422_v2  ;;  %12675 = vst [vmem:[#allocation124_spill] sm:$0xff] %v9614_v12 }
 0x52b   :  { %v3862_v11 = vpop.eup %3861  ;;  %2747 = vmatpush.msrb.mxu0 %v9428_v50  ;;  %2767 = vmatpush.msrb.mxu1 %v9434_v52  ;;  %12676 = vst [vmem:[#allocation131_spill] sm:$0xff] %v9620_v32 }
 0x52c   :  { %v9437_v39 = vmul.f32 %v3862_v11, %v2510_v0  ;;  %2787 = vmatpush.msrb.mxu2 %v9442_v8  ;;  %2807 = vmatpush.msrb.mxu3 %v9448_v13  ;;  %12677 = vst [vmem:[#allocation72_spill] sm:$0xff] %v9626_v34  ;;  %v9668_v11 = vld [vmem:[%s11001_s2 + $0x78] sm:$0xff]  ;;  %v9674_v0 = vld [vmem:[%s11001_s2 + $0x40] sm:$0xff] }
 0x52d   :  { %2748 = vmatpush.msrb.mxu0 %v9454_v40  ;;  %2768 = vmatpush.msrb.mxu1 %v9460_v41  ;;  %12678 = vst [vmem:[#allocation73_spill] sm:$0xff] %v9632_v58 }
 0x52e   :  { %2613 = vmatmul.f32.vlgmr.msra.gmra.mxu0 %v9437_v39  ;;  %2633 = vmatmul.f32.vlgmr.msra.gmra.mxu1 %v9437_v39  ;;  %12682 = vst [vmem:[#allocation7_spill] sm:$0xff] %v9656_v62 }
 0x52f   :  { %2653 = vmatmul.f32.vlgmr.msra.gmra.mxu2 %v9437_v39  ;;  %2673 = vmatmul.f32.vlgmr.msra.gmra.mxu3 %v9437_v39  ;;  %12683 = vst [vmem:[#allocation9_spill] sm:$0xff] %v9662_v38 }
 0x530   :  { %2788 = vmatpush.msrb.mxu2 %v9470_v6  ;;  %2808 = vmatpush.msrb.mxu3 %v9476_v36  ;;  %12684 = vst [vmem:[#allocation10_spill] sm:$0xff] %v9668_v11 }
 0x531   :  { %2749 = vmatpush.msrb.mxu0 %v9482_v10  ;;  %2769 = vmatpush.msrb.mxu1 %v9488_v48  ;;  %12685 = vst [vmem:[#allocation11_spill] sm:$0xff] %v9674_v0 }
 0x532   :  { %2789 = vmatpush.msrb.mxu2 %v9494_v9  ;;  %2809 = vmatpush.msrb.mxu3 %v9500_v59 }
 0x533   :  { %2750 = vmatpush.msrb.mxu0 %v9506_v23  ;;  %2770 = vmatpush.msrb.mxu1 %v9512_v5 }
 0x534   :  { %2790 = vmatpush.msrb.mxu2 %v9518_v44  ;;  %2810 = vmatpush.msrb.mxu3 %v9524_v1 }
 0x535   :  { %2751 = vmatpush.msrb.mxu0 %v9530_v14  ;;  %2771 = vmatpush.msrb.mxu1 %v9536_v19 }
 0x536   :  { %2791 = vmatpush.msrb.mxu2 %v9542_v29  ;;  %2811 = vmatpush.msrb.mxu3 %v9548_v49 }
 0x537   :  { %2752 = vmatpush.msrb.mxu0 %v9554_v30  ;;  %2772 = vmatpush.msrb.mxu1 %v9560_v16 }
 0x538   :  { %2792 = vmatpush.msrb.mxu2 %v9566_v27  ;;  %2812 = vmatpush.msrb.mxu3 %v9572_v18 }
 0x539   :  { %2753 = vmatpush.msrb.mxu0 %v9578_v63  ;;  %2773 = vmatpush.msrb.mxu1 %v9584_v61 }
 0x53a   :  { %2793 = vmatpush.msrb.mxu2 %v9590_v24  ;;  %2813 = vmatpush.msrb.mxu3 %v9596_v28 }
 0x53b   :  { %2754 = vmatpush.msrb.mxu0 %v9602_v31  ;;  %2774 = vmatpush.msrb.mxu1 %v9608_v51 }
 0x53c   :  { %2794 = vmatpush.msrb.mxu2 %v9614_v12  ;;  %2814 = vmatpush.msrb.mxu3 %v9620_v32 }
 0x53d   :  { %2755 = vmatpush.msrb.mxu0 %v9626_v34  ;;  %2775 = vmatpush.msrb.mxu1 %v9632_v58 }
 0x53e   :  { %2795 = vmatpush.msrb.mxu2 %v9638_v42  ;;  %2815 = vmatpush.msrb.mxu3 %v9644_v45 }
 0x53f   :  { %2756 = vmatpush.msrb.mxu0 %v9650_v47  ;;  %2776 = vmatpush.msrb.mxu1 %v9656_v62  ;;  %v9680_v62 = vld [vmem:[%s11001_s2 + $0x48] sm:$0xff] }
 0x540   :  { %2796 = vmatpush.msrb.mxu2 %v9662_v38  ;;  %2816 = vmatpush.msrb.mxu3 %v9668_v11  ;;  %12686 = vst [vmem:[#allocation12_spill] sm:$0xff] %v9680_v62  ;;  %v9686_v38 = vld [vmem:[%s11001_s2 + $0x50] sm:$0xff]  ;;  %v9692_v11 = vld [vmem:[%s11001_s2 + $0x58] sm:$0xff] }
 0x541   :  { %2757 = vmatpush.msrb.mxu0 %v9674_v0  ;;  %2777 = vmatpush.msrb.mxu1 %v9680_v62  ;;  %12687 = vst [vmem:[#allocation13_spill] sm:$0xff] %v9686_v38  ;;  %v9698_v0 = vld [vmem:[%s11001_s2 + $0x20] sm:$0xff]  ;;  %v9704_v62 = vld [vmem:[%s11001_s2 + $0x28] sm:$0xff] }
 0x542   :  { %2797 = vmatpush.msrb.mxu2 %v9686_v38  ;;  %12688 = vst [vmem:[#allocation14_spill] sm:$0xff] %v9692_v11  ;;  %2817 = vmatpush.msrb.mxu3 %v9692_v11  ;;  %v9710_v38 = vld [vmem:[%s11001_s2 + $0x30] sm:$0xff]  ;;  %v9716_v11 = vld [vmem:[%s11001_s2 + $0x38] sm:$0xff] }
 0x543   :  { %12689 = vst [vmem:[#allocation15_spill] sm:$0xff] %v9698_v0  ;;  %2758 = vmatpush.msrb.mxu0 %v9698_v0  ;;  %2778 = vmatpush.msrb.mxu1 %v9704_v62  ;;  %v9722_v0 = vld [vmem:[%s11001_s2] sm:$0xff] }
 0x544   :  { %12690 = vst [vmem:[#allocation16_spill] sm:$0xff] %v9704_v62  ;;  %2798 = vmatpush.msrb.mxu2 %v9710_v38  ;;  %2818 = vmatpush.msrb.mxu3 %v9716_v11  ;;  %v9728_v62 = vld [vmem:[%s11001_s2 + $0x8] sm:$0xff] }
 0x545   :  { %12691 = vst [vmem:[#allocation17_spill] sm:$0xff] %v9710_v38  ;;  %2759 = vmatpush.msrb.mxu0 %v9722_v0  ;;  %2779 = vmatpush.msrb.mxu1 %v9728_v62  ;;  %v9734_v38 = vld [vmem:[%s11001_s2 + $0x10] sm:$0xff] }
 0x546   :  { %12692 = vst [vmem:[#allocation18_spill] sm:$0xff] %v9716_v11  ;;  %2799 = vmatpush.msrb.mxu2 %v9734_v38  ;;  %v9740_v11 = vld [vmem:[%s11001_s2 + $0x18] sm:$0xff]  ;;  %2760 = vmatmul.f32.vlgmr.msrb.gmra.mxu0 %v9437_v39 }
 0x547   :  { %12693 = vst [vmem:[#allocation19_spill] sm:$0xff] %v9722_v0  ;;  %2819 = vmatpush.msrb.mxu3 %v9740_v11  ;;  %2780 = vmatmul.f32.vlgmr.msrb.gmra.mxu1 %v9437_v39 }
 0x548   :  { %12694 = vst [vmem:[#allocation20_spill] sm:$0xff] %v9728_v62  ;;  %2800 = vmatmul.f32.vlgmr.msrb.gmra.mxu2 %v9437_v39  ;;  %2820 = vmatmul.f32.vlgmr.msrb.gmra.mxu3 %v9437_v39  ;;  %v9750_v62 = vld [vmem:[%s11002_s5 + $0x1e0] sm:$0xff]  ;;  %v9768_v39 = vld [vmem:[%s11002_s5 + $0x1f8] sm:$0xff] }
 0x549   :  { %12695 = vst [vmem:[#allocation21_spill] sm:$0xff] %v9734_v38  ;;  %2891 = vmatpush.msra.mxu0 %v9750_v62  ;;  %v9756_v38 = vld [vmem:[%s11002_s5 + $0x1e8] sm:$0xff]  ;;  %2951 = vmatpush.msra.mxu3 %v9768_v39 }
 0x54a   :  { %12696 = vst [vmem:[#allocation22_spill] sm:$0xff] %v9740_v11  ;;  %2911 = vmatpush.msra.mxu1 %v9756_v38  ;;  %v9762_v11 = vld [vmem:[%s11002_s5 + $0x1f0] sm:$0xff] }
 0x54b   :  { %12697 = vst [vmem:[#allocation23_spill] sm:$0xff] %v9750_v62  ;;  %2931 = vmatpush.msra.mxu2 %v9762_v11  ;;  %v9774_v62 = vld [vmem:[%s11002_s5 + $0x1c0] sm:$0xff] }
 0x54c   :  { %12698 = vst [vmem:[#allocation24_spill] sm:$0xff] %v9756_v38  ;;  %2892 = vmatpush.msra.mxu0 %v9774_v62  ;;  %v9780_v38 = vld [vmem:[%s11002_s5 + $0x1c8] sm:$0xff] }
 0x54d   :  { %12699 = vst [vmem:[#allocation25_spill] sm:$0xff] %v9762_v11  ;;  %2912 = vmatpush.msra.mxu1 %v9780_v38  ;;  %v9786_v11 = vld [vmem:[%s11002_s5 + $0x1d0] sm:$0xff] }
 0x54e   :  { %12700 = vst [vmem:[#allocation26_spill] sm:$0xff] %v9768_v39  ;;  %2932 = vmatpush.msra.mxu2 %v9786_v11  ;;  %v9792_v39 = vld [vmem:[%s11002_s5 + $0x1d8] sm:$0xff] }
 0x54f   :  { %12701 = vst [vmem:[#allocation27_spill] sm:$0xff] %v9774_v62  ;;  %2952 = vmatpush.msra.mxu3 %v9792_v39  ;;  %v9798_v62 = vld [vmem:[%s11002_s5 + $0x1a0] sm:$0xff] }
 0x550   :  { %12702 = vst [vmem:[#allocation28_spill] sm:$0xff] %v9780_v38  ;;  %2893 = vmatpush.msra.mxu0 %v9798_v62  ;;  %v9804_v38 = vld [vmem:[%s11002_s5 + $0x1a8] sm:$0xff] }
 0x551   :  { %12703 = vst [vmem:[#allocation29_spill] sm:$0xff] %v9786_v11  ;;  %2913 = vmatpush.msra.mxu1 %v9804_v38  ;;  %v9810_v11 = vld [vmem:[%s11002_s5 + $0x1b0] sm:$0xff] }
 0x552   :  { %12704 = vst [vmem:[#allocation30_spill] sm:$0xff] %v9792_v39  ;;  %2933 = vmatpush.msra.mxu2 %v9810_v11  ;;  %v9816_v39 = vld [vmem:[%s11002_s5 + $0x1b8] sm:$0xff] }
 0x553   :  { %12705 = vst [vmem:[#allocation31_spill] sm:$0xff] %v9798_v62  ;;  %2953 = vmatpush.msra.mxu3 %v9816_v39  ;;  %v9822_v62 = vld [vmem:[%s11002_s5 + $0x180] sm:$0xff] }
 0x554   :  { %12706 = vst [vmem:[#allocation32_spill] sm:$0xff] %v9804_v38  ;;  %2894 = vmatpush.msra.mxu0 %v9822_v62  ;;  %v9828_v38 = vld [vmem:[%s11002_s5 + $0x188] sm:$0xff] }
 0x555   :  { %12707 = vst [vmem:[#allocation33_spill] sm:$0xff] %v9810_v11  ;;  %2914 = vmatpush.msra.mxu1 %v9828_v38  ;;  %v9834_v11 = vld [vmem:[%s11002_s5 + $0x190] sm:$0xff] }
 0x556   :  { %12708 = vst [vmem:[#allocation34_spill] sm:$0xff] %v9816_v39  ;;  %2934 = vmatpush.msra.mxu2 %v9834_v11  ;;  %v9840_v39 = vld [vmem:[%s11002_s5 + $0x198] sm:$0xff] }
 0x557   :  { %12709 = vst [vmem:[#allocation35_spill] sm:$0xff] %v9822_v62  ;;  %2954 = vmatpush.msra.mxu3 %v9840_v39  ;;  %v9846_v62 = vld [vmem:[%s11002_s5 + $0x160] sm:$0xff] }
 0x558   :  { %12710 = vst [vmem:[#allocation36_spill] sm:$0xff] %v9828_v38  ;;  %2895 = vmatpush.msra.mxu0 %v9846_v62  ;;  %v9852_v38 = vld [vmem:[%s11002_s5 + $0x168] sm:$0xff] }
 0x559   :  { %12711 = vst [vmem:[#allocation37_spill] sm:$0xff] %v9834_v11  ;;  %2915 = vmatpush.msra.mxu1 %v9852_v38  ;;  %v9858_v11 = vld [vmem:[%s11002_s5 + $0x170] sm:$0xff] }
 0x55a   :  { %12712 = vst [vmem:[#allocation38_spill] sm:$0xff] %v9840_v39  ;;  %2935 = vmatpush.msra.mxu2 %v9858_v11  ;;  %v9864_v39 = vld [vmem:[%s11002_s5 + $0x178] sm:$0xff] }
 0x55b   :  { %12713 = vst [vmem:[#allocation39_spill] sm:$0xff] %v9846_v62  ;;  %2955 = vmatpush.msra.mxu3 %v9864_v39  ;;  %v9870_v62 = vld [vmem:[%s11002_s5 + $0x140] sm:$0xff] }
 0x55c   :  { %12714 = vst [vmem:[#allocation40_spill] sm:$0xff] %v9852_v38  ;;  %2896 = vmatpush.msra.mxu0 %v9870_v62  ;;  %v9876_v38 = vld [vmem:[%s11002_s5 + $0x148] sm:$0xff] }
 0x55d   :  { %12715 = vst [vmem:[#allocation41_spill] sm:$0xff] %v9858_v11  ;;  %2916 = vmatpush.msra.mxu1 %v9876_v38  ;;  %v9882_v11 = vld [vmem:[%s11002_s5 + $0x150] sm:$0xff] }
 0x55e   :  { %12716 = vst [vmem:[#allocation42_spill] sm:$0xff] %v9864_v39  ;;  %2936 = vmatpush.msra.mxu2 %v9882_v11  ;;  %v9888_v39 = vld [vmem:[%s11002_s5 + $0x158] sm:$0xff] }
 0x55f   :  { %12717 = vst [vmem:[#allocation43_spill] sm:$0xff] %v9870_v62  ;;  %2956 = vmatpush.msra.mxu3 %v9888_v39  ;;  %v9894_v62 = vld [vmem:[%s11002_s5 + $0x120] sm:$0xff] }
 0x560   :  { %12718 = vst [vmem:[#allocation44_spill] sm:$0xff] %v9876_v38  ;;  %2897 = vmatpush.msra.mxu0 %v9894_v62  ;;  %v9900_v38 = vld [vmem:[%s11002_s5 + $0x128] sm:$0xff] }
 0x561   :  { %12719 = vst [vmem:[#allocation45_spill] sm:$0xff] %v9882_v11  ;;  %2917 = vmatpush.msra.mxu1 %v9900_v38  ;;  %v9906_v11 = vld [vmem:[%s11002_s5 + $0x130] sm:$0xff] }
 0x562   :  { %12720 = vst [vmem:[#allocation46_spill] sm:$0xff] %v9888_v39  ;;  %2937 = vmatpush.msra.mxu2 %v9906_v11  ;;  %v9912_v39 = vld [vmem:[%s11002_s5 + $0x138] sm:$0xff] }
 0x563   :  { %12721 = vst [vmem:[#allocation47_spill] sm:$0xff] %v9894_v62  ;;  %2957 = vmatpush.msra.mxu3 %v9912_v39  ;;  %v9918_v62 = vld [vmem:[%s11002_s5 + $0x100] sm:$0xff] }
 0x564   :  { %12722 = vst [vmem:[#allocation48_spill] sm:$0xff] %v9900_v38  ;;  %2898 = vmatpush.msra.mxu0 %v9918_v62  ;;  %v9924_v38 = vld [vmem:[%s11002_s5 + $0x108] sm:$0xff] }
 0x565   :  { %12723 = vst [vmem:[#allocation49_spill] sm:$0xff] %v9906_v11  ;;  %2918 = vmatpush.msra.mxu1 %v9924_v38  ;;  %v9930_v11 = vld [vmem:[%s11002_s5 + $0x110] sm:$0xff] }
 0x566   :  { %12724 = vst [vmem:[#allocation50_spill] sm:$0xff] %v9912_v39  ;;  %2938 = vmatpush.msra.mxu2 %v9930_v11  ;;  %v9936_v39 = vld [vmem:[%s11002_s5 + $0x118] sm:$0xff] }
 0x567   :  { %12725 = vst [vmem:[#allocation51_spill] sm:$0xff] %v9918_v62  ;;  %2958 = vmatpush.msra.mxu3 %v9936_v39  ;;  %v9942_v62 = vld [vmem:[%s11002_s5 + $0xe0] sm:$0xff] }
 0x568   :  { %12726 = vst [vmem:[#allocation54_spill] sm:$0xff] %v9924_v38  ;;  %2899 = vmatpush.msra.mxu0 %v9942_v62  ;;  %v9948_v38 = vld [vmem:[%s11002_s5 + $0xe8] sm:$0xff] }
 0x569   :  { %12727 = vst [vmem:[#allocation55_spill] sm:$0xff] %v9930_v11  ;;  %2919 = vmatpush.msra.mxu1 %v9948_v38  ;;  %v9954_v11 = vld [vmem:[%s11002_s5 + $0xf0] sm:$0xff] }
 0x56a   :  { %12728 = vst [vmem:[#allocation56_spill] sm:$0xff] %v9936_v39  ;;  %2939 = vmatpush.msra.mxu2 %v9954_v11  ;;  %v9960_v39 = vld [vmem:[%s11002_s5 + $0xf8] sm:$0xff] }
 0x56b   :  { %12729 = vst [vmem:[#allocation57_spill] sm:$0xff] %v9942_v62  ;;  %2959 = vmatpush.msra.mxu3 %v9960_v39  ;;  %v9966_v62 = vld [vmem:[%s11002_s5 + $0xc0] sm:$0xff] }
 0x56c   :  { %12730 = vst [vmem:[#allocation58_spill] sm:$0xff] %v9948_v38  ;;  %2900 = vmatpush.msra.mxu0 %v9966_v62  ;;  %v9972_v38 = vld [vmem:[%s11002_s5 + $0xc8] sm:$0xff] }
 0x56d   :  { %12731 = vst [vmem:[#allocation59_spill] sm:$0xff] %v9954_v11  ;;  %2920 = vmatpush.msra.mxu1 %v9972_v38  ;;  %v9978_v11 = vld [vmem:[%s11002_s5 + $0xd0] sm:$0xff] }
 0x56e   :  { %12732 = vst [vmem:[#allocation60_spill] sm:$0xff] %v9960_v39  ;;  %2940 = vmatpush.msra.mxu2 %v9978_v11  ;;  %v9984_v39 = vld [vmem:[%s11002_s5 + $0xd8] sm:$0xff] }
 0x56f   :  { %12733 = vst [vmem:[#allocation61_spill] sm:$0xff] %v9966_v62  ;;  %2960 = vmatpush.msra.mxu3 %v9984_v39  ;;  %v9990_v62 = vld [vmem:[%s11002_s5 + $0xa0] sm:$0xff] }
 0x570   :  { %12734 = vst [vmem:[#allocation62_spill] sm:$0xff] %v9972_v38  ;;  %2901 = vmatpush.msra.mxu0 %v9990_v62  ;;  %v9996_v38 = vld [vmem:[%s11002_s5 + $0xa8] sm:$0xff] }
 0x571   :  { %12735 = vst [vmem:[#allocation63_spill] sm:$0xff] %v9978_v11  ;;  %2921 = vmatpush.msra.mxu1 %v9996_v38  ;;  %v10002_v11 = vld [vmem:[%s11002_s5 + $0xb0] sm:$0xff] }
 0x572   :  { %12736 = vst [vmem:[#allocation64_spill] sm:$0xff] %v9984_v39  ;;  %2941 = vmatpush.msra.mxu2 %v10002_v11  ;;  %v10008_v39 = vld [vmem:[%s11002_s5 + $0xb8] sm:$0xff] }
 0x573   :  { %12737 = vst [vmem:[#allocation65_spill] sm:$0xff] %v9990_v62  ;;  %2961 = vmatpush.msra.mxu3 %v10008_v39  ;;  %v10014_v62 = vld [vmem:[%s11002_s5 + $0x80] sm:$0xff] }
 0x574   :  { %12738 = vst [vmem:[#allocation66_spill] sm:$0xff] %v9996_v38  ;;  %2902 = vmatpush.msra.mxu0 %v10014_v62  ;;  %v10020_v38 = vld [vmem:[%s11002_s5 + $0x88] sm:$0xff] }
 0x575   :  { %12739 = vst [vmem:[#allocation69_spill] sm:$0xff] %v10002_v11  ;;  %2922 = vmatpush.msra.mxu1 %v10020_v38  ;;  %v10026_v11 = vld [vmem:[%s11002_s5 + $0x90] sm:$0xff] }
 0x576   :  { %12740 = vst [vmem:[#allocation70_spill] sm:$0xff] %v10008_v39  ;;  %2942 = vmatpush.msra.mxu2 %v10026_v11  ;;  %v10032_v39 = vld [vmem:[%s11002_s5 + $0x98] sm:$0xff] }
 0x577   :  { %12741 = vst [vmem:[#allocation71_spill] sm:$0xff] %v10014_v62  ;;  %2962 = vmatpush.msra.mxu3 %v10032_v39  ;;  %v10038_v62 = vld [vmem:[%s11002_s5 + $0x60] sm:$0xff] }
 0x578   :  { %12742 = vst [vmem:[#allocation74_spill] sm:$0xff] %v10020_v38  ;;  %2903 = vmatpush.msra.mxu0 %v10038_v62  ;;  %v10044_v38 = vld [vmem:[%s11002_s5 + $0x68] sm:$0xff] }
 0x579   :  { %12743 = vst [vmem:[#allocation75_spill] sm:$0xff] %v10026_v11  ;;  %2923 = vmatpush.msra.mxu1 %v10044_v38  ;;  %v10050_v11 = vld [vmem:[%s11002_s5 + $0x70] sm:$0xff] }
 0x57a   :  { %12744 = vst [vmem:[#allocation76_spill] sm:$0xff] %v10032_v39  ;;  %2943 = vmatpush.msra.mxu2 %v10050_v11  ;;  %v10056_v39 = vld [vmem:[%s11002_s5 + $0x78] sm:$0xff] }
 0x57b   :  { %12745 = vst [vmem:[#allocation77_spill] sm:$0xff] %v10038_v62  ;;  %2963 = vmatpush.msra.mxu3 %v10056_v39  ;;  %v10062_v62 = vld [vmem:[%s11002_s5 + $0x40] sm:$0xff] }
 0x57c   :  { %12746 = vst [vmem:[#allocation78_spill] sm:$0xff] %v10044_v38  ;;  %2904 = vmatpush.msra.mxu0 %v10062_v62  ;;  %v10068_v38 = vld [vmem:[%s11002_s5 + $0x48] sm:$0xff] }
 0x57d   :  { %12747 = vst [vmem:[#allocation79_spill] sm:$0xff] %v10050_v11  ;;  %2924 = vmatpush.msra.mxu1 %v10068_v38  ;;  %v10074_v11 = vld [vmem:[%s11002_s5 + $0x50] sm:$0xff] }
 0x57e   :  { %12748 = vst [vmem:[#allocation80_spill] sm:$0xff] %v10056_v39  ;;  %2944 = vmatpush.msra.mxu2 %v10074_v11  ;;  %v10080_v39 = vld [vmem:[%s11002_s5 + $0x58] sm:$0xff] }
 0x57f   :  { %12749 = vst [vmem:[#allocation81_spill] sm:$0xff] %v10062_v62  ;;  %2964 = vmatpush.msra.mxu3 %v10080_v39  ;;  %v10086_v62 = vld [vmem:[%s11002_s5 + $0x20] sm:$0xff] }
 0x580   :  { %12750 = vst [vmem:[#allocation82_spill] sm:$0xff] %v10068_v38  ;;  %2905 = vmatpush.msra.mxu0 %v10086_v62  ;;  %v10092_v38 = vld [vmem:[%s11002_s5 + $0x28] sm:$0xff] }
 0x581   :  { %12751 = vst [vmem:[#allocation83_spill] sm:$0xff] %v10074_v11  ;;  %2925 = vmatpush.msra.mxu1 %v10092_v38  ;;  %v10098_v11 = vld [vmem:[%s11002_s5 + $0x30] sm:$0xff] }
 0x582   :  { %12752 = vst [vmem:[#allocation84_spill] sm:$0xff] %v10080_v39  ;;  %2945 = vmatpush.msra.mxu2 %v10098_v11  ;;  %v10104_v39 = vld [vmem:[%s11002_s5 + $0x38] sm:$0xff] }
 0x583   :  { %12753 = vst [vmem:[#allocation85_spill] sm:$0xff] %v10086_v62  ;;  %2965 = vmatpush.msra.mxu3 %v10104_v39  ;;  %v10110_v62 = vld [vmem:[%s11002_s5] sm:$0xff] }
 0x584   :  { %12754 = vst [vmem:[#allocation86_spill] sm:$0xff] %v10092_v38  ;;  %2906 = vmatpush.msra.mxu0 %v10110_v62  ;;  %v10116_v38 = vld [vmem:[%s11002_s5 + $0x8] sm:$0xff] }
 0x585   :  { %12755 = vst [vmem:[#allocation87_spill] sm:$0xff] %v10098_v11  ;;  %2926 = vmatpush.msra.mxu1 %v10116_v38  ;;  %v10122_v11 = vld [vmem:[%s11002_s5 + $0x10] sm:$0xff] }
 0x586   :  { %12756 = vst [vmem:[#allocation88_spill] sm:$0xff] %v10104_v39  ;;  %2946 = vmatpush.msra.mxu2 %v10122_v11  ;;  %v10128_v39 = vld [vmem:[%s11002_s5 + $0x18] sm:$0xff] }
 0x587   :  { %12757 = vst [vmem:[#allocation89_spill] sm:$0xff] %v10110_v62  ;;  %2966 = vmatpush.msra.mxu3 %v10128_v39  ;;  %v10134_v62 = vld [vmem:[%s11003_s4 + $0x1e0] sm:$0xff] }
 0x588   :  { %12758 = vst [vmem:[#allocation92_spill] sm:$0xff] %v10116_v38  ;;  %2971 = vmatpush.msrb.mxu0 %v10134_v62  ;;  %v10140_v38 = vld [vmem:[%s11003_s4 + $0x1e8] sm:$0xff] }
 0x589   :  { %12759 = vst [vmem:[#allocation95_spill] sm:$0xff] %v10122_v11  ;;  %2991 = vmatpush.msrb.mxu1 %v10140_v38  ;;  %v10146_v11 = vld [vmem:[%s11003_s4 + $0x1f0] sm:$0xff] }
 0x58a   :  { %12760 = vst [vmem:[#allocation96_spill] sm:$0xff] %v10128_v39  ;;  %3011 = vmatpush.msrb.mxu2 %v10146_v11  ;;  %v10152_v39 = vld [vmem:[%s11003_s4 + $0x1f8] sm:$0xff] }
 0x58b   :  { %12761 = vst [vmem:[#allocation97_spill] sm:$0xff] %v10134_v62  ;;  %3031 = vmatpush.msrb.mxu3 %v10152_v39  ;;  %v10158_v62 = vld [vmem:[%s11003_s4 + $0x1c0] sm:$0xff] }
 0x58c   :  { %12762 = vst [vmem:[#allocation98_spill] sm:$0xff] %v10140_v38  ;;  %2972 = vmatpush.msrb.mxu0 %v10158_v62  ;;  %v10164_v38 = vld [vmem:[%s11003_s4 + $0x1c8] sm:$0xff] }
 0x58d   :  { %12763 = vst [vmem:[#allocation99_spill] sm:$0xff] %v10146_v11  ;;  %2992 = vmatpush.msrb.mxu1 %v10164_v38  ;;  %v10170_v11 = vld [vmem:[%s11003_s4 + $0x1d0] sm:$0xff] }
 0x58e   :  { %12764 = vst [vmem:[#allocation100_spill] sm:$0xff] %v10152_v39  ;;  %3012 = vmatpush.msrb.mxu2 %v10170_v11  ;;  %v10176_v39 = vld [vmem:[%s11003_s4 + $0x1d8] sm:$0xff] }
 0x58f   :  { %12765 = vst [vmem:[#allocation101_spill] sm:$0xff] %v10158_v62  ;;  %3032 = vmatpush.msrb.mxu3 %v10176_v39  ;;  %v10182_v62 = vld [vmem:[%s11003_s4 + $0x1a0] sm:$0xff] }
 0x590   :  { %12766 = vst [vmem:[#allocation102_spill] sm:$0xff] %v10164_v38  ;;  %2973 = vmatpush.msrb.mxu0 %v10182_v62  ;;  %v10188_v38 = vld [vmem:[%s11003_s4 + $0x1a8] sm:$0xff] }
 0x591   :  { %12767 = vst [vmem:[#allocation103_spill] sm:$0xff] %v10170_v11  ;;  %2993 = vmatpush.msrb.mxu1 %v10188_v38  ;;  %v10194_v11 = vld [vmem:[%s11003_s4 + $0x1b0] sm:$0xff] }
 0x592   :  { %12768 = vst [vmem:[#allocation104_spill] sm:$0xff] %v10176_v39  ;;  %3013 = vmatpush.msrb.mxu2 %v10194_v11  ;;  %v10200_v39 = vld [vmem:[%s11003_s4 + $0x1b8] sm:$0xff] }
 0x593   :  { %12769 = vst [vmem:[#allocation105_spill] sm:$0xff] %v10182_v62  ;;  %3033 = vmatpush.msrb.mxu3 %v10200_v39  ;;  %v10206_v62 = vld [vmem:[%s11003_s4 + $0x180] sm:$0xff] }
 0x594   :  { %12770 = vst [vmem:[#allocation106_spill] sm:$0xff] %v10188_v38  ;;  %2974 = vmatpush.msrb.mxu0 %v10206_v62  ;;  %v10212_v38 = vld [vmem:[%s11003_s4 + $0x188] sm:$0xff] }
 0x595   :  { %12771 = vst [vmem:[#allocation109_spill] sm:$0xff] %v10194_v11  ;;  %2994 = vmatpush.msrb.mxu1 %v10212_v38  ;;  %v10218_v11 = vld [vmem:[%s11003_s4 + $0x190] sm:$0xff] }
 0x596   :  { %12772 = vst [vmem:[#allocation112_spill] sm:$0xff] %v10200_v39  ;;  %3014 = vmatpush.msrb.mxu2 %v10218_v11  ;;  %v10224_v39 = vld [vmem:[%s11003_s4 + $0x198] sm:$0xff] }
 0x597   :  { %12773 = vst [vmem:[#allocation113_spill] sm:$0xff] %v10206_v62  ;;  %3034 = vmatpush.msrb.mxu3 %v10224_v39  ;;  %v10230_v62 = vld [vmem:[%s11003_s4 + $0x160] sm:$0xff] }
 0x598   :  { %12774 = vst [vmem:[#allocation114_spill] sm:$0xff] %v10212_v38  ;;  %2975 = vmatpush.msrb.mxu0 %v10230_v62  ;;  %v10236_v38 = vld [vmem:[%s11003_s4 + $0x168] sm:$0xff] }
 0x599   :  { %12775 = vst [vmem:[#allocation115_spill] sm:$0xff] %v10218_v11  ;;  %2995 = vmatpush.msrb.mxu1 %v10236_v38  ;;  %v10242_v11 = vld [vmem:[%s11003_s4 + $0x170] sm:$0xff] }
 0x59a   :  { %12776 = vst [vmem:[#allocation116_spill] sm:$0xff] %v10224_v39  ;;  %3015 = vmatpush.msrb.mxu2 %v10242_v11  ;;  %v10248_v39 = vld [vmem:[%s11003_s4 + $0x178] sm:$0xff] }
 0x59b   :  { %12777 = vst [vmem:[#allocation117_spill] sm:$0xff] %v10230_v62  ;;  %3035 = vmatpush.msrb.mxu3 %v10248_v39  ;;  %v10254_v62 = vld [vmem:[%s11003_s4 + $0x140] sm:$0xff] }
 0x59c   :  { %12778 = vst [vmem:[#allocation118_spill] sm:$0xff] %v10236_v38  ;;  %2976 = vmatpush.msrb.mxu0 %v10254_v62  ;;  %v10260_v38 = vld [vmem:[%s11003_s4 + $0x148] sm:$0xff] }
 0x59d   :  { %12779 = vst [vmem:[#allocation119_spill] sm:$0xff] %v10242_v11  ;;  %2996 = vmatpush.msrb.mxu1 %v10260_v38  ;;  %v10266_v11 = vld [vmem:[%s11003_s4 + $0x150] sm:$0xff] }
 0x59e   :  { %12780 = vst [vmem:[#allocation120_spill] sm:$0xff] %v10248_v39  ;;  %3016 = vmatpush.msrb.mxu2 %v10266_v11  ;;  %v10272_v39 = vld [vmem:[%s11003_s4 + $0x158] sm:$0xff] }
 0x59f   :  { %12781 = vst [vmem:[#allocation121_spill] sm:$0xff] %v10254_v62  ;;  %3036 = vmatpush.msrb.mxu3 %v10272_v39  ;;  %v10278_v62 = vld [vmem:[%s11003_s4 + $0x120] sm:$0xff] }
 0x5a0   :  { %12782 = vst [vmem:[#allocation122_spill] sm:$0xff] %v10260_v38  ;;  %2977 = vmatpush.msrb.mxu0 %v10278_v62  ;;  %v10284_v38 = vld [vmem:[%s11003_s4 + $0x128] sm:$0xff]  ;;  %v2554_v0 = vpop.f32.mrf.mxu1 }
 0x5a1   :  { %12783 = vst [vmem:[#allocation123_spill] sm:$0xff] %v10266_v11  ;;  %2997 = vmatpush.msrb.mxu1 %v10284_v38  ;;  %v10290_v11 = vld [vmem:[%s11003_s4 + $0x130] sm:$0xff] }
 0x5a2   :  { %12784 = vst [vmem:[#allocation125_spill] sm:$0xff] %v10272_v39  ;;  %3017 = vmatpush.msrb.mxu2 %v10290_v11  ;;  %v10296_v39 = vld [vmem:[%s11003_s4 + $0x138] sm:$0xff] }
 0x5a3   :  { %12785 = vst [vmem:[#allocation126_spill] sm:$0xff] %v10278_v62  ;;  %3037 = vmatpush.msrb.mxu3 %v10296_v39  ;;  %v10302_v62 = vld [vmem:[%s11003_s4 + $0x100] sm:$0xff] }
 0x5a4   :  { %12786 = vst [vmem:[#allocation127_spill] sm:$0xff] %v10284_v38  ;;  %2978 = vmatpush.msrb.mxu0 %v10302_v62  ;;  %v10308_v38 = vld [vmem:[%s11003_s4 + $0x108] sm:$0xff] }
 0x5a5   :  { %12787 = vst [vmem:[#allocation130_spill] sm:$0xff] %v10290_v11  ;;  %2998 = vmatpush.msrb.mxu1 %v10308_v38  ;;  %v10314_v11 = vld [vmem:[%s11003_s4 + $0x110] sm:$0xff] }
 0x5a6   :  { %12788 = vst [vmem:[#allocation132_spill] sm:$0xff] %v10296_v39  ;;  %3018 = vmatpush.msrb.mxu2 %v10314_v11  ;;  %v10320_v39 = vld [vmem:[%s11003_s4 + $0x118] sm:$0xff] }
 0x5a7   :  { %12789 = vst [vmem:[#allocation133_spill] sm:$0xff] %v10302_v62  ;;  %3038 = vmatpush.msrb.mxu3 %v10320_v39  ;;  %v10326_v62 = vld [vmem:[%s11003_s4 + $0xe0] sm:$0xff]  ;;  %v2594_v47 = vpop.f32.mrf.mxu3  ;;  %v2574_v12 = vpop.f32.mrf.mxu2 }
 0x5a8   :  { %12790 = vst [vmem:[#allocation134_spill] sm:$0xff] %v10308_v38  ;;  %2979 = vmatpush.msrb.mxu0 %v10326_v62  ;;  %v10332_v38 = vld [vmem:[%s11003_s4 + $0xe8] sm:$0xff] }
 0x5a9   :  { %12791 = vst [vmem:[#allocation135_spill] sm:$0xff] %v10314_v11  ;;  %2999 = vmatpush.msrb.mxu1 %v10332_v38  ;;  %v10338_v11 = vld [vmem:[%s11003_s4 + $0xf0] sm:$0xff] }
 0x5aa   :  { %12792 = vst [vmem:[#allocation136_spill] sm:$0xff] %v10320_v39  ;;  %3019 = vmatpush.msrb.mxu2 %v10338_v11  ;;  %v10344_v39 = vld [vmem:[%s11003_s4 + $0xf8] sm:$0xff] }
 0x5ab   :  { %12793 = vst [vmem:[#allocation137_spill] sm:$0xff] %v10326_v62  ;;  %3039 = vmatpush.msrb.mxu3 %v10344_v39  ;;  %v10350_v62 = vld [vmem:[%s11003_s4 + $0xc0] sm:$0xff]  ;;  %v2634_v42 = vpop.f32.mrf.mxu1 }
 0x5ac   :  { %12794 = vst [vmem:[#allocation138_spill] sm:$0xff] %v10332_v38  ;;  %2980 = vmatpush.msrb.mxu0 %v10350_v62  ;;  %v10356_v38 = vld [vmem:[%s11003_s4 + $0xc8] sm:$0xff]  ;;  %v2635_v58 = vadd.f32 %v2634_v42, %v2554_v0 }
 0x5ad   :  { %12795 = vst [vmem:[#allocation139_spill] sm:$0xff] %v10338_v11  ;;  %3000 = vmatpush.msrb.mxu1 %v10356_v38  ;;  %v10362_v11 = vld [vmem:[%s11003_s4 + $0xd0] sm:$0xff] }
 0x5ae   :  { %12796 = vst [vmem:[#allocation140_spill] sm:$0xff] %v10344_v39  ;;  %3020 = vmatpush.msrb.mxu2 %v10362_v11  ;;  %v10368_v39 = vld [vmem:[%s11003_s4 + $0xd8] sm:$0xff]  ;;  %v2678_v32 = vadd.f32 %v2635_v58, %v12651_v7 }
 0x5af   :  { %12797 = vst [vmem:[#allocation141_spill] sm:$0xff] %v10350_v62  ;;  %3040 = vmatpush.msrb.mxu3 %v10368_v39  ;;  %v10374_v62 = vld [vmem:[%s11003_s4 + $0xa0] sm:$0xff] }
 0x5b0   :  { %12798 = vst [vmem:[#allocation142_spill] sm:$0xff] %v10356_v38  ;;  %2981 = vmatpush.msrb.mxu0 %v10374_v62  ;;  %v10380_v38 = vld [vmem:[%s11003_s4 + $0xa8] sm:$0xff]  ;;  %v3667_v51 = vmul.f32 -1.442695, %v2678_v32 }
 0x5b1   :  { %12799 = vst [vmem:[#allocation143_spill] sm:$0xff] %v10362_v11  ;;  %3001 = vmatpush.msrb.mxu1 %v10380_v38  ;;  %v10386_v11 = vld [vmem:[%s11003_s4 + $0xb0] sm:$0xff] }
 0x5b2   :  { %12800 = vst [vmem:[#allocation145_spill] sm:$0xff] %v10368_v39  ;;  %3021 = vmatpush.msrb.mxu2 %v10386_v11  ;;  %v10392_v39 = vld [vmem:[%s11003_s4 + $0xb8] sm:$0xff]  ;;  %v2674_v31 = vpop.f32.mrf.mxu3  ;;  %v2654_v27 = vpop.f32.mrf.mxu2 }
 0x5b3   :  { %12801 = vst [vmem:[#allocation146_spill] sm:$0xff] %v10374_v62  ;;  %3041 = vmatpush.msrb.mxu3 %v10392_v39  ;;  %v10398_v62 = vld [vmem:[%s11003_s4 + $0x80] sm:$0xff]  ;;  %v2675_v28 = vadd.f32 %v2674_v31, %v2594_v47 }
 0x5b4   :  { %12802 = vst [vmem:[#allocation147_spill] sm:$0xff] %v10380_v38  ;;  %2982 = vmatpush.msrb.mxu0 %v10398_v62  ;;  %v10404_v38 = vld [vmem:[%s11003_s4 + $0x88] sm:$0xff] }
 0x5b5   :  { %12803 = vst [vmem:[#allocation150_spill] sm:$0xff] %v10386_v11  ;;  %3002 = vmatpush.msrb.mxu1 %v10404_v38  ;;  %v10410_v11 = vld [vmem:[%s11003_s4 + $0x90] sm:$0xff] }
 0x5b6   :  { %12804 = vst [vmem:[#allocation151_spill] sm:$0xff] %v10392_v39  ;;  %3022 = vmatpush.msrb.mxu2 %v10410_v11  ;;  %v10416_v39 = vld [vmem:[%s11003_s4 + $0x98] sm:$0xff] }
 0x5b7   :  { %12805 = vst [vmem:[#allocation152_spill] sm:$0xff] %v10398_v62  ;;  %3042 = vmatpush.msrb.mxu3 %v10416_v39  ;;  %v10422_v62 = vld [vmem:[%s11003_s4 + $0x60] sm:$0xff] }
 0x5b8   :  { %12806 = vst [vmem:[#allocation153_spill] sm:$0xff] %v10404_v38  ;;  %2983 = vmatpush.msrb.mxu0 %v10422_v62  ;;  %v10428_v38 = vld [vmem:[%s11003_s4 + $0x68] sm:$0xff] }
 0x5b9   :  { %12807 = vst [vmem:[#allocation154_spill] sm:$0xff] %v10410_v11  ;;  %3003 = vmatpush.msrb.mxu1 %v10428_v38  ;;  %v10434_v11 = vld [vmem:[%s11003_s4 + $0x70] sm:$0xff] }
 0x5ba   :  { %12808 = vst [vmem:[#allocation156_spill] sm:$0xff] %v10416_v39  ;;  %3023 = vmatpush.msrb.mxu2 %v10434_v11  ;;  %v10440_v39 = vld [vmem:[%s11003_s4 + $0x78] sm:$0xff] }
 0x5bb   :  { %12809 = vst [vmem:[#allocation157_spill] sm:$0xff] %v10422_v62  ;;  %3043 = vmatpush.msrb.mxu3 %v10440_v39  ;;  %v10446_v62 = vld [vmem:[%s11003_s4 + $0x40] sm:$0xff] }
 0x5bc   :  { %12810 = vst [vmem:[#allocation158_spill] sm:$0xff] %v10428_v38  ;;  %2984 = vmatpush.msrb.mxu0 %v10446_v62  ;;  %v10452_v38 = vld [vmem:[%s11003_s4 + $0x48] sm:$0xff] }
 0x5bd   :  { %12811 = vst [vmem:[#allocation159_spill] sm:$0xff] %v10434_v11  ;;  %3004 = vmatpush.msrb.mxu1 %v10452_v38  ;;  %v10458_v11 = vld [vmem:[%s11003_s4 + $0x50] sm:$0xff] }
 0x5be   :  { %12812 = vst [vmem:[#allocation160_spill] sm:$0xff] %v10440_v39  ;;  %3024 = vmatpush.msrb.mxu2 %v10458_v11  ;;  %v10464_v39 = vld [vmem:[%s11003_s4 + $0x58] sm:$0xff] }
 0x5bf   :  { %12813 = vst [vmem:[#allocation161_spill] sm:$0xff] %v10446_v62  ;;  %3044 = vmatpush.msrb.mxu3 %v10464_v39  ;;  %v10470_v62 = vld [vmem:[%s11003_s4 + $0x20] sm:$0xff] }
 0x5c0   :  { %12814 = vst [vmem:[#allocation162_spill] sm:$0xff] %v10452_v38  ;;  %2985 = vmatpush.msrb.mxu0 %v10470_v62  ;;  %v10476_v38 = vld [vmem:[%s11003_s4 + $0x28] sm:$0xff] }
 0x5c1   :  { %12815 = vst [vmem:[#allocation52_spill] sm:$0xff] %v10458_v11  ;;  %3005 = vmatpush.msrb.mxu1 %v10476_v38  ;;  %v10482_v11 = vld [vmem:[%s11003_s4 + $0x30] sm:$0xff] }
 0x5c2   :  { %12816 = vst [vmem:[#allocation53_spill] sm:$0xff] %v10464_v39  ;;  %3025 = vmatpush.msrb.mxu2 %v10482_v11  ;;  %v10488_v39 = vld [vmem:[%s11003_s4 + $0x38] sm:$0xff] }
 0x5c3   :  { %12817 = vst [vmem:[#allocation68_spill] sm:$0xff] %v10470_v62  ;;  %3045 = vmatpush.msrb.mxu3 %v10488_v39  ;;  %v10494_v62 = vld [vmem:[%s11003_s4] sm:$0xff] }
 0x5c4   :  { %12818 = vst [vmem:[#allocation67_spill] sm:$0xff] %v10476_v38  ;;  %2986 = vmatpush.msrb.mxu0 %v10494_v62  ;;  %v10500_v38 = vld [vmem:[%s11003_s4 + $0x8] sm:$0xff] }
 0x5c5   :  { %12819 = vst [vmem:[#allocation172_spill] sm:$0xff] %v10482_v11  ;;  %3006 = vmatpush.msrb.mxu1 %v10500_v38  ;;  %v10506_v11 = vld [vmem:[%s11003_s4 + $0x10] sm:$0xff] }
 0x5c6   :  { %12820 = vst [vmem:[#allocation173_spill] sm:$0xff] %v10488_v39  ;;  %3026 = vmatpush.msrb.mxu2 %v10506_v11  ;;  %v10512_v39 = vld [vmem:[%s11003_s4 + $0x18] sm:$0xff] }
 0x5c7   :  { %12821 = vst [vmem:[#allocation174_spill] sm:$0xff] %v10494_v62  ;;  %3046 = vmatpush.msrb.mxu3 %v10512_v39  ;;  %v2534_v62 = vpop.f32.mrf.mxu0 }
 0x5c8   :  { %12822 = vst [vmem:[#allocation175_spill] sm:$0xff] %v10500_v38 }
 0x5c9   :  { %12823 = vst [vmem:[#allocation176_spill] sm:$0xff] %v10506_v11 }
 0x5ca   :  { %12824 = vst [vmem:[#allocation177_spill] sm:$0xff] %v10512_v39  ;;  %v2680_v39 = vadd.f32 %v2675_v28, %v12652_v22  ;;  %v12825_v28 = vld [vmem:[#allocation148_spill] sm:$0xff] }
 0x5cb   :  { %v170_v47 = vadd.f32 %v12825_v28, %v12653_v60 }
 0x5cc   :  { %v3668_v24 = vmul.f32 -1.442695, %v2680_v39 }
 0x5cf   :  { %v2614_v45 = vpop.f32.mrf.mxu0 }
 0x5d0   :  { %v2615_v38 = vadd.f32 %v2614_v45, %v2534_v62  ;;  %v2655_v45 = vadd.f32 %v2654_v27, %v2574_v12  ;;  %v2781_v12 = vpop.f32.mrf.mxu1 }
 0x5d2   :  { %v2677_v34 = vadd.f32 %v2615_v38, %v12650_v37 }
 0x5d4   :  { %v3666_v11 = vmul.f32 -1.442695, %v2677_v34  ;;  %v2679_v34 = vadd.f32 %v2655_v45, %v12659_v20 }
 0x5d6   :  { %3863 = vpow2.f32 %v3666_v11 }
 0x5d7   :  { %3865 = vpow2.f32 %v3667_v51  ;;  %v2761_v27 = vpop.f32.mrf.mxu0 }
 0x5d8   :  { %3867 = vpow2.f32 %v3668_v24  ;;  %v2824_v45 = vadd.f32 %v2761_v27, %v170_v47 }
 0x5da   :  { %v3669_v28 = vmul.f32 -1.442695, %v2824_v45 }
 0x5dc   :  { %v3864_v61 = vpop.eup %3863 }
 0x5dd   :  { %v3866_v63 = vpop.eup %3865  ;;  %v2684_v18 = vadd.f32 1.0, %v3864_v61  ;;  %v12826_v61 = vld [vmem:[#allocation149_spill] sm:$0xff] }
 0x5de   :  { %v2703_v42 = vadd.f32 1.0, %v3866_v63  ;;  %v3868_v58 = vpop.eup %3867  ;;  %v211_v24 = vadd.f32 %v12826_v61, %v12655_v43  ;;  %v12827_v61 = vld [vmem:[#allocation163_spill] sm:$0xff] }
 0x5df   :  { %3869 = vrcp.f32 %v2684_v18  ;;  %v10519_v32 = vadd.f32 1.0, %v3868_v58  ;;  %v2694_v11 = vand.u32 2147483647, %v2684_v18  ;;  %v2696_v39 = vand.u32 2147483648, %v2684_v18 }
 0x5e0   :  { %3871 = vrcp.f32 %v2703_v42  ;;  %v2825_v58 = vadd.f32 %v2781_v12, %v211_v24  ;;  %v2715_v20 = vand.u32 2147483648, %v2703_v42  ;;  %v2713_v7 = vand.u32 2147483647, %v2703_v42 }
 0x5e1   :  { %3873 = vrcp.f32 %v10519_v32  ;;  %vm2709_vm6 = vweird.f32 %v2703_v42  ;;  %vm2690_vm7 = vweird.f32 %v2684_v18  ;;  %vm2695_vm10 = vcmp.eq.f32.partialorder %v2694_v11, 8.507059e+37 }
 0x5e2   :  { %3875 = vtanh.f32 %v2679_v34  ;;  %v3670_v60 = vmul.f32 -1.442695, %v2825_v58  ;;  %vm2714_vm11 = vcmp.eq.f32.partialorder %v2713_v7, 8.507059e+37  ;;  %v2821_v58 = vpop.f32.mrf.mxu3  ;;  %v2735_v7 = vand.u32 2147483648, %v10519_v32 }
 0x5e3   :  { %3877 = vpow2.f32 %v3669_v28  ;;  %vm2729_vm13 = vweird.f32 %v10519_v32 }
 0x5e4   :  { %3879 = vpow2.f32 %v3670_v60 }
 0x5e5   :  { %v3870_v62 = vpop.eup %3869 }
 0x5e6   :  { %v3872_v51 = vpop.eup %3871  ;;  %v2686_v31 = vmul.f32 %v3870_v62, %v2684_v18  ;;  %vm2691_vm4 = vweird.f32 %v3870_v62 }
 0x5e7   :  { %v2705_v63 = vmul.f32 %v3872_v51, %v2703_v42  ;;  %vm2710_vm5 = vweird.f32 %v3872_v51  ;;  %v3874_v16 = vpop.eup %3873  ;;  %vm2692_vm8 = vmor %vm2690_vm7, %vm2691_vm4 }
 0x5e8   :  { %v2687_v38 = vsub.f32 1.0, %v2686_v31  ;;  %v293_v31 = vadd.f32 %v12827_v61, %v12657_v57  ;;  %v2725_v47 = vmul.f32 %v3874_v16, %v10519_v32  ;;  %v3876_v24 = vpop.eup %3875  ;;  %vm2711_vm9 = vmor %vm2709_vm6, %vm2710_vm5  ;;  %vm2730_vm12 = vweird.f32 %v3874_v16 }
 0x5e9   :  { %v2706_v0 = vsub.f32 1.0, %v2705_v63  ;;  %v2697_v63 = vor.u32 1.1754944e-38, %v2696_v39  ;;  %v3878_v57 = vpop.eup %3877  ;;  %vm2731_vm14 = vmor %vm2729_vm13, %vm2730_vm12 }
 0x5ea   :  { %v2688_v22 = vmul.f32 %v3870_v62, %v2687_v38  ;;  %v2716_v38 = vor.u32 1.1754944e-38, %v2715_v20  ;;  %v2726_v45 = vsub.f32 1.0, %v2725_v47  ;;  %v2827_v18 = vadd.f32 %v2821_v58, %v293_v31  ;;  %v3880_v30 = vpop.eup %3879  ;;  %v12828_v31 = vld [vmem:[#allocation168_spill] sm:$0xff] }
 0x5eb   :  { %v2707_v37 = vmul.f32 %v3872_v51, %v2706_v0  ;;  %v10532_v20 = vadd.f32 1.0, %v3878_v57 }
 0x5ec   :  { %v2689_v34 = vadd.f32 %v3870_v62, %v2688_v22  ;;  %v3671_v61 = vmul.f32 -1.442695, %v2827_v18 }
 0x5ed   :  { %v2708_v43 = vadd.f32 %v3872_v51, %v2707_v37  ;;  %v2727_v37 = vmul.f32 %v3874_v16, %v2726_v45  ;;  %v2843_v58 = vand.u32 2147483648, %v10532_v20  ;;  %v2841_v18 = vand.u32 2147483647, %v10532_v20 }
 0x5ee   :  { %v2693_v27 = vsel %vm2692_vm8, %v3870_v62, %v2689_v34  ;;  %3881 = vpow2.f32 %v3671_v61  ;;  %v2801_v62 = vpop.f32.mrf.mxu2  ;;  %v252_v34 = vadd.f32 %v12828_v31, %v6105_v21  ;;  %vm2837_vm2 = vweird.f32 %v10532_v20  ;;  %v12848_v31 = vld [vmem:[#allocation10_spill] sm:$0xff] }
 0x5ef   :  { %v2698_v12 = vsel %vm2695_vm10, %v2697_v63, %v2693_v27  ;;  %v2712_v0 = vsel %vm2711_vm9, %v3872_v51, %v2708_v43  ;;  %v2728_v60 = vadd.f32 %v3874_v16, %v2727_v37  ;;  %v10536_v43 = vadd.f32 1.0, %v3880_v30 }
 0x5f0   :  { %v2717_v42 = vsel %vm2714_vm11, %v2716_v38, %v2712_v0  ;;  %v2740_v22 = vmul.f32 %v3876_v24, %v2698_v12  ;;  %v2736_v51 = vor.u32 1.1754944e-38, %v2735_v7  ;;  %v2826_v38 = vadd.f32 %v2801_v62, %v252_v34  ;;  %v12845_v62 = vld [vmem:[#allocation8_spill] sm:$0xff]  ;;  %v12849_v34 = vld [vmem:[#allocation11_spill] sm:$0xff] }
 0x5f1   :  { %v2739_v39 = vmul.f32 %v2717_v42, %v9308_v56  ;;  %v2733_v56 = vand.u32 2147483647, %v10519_v32  ;;  %v2732_v57 = vsel %vm2731_vm14, %v3874_v16, %v2728_v60  ;;  %v2862_v42 = vand.u32 2147483648, %v10536_v43 }
 0x5f2   :  { %v2860_v37 = vand.u32 2147483647, %v10536_v43  ;;  %vm2856_vm3 = vweird.f32 %v10536_v43  ;;  %vm2842_vm6 = vcmp.eq.f32.partialorder %v2841_v18, 8.507059e+37  ;;  %v12864_v18 = vld [vmem:[#allocation26_spill] sm:$0xff] }
 0x5f3   :  { %v10530_v28 = vadd.f32 %v2740_v22, %v2739_v39  ;;  %vm2734_vm15 = vcmp.eq.f32.partialorder %v2733_v56, 8.507059e+37  ;;  %v12843_v56 = vld [vmem:[#allocation91_spill] sm:$0xff] }
 0x5f4   :  { %v3882_v11 = vpop.eup %3881  ;;  %v2737_v47 = vsel %vm2734_vm15, %v2736_v51, %v2732_v57  ;;  %vm2861_vm7 = vcmp.eq.f32.partialorder %v2860_v37, 8.507059e+37  ;;  %v12844_v57 = vld [vmem:[#allocation90_spill] sm:$0xff]  ;;  %v12846_v51 = vld [vmem:[#allocation7_spill] sm:$0xff]  ;;  %v12866_v37 = vld [vmem:[#allocation28_spill] sm:$0xff] }
 0x5f5   :  { %3883 = vtanh.f32 %v10530_v28  ;;  %v10544_v30 = vadd.f32 1.0, %v3882_v11  ;;  %v12847_v11 = vld [vmem:[#allocation9_spill] sm:$0xff] }
 0x5f6   :  { %3885 = vrcp.f32 %v10532_v20 }
 0x5f7   :  { %3887 = vrcp.f32 %v10536_v43  ;;  %vm2876_vm9 = vweird.f32 %v10544_v30 }
 0x5f8   :  { %3889 = vrcp.f32 %v10544_v30 }
 0x5f9   :  { %3891 = vtanh.f32 %v2826_v38  ;;  %v12854_v38 = vld [vmem:[#allocation16_spill] sm:$0xff] }
 0x5fb   :  { %v3884_v63 = vpop.eup %3883 }
 0x5fc   :  { %v3886_v24 = vpop.eup %3885  ;;  %v2743_v27 = vmul.f32 %v3884_v63, %v2737_v47  ;;  %v12850_v63 = vld [vmem:[#allocation12_spill] sm:$0xff]  ;;  %v12852_v47 = vld [vmem:[#allocation14_spill] sm:$0xff] }
 0x5fd   :  { %v3888_v12 = vpop.eup %3887  ;;  %v2833_v32 = vmul.f32 %v3886_v24, %v10532_v20  ;;  %vm2838_vm0 = vweird.f32 %v3886_v24 }
 0x5fe   :  { %v2852_v16 = vmul.f32 %v3888_v12, %v10536_v43  ;;  %2907 = vmatmul.f32.vlgmr.msra.gmra.mxu0 %v2743_v27  ;;  %2927 = vmatmul.f32.vlgmr.msra.gmra.mxu1 %v2743_v27  ;;  %vm2857_vm1 = vweird.f32 %v3888_v12  ;;  %vm2839_vm4 = vmor %vm2837_vm2, %vm2838_vm0  ;;  %v12842_v43 = vld [vmem:[#allocation73_spill] sm:$0xff] }
 0x5ff   :  { %v2834_v0 = vsub.f32 1.0, %v2833_v32  ;;  %2947 = vmatmul.f32.vlgmr.msra.gmra.mxu2 %v2743_v27  ;;  %2967 = vmatmul.f32.vlgmr.msra.gmra.mxu3 %v2743_v27  ;;  %vm2858_vm5 = vmor %vm2856_vm3, %vm2857_vm1  ;;  %v12855_v27 = vld [vmem:[#allocation17_spill] sm:$0xff]  ;;  %v12857_v32 = vld [vmem:[#allocation19_spill] sm:$0xff] }
 0x600   :  { %v2853_v45 = vsub.f32 1.0, %v2852_v16  ;;  %3118 = vmatpush.msra.mxu0 %v9345_v35  ;;  %3138 = vmatpush.msra.mxu1 %v9351_v33  ;;  %v10559_v35 = vpop.eup %3889  ;;  %v12858_v16 = vld [vmem:[#allocation20_spill] sm:$0xff] }
 0x601   :  { %v2835_v22 = vmul.f32 %v3886_v24, %v2834_v0  ;;  %3158 = vmatpush.msra.mxu2 %v9359_v46  ;;  %3178 = vmatpush.msra.mxu3 %v9365_v3  ;;  %v2844_v46 = vor.u32 1.1754944e-38, %v2843_v58  ;;  %vm2877_vm8 = vweird.f32 %v10559_v35  ;;  %v12859_v0 = vld [vmem:[#allocation21_spill] sm:$0xff]  ;;  %v12861_v58 = vld [vmem:[#allocation23_spill] sm:$0xff] }
 0x602   :  { %v2854_v39 = vmul.f32 %v3888_v12, %v2853_v45  ;;  %3119 = vmatpush.msra.mxu0 %v9377_v53  ;;  %3139 = vmatpush.msra.mxu1 %v9383_v54  ;;  %v2872_v53 = vmul.f32 %v10559_v35, %v10544_v30  ;;  %v2863_v54 = vor.u32 1.1754944e-38, %v2862_v42  ;;  %vm2878_vm10 = vmor %vm2876_vm9, %vm2877_vm8  ;;  %v12860_v45 = vld [vmem:[#allocation22_spill] sm:$0xff]  ;;  %v12862_v42 = vld [vmem:[#allocation24_spill] sm:$0xff] }
 0x603   :  { %v2836_v33 = vadd.f32 %v3886_v24, %v2835_v22  ;;  %3159 = vmatpush.msra.mxu2 %v9392_v15  ;;  %3179 = vmatpush.msra.mxu3 %v9398_v55  ;;  %v3892_v15 = vpop.eup %3891  ;;  %v12863_v22 = vld [vmem:[#allocation25_spill] sm:$0xff] }
 0x604   :  { %v2855_v3 = vadd.f32 %v3888_v12, %v2854_v39  ;;  %3120 = vmatpush.msra.mxu0 %v9404_v25  ;;  %3140 = vmatpush.msra.mxu1 %v9410_v26  ;;  %v2873_v60 = vsub.f32 1.0, %v2872_v53  ;;  %v12865_v39 = vld [vmem:[#allocation27_spill] sm:$0xff]  ;;  %v12871_v53 = vld [vmem:[#allocation33_spill] sm:$0xff] }
 0x605   :  { %v2840_v61 = vsel %vm2839_vm4, %v3886_v24, %v2836_v33  ;;  %3160 = vmatpush.msra.mxu2 %v9416_v4  ;;  %3180 = vmatpush.msra.mxu3 %v9422_v2  ;;  %v12853_v24 = vld [vmem:[#allocation15_spill] sm:$0xff]  ;;  %v12868_v33 = vld [vmem:[#allocation30_spill] sm:$0xff] }
 0x606   :  { %v2845_v55 = vsel %vm2842_vm6, %v2844_v46, %v2840_v61  ;;  %v2859_v20 = vsel %vm2858_vm5, %v3888_v12, %v2855_v3  ;;  %3121 = vmatpush.msra.mxu0 %v9428_v50  ;;  %3141 = vmatpush.msra.mxu1 %v9434_v52  ;;  %v2874_v4 = vmul.f32 %v10559_v35, %v2873_v60  ;;  %v2880_v52 = vand.u32 2147483647, %v10544_v30  ;;  %v12856_v12 = vld [vmem:[#allocation18_spill] sm:$0xff]  ;;  %v12869_v46 = vld [vmem:[#allocation31_spill] sm:$0xff]  ;;  %v12870_v3 = vld [vmem:[#allocation32_spill] sm:$0xff] }
 0x607   :  { %v2864_v25 = vsel %vm2861_vm7, %v2863_v54, %v2859_v20  ;;  %v2887_v26 = vmul.f32 %v3892_v15, %v2845_v55  ;;  %3161 = vmatpush.msra.mxu2 %v9442_v8  ;;  %3181 = vmatpush.msra.mxu3 %v9448_v13  ;;  %v12872_v54 = vld [vmem:[#allocation34_spill] sm:$0xff]  ;;  %v12873_v61 = vld [vmem:[#allocation35_spill] sm:$0xff]  ;;  %v12874_v15 = vld [vmem:[#allocation36_spill] sm:$0xff] }
 0x608   :  { %v2886_v7 = vmul.f32 %v2864_v25, %v9336_v17  ;;  %3122 = vmatpush.msra.mxu0 %v9454_v40  ;;  %3142 = vmatpush.msra.mxu1 %v9460_v41  ;;  %v2875_v50 = vadd.f32 %v10559_v35, %v2874_v4  ;;  %v2882_v17 = vand.u32 2147483648, %v10544_v30  ;;  %v12829_v40 = vld [vmem:[#allocation190_spill] sm:$0xff]  ;;  %v12830_v41 = vld [vmem:[#allocation191_spill] sm:$0xff]  ;;  %vm2881_vm11 = vcmp.eq.f32.partialorder %v2880_v52, 8.507059e+37  ;;  %v12851_v30 = vld [vmem:[#allocation13_spill] sm:$0xff] }
 0x609   :  { %3162 = vmatpush.msra.mxu2 %v9470_v6  ;;  %3182 = vmatpush.msra.mxu3 %v9476_v36  ;;  %v12831_v6 = vld [vmem:[#allocation192_spill] sm:$0xff]  ;;  %v12832_v36 = vld [vmem:[#allocation193_spill] sm:$0xff]  ;;  %v12876_v20 = vld [vmem:[#allocation38_spill] sm:$0xff] }
 0x60a   :  { %v10583_v2 = vadd.f32 %v2887_v26, %v2886_v7  ;;  %3123 = vmatpush.msra.mxu0 %v9482_v10  ;;  %3143 = vmatpush.msra.mxu1 %v9488_v48  ;;  %v2879_v8 = vsel %vm2878_vm10, %v10559_v35, %v2875_v50  ;;  %v2883_v13 = vor.u32 1.1754944e-38, %v2882_v17  ;;  %v12867_v35 = vld [vmem:[#allocation29_spill] sm:$0xff]  ;;  %v12877_v60 = vld [vmem:[#allocation39_spill] sm:$0xff]  ;;  %v12878_v25 = vld [vmem:[#allocation40_spill] sm:$0xff] }
 0x60b   :  { %3163 = vmatpush.msra.mxu2 %v9494_v9  ;;  %3183 = vmatpush.msra.mxu3 %v9500_v59  ;;  %v12833_v9 = vld [vmem:[#allocation93_spill] sm:$0xff]  ;;  %v12834_v59 = vld [vmem:[#allocation94_spill] sm:$0xff]  ;;  %v12881_v4 = vld [vmem:[#allocation43_spill] sm:$0xff] }
 0x60c   :  { %3893 = vtanh.f32 %v10583_v2  ;;  %3124 = vmatpush.msra.mxu0 %v9506_v23  ;;  %3144 = vmatpush.msra.mxu1 %v9512_v5  ;;  %v2884_v48 = vsel %vm2881_vm11, %v2883_v13, %v2879_v8  ;;  %v12835_v5 = vld [vmem:[#allocation108_spill] sm:$0xff]  ;;  %v12875_v55 = vld [vmem:[#allocation37_spill] sm:$0xff]  ;;  %v12880_v7 = vld [vmem:[#allocation42_spill] sm:$0xff] }
 0x60d   :  { %3164 = vmatpush.msra.mxu2 %v9518_v44  ;;  %3184 = vmatpush.msra.mxu3 %v9524_v1  ;;  %v12836_v44 = vld [vmem:[#allocation107_spill] sm:$0xff]  ;;  %v12837_v1 = vld [vmem:[#allocation110_spill] sm:$0xff]  ;;  %v12879_v26 = vld [vmem:[#allocation41_spill] sm:$0xff] }
 0x60e   :  { %3125 = vmatpush.msra.mxu0 %v9530_v14  ;;  %3145 = vmatpush.msra.mxu1 %v9536_v19  ;;  %v12838_v14 = vld [vmem:[#allocation111_spill] sm:$0xff]  ;;  %v12839_v19 = vld [vmem:[#allocation124_spill] sm:$0xff]  ;;  %v12883_v17 = vld [vmem:[#allocation45_spill] sm:$0xff] }
 0x60f   :  { %3165 = vmatpush.msra.mxu2 %v9542_v29  ;;  %3185 = vmatpush.msra.mxu3 %v9548_v49  ;;  %v12840_v29 = vld [vmem:[#allocation131_spill] sm:$0xff]  ;;  %v12841_v49 = vld [vmem:[#allocation72_spill] sm:$0xff]  ;;  %v12884_v52 = vld [vmem:[#allocation46_spill] sm:$0xff] }
 0x610   :  { %3126 = vmatpush.msra.mxu0 %v12829_v40  ;;  %3146 = vmatpush.msra.mxu1 %v12830_v41  ;;  %v12882_v50 = vld [vmem:[#allocation44_spill] sm:$0xff]  ;;  %v12885_v8 = vld [vmem:[#allocation47_spill] sm:$0xff]  ;;  %v12887_v40 = vld [vmem:[#allocation49_spill] sm:$0xff] }
 0x611   :  { %3166 = vmatpush.msra.mxu2 %v12831_v6  ;;  %3186 = vmatpush.msra.mxu3 %v12832_v36  ;;  %v12886_v13 = vld [vmem:[#allocation48_spill] sm:$0xff]  ;;  %v12888_v41 = vld [vmem:[#allocation50_spill] sm:$0xff]  ;;  %v12889_v6 = vld [vmem:[#allocation51_spill] sm:$0xff] }
 0x612   :  { %v3894_v10 = vpop.eup %3893  ;;  %3127 = vmatpush.msra.mxu0 %v12833_v9  ;;  %3147 = vmatpush.msra.mxu1 %v12834_v59  ;;  %v12890_v36 = vld [vmem:[#allocation54_spill] sm:$0xff]  ;;  %v12893_v9 = vld [vmem:[#allocation57_spill] sm:$0xff] }
 0x613   :  { %v2890_v23 = vmul.f32 %v3894_v10, %v2884_v48  ;;  %3167 = vmatpush.msra.mxu2 %v12835_v5  ;;  %3187 = vmatpush.msra.mxu3 %v12836_v44  ;;  %v12891_v10 = vld [vmem:[#allocation55_spill] sm:$0xff]  ;;  %v12892_v48 = vld [vmem:[#allocation56_spill] sm:$0xff]  ;;  %v12894_v59 = vld [vmem:[#allocation58_spill] sm:$0xff] }
 0x614   :  { %3128 = vmatpush.msra.mxu0 %v12837_v1  ;;  %3148 = vmatpush.msra.mxu1 %v12838_v14  ;;  %v12896_v5 = vld [vmem:[#allocation60_spill] sm:$0xff]  ;;  %v12897_v44 = vld [vmem:[#allocation61_spill] sm:$0xff]  ;;  %v12898_v1 = vld [vmem:[#allocation62_spill] sm:$0xff] }
 0x615   :  { %3168 = vmatpush.msra.mxu2 %v12839_v19  ;;  %3188 = vmatpush.msra.mxu3 %v12840_v29  ;;  %v12899_v14 = vld [vmem:[#allocation63_spill] sm:$0xff]  ;;  %v12900_v19 = vld [vmem:[#allocation64_spill] sm:$0xff]  ;;  %v12901_v29 = vld [vmem:[#allocation65_spill] sm:$0xff] }
 0x616   :  { %2987 = vmatmul.f32.vlgmr.msrb.gmra.mxu0 %v2890_v23  ;;  %3007 = vmatmul.f32.vlgmr.msrb.gmra.mxu1 %v2890_v23 }
 0x617   :  { %3027 = vmatmul.f32.vlgmr.msrb.gmra.mxu2 %v2890_v23  ;;  %3047 = vmatmul.f32.vlgmr.msrb.gmra.mxu3 %v2890_v23 }
 0x618   :  { %3129 = vmatpush.msra.mxu0 %v12841_v49  ;;  %3149 = vmatpush.msra.mxu1 %v12842_v43  ;;  %v12902_v49 = vld [vmem:[#allocation66_spill] sm:$0xff]  ;;  %v12903_v43 = vld [vmem:[#allocation69_spill] sm:$0xff] }
 0x619   :  { %3169 = vmatpush.msra.mxu2 %v12843_v56  ;;  %3189 = vmatpush.msra.mxu3 %v12844_v57  ;;  %v12904_v56 = vld [vmem:[#allocation70_spill] sm:$0xff]  ;;  %v12905_v57 = vld [vmem:[#allocation71_spill] sm:$0xff] }
 0x61a   :  { %3130 = vmatpush.msra.mxu0 %v12845_v62  ;;  %3150 = vmatpush.msra.mxu1 %v12846_v51  ;;  %v12906_v62 = vld [vmem:[#allocation74_spill] sm:$0xff]  ;;  %v12907_v51 = vld [vmem:[#allocation75_spill] sm:$0xff] }
 0x61b   :  { %3170 = vmatpush.msra.mxu2 %v12847_v11  ;;  %3190 = vmatpush.msra.mxu3 %v12848_v31  ;;  %v12908_v11 = vld [vmem:[#allocation76_spill] sm:$0xff]  ;;  %v12909_v31 = vld [vmem:[#allocation77_spill] sm:$0xff] }
 0x61c   :  { %3131 = vmatpush.msra.mxu0 %v12849_v34  ;;  %3151 = vmatpush.msra.mxu1 %v12850_v63  ;;  %v12910_v34 = vld [vmem:[#allocation78_spill] sm:$0xff]  ;;  %v12911_v63 = vld [vmem:[#allocation79_spill] sm:$0xff] }
 0x61d   :  { %3171 = vmatpush.msra.mxu2 %v12851_v30  ;;  %3191 = vmatpush.msra.mxu3 %v12852_v47  ;;  %v12912_v30 = vld [vmem:[#allocation80_spill] sm:$0xff]  ;;  %v12913_v47 = vld [vmem:[#allocation81_spill] sm:$0xff] }
 0x61e   :  { %3132 = vmatpush.msra.mxu0 %v12853_v24  ;;  %3152 = vmatpush.msra.mxu1 %v12854_v38  ;;  %v12914_v24 = vld [vmem:[#allocation82_spill] sm:$0xff]  ;;  %v12915_v38 = vld [vmem:[#allocation83_spill] sm:$0xff] }
 0x61f   :  { %3172 = vmatpush.msra.mxu2 %v12855_v27  ;;  %3192 = vmatpush.msra.mxu3 %v12856_v12  ;;  %v12916_v27 = vld [vmem:[#allocation84_spill] sm:$0xff]  ;;  %v12917_v12 = vld [vmem:[#allocation85_spill] sm:$0xff] }
 0x620   :  { %3133 = vmatpush.msra.mxu0 %v12857_v32  ;;  %3153 = vmatpush.msra.mxu1 %v12858_v16  ;;  %v12918_v32 = vld [vmem:[#allocation86_spill] sm:$0xff]  ;;  %v12919_v16 = vld [vmem:[#allocation87_spill] sm:$0xff] }
 0x621   :  { %3173 = vmatpush.msra.mxu2 %v12859_v0  ;;  %3193 = vmatpush.msra.mxu3 %v12860_v45  ;;  %v12920_v0 = vld [vmem:[#allocation88_spill] sm:$0xff]  ;;  %v12921_v45 = vld [vmem:[#allocation89_spill] sm:$0xff] }
 0x622   :  { %3134 = vmatmul.f32.vlgmr.msra.gmra.mxu0 %v2890_v23  ;;  %3154 = vmatmul.f32.vlgmr.msra.gmra.mxu1 %v2890_v23 }
 0x623   :  { %3174 = vmatmul.f32.vlgmr.msra.gmra.mxu2 %v2890_v23  ;;  %3194 = vmatmul.f32.vlgmr.msra.gmra.mxu3 %v2890_v23  ;;  %v12895_v23 = vld [vmem:[#allocation59_spill] sm:$0xff] }
 0x624   :  { %3265 = vmatpush.msrb.mxu0 %v12861_v58  ;;  %3285 = vmatpush.msrb.mxu1 %v12862_v42  ;;  %v12922_v58 = vld [vmem:[#allocation92_spill] sm:$0xff]  ;;  %v12923_v42 = vld [vmem:[#allocation95_spill] sm:$0xff] }
 0x625   :  { %3305 = vmatpush.msrb.mxu2 %v12863_v22  ;;  %3325 = vmatpush.msrb.mxu3 %v12864_v18  ;;  %v12924_v22 = vld [vmem:[#allocation96_spill] sm:$0xff]  ;;  %v12925_v18 = vld [vmem:[#allocation97_spill] sm:$0xff] }
 0x626   :  { %3266 = vmatpush.msrb.mxu0 %v12865_v39  ;;  %3286 = vmatpush.msrb.mxu1 %v12866_v37  ;;  %v12926_v39 = vld [vmem:[#allocation98_spill] sm:$0xff]  ;;  %v12927_v37 = vld [vmem:[#allocation99_spill] sm:$0xff] }
 0x627   :  { %3306 = vmatpush.msrb.mxu2 %v12867_v35  ;;  %3326 = vmatpush.msrb.mxu3 %v12868_v33  ;;  %v12928_v35 = vld [vmem:[#allocation100_spill] sm:$0xff]  ;;  %v12929_v33 = vld [vmem:[#allocation101_spill] sm:$0xff] }
 0x628   :  { %3267 = vmatpush.msrb.mxu0 %v12869_v46  ;;  %3287 = vmatpush.msrb.mxu1 %v12870_v3  ;;  %v12930_v46 = vld [vmem:[#allocation102_spill] sm:$0xff]  ;;  %v12931_v3 = vld [vmem:[#allocation103_spill] sm:$0xff] }
 0x629   :  { %3307 = vmatpush.msrb.mxu2 %v12871_v53  ;;  %3327 = vmatpush.msrb.mxu3 %v12872_v54  ;;  %v12932_v53 = vld [vmem:[#allocation104_spill] sm:$0xff]  ;;  %v12933_v54 = vld [vmem:[#allocation105_spill] sm:$0xff] }
 0x62a   :  { %3268 = vmatpush.msrb.mxu0 %v12873_v61  ;;  %3288 = vmatpush.msrb.mxu1 %v12874_v15  ;;  %v12934_v61 = vld [vmem:[#allocation106_spill] sm:$0xff]  ;;  %v12935_v15 = vld [vmem:[#allocation109_spill] sm:$0xff] }
 0x62b   :  { %3308 = vmatpush.msrb.mxu2 %v12875_v55  ;;  %3328 = vmatpush.msrb.mxu3 %v12876_v20  ;;  %v12936_v55 = vld [vmem:[#allocation112_spill] sm:$0xff]  ;;  %v12937_v20 = vld [vmem:[#allocation113_spill] sm:$0xff] }
 0x62c   :  { %3269 = vmatpush.msrb.mxu0 %v12877_v60  ;;  %3289 = vmatpush.msrb.mxu1 %v12878_v25  ;;  %v12938_v60 = vld [vmem:[#allocation114_spill] sm:$0xff]  ;;  %v12939_v25 = vld [vmem:[#allocation115_spill] sm:$0xff] }
 0x62d   :  { %3309 = vmatpush.msrb.mxu2 %v12879_v26  ;;  %3329 = vmatpush.msrb.mxu3 %v12880_v7  ;;  %v12940_v26 = vld [vmem:[#allocation116_spill] sm:$0xff]  ;;  %v12941_v7 = vld [vmem:[#allocation117_spill] sm:$0xff] }
 0x62e   :  { %3270 = vmatpush.msrb.mxu0 %v12881_v4  ;;  %3290 = vmatpush.msrb.mxu1 %v12882_v50  ;;  %v12942_v4 = vld [vmem:[#allocation118_spill] sm:$0xff]  ;;  %v12943_v50 = vld [vmem:[#allocation119_spill] sm:$0xff] }
 0x62f   :  { %3310 = vmatpush.msrb.mxu2 %v12883_v17  ;;  %3330 = vmatpush.msrb.mxu3 %v12884_v52  ;;  %v12944_v17 = vld [vmem:[#allocation120_spill] sm:$0xff]  ;;  %v12945_v52 = vld [vmem:[#allocation121_spill] sm:$0xff] }
 0x630   :  { %3271 = vmatpush.msrb.mxu0 %v12885_v8  ;;  %3291 = vmatpush.msrb.mxu1 %v12886_v13  ;;  %v12946_v8 = vld [vmem:[#allocation122_spill] sm:$0xff]  ;;  %v12947_v13 = vld [vmem:[#allocation123_spill] sm:$0xff] }
 0x631   :  { %3311 = vmatpush.msrb.mxu2 %v12887_v40  ;;  %3331 = vmatpush.msrb.mxu3 %v12888_v41  ;;  %v12948_v40 = vld [vmem:[#allocation125_spill] sm:$0xff]  ;;  %v12949_v41 = vld [vmem:[#allocation126_spill] sm:$0xff] }
 0x632   :  { %3272 = vmatpush.msrb.mxu0 %v12889_v6  ;;  %3292 = vmatpush.msrb.mxu1 %v12890_v36  ;;  %v12950_v6 = vld [vmem:[#allocation127_spill] sm:$0xff]  ;;  %v12951_v36 = vld [vmem:[#allocation130_spill] sm:$0xff] }
 0x633   :  { %3312 = vmatpush.msrb.mxu2 %v12891_v10  ;;  %3332 = vmatpush.msrb.mxu3 %v12892_v48  ;;  %v12952_v10 = vld [vmem:[#allocation132_spill] sm:$0xff]  ;;  %v12953_v48 = vld [vmem:[#allocation133_spill] sm:$0xff] }
 0x634   :  { %3273 = vmatpush.msrb.mxu0 %v12893_v9  ;;  %3293 = vmatpush.msrb.mxu1 %v12894_v59  ;;  %v12954_v9 = vld [vmem:[#allocation134_spill] sm:$0xff]  ;;  %v12955_v59 = vld [vmem:[#allocation135_spill] sm:$0xff] }
 0x635   :  { %3313 = vmatpush.msrb.mxu2 %v12895_v23  ;;  %3333 = vmatpush.msrb.mxu3 %v12896_v5  ;;  %v12956_v23 = vld [vmem:[#allocation136_spill] sm:$0xff]  ;;  %v12957_v5 = vld [vmem:[#allocation137_spill] sm:$0xff] }
 0x636   :  { %3274 = vmatpush.msrb.mxu0 %v12897_v44  ;;  %3294 = vmatpush.msrb.mxu1 %v12898_v1  ;;  %v12958_v44 = vld [vmem:[#allocation138_spill] sm:$0xff]  ;;  %v12959_v1 = vld [vmem:[#allocation139_spill] sm:$0xff] }
 0x637   :  { %3314 = vmatpush.msrb.mxu2 %v12899_v14  ;;  %3334 = vmatpush.msrb.mxu3 %v12900_v19  ;;  %v12960_v14 = vld [vmem:[#allocation140_spill] sm:$0xff]  ;;  %v12961_v19 = vld [vmem:[#allocation141_spill] sm:$0xff] }
 0x638   :  { %3275 = vmatpush.msrb.mxu0 %v12901_v29  ;;  %3295 = vmatpush.msrb.mxu1 %v12902_v49  ;;  %v12962_v29 = vld [vmem:[#allocation142_spill] sm:$0xff]  ;;  %v12963_v49 = vld [vmem:[#allocation143_spill] sm:$0xff] }
 0x639   :  { %3315 = vmatpush.msrb.mxu2 %v12903_v43  ;;  %3335 = vmatpush.msrb.mxu3 %v12904_v56  ;;  %v12964_v43 = vld [vmem:[#allocation145_spill] sm:$0xff]  ;;  %v12965_v56 = vld [vmem:[#allocation146_spill] sm:$0xff] }
 0x63a   :  { %3276 = vmatpush.msrb.mxu0 %v12905_v57  ;;  %3296 = vmatpush.msrb.mxu1 %v12906_v62  ;;  %v12966_v57 = vld [vmem:[#allocation147_spill] sm:$0xff]  ;;  %v12967_v62 = vld [vmem:[#allocation150_spill] sm:$0xff] }
 0x63b   :  { %3316 = vmatpush.msrb.mxu2 %v12907_v51  ;;  %3336 = vmatpush.msrb.mxu3 %v12908_v11  ;;  %v12968_v51 = vld [vmem:[#allocation151_spill] sm:$0xff]  ;;  %v12969_v11 = vld [vmem:[#allocation152_spill] sm:$0xff] }
 0x63c   :  { %3277 = vmatpush.msrb.mxu0 %v12909_v31  ;;  %3297 = vmatpush.msrb.mxu1 %v12910_v34  ;;  %v12970_v31 = vld [vmem:[#allocation153_spill] sm:$0xff]  ;;  %v12971_v34 = vld [vmem:[#allocation154_spill] sm:$0xff] }
 0x63d   :  { %3317 = vmatpush.msrb.mxu2 %v12911_v63  ;;  %3337 = vmatpush.msrb.mxu3 %v12912_v30  ;;  %v12972_v63 = vld [vmem:[#allocation156_spill] sm:$0xff]  ;;  %v12973_v30 = vld [vmem:[#allocation157_spill] sm:$0xff] }
 0x63e   :  { %3278 = vmatpush.msrb.mxu0 %v12913_v47  ;;  %3298 = vmatpush.msrb.mxu1 %v12914_v24  ;;  %v12974_v47 = vld [vmem:[#allocation158_spill] sm:$0xff]  ;;  %v12975_v24 = vld [vmem:[#allocation159_spill] sm:$0xff] }
 0x63f   :  { %3318 = vmatpush.msrb.mxu2 %v12915_v38  ;;  %3338 = vmatpush.msrb.mxu3 %v12916_v27  ;;  %v12976_v38 = vld [vmem:[#allocation160_spill] sm:$0xff]  ;;  %v12977_v27 = vld [vmem:[#allocation161_spill] sm:$0xff] }
 0x640   :  { %3279 = vmatpush.msrb.mxu0 %v12917_v12  ;;  %3299 = vmatpush.msrb.mxu1 %v12918_v32  ;;  %v12978_v12 = vld [vmem:[#allocation162_spill] sm:$0xff]  ;;  %v12979_v32 = vld [vmem:[#allocation52_spill] sm:$0xff] }
 0x641   :  { %3319 = vmatpush.msrb.mxu2 %v12919_v16  ;;  %3339 = vmatpush.msrb.mxu3 %v12920_v0  ;;  %v12980_v16 = vld [vmem:[#allocation53_spill] sm:$0xff]  ;;  %v12981_v0 = vld [vmem:[#allocation68_spill] sm:$0xff] }
 0x642   :  { %3280 = vmatpush.msrb.mxu0 %v12921_v45  ;;  %3300 = vmatpush.msrb.mxu1 %v12922_v58  ;;  %v12982_v45 = vld [vmem:[#allocation67_spill] sm:$0xff]  ;;  %v12983_v58 = vld [vmem:[#allocation172_spill] sm:$0xff] }
 0x643   :  { %3320 = vmatpush.msrb.mxu2 %v12923_v42  ;;  %3340 = vmatpush.msrb.mxu3 %v12924_v22  ;;  %v12984_v42 = vld [vmem:[#allocation173_spill] sm:$0xff]  ;;  %v12985_v22 = vld [vmem:[#allocation174_spill] sm:$0xff] }
 0x644   :  { %3345 = vmatpush.msra.mxu0 %v12925_v18  ;;  %3365 = vmatpush.msra.mxu1 %v12926_v39  ;;  %v12986_v18 = vld [vmem:[#allocation175_spill] sm:$0xff]  ;;  %v12987_v39 = vld [vmem:[#allocation176_spill] sm:$0xff] }
 0x645   :  { %3385 = vmatpush.msra.mxu2 %v12927_v37  ;;  %3405 = vmatpush.msra.mxu3 %v12928_v35  ;;  %v12988_v37 = vld [vmem:[#allocation177_spill] sm:$0xff] }
 0x646   :  { %3346 = vmatpush.msra.mxu0 %v12929_v33  ;;  %3366 = vmatpush.msra.mxu1 %v12930_v46 }
 0x647   :  { %3386 = vmatpush.msra.mxu2 %v12931_v3  ;;  %3406 = vmatpush.msra.mxu3 %v12932_v53 }
 0x648   :  { %3347 = vmatpush.msra.mxu0 %v12933_v54  ;;  %3367 = vmatpush.msra.mxu1 %v12934_v61 }
 0x649   :  { %3387 = vmatpush.msra.mxu2 %v12935_v15  ;;  %3407 = vmatpush.msra.mxu3 %v12936_v55  ;;  %v12989_v15 = vld [vmem:[#allocation4_spill] sm:$0xff] }
 0x64a   :  { %3348 = vmatpush.msra.mxu0 %v12937_v20  ;;  %3368 = vmatpush.msra.mxu1 %v12938_v60  ;;  %v12990_v20 = vld [vmem:[#allocation3_spill] sm:$0xff] }
 0x64b   :  { %3388 = vmatpush.msra.mxu2 %v12939_v25  ;;  %3408 = vmatpush.msra.mxu3 %v12940_v26 }
 0x64c   :  { %3349 = vmatpush.msra.mxu0 %v12941_v7  ;;  %3369 = vmatpush.msra.mxu1 %v12942_v4 }
 0x64d   :  { %3389 = vmatpush.msra.mxu2 %v12943_v50  ;;  %3409 = vmatpush.msra.mxu3 %v12944_v17  ;;  %v12991_v17 = vld [vmem:[#allocation5_spill] sm:$0xff] }
 0x64e   :  { %3350 = vmatpush.msra.mxu0 %v12945_v52  ;;  %3370 = vmatpush.msra.mxu1 %v12946_v8  ;;  %v12992_v8 = vld [vmem:[#allocation166_spill] sm:$0xff] }
 0x64f   :  { %3390 = vmatpush.msra.mxu2 %v12947_v13  ;;  %3410 = vmatpush.msra.mxu3 %v12948_v40  ;;  %v12993_v13 = vld [vmem:[#allocation164_spill] sm:$0xff] }
 0x650   :  { %3351 = vmatpush.msra.mxu0 %v12949_v41  ;;  %3371 = vmatpush.msra.mxu1 %v12950_v6  ;;  %v173_v40 = vadd.f32 %v12993_v13, %v12992_v8  ;;  %v12994_v41 = vld [vmem:[#allocation167_spill] sm:$0xff]  ;;  %v12995_v6 = vld [vmem:[#allocation165_spill] sm:$0xff] }
 0x651   :  { %3391 = vmatpush.msra.mxu2 %v12951_v36  ;;  %3411 = vmatpush.msra.mxu3 %v12952_v10  ;;  %v214_v36 = vadd.f32 %v12995_v6, %v12994_v41 }
 0x652   :  { %3352 = vmatpush.msra.mxu0 %v12953_v48  ;;  %3372 = vmatpush.msra.mxu1 %v12954_v9 }
 0x653   :  { %3392 = vmatpush.msra.mxu2 %v12955_v59  ;;  %3412 = vmatpush.msra.mxu3 %v12956_v23 }
 0x654   :  { %3353 = vmatpush.msra.mxu0 %v12957_v5  ;;  %3373 = vmatpush.msra.mxu1 %v12958_v44 }
 0x655   :  { %3393 = vmatpush.msra.mxu2 %v12959_v1  ;;  %3413 = vmatpush.msra.mxu3 %v12960_v14 }
 0x656   :  { %3354 = vmatpush.msra.mxu0 %v12961_v19  ;;  %3374 = vmatpush.msra.mxu1 %v12962_v29 }
 0x657   :  { %3394 = vmatpush.msra.mxu2 %v12963_v49  ;;  %3414 = vmatpush.msra.mxu3 %v12964_v43 }
 0x658   :  { %3355 = vmatpush.msra.mxu0 %v12965_v56  ;;  %3375 = vmatpush.msra.mxu1 %v12966_v57  ;;  %v12996_v56 = vld [vmem:[#allocation170_spill] sm:$0xff]  ;;  %v12997_v57 = vld [vmem:[#allocation169_spill] sm:$0xff] }
 0x659   :  { %3395 = vmatpush.msra.mxu2 %v12967_v62  ;;  %3415 = vmatpush.msra.mxu3 %v12968_v51  ;;  %v296_v62 = vadd.f32 %v12997_v57, %v12996_v56 }
 0x65a   :  { %3356 = vmatpush.msra.mxu0 %v12969_v11  ;;  %3376 = vmatpush.msra.mxu1 %v12970_v31 }
 0x65b   :  { %3396 = vmatpush.msra.mxu2 %v12971_v34  ;;  %3416 = vmatpush.msra.mxu3 %v12972_v63  ;;  %v12998_v34 = vld [vmem:[#allocation6_spill] sm:$0xff] }
 0x65c   :  { %3357 = vmatpush.msra.mxu0 %v12973_v30  ;;  %3377 = vmatpush.msra.mxu1 %v12974_v47 }
 0x65d   :  { %3397 = vmatpush.msra.mxu2 %v12975_v24  ;;  %3417 = vmatpush.msra.mxu3 %v12976_v38 }
 0x65e   :  { %3358 = vmatpush.msra.mxu0 %v12977_v27  ;;  %3378 = vmatpush.msra.mxu1 %v12978_v12 }
 0x65f   :  { %3398 = vmatpush.msra.mxu2 %v12979_v32  ;;  %3418 = vmatpush.msra.mxu3 %v12980_v16 }
 0x660   :  { %3359 = vmatpush.msra.mxu0 %v12981_v0  ;;  %3379 = vmatpush.msra.mxu1 %v12982_v45 }
 0x661   :  { %3399 = vmatpush.msra.mxu2 %v12983_v58  ;;  %3419 = vmatpush.msra.mxu3 %v12984_v42 }
 0x662   :  { %3360 = vmatpush.msra.mxu0 %v12985_v22  ;;  %3380 = vmatpush.msra.mxu1 %v12986_v18 }
 0x663   :  { %3400 = vmatpush.msra.mxu2 %v12987_v39  ;;  %3420 = vmatpush.msra.mxu3 %v12988_v37 }
 0x67b   :  { %v2908_v35 = vpop.f32.mrf.mxu0  ;;  %v2928_v33 = vpop.f32.mrf.mxu1 }
 0x682   :  { %v2968_v46 = vpop.f32.mrf.mxu3  ;;  %v2948_v7 = vpop.f32.mrf.mxu2 }
 0x693   :  { %v2988_v3 = vpop.f32.mrf.mxu0  ;;  %v3008_v53 = vpop.f32.mrf.mxu1 }
 0x694   :  { %v2989_v54 = vadd.f32 %v2988_v3, %v2908_v35  ;;  %v3009_v61 = vadd.f32 %v3008_v53, %v2928_v33  ;;  %v12999_v53 = vld [vmem:[#allocation171_spill] sm:$0xff] }
 0x696   :  { %v3051_v55 = vadd.f32 %v2989_v54, %v12989_v15  ;;  %v3052_v60 = vadd.f32 %v3009_v61, %v12990_v20  ;;  %v255_v54 = vadd.f32 %v12999_v53, %v6105_v21 }
 0x698   :  { %v3672_v25 = vmul.f32 -1.442695, %v3051_v55  ;;  %v3673_v26 = vmul.f32 -1.442695, %v3052_v60 }
 0x69a   :  { %3895 = vpow2.f32 %v3672_v25  ;;  %v3048_v4 = vpop.f32.mrf.mxu3  ;;  %v3028_v14 = vpop.f32.mrf.mxu2 }
 0x69b   :  { %3897 = vpow2.f32 %v3673_v26  ;;  %v3049_v50 = vadd.f32 %v3048_v4, %v2968_v46  ;;  %v3029_v43 = vadd.f32 %v3028_v14, %v2948_v7 }
 0x69d   :  { %v3054_v52 = vadd.f32 %v3049_v50, %v12991_v17  ;;  %v3053_v63 = vadd.f32 %v3029_v43, %v12998_v34 }
 0x69f   :  { %v3674_v10 = vmul.f32 -1.442695, %v3054_v52  ;;  %v3135_v48 = vpop.f32.mrf.mxu0  ;;  %v3155_v9 = vpop.f32.mrf.mxu1 }
 0x6a0   :  { %v3896_v59 = vpop.eup %3895  ;;  %v3198_v23 = vadd.f32 %v3135_v48, %v173_v40  ;;  %v3199_v5 = vadd.f32 %v3155_v9, %v214_v36 }
 0x6a1   :  { %v3898_v44 = vpop.eup %3897  ;;  %v3058_v1 = vadd.f32 1.0, %v3896_v59  ;;  %3899 = vpow2.f32 %v3674_v10 }
 0x6a2   :  { %v3077_v19 = vadd.f32 1.0, %v3898_v44  ;;  %v3675_v29 = vmul.f32 -1.442695, %v3198_v23  ;;  %v3676_v49 = vmul.f32 -1.442695, %v3199_v5 }
 0x6a3   :  { %3901 = vrcp.f32 %v3058_v1  ;;  %v3068_v42 = vand.u32 2147483647, %v3058_v1  ;;  %v3070_v22 = vand.u32 2147483648, %v3058_v1  ;;  %vm3064_vm15 = vweird.f32 %v3058_v1 }
 0x6a4   :  { %3903 = vrcp.f32 %v3077_v19  ;;  %v3089_v39 = vand.u32 2147483648, %v3077_v19  ;;  %v3087_v33 = vand.u32 2147483647, %v3077_v19  ;;  %vm3083_vm14 = vweird.f32 %v3077_v19 }
 0x6a5   :  { %3905 = vpow2.f32 %v3675_v29  ;;  %vm3069_vm1 = vcmp.eq.f32.partialorder %v3068_v42, 8.507059e+37  ;;  %v3071_v60 = vor.u32 1.1754944e-38, %v3070_v22 }
 0x6a6   :  { %3907 = vpow2.f32 %v3676_v49  ;;  %v3195_v51 = vpop.f32.mrf.mxu3  ;;  %v3175_v46 = vpop.f32.mrf.mxu2  ;;  %v3090_v4 = vor.u32 1.1754944e-38, %v3089_v39  ;;  %vm3088_vm3 = vcmp.eq.f32.partialorder %v3087_v33, 8.507059e+37 }
 0x6a7   :  { %v3900_v11 = vpop.eup %3899  ;;  %v3201_v31 = vadd.f32 %v3195_v51, %v296_v62  ;;  %v3200_v52 = vadd.f32 %v3175_v46, %v255_v54 }
 0x6a8   :  { %v10774_v30 = vadd.f32 1.0, %v3900_v11 }
 0x6a9   :  { %v3902_v47 = vpop.eup %3901  ;;  %v3677_v24 = vmul.f32 -1.442695, %v3201_v31 }
 0x6aa   :  { %v3904_v38 = vpop.eup %3903  ;;  %v3060_v27 = vmul.f32 %v3902_v47, %v3058_v1  ;;  %3909 = vrcp.f32 %v10774_v30  ;;  %vm3065_vm12 = vweird.f32 %v3902_v47  ;;  %vm3103_vm4 = vweird.f32 %v10774_v30 }
 0x6ab   :  { %v3906_v12 = vpop.eup %3905  ;;  %v3079_v32 = vmul.f32 %v3904_v38, %v3077_v19  ;;  %3911 = vpow2.f32 %v3677_v24  ;;  %vm3084_vm13 = vweird.f32 %v3904_v38  ;;  %vm3066_vm0 = vmor %vm3064_vm15, %vm3065_vm12  ;;  %v3109_v44 = vand.u32 2147483648, %v10774_v30 }
 0x6ac   :  { %v3908_v16 = vpop.eup %3907  ;;  %v3061_v0 = vsub.f32 1.0, %v3060_v27  ;;  %3913 = vtanh.f32 %v3053_v63  ;;  %v10777_v45 = vadd.f32 1.0, %v3906_v12  ;;  %vm3085_vm2 = vmor %vm3083_vm14, %vm3084_vm13  ;;  %v3107_v51 = vand.u32 2147483647, %v10774_v30  ;;  %v3492_v63 = vld [vmem:[%s11007_s7] sm:$0xff] }
 0x6ad   :  { %v3080_v58 = vsub.f32 1.0, %v3079_v32  ;;  %v10779_v18 = vadd.f32 1.0, %v3908_v16 }
 0x6ae   :  { %v3062_v37 = vmul.f32 %v3902_v47, %v3061_v0  ;;  %3915 = vrcp.f32 %v10777_v45  ;;  %v3215_v14 = vand.u32 2147483647, %v10777_v45  ;;  %v3217_v29 = vand.u32 2147483648, %v10777_v45 }
 0x6af   :  { %v3081_v35 = vmul.f32 %v3904_v38, %v3080_v58  ;;  %3917 = vrcp.f32 %v10779_v18  ;;  %v3236_v49 = vand.u32 2147483648, %v10779_v18  ;;  %v3234_v62 = vand.u32 2147483647, %v10779_v18 }
 0x6b0   :  { %v10783_v3 = vpop.eup %3909  ;;  %v3063_v61 = vadd.f32 %v3902_v47, %v3062_v37  ;;  %vm3211_vm8 = vweird.f32 %v10777_v45  ;;  %vm3230_vm10 = vweird.f32 %v10779_v18  ;;  %vm3216_vm13 = vcmp.eq.f32.partialorder %v3215_v14, 8.507059e+37 }
 0x6b1   :  { %v3912_v55 = vpop.eup %3911  ;;  %v3082_v25 = vadd.f32 %v3904_v38, %v3081_v35  ;;  %v3099_v26 = vmul.f32 %v10783_v3, %v10774_v30  ;;  %vm3104_vm5 = vweird.f32 %v10783_v3  ;;  %v3237_v32 = vor.u32 1.1754944e-38, %v3236_v49  ;;  %v3495_v49 = vld [vmem:[%s11007_s7 + $0x18] sm:$0xff] }
 0x6b2   :  { %v3914_v7 = vpop.eup %3913  ;;  %v3067_v50 = vsel %vm3066_vm0, %v3902_v47, %v3063_v61  ;;  %v10790_v8 = vadd.f32 1.0, %v3912_v55  ;;  %vm10813_vm9 = vmor %vm3103_vm4, %vm3104_vm5  ;;  %v3110_v47 = vor.u32 1.1754944e-38, %v3109_v44  ;;  %vm3235_vm14 = vcmp.eq.f32.partialorder %v3234_v62, 8.507059e+37  ;;  %v3498_v44 = vld [vmem:[%s11007_s7 + $0x30] sm:$0xff]  ;;  %v3493_v62 = vld [vmem:[%s11007_s7 + $0x8] sm:$0xff] }
 0x6b3   :  { %v3072_v21 = vsel %vm3069_vm1, %v3071_v60, %v3067_v50  ;;  %v3086_v13 = vsel %vm3085_vm2, %v3904_v38, %v3082_v25  ;;  %v3100_v40 = vsub.f32 1.0, %v3099_v26  ;;  %v3218_v38 = vor.u32 1.1754944e-38, %v3217_v29  ;;  %v3507_v25 = vld [vmem:[%s11007_s7 + $0x78] sm:$0xff]  ;;  %v3506_v26 = vld [vmem:[%s11007_s7 + $0x70] sm:$0xff]  ;;  %v3505_v50 = vld [vmem:[%s11007_s7 + $0x68] sm:$0xff] }
 0x6b4   :  { %v3916_v41 = vpop.eup %3915  ;;  %v3091_v6 = vsel %vm3088_vm3, %v3090_v4, %v3086_v13  ;;  %v3114_v36 = vmul.f32 %v3914_v7, %v3072_v21  ;;  %3919 = vrcp.f32 %v10790_v8  ;;  %vm3108_vm15 = vcmp.eq.f32.partialorder %v3107_v51, 8.507059e+37  ;;  %v3502_v21 = vld [vmem:[%s11007_s7 + $0x50] sm:$0xff]  ;;  %v3497_v29 = vld [vmem:[%s11007_s7 + $0x28] sm:$0xff] }
 0x6b5   :  { %v3918_v10 = vpop.eup %3917  ;;  %v3113_v48 = vmul.f32 %v3091_v6, %v10530_v28  ;;  %v3101_v9 = vmul.f32 %v10783_v3, %v3100_v40  ;;  %v3207_v59 = vmul.f32 %v3916_v41, %v10777_v45  ;;  %3921 = vtanh.f32 %v3200_v52  ;;  %v3504_v52 = vld [vmem:[%s11007_s7 + $0x60] sm:$0xff]  ;;  %v3501_v40 = vld [vmem:[%s11007_s7 + $0x48] sm:$0xff] }
 0x6b6   :  { %v3226_v23 = vmul.f32 %v3918_v10, %v10779_v18  ;;  %vm3212_vm6 = vweird.f32 %v3916_v41  ;;  %vm3231_vm7 = vweird.f32 %v3918_v10  ;;  %vm3250_vm1 = vweird.f32 %v10790_v8 }
 0x6b7   :  { %v10798_v5 = vadd.f32 %v3114_v36, %v3113_v48  ;;  %v3208_v1 = vsub.f32 1.0, %v3207_v59  ;;  %v3102_v28 = vadd.f32 %v10783_v3, %v3101_v9  ;;  %vm3213_vm11 = vmor %vm3211_vm8, %vm3212_vm6  ;;  %v3254_v53 = vand.u32 2147483647, %v10790_v8  ;;  %v3500_v36 = vld [vmem:[%s11007_s7 + $0x40] sm:$0xff]  ;;  %v3499_v9 = vld [vmem:[%s11007_s7 + $0x38] sm:$0xff] }
 0x6b8   :  { %v3227_v19 = vsub.f32 1.0, %v3226_v23  ;;  %vm3232_vm12 = vmor %vm3230_vm10, %vm3231_vm7 }
 0x6b9   :  { %3923 = vtanh.f32 %v10798_v5  ;;  %v3209_v43 = vmul.f32 %v3916_v41, %v3208_v1  ;;  %v3106_v12 = vsel %vm10813_vm9, %v10783_v3, %v3102_v28  ;;  %v3256_v3 = vand.u32 2147483648, %v10790_v8  ;;  %v3496_v28 = vld [vmem:[%s11007_s7 + $0x20] sm:$0xff] }
 0x6ba   :  { %v3920_v56 = vpop.eup %3919  ;;  %v3228_v57 = vmul.f32 %v3918_v10, %v3227_v19  ;;  %v3111_v39 = vsel %vm3108_vm15, %v3110_v47, %v3106_v12  ;;  %vm3255_vm3 = vcmp.eq.f32.partialorder %v3254_v53, 8.507059e+37 }
 0x6bb   :  { %v3210_v11 = vadd.f32 %v3916_v41, %v3209_v43  ;;  %v3246_v31 = vmul.f32 %v3920_v56, %v10790_v8  ;;  %v3922_v24 = vpop.eup %3921  ;;  %vm3251_vm0 = vweird.f32 %v3920_v56  ;;  %v3257_v61 = vor.u32 1.1754944e-38, %v3256_v3  ;;  %v3503_v8 = vld [vmem:[%s11007_s7 + $0x58] sm:$0xff] }
 0x6bc   :  { %v3229_v27 = vadd.f32 %v3918_v10, %v3228_v57  ;;  %vm3252_vm2 = vmor %vm3250_vm1, %vm3251_vm0  ;;  %vm3627_vm0 = vcmask 7168  }
 0x6bd   :  { %v3214_v16 = vsel %vm3213_vm11, %v3916_v41, %v3210_v11  ;;  %v3247_v30 = vsub.f32 1.0, %v3246_v31 }
 0x6be   :  { %v3219_v0 = vsel %vm3216_vm13, %v3218_v38, %v3214_v16  ;;  %v3233_v45 = vsel %vm3232_vm12, %v3918_v10, %v3229_v27  ;;  %v3547_v38 = vld [vmem:[%s11008_s9 + $0x70] sm:$0xff]  ;;  %v3546_v27 = vld [vmem:[%s11008_s9 + $0x68] sm:$0xff] }
 0x6bf   :  { %v3924_v58 = vpop.eup %3923  ;;  %v3238_v42 = vsel %vm3235_vm14, %v3237_v32, %v3233_v45  ;;  %v3261_v22 = vmul.f32 %v3922_v24, %v3219_v0  ;;  %v3248_v18 = vmul.f32 %v3920_v56, %v3247_v30  ;;  %v3548_v24 = vld [vmem:[%s11008_s9 + $0x78] sm:$0xff]  ;;  %v3545_v32 = vld [vmem:[%s11008_s9 + $0x60] sm:$0xff] }
 0x6c0   :  { %v3260_v37 = vmul.f32 %v3238_v42, %v10583_v2  ;;  %v3117_v35 = vmul.f32 %v3924_v58, %v3111_v39  ;;  %v3544_v0 = vld [vmem:[%s11008_s9 + $0x58] sm:$0xff] }
 0x6c1   :  { %v3249_v46 = vadd.f32 %v3920_v56, %v3248_v18  ;;  %v3543_v18 = vld [vmem:[%s11008_s9 + $0x50] sm:$0xff] }
 0x6c2   :  { %v3262_v33 = vadd.f32 %v3261_v22, %v3260_v37  ;;  %3281 = vmatmul.f32.vlgmr.msrb.gmra.mxu0 %v3117_v35  ;;  %3301 = vmatmul.f32.vlgmr.msrb.gmra.mxu1 %v3117_v35 }
 0x6c3   :  { %3321 = vmatmul.f32.vlgmr.msrb.gmra.mxu2 %v3117_v35  ;;  %3341 = vmatmul.f32.vlgmr.msrb.gmra.mxu3 %v3117_v35  ;;  %v3253_v54 = vsel %vm3252_vm2, %v3920_v56, %v3249_v46  ;;  %v3494_v56 = vld [vmem:[%s11007_s7 + $0x10] sm:$0xff]  ;;  %v3542_v35 = vld [vmem:[%s11008_s9 + $0x48] sm:$0xff] }
 0x6c4   :  { %3925 = vtanh.f32 %v3262_v33  ;;  %v3258_v55 = vsel %vm3255_vm3, %v3257_v61, %v3253_v54  ;;  %3512 = vmatpush.msrb.mxu0 %v3507_v25  ;;  %3553 = vmatpush.msrb.mxu1 %v3548_v24  ;;  %v3541_v54 = vld [vmem:[%s11008_s9 + $0x40] sm:$0xff]  ;;  %v3540_v25 = vld [vmem:[%s11008_s9 + $0x38] sm:$0xff] }
 0x6c5   :  { %v3581_v24 = vld [vmem:[%s11010_s11 + $0x38] sm:$0xff] }
 0x6c6   :  { %3513 = vmatpush.msrb.mxu0 %v3506_v26  ;;  %3554 = vmatpush.msrb.mxu1 %v3547_v38  ;;  %v3580_v38 = vld [vmem:[%s11010_s11 + $0x30] sm:$0xff] }
 0x6c8   :  { %3514 = vmatpush.msrb.mxu0 %v3505_v50  ;;  %3555 = vmatpush.msrb.mxu1 %v3546_v27  ;;  %v3579_v27 = vld [vmem:[%s11010_s11 + $0x28] sm:$0xff] }
 0x6ca   :  { %v3926_v2 = vpop.eup %3925  ;;  %3515 = vmatpush.msrb.mxu0 %v3504_v52  ;;  %3556 = vmatpush.msrb.mxu1 %v3545_v32  ;;  %v3577_v32 = vld [vmem:[%s11010_s11 + $0x18] sm:$0xff] }
 0x6cb   :  { %v3264_v60 = vmul.f32 %v3926_v2, %v3258_v55 }
 0x6cc   :  { %3516 = vmatpush.msrb.mxu0 %v3503_v8  ;;  %3557 = vmatpush.msrb.mxu1 %v3544_v0  ;;  %v3539_v8 = vld [vmem:[%s11008_s9 + $0x30] sm:$0xff] }
 0x6cd   :  { %3361 = vmatmul.f32.vlgmr.msra.gmra.mxu0 %v3264_v60  ;;  %3381 = vmatmul.f32.vlgmr.msra.gmra.mxu1 %v3264_v60 }
 0x6ce   :  { %3401 = vmatmul.f32.vlgmr.msra.gmra.mxu2 %v3264_v60  ;;  %3421 = vmatmul.f32.vlgmr.msra.gmra.mxu3 %v3264_v60 }
 0x6cf   :  { %3517 = vmatpush.msrb.mxu0 %v3502_v21  ;;  %3558 = vmatpush.msrb.mxu1 %v3543_v18  ;;  %v3683_v18 = vld [vmem:[%s11009_s10] ss:$0 sm:$0xff] }
 0x6d1   :  { %3518 = vmatpush.msrb.mxu0 %v3501_v40  ;;  %3559 = vmatpush.msrb.mxu1 %v3542_v35 }
 0x6d3   :  { %3519 = vmatpush.msrb.mxu0 %v3500_v36  ;;  %3560 = vmatpush.msrb.mxu1 %v3541_v54 }
 0x6d5   :  { %3520 = vmatpush.msrb.mxu0 %v3499_v9  ;;  %3561 = vmatpush.msrb.mxu1 %v3540_v25 }
 0x6d7   :  { %3521 = vmatpush.msrb.mxu0 %v3498_v44  ;;  %3562 = vmatpush.msrb.mxu1 %v3539_v8 }
 0x6d9   :  { %3522 = vmatpush.msrb.mxu0 %v3497_v29 }
 0x6db   :  { %3523 = vmatpush.msrb.mxu0 %v3496_v28 }
 0x6dd   :  { %3524 = vmatpush.msrb.mxu0 %v3495_v49  ;;  %v3535_v49 = vld [vmem:[%s11008_s9 + $0x10] sm:$0xff] }
 0x6df   :  { %3525 = vmatpush.msrb.mxu0 %v3494_v56  ;;  %v3533_v56 = vld [vmem:[%s11008_s9] sm:$0xff] }
 0x6e1   :  { %3526 = vmatpush.msrb.mxu0 %v3493_v62  ;;  %v3588_v62 = vld [vmem:[%s11010_s11 + $0x70] sm:$0xff] }
 0x6e3   :  { %3527 = vmatpush.msrb.mxu0 %v3492_v63  ;;  %v3584_v63 = vld [vmem:[%s11010_s11 + $0x50] sm:$0xff] }
 0x73f   :  { %v3282_v7 = vpop.f32.mrf.mxu0  ;;  %v3302_v4 = vpop.f32.mrf.mxu1 }
 0x746   :  { %v3342_v13 = vpop.f32.mrf.mxu3  ;;  %v3322_v1 = vpop.f32.mrf.mxu2 }
 0x74a   :  { %v3362_v41 = vpop.f32.mrf.mxu0  ;;  %v3382_v6 = vpop.f32.mrf.mxu1 }
 0x74b   :  { %v3363_v10 = vadd.f32 %v3362_v41, %v3282_v7  ;;  %v3383_v48 = vadd.f32 %v3382_v6, %v3302_v4 }
 0x74d   :  { %v3425_v59 = vadd.f32 %v3363_v10, %v12989_v15  ;;  %v3426_v23 = vadd.f32 %v3383_v48, %v12990_v20  ;;  %v3538_v10 = vld [vmem:[%s11008_s9 + $0x28] sm:$0xff] }
 0x74e   :  { %3563 = vmatpush.msrb.mxu1 %v3538_v10 }
 0x74f   :  { %v3678_v14 = vmul.f32 -1.442695, %v3425_v59  ;;  %v3679_v19 = vmul.f32 -1.442695, %v3426_v23  ;;  %v3537_v59 = vld [vmem:[%s11008_s9 + $0x20] sm:$0xff] }
 0x750   :  { %3564 = vmatpush.msrb.mxu1 %v3537_v59 }
 0x751   :  { %3927 = vpow2.f32 %v3678_v14  ;;  %v3422_v15 = vpop.f32.mrf.mxu3  ;;  %v3402_v47 = vpop.f32.mrf.mxu2 }
 0x752   :  { %3929 = vpow2.f32 %v3679_v19  ;;  %v3423_v20 = vadd.f32 %v3422_v15, %v3342_v13  ;;  %v3403_v12 = vadd.f32 %v3402_v47, %v3322_v1  ;;  %v3536_v1 = vld [vmem:[%s11008_s9 + $0x18] sm:$0xff]  ;;  %v3582_v47 = vld [vmem:[%s11010_s11 + $0x40] sm:$0xff] }
 0x753   :  { %3565 = vmatpush.msrb.mxu1 %v3536_v1 }
 0x754   :  { %v3428_v43 = vadd.f32 %v3423_v20, %v12991_v17  ;;  %v3427_v58 = vadd.f32 %v3403_v12, %v12998_v34  ;;  %v3578_v12 = vld [vmem:[%s11010_s11 + $0x20] sm:$0xff] }
 0x755   :  { %3566 = vmatpush.msrb.mxu1 %v3535_v49 }
 0x756   :  { %v3680_v57 = vmul.f32 -1.442695, %v3428_v43  ;;  %v3534_v43 = vld [vmem:[%s11008_s9 + $0x8] sm:$0xff] }
 0x757   :  { %v3928_v51 = vpop.eup %3927  ;;  %3567 = vmatpush.msrb.mxu1 %v3534_v43 }
 0x758   :  { %v3930_v11 = vpop.eup %3929  ;;  %v3432_v31 = vadd.f32 1.0, %v3928_v51  ;;  %3931 = vpow2.f32 %v3680_v57  ;;  %v3589_v57 = vld [vmem:[%s11010_s11 + $0x78] sm:$0xff]  ;;  %v3587_v51 = vld [vmem:[%s11010_s11 + $0x68] sm:$0xff] }
 0x759   :  { %v3451_v17 = vadd.f32 1.0, %v3930_v11  ;;  %3594 = vmatpush.msrb.mxu2 %v3589_v57  ;;  %3568 = vmatpush.msrb.mxu1 %v3533_v56  ;;  %v3586_v11 = vld [vmem:[%s11010_s11 + $0x60] sm:$0xff] }
 0x75a   :  { %3933 = vrcp.f32 %v3432_v31  ;;  %v3444_v46 = vand.u32 2147483648, %v3432_v31  ;;  %v3442_v53 = vand.u32 2147483647, %v3432_v31  ;;  %vm3438_vm6 = vweird.f32 %v3432_v31 }
 0x75b   :  { %3935 = vrcp.f32 %v3451_v17  ;;  %v3463_v34 = vand.u32 2147483648, %v3451_v17  ;;  %v3461_v2 = vand.u32 2147483647, %v3451_v17  ;;  %vm3457_vm7 = vweird.f32 %v3451_v17  ;;  %3595 = vmatpush.msrb.mxu2 %v3588_v62 }
 0x75c   :  { %v3445_v26 = vor.u32 1.1754944e-38, %v3444_v46  ;;  %vm3443_vm10 = vcmp.eq.f32.partialorder %v3442_v53, 8.507059e+37  ;;  %v3684_v46 = vld [vmem:[%s11011_s12] ss:$0 sm:$0xff] }
 0x75d   :  { %v3464_v50 = vor.u32 1.1754944e-38, %v3463_v34  ;;  %vm3462_vm11 = vcmp.eq.f32.partialorder %v3461_v2, 8.507059e+37  ;;  %3596 = vmatpush.msrb.mxu2 %v3587_v51  ;;  %v3685_v53 = vld [vmem:[%s11012_s13] ss:$0 sm:$0xff] }
 0x75e   :  { %v3932_v16 = vpop.eup %3931 }
 0x75f   :  { %v10888_v30 = vadd.f32 1.0, %v3932_v16  ;;  %3597 = vmatpush.msrb.mxu2 %v3586_v11  ;;  %v3682_v16 = vld [vmem:[%s11006_s8] ss:$0 sm:$0xff] }
 0x760   :  { %v3934_v45 = vpop.eup %3933 }
 0x761   :  { %v3936_v42 = vpop.eup %3935  ;;  %v3434_v22 = vmul.f32 %v3934_v45, %v3432_v31  ;;  %3937 = vrcp.f32 %v10888_v30  ;;  %vm3439_vm4 = vweird.f32 %v3934_v45  ;;  %v3483_v14 = vand.u32 2147483648, %v10888_v30  ;;  %v3585_v31 = vld [vmem:[%s11010_s11 + $0x58] sm:$0xff] }
 0x762   :  { %v3453_v39 = vmul.f32 %v3936_v42, %v3451_v17  ;;  %3939 = vtanh.f32 %v3427_v58  ;;  %vm3458_vm5 = vweird.f32 %v3936_v42  ;;  %vm3440_vm8 = vmor %vm3438_vm6, %vm3439_vm4  ;;  %vm3477_vm13 = vweird.f32 %v10888_v30  ;;  %3598 = vmatpush.msrb.mxu2 %v3585_v31  ;;  %v3583_v17 = vld [vmem:[%s11010_s11 + $0x48] sm:$0xff]  ;;  %v3576_v58 = vld [vmem:[%s11010_s11 + $0x10] sm:$0xff] }
 0x763   :  { %v3435_v37 = vsub.f32 1.0, %v3434_v22  ;;  %vm3459_vm9 = vmor %vm3457_vm7, %vm3458_vm5  ;;  %v3484_v29 = vor.u32 1.1754944e-38, %v3483_v14  ;;  %v3574_v22 = vld [vmem:[%s11010_s11] sm:$0xff] }
 0x764   :  { %v3454_v33 = vsub.f32 1.0, %v3453_v39  ;;  %3599 = vmatpush.msrb.mxu2 %v3584_v63 }
 0x765   :  { %v3436_v3 = vmul.f32 %v3934_v45, %v3435_v37 }
 0x766   :  { %v3455_v61 = vmul.f32 %v3936_v42, %v3454_v33  ;;  %3600 = vmatpush.msrb.mxu2 %v3583_v17  ;;  %v20_v33 = vstv %s11013_s14 }
 0x767   :  { %v3938_v55 = vpop.eup %3937  ;;  %v3437_v60 = vadd.f32 %v3934_v45, %v3436_v3  ;;  %21 = vst [vmem:[#allocation2] sm:$0x1] %v20_v33 }
 0x768   :  { %v3456_v7 = vadd.f32 %v3936_v42, %v3455_v61  ;;  %v3473_v4 = vmul.f32 %v3938_v55, %v10888_v30  ;;  %v3940_v21 = vpop.eup %3939  ;;  %vm3478_vm12 = vweird.f32 %v3938_v55  ;;  %3601 = vmatpush.msrb.mxu2 %v3582_v47 }
 0x769   :  { %v3441_v52 = vsel %vm3440_vm8, %v3934_v45, %v3437_v60  ;;  %vm3479_vm14 = vmor %vm3477_vm13, %vm3478_vm12 }
 0x76a   :  { %v3446_v13 = vsel %vm3443_vm10, %v3445_v26, %v3441_v52  ;;  %v3460_v40 = vsel %vm3459_vm9, %v3936_v42, %v3456_v7  ;;  %v3474_v41 = vsub.f32 1.0, %v3473_v4  ;;  %3602 = vmatpush.msrb.mxu2 %v3581_v24  ;;  %v3575_v42 = vld [vmem:[%s11010_s11 + $0x8] sm:$0xff] }
 0x76b   :  { %v3465_v6 = vsel %vm3462_vm11, %v3464_v50, %v3460_v40  ;;  %v3488_v36 = vmul.f32 %v3940_v21, %v3446_v13 }
 0x76c   :  { %v3487_v48 = vmul.f32 %v3465_v6, %v10798_v5  ;;  %v3475_v9 = vmul.f32 %v3938_v55, %v3474_v41  ;;  %v3481_v5 = vand.u32 2147483647, %v10888_v30  ;;  %3603 = vmatpush.msrb.mxu2 %v3580_v38 }
 0x76e   :  { %v3489_v23 = vadd.f32 %v3488_v36, %v3487_v48  ;;  %v3476_v44 = vadd.f32 %v3938_v55, %v3475_v9  ;;  %vm3482_vm15 = vcmp.eq.f32.partialorder %v3481_v5, 8.507059e+37  ;;  %3604 = vmatpush.msrb.mxu2 %v3579_v27  ;;  %v3686_v2 = vld [vmem:[#allocation2] ss:$0 sm:$0xff] }
 0x770   :  { %3941 = vtanh.f32 %v3489_v23  ;;  %v3480_v19 = vsel %vm3479_vm14, %v3938_v55, %v3476_v44  ;;  %3605 = vmatpush.msrb.mxu2 %v3578_v12 }
 0x771   :  { %v3485_v15 = vsel %vm3482_vm15, %v3484_v29, %v3480_v19 }
 0x772   :  { %3606 = vmatpush.msrb.mxu2 %v3577_v32 }
 0x774   :  { %3607 = vmatpush.msrb.mxu2 %v3576_v58 }
 0x776   :  { %v3942_v28 = vpop.eup %3941  ;;  %3608 = vmatpush.msrb.mxu2 %v3575_v42 }
 0x777   :  { %v3491_v20 = vmul.f32 %v3942_v28, %v3485_v15 }
 0x778   :  { %3609 = vmatpush.msrb.mxu2 %v3574_v22 }
 0x779   :  { %3528 = vmatmul.f32.vlgmr.msrb.gmra.mxu0 %v3491_v20 }
 0x7f6   :  { %v3529_v30 = vpop.f32.mrf.mxu0 }
 0x7f7   :  { %v3530_v0 = vadd.f32 %v3682_v16, %v3529_v30 }
 0x7f9   :  { %v3532_v45 = vmax.f32 %v3530_v0, 0.0 }
 0x7fb   :  { %3569 = vmatmul.f32.vlgmr.msrb.gmra.mxu1 %v3532_v45 }
 0x878   :  { %v3570_v39 = vpop.f32.mrf.mxu1 }
 0x879   :  { %v3571_v37 = vadd.f32 %v3683_v18, %v3570_v39 }
 0x87b   :  { %v3573_v35 = vmax.f32 %v3571_v37, 0.0 }
 0x87d   :  { %3610 = vmatmul.f32.vlgmr.msrb.gmra.mxu2 %v3573_v35 }
 0x900   :  { %v3611_v34 = vpop.f32.mrf.mxu2 }
 0x901   :  { %v3612_v3 = vadd.f32 %v3684_v46, %v3611_v34 }
 0x903   :  { %v3614_v54 = vmax.f32 %v3612_v3, 0.0 }
 0x905   :  { %v3619_v61 = vmul.f32 %v3685_v53, %v3614_v54 }
 0x907   :  { %3620 = vadd.xlane.f32.xlu0 %v3619_v61 }
 0x97a   :  { %v3621_v55 = vpop.xlane.xlu0 %3620 }
 0x97b   :  { %v3626_v60 = vadd.f32 %v3686_v2, %v3621_v55 }
 0x97d   :  { %3628 = vst.msk [vmem:[%s11014_s15] sm:$0xff] %vm3627_vm0, %v3626_v60 }

</bundles_post_ra>
